<compile_context>
chip_gen: v6e
topology: v6e:2x2x1
jax: 0.10.0
libtpu: 0.0.40
codegen_flags: <defaults>
</compile_context>

<pallas_src>
import functools
import math

import numpy as np

import jax
import jax.numpy as jnp
from jax.experimental import pallas as pl
from jax.experimental.pallas import tpu as pltpu


# --------------------------------------------------------------------------------------
# small helpers usable inside kernels
# --------------------------------------------------------------------------------------
def _dot_t(a, b):
    """a @ b.T (contract last dims) without an explicit transpose."""
    return jax.lax.dot_general(a, b, (((1,), (1,)), ((), ())),
                               preferred_element_type=jnp.float32)


def _softmax(x, axis):
    m = jnp.max(x, axis=axis, keepdims=True)
    e = jnp.exp(x - m)
    return e * pl.reciprocal(jnp.sum(e, axis=axis, keepdims=True), approx=True)


def _log_softmax(x, axis):
    m = jnp.max(x, axis=axis, keepdims=True)
    s = x - m
    return s - jnp.log(jnp.sum(jnp.exp(s), axis=axis, keepdims=True))


def _sigmoid(x):
    e = jnp.exp(-jnp.abs(x))
    return jnp.where(x >= 0.0, 1.0 / (1.0 + e), e / (1.0 + e))


def _layernorm(x, g, b):
    mu = jnp.mean(x, axis=-1, keepdims=True)
    var = jnp.mean((x - mu) ** 2, axis=-1, keepdims=True)
    return (x - mu) * jax.lax.rsqrt(var + 1e-5) * g + b


# --------------------------------------------------------------------------------------
# shared in-kernel encoder stack: [ln + dwconv(roll) + pwconv + relu + res] x C
#                                 + [ln + fused-QKV MHA + folded out-proj + res]
#                                 + [ln + FFN + res]     (repeated NB blocks)
# --------------------------------------------------------------------------------------
def _encoder_stack_2d(x, neg_row, cvalid_col, pe, small, qkvw, bigw, *, NB, C, K, NH):
    # x: (L, H) f32; neg_row: (1, L) = padding_mask * 1e30; cvalid_col: (L, 1) or None
    # small: (NB, NS, H) f32 packed vectors; qkvw: (NB, H, 3H) bf16;
    # bigw: (NB*(C+3), H, H) bf16  [pw_w x C, wo, ffn1_w, ffn2_w] per block
    L, H = x.shape
    d = H // NH
    padh = K // 2
    scale = 1.0 / math.sqrt(d)
    base = 3 * C + C * K
    pos = jax.lax.broadcasted_iota(jnp.int32, (L, 1), 0)

    # TODO(synk): dropout (p=0.1) inside the encoder is treated as identity (eval mode).
    for nb in range(NB):
        s3 = small[nb]                       # (NS, H)
        qw = qkvw[nb]                        # (H, 3H) bf16
        boff = nb * (C + 3)
        if nb == 0:
            x = x + pe                       # positional encoding on first block

        # ---- conv sub-blocks: depthwise via XLU roll + masked edges, pointwise on MXU --
        for c in range(C):
            res = x
            xn = _layernorm(x, s3[c:c + 1, :], s3[C + c:C + c + 1, :])
            if cvalid_col is not None:
                # zero positions beyond the true sequence length (query padded to Lc),
                # matching PyTorch's zero padding of the shorter tensor.
                xn = xn * cvalid_col
            acc = jnp.zeros((L, H), jnp.float32)
            for k in range(K):
                lo = padh - k
                wrow = s3[2 * C + c * K + k:2 * C + c * K + k + 1, :]
                if lo == 0:
                    term = xn
                else:
                    yk = pltpu.roll(xn, shift=lo % L, axis=0)
                    ok = (pos >= lo) if lo > 0 else (pos < L + lo)
                    term = jnp.where(ok, yk, 0.0)
                acc = acc + term * wrow
            y = (jnp.dot(acc.astype(jnp.bfloat16), bigw[boff + c],
                         preferred_element_type=jnp.float32)
                 + s3[2 * C + C * K + c:2 * C + C * K + c + 1, :])
            x = jnp.maximum(y, 0.0) + res

        # ---- self-attention sub-block: fused QKV, per-head out-proj folded ------------
        res = x
        xn = _layernorm(x, s3[base:base + 1, :], s3[base + 1:base + 2, :])
        bqkv = jnp.concatenate([s3[base + 2:base + 3, :], s3[base + 3:base + 4, :],
                                s3[base + 4:base + 5, :]], axis=-1)
        qkv = jnp.dot(xn.astype(jnp.bfloat16), qw, preferred_element_type=jnp.float32) + bqkv
        wo = bigw[boff + C]
        attn = jnp.zeros((L, H), jnp.float32)
        # Per-head Python loop kept: with H=32 / d=8 / NH=4 batching the heads would
        # need cross-lane head transposes that cost more than they save at this size.
        for hh in range(NH):
            qh = qkv[:, hh * d:(hh + 1) * d].astype(jnp.bfloat16)
            kh = qkv[:, H + hh * d:H + (hh + 1) * d].astype(jnp.bfloat16)
            vh = qkv[:, 2 * H + hh * d:2 * H + (hh + 1) * d].astype(jnp.bfloat16)
            s = _dot_t(qh, kh) * scale - neg_row
            p = _softmax(s, axis=-1)
            head = jnp.dot(p.astype(jnp.bfloat16), vh, preferred_element_type=jnp.float32)
            attn = attn + jnp.dot(head.astype(jnp.bfloat16), wo[hh * d:(hh + 1) * d, :],
                                  preferred_element_type=jnp.float32)
        x = attn + s3[base + 5:base + 6, :] + res

        # ---- feed-forward sub-block ----------------------------------------------------
        res = x
        xn = _layernorm(x, s3[base + 6:base + 7, :], s3[base + 7:base + 8, :])
        y = jnp.maximum(jnp.dot(xn.astype(jnp.bfloat16), bigw[boff + C + 1],
                                preferred_element_type=jnp.float32) + s3[base + 8:base + 9, :], 0.0)
        y = jnp.dot(y.astype(jnp.bfloat16), bigw[boff + C + 2],
                    preferred_element_type=jnp.float32) + s3[base + 9:base + 10, :]
        x = y + res
    return x


# --------------------------------------------------------------------------------------
# fused kernel 1: embedding (char matmul + maxpool + concat + proj + highway x2)
#                 + full embedding-encoder, for context AND query in one call
# --------------------------------------------------------------------------------------
def _embed_encode_kernel(ce_ref, we_ref, amask_ref, cvalid_ref, pe_ref,
                         esmall_ref, charw_ref, projw_ref, hww_ref,
                         encs_ref, encq_ref, encb_ref, o_ref,
                         *, L, W, NB, C, K, NH, n_hw):
    H = o_ref.shape[-1]
    es = esmall_ref[...]                               # (2 + 2*n_hw, H) f32

    # ---- char features: one (W*L, Ce) matmul, max over chars, bias + relu -------------
    # TODO(synk): the char path is a kernel-size-1 per-char linear + maxpool; a real
    #             char conv with kernel > 1 (as in standard QANet) would differ.
    ce = ce_ref[0]                                     # (W*L, Ce), char-major rows
    y = jnp.dot(ce.astype(jnp.bfloat16), charw_ref[...],
                preferred_element_type=jnp.float32)    # (W*L, H)
    feat = y[0:L, :]
    for wi in range(1, W):
        feat = jnp.maximum(feat, y[wi * L:(wi + 1) * L, :])
    feat = jnp.maximum(feat + es[0:1, :], 0.0)         # relu(max+b) == max(relu(+b))

    # ---- concat with word embedding, projection, highway x2 ---------------------------
    emb = jnp.concatenate([feat, we_ref[0]], axis=-1)  # (L, H + We)
    h = jnp.dot(emb.astype(jnp.bfloat16), projw_ref[...],
                preferred_element_type=jnp.float32) + es[1:2, :]
    hww = hww_ref[...]                                 # (2*n_hw, H, H) bf16
    for i in range(n_hw):
        g = _sigmoid(jnp.dot(h.astype(jnp.bfloat16), hww[i],
                             preferred_element_type=jnp.float32) + es[2 + i:3 + i, :])
        t = jnp.maximum(jnp.dot(h.astype(jnp.bfloat16), hww[n_hw + i],
                                preferred_element_type=jnp.float32)
                        + es[2 + n_hw + i:3 + n_hw + i, :], 0.0)
        h = g * t + (1.0 - g) * h

    # ---- embedding encoder -------------------------------------------------------------
    neg = amask_ref[0] * 1e30                          # (1, L), 1.0 where key is padding
    cvalid = cvalid_ref[0]                             # (L, 1), 0.0 beyond true length
    h = _encoder_stack_2d(h, neg, cvalid, pe_ref[...],
                          encs_ref[...], encq_ref[...], encb_ref[...],
                          NB=NB, C=C, K=K, NH=NH)
    o_ref[0] = h


@functools.lru_cache(maxsize=None)
def _embed_encode_call(NB2, L, W, Ce, We, H, n_hw, NBe, C, K, NH):
    NS = 3 * C + C * K + 10
    enc_flops_pos = NBe * (2 * (C + 6) * H * H + 2 * C * K * H + 4 * L * H)
    flops = NB2 * L * (2 * W * Ce * H + 2 * (H + We) * H + 4 * n_hw * H * H + enc_flops_pos)
    trans = NB2 * L * (2 * n_hw * H + NBe * (NH * L + 2 * H))
    bytes_acc = (4 * NB2 * L * (W * Ce + We + 2 * H + 2)
                 + 2 * (Ce + H + We + 2 * n_hw * H) * H
                 + NBe * (4 * NS * H + 2 * 3 * H * H + 2 * (C + 3) * H * H))
    return pl.pallas_call(
        functools.partial(_embed_encode_kernel, L=L, W=W, NB=NBe, C=C, K=K, NH=NH, n_hw=n_hw),
        out_shape=jax.ShapeDtypeStruct((NB2, L, H), jnp.float32),
        grid=(NB2,),
        in_specs=[
            pl.BlockSpec((1, W * L, Ce), lambda b: (b, 0, 0)),      # char embeddings
            pl.BlockSpec((1, L, We), lambda b: (b, 0, 0)),          # word embeddings
            pl.BlockSpec((1, 1, L), lambda b: (b, 0, 0)),           # attention padding mask
            pl.BlockSpec((1, L, 1), lambda b: (b, 0, 0)),           # conv validity mask
            pl.BlockSpec((L, H), lambda b: (0, 0)),                 # positional encoding
            pl.BlockSpec((2 + 2 * n_hw, H), lambda b: (0, 0)),      # embedding small params
            pl.BlockSpec((Ce, H), lambda b: (0, 0)),                # char conv weight (bf16)
            pl.BlockSpec((H + We, H), lambda b: (0, 0)),            # projection weight (bf16)
            pl.BlockSpec((2 * n_hw, H, H), lambda b: (0, 0, 0)),    # highway weights (bf16)
            pl.BlockSpec((NBe, NS, H), lambda b: (0, 0, 0)),        # encoder small params
            pl.BlockSpec((NBe, H, 3 * H), lambda b: (0, 0, 0)),     # fused QKV weights (bf16)
            pl.BlockSpec((NBe * (C + 3), H, H), lambda b: (0, 0, 0)),  # big weights (bf16)
        ],
        out_specs=pl.BlockSpec((1, L, H), lambda b: (b, 0, 0)),
        compiler_params=pltpu.CompilerParams(dimension_semantics=("parallel",)),
        cost_estimate=pl.CostEstimate(flops=int(flops), transcendentals=int(trans),
                                      bytes_accessed=int(bytes_acc)),
    )


# --------------------------------------------------------------------------------------
# fused kernel 2: context-query attention + cq_resizer
# --------------------------------------------------------------------------------------
def _cq_kernel(c_ref, q_ref, cmaskc_ref, qmaskr_ref, cqs_ref, rw_ref, o_ref):
    c = c_ref[0]                       # (Lc, H)
    q = q_ref[0]                       # (Lq, H)
    cqs = cqs_ref[...]                 # (5, H): [w4c, w4q, w4m, bias(pad), resizer_b]
    Lc = c.shape[0]
    Lq = q.shape[0]

    # trilinear similarity; the per-row / per-column terms are VPU row-reduces folded
    # into one (Lc, H+2) x (H+2, Lq) MXU matmul (no M=1 / N=1 matmuls).
    s0 = jnp.sum(c * cqs[0:1, :], axis=-1, keepdims=True)      # (Lc, 1)
    s1 = jnp.sum(q * cqs[1:2, :], axis=-1, keepdims=True)      # (Lq, 1)
    bias = cqs[3:4, 0:1]                                       # (1, 1)
    c_aug = jnp.concatenate([c * cqs[2:3, :], s0 + bias, jnp.ones((Lc, 1), jnp.float32)], axis=-1)
    q_aug = jnp.concatenate([q, jnp.ones((Lq, 1), jnp.float32), s1], axis=-1)
    S = _dot_t(c_aug.astype(jnp.bfloat16), q_aug.astype(jnp.bfloat16))   # (Lc, Lq)

    qpad = qmaskr_ref[0]               # (1, Lq)
    cpad = cmaskc_ref[0]               # (Lc, 1)
    S1 = _softmax(S - qpad * 1e30, axis=1)
    S2 = _softmax(S - cpad * 1e30, axis=0)
    A = jnp.dot(S1.astype(jnp.bfloat16), q.astype(jnp.bfloat16),
                preferred_element_type=jnp.float32)                      # (Lc, H)
    SS = _dot_t(S1.astype(jnp.bfloat16), S2.astype(jnp.bfloat16))        # (Lc, Lc)
    Bm = jnp.dot(SS.astype(jnp.bfloat16), c.astype(jnp.bfloat16),
                 preferred_element_type=jnp.float32)                     # (Lc, H)
    x4 = jnp.concatenate([c, A, c * A, c * Bm], axis=-1)                 # (Lc, 4H) lane-dense
    o_ref[0] = (jnp.dot(x4.astype(jnp.bfloat16), rw_ref[...],
                        preferred_element_type=jnp.float32) + cqs[4:5, :])


@functools.lru_cache(maxsize=None)
def _cq_call(B, Lc, Lq, H):
    flops = B * (2 * Lc * Lq * (H + 2) + 2 * Lc * Lq * H + 2 * Lc * Lc * Lq
                 + 2 * Lc * Lc * H + 8 * Lc * H * H)
    trans = 2 * B * Lc * Lq
    bytes_acc = 4 * B * (2 * Lc * H + Lq * H + Lc + Lq) + 2 * 4 * H * H + 4 * 5 * H
    return pl.pallas_call(
        _cq_kernel,
        out_shape=jax.ShapeDtypeStruct((B, Lc, H), jnp.float32),
        grid=(B,),
        in_specs=[pl.BlockSpec((1, Lc, H), lambda b: (b, 0, 0)),
                  pl.BlockSpec((1, Lq, H), lambda b: (b, 0, 0)),
                  pl.BlockSpec((1, Lc, 1), lambda b: (b, 0, 0)),
                  pl.BlockSpec((1, 1, Lq), lambda b: (b, 0, 0)),
                  pl.BlockSpec((5, H), lambda b: (0, 0)),               # packed small params
                  pl.BlockSpec((4 * H, H), lambda b: (0, 0))],          # resizer weight (bf16)
        out_specs=pl.BlockSpec((1, Lc, H), lambda b: (b, 0, 0)),
        compiler_params=pltpu.CompilerParams(dimension_semantics=("parallel",)),
        cost_estimate=pl.CostEstimate(flops=int(flops), transcendentals=int(trans),
                                      bytes_accessed=int(bytes_acc)),
    )


# --------------------------------------------------------------------------------------
# fused kernel 3: model encoder applied 3x (M0, M1, M2) + start/end pointer output
# --------------------------------------------------------------------------------------
def _model_output_kernel(x_ref, amask_ref, cmaskc_ref, pe_ref,
                         msmall_ref, mqkv_ref, mbig_ref, wout_ref, y_ref,
                         *, NB, C, K, NH):
    small = msmall_ref[...]
    qkvw = mqkv_ref[...]
    bigw = mbig_ref[...]
    pe = pe_ref[...]
    neg = amask_ref[0] * 1e30                         # (1, L)
    x0 = x_ref[0]                                     # (L, H)

    # TODO(synk): F.dropout(p=0.1) between the three passes treated as identity (eval mode).
    m0 = _encoder_stack_2d(x0, neg, None, pe, small, qkvw, bigw, NB=NB, C=C, K=K, NH=NH)
    m1 = _encoder_stack_2d(m0, neg, None, pe, small, qkvw, bigw, NB=NB, C=C, K=K, NH=NH)
    m2 = _encoder_stack_2d(m1, neg, None, pe, small, qkvw, bigw, NB=NB, C=C, K=K, NH=NH)

    # TODO(synk): ConditionalQuestionAnsweringOutput internals unspecified; standard QANet
    #             start/end pointer (masked log-softmax over [M0;M1] / [M0;M2]) is used.
    w = wout_ref[...]                                 # (5, H): w1a, w1b, w2a, w2b, [b1,b2,..]
    negc = cmaskc_ref[0] * 1e30                       # (L, 1)
    l1 = (jnp.sum(m0 * w[0:1, :], axis=-1, keepdims=True)
          + jnp.sum(m1 * w[1:2, :], axis=-1, keepdims=True) + w[4:5, 0:1] - negc)
    l2 = (jnp.sum(m0 * w[2:3, :], axis=-1, keepdims=True)
          + jnp.sum(m2 * w[3:4, :], axis=-1, keepdims=True) + w[4:5, 1:2] - negc)
    logits = jnp.concatenate([l1, l2], axis=-1)       # (L, 2)
    y_ref[0] = _log_softmax(logits, axis=0)


@functools.lru_cache(maxsize=None)
def _model_output_call(B, L, H, NBm, C, K, NH):
    NS = 3 * C + C * K + 10
    enc_flops = NBm * L * (2 * (C + 6) * H * H + 2 * C * K * H + 4 * L * H)
    flops = B * (3 * enc_flops + 8 * L * H)
    trans = B * 3 * NBm * L * (NH * L + 2 * H)
    bytes_acc = (4 * B * L * (H + 3)
                 + NBm * (4 * NS * H + 2 * 3 * H * H + 2 * (C + 3) * H * H) + 4 * 5 * H)
    return pl.pallas_call(
        functools.partial(_model_output_kernel, NB=NBm, C=C, K=K, NH=NH),
        out_shape=jax.ShapeDtypeStruct((B, L, 2), jnp.float32),
        grid=(B,),
        in_specs=[
            pl.BlockSpec((1, L, H), lambda b: (b, 0, 0)),           # x (after cq_resizer)
            pl.BlockSpec((1, 1, L), lambda b: (b, 0, 0)),           # attention padding mask
            pl.BlockSpec((1, L, 1), lambda b: (b, 0, 0)),           # column padding mask
            pl.BlockSpec((L, H), lambda b: (0, 0)),                 # positional encoding
            pl.BlockSpec((NBm, NS, H), lambda b: (0, 0, 0)),        # encoder small params
            pl.BlockSpec((NBm, H, 3 * H), lambda b: (0, 0, 0)),     # fused QKV weights (bf16)
            pl.BlockSpec((NBm * (C + 3), H, H), lambda b: (0, 0, 0)),  # big weights (bf16)
            pl.BlockSpec((5, H), lambda b: (0, 0)),                 # output head weights
        ],
        out_specs=pl.BlockSpec((1, L, 2), lambda b: (b, 0, 0)),
        compiler_params=pltpu.CompilerParams(dimension_semantics=("parallel",)),
        cost_estimate=pl.CostEstimate(flops=int(flops), transcendentals=int(trans),
                                      bytes_accessed=int(bytes_acc)),
    )


# --------------------------------------------------------------------------------------
# parameter packing (lane-dense slabs) and positional encoding
# --------------------------------------------------------------------------------------
def _pack_encoder(enc):
    blocks = enc["blocks"]
    NB = len(blocks)
    C, K, H = blocks[0]["dw_w"].shape
    small, qkvw, bigw = [], [], []
    for blk in blocks:
        small.append(jnp.concatenate([
            blk["conv_ln_g"], blk["conv_ln_b"], blk["dw_w"].reshape(C * K, H), blk["pw_b"],
            blk["ln1_g"], blk["ln1_b"], blk["bqkv"].reshape(3, H),
            blk["bo"], blk["ln2_g"], blk["ln2_b"], blk["ffn1_b"], blk["ffn2_b"]], axis=0))
        qkvw.append(blk["wqkv"])
        bigw.append(jnp.concatenate(
            [blk["pw_w"], blk["wo"][None], blk["ffn1_w"][None], blk["ffn2_w"][None]], axis=0))
    return dict(small=jnp.stack(small, axis=0),
                qkvw=jnp.stack(qkvw, axis=0).astype(jnp.bfloat16),
                bigw=jnp.concatenate(bigw, axis=0).astype(jnp.bfloat16),
                NB=NB, C=C, K=K)


@functools.lru_cache(maxsize=None)
def positional_encoding(L, H):
    pos = np.arange(L, dtype=np.float32)[:, None]
    i = np.arange(H, dtype=np.float32)[None, :]
    angle = pos / np.power(10000.0, (2.0 * np.floor(i / 2.0)) / H)
    pe = np.where((np.arange(H)[None, :] % 2) == 0, np.sin(angle), np.cos(angle))
    return jnp.asarray(pe, jnp.float32)


# --------------------------------------------------------------------------------------
# full forward pass
# --------------------------------------------------------------------------------------
def conditional_qanet_forward(params, cfg, context_idxs, context_char_idxs,
                              query_idxs, query_char_idxs):
    H = cfg["hidden_size"]
    B, Lc = context_idxs.shape
    Lq = query_idxs.shape[1]
    W = context_char_idxs.shape[2]
    assert Lq <= Lc, "combined embed path assumes query length <= context length"

    # ---- pack weights into lane-dense slabs (tiny; done under jit) ---------------------
    emb = params["embedding"]
    n_hw = emb["hw_wg"].shape[0]
    esmall = jnp.concatenate([emb["char_b"], emb["proj_b"], emb["hw_bg"], emb["hw_bt"]], axis=0)
    charw = emb["char_w"].astype(jnp.bfloat16)
    projw = emb["proj_w"].astype(jnp.bfloat16)
    hww = jnp.concatenate([emb["hw_wg"], emb["hw_wt"]], axis=0).astype(jnp.bfloat16)
    ee = _pack_encoder(params["embed_encoder"])
    me = _pack_encoder(params["model_encoder"])

    cq = params["cq"]
    bias_row = jnp.pad(cq["bias"], ((0, 0), (0, H - 1)))
    cqsmall = jnp.concatenate([cq["w4c"].T, cq["w4q"].T, cq["w4m"], bias_row,
                               params["resizer_b"]], axis=0)            # (5, H)
    rw = params["resizer_w"].astype(jnp.bfloat16)

    out_p = params["output"]
    bout_row = jnp.pad(out_p["b"], ((0, 0), (0, H - 2)))
    wout = jnp.concatenate([out_p["w1"][:, :H], out_p["w1"][:, H:],
                            out_p["w2"][:, :H], out_p["w2"][:, H:], bout_row], axis=0)

    # ---- combined context+query embedding & embedding encoder (one pallas_call) --------
    qw_pad = jnp.zeros((B, Lc), context_idxs.dtype).at[:, :Lq].set(query_idxs)
    qc_pad = jnp.zeros((B, Lc, W), context_char_idxs.dtype).at[:, :Lq, :].set(query_char_idxs)
    all_widx = jnp.concatenate([context_idxs, qw_pad], axis=0)           # (2B, Lc)
    all_cidx = jnp.concatenate([context_char_idxs, qc_pad], axis=0)      # (2B, Lc, W)

    pad_mask = (all_widx == 0).astype(jnp.float32)                       # 1.0 where padding
    amask = pad_mask.reshape(2 * B, 1, Lc)
    valid_len = jnp.concatenate([jnp.full((B,), Lc, jnp.int32), jnp.full((B,), Lq, jnp.int32)])
    cvalid = (jnp.arange(Lc)[None, :] < valid_len[:, None]).astype(jnp.float32)
    cvalid = cvalid.reshape(2 * B, Lc, 1)

    we = emb["word_emb"][all_widx]                                       # (2B, Lc, We)
    ce = emb["char_emb"][all_cidx]                                       # (2B, Lc, W, Ce)
    Ce_ = ce.shape[-1]
    We_ = we.shape[-1]
    ce_wl = jnp.transpose(ce, (0, 2, 1, 3)).reshape(2 * B, W * Lc, Ce_)  # char-major rows
    pe = positional_encoding(Lc, H)

    enc_out = _embed_encode_call(2 * B, Lc, W, Ce_, We_, H, n_hw,
                                 ee["NB"], ee["C"], ee["K"], cfg["embed_encoder_num_heads"])(
        ce_wl, we, amask, cvalid, pe, esmall, charw, projw, hww,
        ee["small"], ee["qkvw"], ee["bigw"])
    c = enc_out[:B]
    q = enc_out[B:, :Lq, :]

    # ---- context-query attention + resizer ---------------------------------------------
    c_pad = (context_idxs == 0).astype(jnp.float32)
    q_pad = (query_idxs == 0).astype(jnp.float32)
    x = _cq_call(B, Lc, Lq, H)(c, q, c_pad.reshape(B, Lc, 1), q_pad.reshape(B, 1, Lq),
                               cqsmall, rw)

    # TODO(synk): F.dropout(p=0.1) after cq_resizer treated as identity (eval mode).
    # ---- model encoder x3 + output head (one pallas_call; M0/M1/M2 stay in VMEM) -------
    y = _model_output_call(B, Lc, H, me["NB"], me["C"], me["K"],
                           cfg["model_encoder_num_heads"])(
        x, c_pad.reshape(B, 1, Lc), c_pad.reshape(B, Lc, 1), pe,
        me["small"], me["qkvw"], me["bigw"], wout)
    return y[..., 0], y[..., 1]


# --------------------------------------------------------------------------------------
# deterministic parameter initialization (PyTorch-module-equivalent layout)
# --------------------------------------------------------------------------------------
def init_params(cfg, seed=0):
    base = jax.random.PRNGKey(seed)
    counter = [0]

    def w(shape, scale=0.1):
        counter[0] += 1
        return scale * jax.random.normal(jax.random.fold_in(base, counter[0]), shape, jnp.float32)

    H = cfg["hidden_size"]
    We = cfg["word_embed_size"]
    Ce = cfg["char_embed_size"]

    def encoder_params(num_convs, kernel_size, num_blocks):
        blocks = []
        for _ in range(num_blocks):
            blocks.append(dict(
                conv_ln_g=jnp.ones((num_convs, H), jnp.float32),
                conv_ln_b=jnp.zeros((num_convs, H), jnp.float32),
                dw_w=w((num_convs, kernel_size, H)),
                pw_w=w((num_convs, H, H)),
                pw_b=jnp.zeros((num_convs, H), jnp.float32),
                ln1_g=jnp.ones((1, H), jnp.float32), ln1_b=jnp.zeros((1, H), jnp.float32),
                wqkv=w((H, 3 * H)), bqkv=jnp.zeros((1, 3 * H), jnp.float32),
                wo=w((H, H)), bo=jnp.zeros((1, H), jnp.float32),
                ln2_g=jnp.ones((1, H), jnp.float32), ln2_b=jnp.zeros((1, H), jnp.float32),
                ffn1_w=w((H, H)), ffn1_b=jnp.zeros((1, H), jnp.float32),
                ffn2_w=w((H, H)), ffn2_b=jnp.zeros((1, H), jnp.float32),
            ))
        return dict(blocks=blocks)

    return dict(
        embedding=dict(
            word_emb=w((cfg["word_vocab"], We), 1.0).at[0].set(0.0),
            char_emb=w((cfg["char_vocab"], Ce), 1.0).at[0].set(0.0),
            char_w=w((Ce, H)), char_b=jnp.zeros((1, H), jnp.float32),
            proj_w=w((H + We, H)), proj_b=jnp.zeros((1, H), jnp.float32),
            hw_wg=w((2, H, H)), hw_bg=jnp.zeros((2, H), jnp.float32),
            hw_wt=w((2, H, H)), hw_bt=jnp.zeros((2, H), jnp.float32),
        ),
        embed_encoder=encoder_params(cfg["embed_encoder_num_convs"],
                                     cfg["embed_encoder_kernel_size"],
                                     cfg["embed_encoder_num_blocks"]),
        cq=dict(w4c=w((H, 1)), w4q=w((H, 1)), w4m=w((1, H)),
                bias=jnp.zeros((1, 1), jnp.float32)),
        resizer_w=w((4 * H, H)), resizer_b=jnp.zeros((1, H), jnp.float32),
        model_encoder=encoder_params(cfg["model_encoder_num_convs"],
                                     cfg["model_encoder_kernel_size"],
                                     cfg["model_encoder_num_blocks"]),
        output=dict(w1=w((1, 2 * H)), w2=w((1, 2 * H)), b=jnp.zeros((1, 2), jnp.float32)),
    )


# --------------------------------------------------------------------------------------
# main
# --------------------------------------------------------------------------------------
if __name__ == "__main__":
    cfg = dict(
        word_vocab=32, char_vocab=24,
        word_embed_size=32, char_embed_size=16, hidden_size=32,
        embed_encoder_num_convs=2, embed_encoder_kernel_size=5,
        embed_encoder_num_heads=4, embed_encoder_num_blocks=1,
        model_encoder_num_convs=2, model_encoder_kernel_size=5,
        model_encoder_num_heads=4, model_encoder_num_blocks=1,
    )
    B, Lc, Lq, W = 2, 16, 8, 4

    params = init_params(cfg, seed=0)

    key = jax.random.PRNGKey(0)
    k1, k2, k3, k4 = jax.random.split(jax.random.fold_in(key, 12345), 4)
    context_idxs = jax.random.randint(k1, (B, Lc), 1, cfg["word_vocab"]).at[:, -3:].set(0)
    context_char_idxs = jax.random.randint(k2, (B, Lc, W), 1, cfg["char_vocab"])
    query_idxs = jax.random.randint(k3, (B, Lq), 1, cfg["word_vocab"]).at[:, -2:].set(0)
    query_char_idxs = jax.random.randint(k4, (B, Lq, W), 1, cfg["char_vocab"])

    fwd = jax.jit(lambda p, ci, cc, qi, qc: conditional_qanet_forward(p, cfg, ci, cc, qi, qc))
    y1, y2 = fwd(params, context_idxs, context_char_idxs, query_idxs, query_char_idxs)
    jax.block_until_ready((y1, y2))

    assert y1.shape == (B, Lc) and y2.shape == (B, Lc)
    assert bool(jnp.all(jnp.isfinite(y1))) and bool(jnp.all(jnp.isfinite(y2)))
    print("KERNEL_OK")
</pallas_src>

<mosaic_0001>
module attributes {stable_mosaic.version = 11 : i64} {
  func.func @_embed_encode_kernel(%arg0: i32, %arg1: memref<1x64x16xf32, #tpu.memory_space<vmem>>, %arg2: memref<1x16x32xf32, #tpu.memory_space<vmem>>, %arg3: memref<1x1x16xf32, #tpu.memory_space<vmem>>, %arg4: memref<1x16x1xf32, #tpu.memory_space<vmem>>, %arg5: memref<16x32xf32, #tpu.memory_space<vmem>>, %arg6: memref<6x32xf32, #tpu.memory_space<vmem>>, %arg7: memref<16x32xbf16, #tpu.memory_space<vmem>>, %arg8: memref<64x32xbf16, #tpu.memory_space<vmem>>, %arg9: memref<4x32x32xbf16, #tpu.memory_space<vmem>>, %arg10: memref<1x26x32xf32, #tpu.memory_space<vmem>>, %arg11: memref<1x32x96xbf16, #tpu.memory_space<vmem>>, %arg12: memref<5x32x32xbf16, #tpu.memory_space<vmem>>, %arg13: memref<1x16x32xf32, #tpu.memory_space<vmem>>) attributes {dimension_semantics = [#tpu.dimension_semantics<parallel>], iteration_bounds = array<i64: 4>, scalar_prefetch = 0 : i64, scratch_operands = 0 : i64, tpu.core_type = #tpu.core_type<tc>, window_params = [{transform_indices = @transform_0, window_bounds = array<i64: 1, 64, 16>}, {transform_indices = @transform_1, window_bounds = array<i64: 1, 16, 32>}, {transform_indices = @transform_2, window_bounds = array<i64: 1, 1, 16>}, {transform_indices = @transform_3, window_bounds = array<i64: 1, 16, 1>}, {pipeline_mode = #tpu.pipeline_mode<synchronous>, transform_indices = @transform_4, window_bounds = array<i64: 16, 32>}, {pipeline_mode = #tpu.pipeline_mode<synchronous>, transform_indices = @transform_5, window_bounds = array<i64: 6, 32>}, {pipeline_mode = #tpu.pipeline_mode<synchronous>, transform_indices = @transform_6, window_bounds = array<i64: 16, 32>}, {pipeline_mode = #tpu.pipeline_mode<synchronous>, transform_indices = @transform_7, window_bounds = array<i64: 64, 32>}, {pipeline_mode = #tpu.pipeline_mode<synchronous>, transform_indices = @transform_8, window_bounds = array<i64: 4, 32, 32>}, {pipeline_mode = #tpu.pipeline_mode<synchronous>, transform_indices = @transform_9, window_bounds = array<i64: 1, 26, 32>}, {pipeline_mode = #tpu.pipeline_mode<synchronous>, transform_indices = @transform_10, window_bounds = array<i64: 1, 32, 96>}, {pipeline_mode = #tpu.pipeline_mode<synchronous>, transform_indices = @transform_11, window_bounds = array<i64: 5, 32, 32>}, {transform_indices = @transform_12, window_bounds = array<i64: 1, 16, 32>}]} {
    %c0 = arith.constant 0 : index
    %c0_0 = arith.constant 0 : index
    %0 = vector.load %arg6[%c0, %c0_0] : memref<6x32xf32, #tpu.memory_space<vmem>>, vector<6x32xf32>
    %c0_1 = arith.constant 0 : index
    %c0_2 = arith.constant 0 : index
    %c0_3 = arith.constant 0 : index
    %1 = vector.load %arg1[%c0_1, %c0_2, %c0_3] : memref<1x64x16xf32, #tpu.memory_space<vmem>>, vector<1x64x16xf32>
    %2 = vector.shape_cast %1 : vector<1x64x16xf32> to vector<64x16xf32>
    %3 = arith.truncf %2 : vector<64x16xf32> to vector<64x16xbf16>
    %c0_4 = arith.constant 0 : index
    %c0_5 = arith.constant 0 : index
    %4 = vector.load %arg7[%c0_4, %c0_5] : memref<16x32xbf16, #tpu.memory_space<vmem>>, vector<16x32xbf16>
    %cst = arith.constant dense<0.000000e+00> : vector<64x32xf32>
    %5 = tpu.matmul %3, %4, %cst {dimension_numbers = #tpu.dot_dimension_numbers<[1], [0], [0], [1], [0, 0, 1, 1], [], []>} : vector<64x16xbf16>, vector<16x32xbf16>, vector<64x32xf32> -> vector<64x32xf32>
    %6 = vector.extract_strided_slice %5 {offsets = [0, 0], sizes = [16, 32], strides = [1, 1]} : vector<64x32xf32> to vector<16x32xf32>
    %7 = vector.extract_strided_slice %5 {offsets = [16, 0], sizes = [16, 32], strides = [1, 1]} : vector<64x32xf32> to vector<16x32xf32>
    %8 = arith.maximumf %6, %7 : vector<16x32xf32>
    %9 = vector.extract_strided_slice %5 {offsets = [32, 0], sizes = [16, 32], strides = [1, 1]} : vector<64x32xf32> to vector<16x32xf32>
    %10 = arith.maximumf %8, %9 : vector<16x32xf32>
    %11 = vector.extract_strided_slice %5 {offsets = [48, 0], sizes = [16, 32], strides = [1, 1]} : vector<64x32xf32> to vector<16x32xf32>
    %12 = arith.maximumf %10, %11 : vector<16x32xf32>
    %13 = vector.extract_strided_slice %0 {offsets = [0, 0], sizes = [1, 32], strides = [1, 1]} : vector<6x32xf32> to vector<1x32xf32>
    %14 = vector.broadcast %13 : vector<1x32xf32> to vector<16x32xf32>
    %15 = arith.addf %12, %14 : vector<16x32xf32>
    %cst_6 = arith.constant 0.000000e+00 : f32
    %16 = vector.broadcast %cst_6 : f32 to vector<16x32xf32>
    %17 = arith.maximumf %15, %16 : vector<16x32xf32>
    %c0_7 = arith.constant 0 : index
    %c0_8 = arith.constant 0 : index
    %c0_9 = arith.constant 0 : index
    %18 = vector.load %arg2[%c0_7, %c0_8, %c0_9] : memref<1x16x32xf32, #tpu.memory_space<vmem>>, vector<1x16x32xf32>
    %19 = vector.shape_cast %18 : vector<1x16x32xf32> to vector<16x32xf32>
    %20 = tpu.concatenate %17, %19 in 1 : vector<16x32xf32>, vector<16x32xf32> -> vector<16x64xf32>
    %21 = arith.truncf %20 : vector<16x64xf32> to vector<16x64xbf16>
    %c0_10 = arith.constant 0 : index
    %c0_11 = arith.constant 0 : index
    %22 = vector.load %arg8[%c0_10, %c0_11] : memref<64x32xbf16, #tpu.memory_space<vmem>>, vector<64x32xbf16>
    %cst_12 = arith.constant dense<0.000000e+00> : vector<16x32xf32>
    %23 = tpu.matmul %21, %22, %cst_12 {dimension_numbers = #tpu.dot_dimension_numbers<[1], [0], [0], [1], [0, 0, 1, 1], [], []>} : vector<16x64xbf16>, vector<64x32xbf16>, vector<16x32xf32> -> vector<16x32xf32>
    %24 = vector.extract_strided_slice %0 {offsets = [1, 0], sizes = [1, 32], strides = [1, 1]} : vector<6x32xf32> to vector<1x32xf32>
    %25 = vector.broadcast %24 : vector<1x32xf32> to vector<16x32xf32>
    %26 = arith.addf %23, %25 : vector<16x32xf32>
    %c0_13 = arith.constant 0 : index
    %c0_14 = arith.constant 0 : index
    %c0_15 = arith.constant 0 : index
    %27 = vector.load %arg9[%c0_13, %c0_14, %c0_15] : memref<4x32x32xbf16, #tpu.memory_space<vmem>>, vector<4x32x32xbf16>
    %28 = arith.truncf %26 : vector<16x32xf32> to vector<16x32xbf16>
    %29 = vector.extract_strided_slice %27 {offsets = [0, 0, 0], sizes = [1, 32, 32], strides = [1, 1, 1]} : vector<4x32x32xbf16> to vector<1x32x32xbf16>
    %30 = vector.shape_cast %29 : vector<1x32x32xbf16> to vector<32x32xbf16>
    %cst_16 = arith.constant dense<0.000000e+00> : vector<16x32xf32>
    %31 = tpu.matmul %28, %30, %cst_16 {dimension_numbers = #tpu.dot_dimension_numbers<[1], [0], [0], [1], [0, 0, 1, 1], [], []>} : vector<16x32xbf16>, vector<32x32xbf16>, vector<16x32xf32> -> vector<16x32xf32>
    %32 = vector.extract_strided_slice %0 {offsets = [2, 0], sizes = [1, 32], strides = [1, 1]} : vector<6x32xf32> to vector<1x32xf32>
    %33 = vector.broadcast %32 : vector<1x32xf32> to vector<16x32xf32>
    %34 = arith.addf %31, %33 : vector<16x32xf32>
    %35 = math.absf %34 : vector<16x32xf32>
    %cst_17 = arith.constant 0.000000e+00 : f32
    %36 = vector.broadcast %cst_17 : f32 to vector<16x32xf32>
    %37 = arith.subf %36, %35 : vector<16x32xf32>
    %38 = math.exp %37 : vector<16x32xf32>
    %cst_18 = arith.constant 0.000000e+00 : f32
    %39 = vector.broadcast %cst_18 : f32 to vector<16x32xf32>
    %40 = arith.cmpf oge, %34, %39 : vector<16x32xf32>
    %cst_19 = arith.constant 1.000000e+00 : f32
    %41 = vector.broadcast %cst_19 : f32 to vector<16x32xf32>
    %42 = arith.addf %41, %38 : vector<16x32xf32>
    %cst_20 = arith.constant 1.000000e+00 : f32
    %43 = vector.broadcast %cst_20 : f32 to vector<16x32xf32>
    %44 = arith.divf %43, %42 : vector<16x32xf32>
    %cst_21 = arith.constant 1.000000e+00 : f32
    %45 = vector.broadcast %cst_21 : f32 to vector<16x32xf32>
    %46 = arith.addf %45, %38 : vector<16x32xf32>
    %47 = arith.divf %38, %46 : vector<16x32xf32>
    %48 = arith.select %40, %44, %47 : vector<16x32xi1>, vector<16x32xf32>
    %49 = arith.truncf %26 : vector<16x32xf32> to vector<16x32xbf16>
    %50 = vector.extract_strided_slice %27 {offsets = [2, 0, 0], sizes = [1, 32, 32], strides = [1, 1, 1]} : vector<4x32x32xbf16> to vector<1x32x32xbf16>
    %51 = vector.shape_cast %50 : vector<1x32x32xbf16> to vector<32x32xbf16>
    %cst_22 = arith.constant dense<0.000000e+00> : vector<16x32xf32>
    %52 = tpu.matmul %49, %51, %cst_22 {dimension_numbers = #tpu.dot_dimension_numbers<[1], [0], [0], [1], [0, 0, 1, 1], [], []>} : vector<16x32xbf16>, vector<32x32xbf16>, vector<16x32xf32> -> vector<16x32xf32>
    %53 = vector.extract_strided_slice %0 {offsets = [4, 0], sizes = [1, 32], strides = [1, 1]} : vector<6x32xf32> to vector<1x32xf32>
    %54 = vector.broadcast %53 : vector<1x32xf32> to vector<16x32xf32>
    %55 = arith.addf %52, %54 : vector<16x32xf32>
    %cst_23 = arith.constant 0.000000e+00 : f32
    %56 = vector.broadcast %cst_23 : f32 to vector<16x32xf32>
    %57 = arith.maximumf %55, %56 : vector<16x32xf32>
    %58 = arith.mulf %48, %57 : vector<16x32xf32>
    %cst_24 = arith.constant 1.000000e+00 : f32
    %59 = vector.broadcast %cst_24 : f32 to vector<16x32xf32>
    %60 = arith.subf %59, %48 : vector<16x32xf32>
    %61 = arith.mulf %60, %26 : vector<16x32xf32>
    %62 = arith.addf %58, %61 : vector<16x32xf32>
    %63 = arith.truncf %62 : vector<16x32xf32> to vector<16x32xbf16>
    %64 = vector.extract_strided_slice %27 {offsets = [1, 0, 0], sizes = [1, 32, 32], strides = [1, 1, 1]} : vector<4x32x32xbf16> to vector<1x32x32xbf16>
    %65 = vector.shape_cast %64 : vector<1x32x32xbf16> to vector<32x32xbf16>
    %cst_25 = arith.constant dense<0.000000e+00> : vector<16x32xf32>
    %66 = tpu.matmul %63, %65, %cst_25 {dimension_numbers = #tpu.dot_dimension_numbers<[1], [0], [0], [1], [0, 0, 1, 1], [], []>} : vector<16x32xbf16>, vector<32x32xbf16>, vector<16x32xf32> -> vector<16x32xf32>
    %67 = vector.extract_strided_slice %0 {offsets = [3, 0], sizes = [1, 32], strides = [1, 1]} : vector<6x32xf32> to vector<1x32xf32>
    %68 = vector.broadcast %67 : vector<1x32xf32> to vector<16x32xf32>
    %69 = arith.addf %66, %68 : vector<16x32xf32>
    %70 = math.absf %69 : vector<16x32xf32>
    %cst_26 = arith.constant 0.000000e+00 : f32
    %71 = vector.broadcast %cst_26 : f32 to vector<16x32xf32>
    %72 = arith.subf %71, %70 : vector<16x32xf32>
    %73 = math.exp %72 : vector<16x32xf32>
    %cst_27 = arith.constant 0.000000e+00 : f32
    %74 = vector.broadcast %cst_27 : f32 to vector<16x32xf32>
    %75 = arith.cmpf oge, %69, %74 : vector<16x32xf32>
    %cst_28 = arith.constant 1.000000e+00 : f32
    %76 = vector.broadcast %cst_28 : f32 to vector<16x32xf32>
    %77 = arith.addf %76, %73 : vector<16x32xf32>
    %cst_29 = arith.constant 1.000000e+00 : f32
    %78 = vector.broadcast %cst_29 : f32 to vector<16x32xf32>
    %79 = arith.divf %78, %77 : vector<16x32xf32>
    %cst_30 = arith.constant 1.000000e+00 : f32
    %80 = vector.broadcast %cst_30 : f32 to vector<16x32xf32>
    %81 = arith.addf %80, %73 : vector<16x32xf32>
    %82 = arith.divf %73, %81 : vector<16x32xf32>
    %83 = arith.select %75, %79, %82 : vector<16x32xi1>, vector<16x32xf32>
    %84 = arith.truncf %62 : vector<16x32xf32> to vector<16x32xbf16>
    %85 = vector.extract_strided_slice %27 {offsets = [3, 0, 0], sizes = [1, 32, 32], strides = [1, 1, 1]} : vector<4x32x32xbf16> to vector<1x32x32xbf16>
    %86 = vector.shape_cast %85 : vector<1x32x32xbf16> to vector<32x32xbf16>
    %cst_31 = arith.constant dense<0.000000e+00> : vector<16x32xf32>
    %87 = tpu.matmul %84, %86, %cst_31 {dimension_numbers = #tpu.dot_dimension_numbers<[1], [0], [0], [1], [0, 0, 1, 1], [], []>} : vector<16x32xbf16>, vector<32x32xbf16>, vector<16x32xf32> -> vector<16x32xf32>
    %88 = vector.extract_strided_slice %0 {offsets = [5, 0], sizes = [1, 32], strides = [1, 1]} : vector<6x32xf32> to vector<1x32xf32>
    %89 = vector.broadcast %88 : vector<1x32xf32> to vector<16x32xf32>
    %90 = arith.addf %87, %89 : vector<16x32xf32>
    %cst_32 = arith.constant 0.000000e+00 : f32
    %91 = vector.broadcast %cst_32 : f32 to vector<16x32xf32>
    %92 = arith.maximumf %90, %91 : vector<16x32xf32>
    %93 = arith.mulf %83, %92 : vector<16x32xf32>
    %cst_33 = arith.constant 1.000000e+00 : f32
    %94 = vector.broadcast %cst_33 : f32 to vector<16x32xf32>
    %95 = arith.subf %94, %83 : vector<16x32xf32>
    %96 = arith.mulf %95, %62 : vector<16x32xf32>
    %97 = arith.addf %93, %96 : vector<16x32xf32>
    %c0_34 = arith.constant 0 : index
    %c0_35 = arith.constant 0 : index
    %c0_36 = arith.constant 0 : index
    %98 = vector.load %arg3[%c0_34, %c0_35, %c0_36] : memref<1x1x16xf32, #tpu.memory_space<vmem>>, vector<1x1x16xf32>
    %99 = vector.shape_cast %98 : vector<1x1x16xf32> to vector<1x16xf32>
    %cst_37 = arith.constant 1.000000e+30 : f32
    %100 = vector.broadcast %cst_37 : f32 to vector<1x16xf32>
    %101 = arith.mulf %99, %100 : vector<1x16xf32>
    %c0_38 = arith.constant 0 : index
    %c0_39 = arith.constant 0 : index
    %c0_40 = arith.constant 0 : index
    %102 = vector.load %arg4[%c0_38, %c0_39, %c0_40] : memref<1x16x1xf32, #tpu.memory_space<vmem>>, vector<1x16x1xf32>
    %103 = vector.shape_cast %102 : vector<1x16x1xf32> to vector<16x1xf32>
    %c0_41 = arith.constant 0 : index
    %c0_42 = arith.constant 0 : index
    %104 = vector.load %arg5[%c0_41, %c0_42] : memref<16x32xf32, #tpu.memory_space<vmem>>, vector<16x32xf32>
    %c0_43 = arith.constant 0 : index
    %c0_44 = arith.constant 0 : index
    %c0_45 = arith.constant 0 : index
    %105 = vector.load %arg10[%c0_43, %c0_44, %c0_45] : memref<1x26x32xf32, #tpu.memory_space<vmem>>, vector<1x26x32xf32>
    %c0_46 = arith.constant 0 : index
    %c0_47 = arith.constant 0 : index
    %c0_48 = arith.constant 0 : index
    %106 = vector.load %arg11[%c0_46, %c0_47, %c0_48] : memref<1x32x96xbf16, #tpu.memory_space<vmem>>, vector<1x32x96xbf16>
    %c0_49 = arith.constant 0 : index
    %c0_50 = arith.constant 0 : index
    %c0_51 = arith.constant 0 : index
    %107 = vector.load %arg12[%c0_49, %c0_50, %c0_51] : memref<5x32x32xbf16, #tpu.memory_space<vmem>>, vector<5x32x32xbf16>
    %108 = tpu.iota {dimensions = array<i32: 0>} : vector<16x1xi32>
    %109 = vector.shape_cast %105 : vector<1x26x32xf32> to vector<26x32xf32>
    %110 = vector.shape_cast %106 : vector<1x32x96xbf16> to vector<32x96xbf16>
    %111 = arith.addf %97, %104 : vector<16x32xf32>
    %112 = vector.extract_strided_slice %109 {offsets = [0, 0], sizes = [1, 32], strides = [1, 1]} : vector<26x32xf32> to vector<1x32xf32>
    %113 = vector.extract_strided_slice %109 {offsets = [2, 0], sizes = [1, 32], strides = [1, 1]} : vector<26x32xf32> to vector<1x32xf32>
    %cst_52 = arith.constant dense<0.000000e+00> : vector<16xf32>
    %114 = vector.multi_reduction <add>, %111, %cst_52 [1] : vector<16x32xf32> to vector<16xf32>
    %115 = vector.shape_cast %114 : vector<16xf32> to vector<16x1xf32>
    %cst_53 = arith.constant 3.200000e+01 : f32
    %116 = vector.broadcast %cst_53 : f32 to vector<16x1xf32>
    %117 = arith.divf %115, %116 : vector<16x1xf32>
    %118 = vector.broadcast %117 : vector<16x1xf32> to vector<16x32xf32>
    %119 = arith.subf %111, %118 : vector<16x32xf32>
    %120 = arith.mulf %119, %119 : vector<16x32xf32>
    %cst_54 = arith.constant dense<0.000000e+00> : vector<16xf32>
    %121 = vector.multi_reduction <add>, %120, %cst_54 [1] : vector<16x32xf32> to vector<16xf32>
    %122 = vector.shape_cast %121 : vector<16xf32> to vector<16x1xf32>
    %cst_55 = arith.constant 3.200000e+01 : f32
    %123 = vector.broadcast %cst_55 : f32 to vector<16x1xf32>
    %124 = arith.divf %122, %123 : vector<16x1xf32>
    %125 = vector.broadcast %117 : vector<16x1xf32> to vector<16x32xf32>
    %126 = arith.subf %111, %125 : vector<16x32xf32>
    %cst_56 = arith.constant 9.99999974E-6 : f32
    %127 = vector.broadcast %cst_56 : f32 to vector<16x1xf32>
    %128 = arith.addf %124, %127 : vector<16x1xf32>
    %129 = math.rsqrt %128 : vector<16x1xf32>
    %130 = vector.broadcast %129 : vector<16x1xf32> to vector<16x32xf32>
    %131 = arith.mulf %126, %130 : vector<16x32xf32>
    %132 = vector.broadcast %112 : vector<1x32xf32> to vector<16x32xf32>
    %133 = arith.mulf %131, %132 : vector<16x32xf32>
    %134 = vector.broadcast %113 : vector<1x32xf32> to vector<16x32xf32>
    %135 = arith.addf %133, %134 : vector<16x32xf32>
    %136 = vector.broadcast %103 : vector<16x1xf32> to vector<16x32xf32>
    %137 = arith.mulf %135, %136 : vector<16x32xf32>
    %cst_57 = arith.constant 0.000000e+00 : f32
    %138 = vector.broadcast %cst_57 : f32 to vector<16x32xf32>
    %139 = vector.extract_strided_slice %109 {offsets = [4, 0], sizes = [1, 32], strides = [1, 1]} : vector<26x32xf32> to vector<1x32xf32>
    %c2_i32 = arith.constant 2 : i32
    %140 = tpu.dynamic_rotate %137 by %c2_i32 dim 0 : vector<16x32xf32>, i32 -> vector<16x32xf32>
    %c2_i32_58 = arith.constant 2 : i32
    %141 = vector.broadcast %c2_i32_58 : i32 to vector<16x1xi32>
    %142 = arith.cmpi sge, %108, %141 : vector<16x1xi32>
    %cst_59 = arith.constant 0.000000e+00 : f32
    %143 = vector.shape_cast %142 : vector<16x1xi1> to vector<16x1xi1>
    %144 = vector.broadcast %143 : vector<16x1xi1> to vector<16x32xi1>
    %145 = vector.broadcast %cst_59 : f32 to vector<16x32xf32>
    %146 = arith.select %144, %140, %145 : vector<16x32xi1>, vector<16x32xf32>
    %147 = vector.broadcast %139 : vector<1x32xf32> to vector<16x32xf32>
    %148 = arith.mulf %146, %147 : vector<16x32xf32>
    %149 = arith.addf %138, %148 : vector<16x32xf32>
    %150 = vector.extract_strided_slice %109 {offsets = [5, 0], sizes = [1, 32], strides = [1, 1]} : vector<26x32xf32> to vector<1x32xf32>
    %c1_i32 = arith.constant 1 : i32
    %151 = tpu.dynamic_rotate %137 by %c1_i32 dim 0 : vector<16x32xf32>, i32 -> vector<16x32xf32>
    %c1_i32_60 = arith.constant 1 : i32
    %152 = vector.broadcast %c1_i32_60 : i32 to vector<16x1xi32>
    %153 = arith.cmpi sge, %108, %152 : vector<16x1xi32>
    %cst_61 = arith.constant 0.000000e+00 : f32
    %154 = vector.shape_cast %153 : vector<16x1xi1> to vector<16x1xi1>
    %155 = vector.broadcast %154 : vector<16x1xi1> to vector<16x32xi1>
    %156 = vector.broadcast %cst_61 : f32 to vector<16x32xf32>
    %157 = arith.select %155, %151, %156 : vector<16x32xi1>, vector<16x32xf32>
    %158 = vector.broadcast %150 : vector<1x32xf32> to vector<16x32xf32>
    %159 = arith.mulf %157, %158 : vector<16x32xf32>
    %160 = arith.addf %149, %159 : vector<16x32xf32>
    %161 = vector.extract_strided_slice %109 {offsets = [6, 0], sizes = [1, 32], strides = [1, 1]} : vector<26x32xf32> to vector<1x32xf32>
    %162 = vector.broadcast %161 : vector<1x32xf32> to vector<16x32xf32>
    %163 = arith.mulf %137, %162 : vector<16x32xf32>
    %164 = arith.addf %160, %163 : vector<16x32xf32>
    %165 = vector.extract_strided_slice %109 {offsets = [7, 0], sizes = [1, 32], strides = [1, 1]} : vector<26x32xf32> to vector<1x32xf32>
    %c15_i32 = arith.constant 15 : i32
    %166 = tpu.dynamic_rotate %137 by %c15_i32 dim 0 : vector<16x32xf32>, i32 -> vector<16x32xf32>
    %c15_i32_62 = arith.constant 15 : i32
    %167 = vector.broadcast %c15_i32_62 : i32 to vector<16x1xi32>
    %168 = arith.cmpi slt, %108, %167 : vector<16x1xi32>
    %cst_63 = arith.constant 0.000000e+00 : f32
    %169 = vector.shape_cast %168 : vector<16x1xi1> to vector<16x1xi1>
    %170 = vector.broadcast %169 : vector<16x1xi1> to vector<16x32xi1>
    %171 = vector.broadcast %cst_63 : f32 to vector<16x32xf32>
    %172 = arith.select %170, %166, %171 : vector<16x32xi1>, vector<16x32xf32>
    %173 = vector.broadcast %165 : vector<1x32xf32> to vector<16x32xf32>
    %174 = arith.mulf %172, %173 : vector<16x32xf32>
    %175 = arith.addf %164, %174 : vector<16x32xf32>
    %176 = vector.extract_strided_slice %109 {offsets = [8, 0], sizes = [1, 32], strides = [1, 1]} : vector<26x32xf32> to vector<1x32xf32>
    %c14_i32 = arith.constant 14 : i32
    %177 = tpu.dynamic_rotate %137 by %c14_i32 dim 0 : vector<16x32xf32>, i32 -> vector<16x32xf32>
    %c14_i32_64 = arith.constant 14 : i32
    %178 = vector.broadcast %c14_i32_64 : i32 to vector<16x1xi32>
    %179 = arith.cmpi slt, %108, %178 : vector<16x1xi32>
    %cst_65 = arith.constant 0.000000e+00 : f32
    %180 = vector.shape_cast %179 : vector<16x1xi1> to vector<16x1xi1>
    %181 = vector.broadcast %180 : vector<16x1xi1> to vector<16x32xi1>
    %182 = vector.broadcast %cst_65 : f32 to vector<16x32xf32>
    %183 = arith.select %181, %177, %182 : vector<16x32xi1>, vector<16x32xf32>
    %184 = vector.broadcast %176 : vector<1x32xf32> to vector<16x32xf32>
    %185 = arith.mulf %183, %184 : vector<16x32xf32>
    %186 = arith.addf %175, %185 : vector<16x32xf32>
    %187 = arith.truncf %186 : vector<16x32xf32> to vector<16x32xbf16>
    %188 = vector.extract_strided_slice %107 {offsets = [0, 0, 0], sizes = [1, 32, 32], strides = [1, 1, 1]} : vector<5x32x32xbf16> to vector<1x32x32xbf16>
    %189 = vector.shape_cast %188 : vector<1x32x32xbf16> to vector<32x32xbf16>
    %cst_66 = arith.constant dense<0.000000e+00> : vector<16x32xf32>
    %190 = tpu.matmul %187, %189, %cst_66 {dimension_numbers = #tpu.dot_dimension_numbers<[1], [0], [0], [1], [0, 0, 1, 1], [], []>} : vector<16x32xbf16>, vector<32x32xbf16>, vector<16x32xf32> -> vector<16x32xf32>
    %191 = vector.extract_strided_slice %109 {offsets = [14, 0], sizes = [1, 32], strides = [1, 1]} : vector<26x32xf32> to vector<1x32xf32>
    %192 = vector.broadcast %191 : vector<1x32xf32> to vector<16x32xf32>
    %193 = arith.addf %190, %192 : vector<16x32xf32>
    %cst_67 = arith.constant 0.000000e+00 : f32
    %194 = vector.broadcast %cst_67 : f32 to vector<16x32xf32>
    %195 = arith.maximumf %193, %194 : vector<16x32xf32>
    %196 = arith.addf %195, %111 : vector<16x32xf32>
    %197 = vector.extract_strided_slice %109 {offsets = [1, 0], sizes = [1, 32], strides = [1, 1]} : vector<26x32xf32> to vector<1x32xf32>
    %198 = vector.extract_strided_slice %109 {offsets = [3, 0], sizes = [1, 32], strides = [1, 1]} : vector<26x32xf32> to vector<1x32xf32>
    %cst_68 = arith.constant dense<0.000000e+00> : vector<16xf32>
    %199 = vector.multi_reduction <add>, %196, %cst_68 [1] : vector<16x32xf32> to vector<16xf32>
    %200 = vector.shape_cast %199 : vector<16xf32> to vector<16x1xf32>
    %cst_69 = arith.constant 3.200000e+01 : f32
    %201 = vector.broadcast %cst_69 : f32 to vector<16x1xf32>
    %202 = arith.divf %200, %201 : vector<16x1xf32>
    %203 = vector.broadcast %202 : vector<16x1xf32> to vector<16x32xf32>
    %204 = arith.subf %196, %203 : vector<16x32xf32>
    %205 = arith.mulf %204, %204 : vector<16x32xf32>
    %cst_70 = arith.constant dense<0.000000e+00> : vector<16xf32>
    %206 = vector.multi_reduction <add>, %205, %cst_70 [1] : vector<16x32xf32> to vector<16xf32>
    %207 = vector.shape_cast %206 : vector<16xf32> to vector<16x1xf32>
    %cst_71 = arith.constant 3.200000e+01 : f32
    %208 = vector.broadcast %cst_71 : f32 to vector<16x1xf32>
    %209 = arith.divf %207, %208 : vector<16x1xf32>
    %210 = vector.broadcast %202 : vector<16x1xf32> to vector<16x32xf32>
    %211 = arith.subf %196, %210 : vector<16x32xf32>
    %cst_72 = arith.constant 9.99999974E-6 : f32
    %212 = vector.broadcast %cst_72 : f32 to vector<16x1xf32>
    %213 = arith.addf %209, %212 : vector<16x1xf32>
    %214 = math.rsqrt %213 : vector<16x1xf32>
    %215 = vector.broadcast %214 : vector<16x1xf32> to vector<16x32xf32>
    %216 = arith.mulf %211, %215 : vector<16x32xf32>
    %217 = vector.broadcast %197 : vector<1x32xf32> to vector<16x32xf32>
    %218 = arith.mulf %216, %217 : vector<16x32xf32>
    %219 = vector.broadcast %198 : vector<1x32xf32> to vector<16x32xf32>
    %220 = arith.addf %218, %219 : vector<16x32xf32>
    %221 = vector.broadcast %103 : vector<16x1xf32> to vector<16x32xf32>
    %222 = arith.mulf %220, %221 : vector<16x32xf32>
    %cst_73 = arith.constant 0.000000e+00 : f32
    %223 = vector.broadcast %cst_73 : f32 to vector<16x32xf32>
    %224 = vector.extract_strided_slice %109 {offsets = [9, 0], sizes = [1, 32], strides = [1, 1]} : vector<26x32xf32> to vector<1x32xf32>
    %c2_i32_74 = arith.constant 2 : i32
    %225 = tpu.dynamic_rotate %222 by %c2_i32_74 dim 0 : vector<16x32xf32>, i32 -> vector<16x32xf32>
    %c2_i32_75 = arith.constant 2 : i32
    %226 = vector.broadcast %c2_i32_75 : i32 to vector<16x1xi32>
    %227 = arith.cmpi sge, %108, %226 : vector<16x1xi32>
    %cst_76 = arith.constant 0.000000e+00 : f32
    %228 = vector.shape_cast %227 : vector<16x1xi1> to vector<16x1xi1>
    %229 = vector.broadcast %228 : vector<16x1xi1> to vector<16x32xi1>
    %230 = vector.broadcast %cst_76 : f32 to vector<16x32xf32>
    %231 = arith.select %229, %225, %230 : vector<16x32xi1>, vector<16x32xf32>
    %232 = vector.broadcast %224 : vector<1x32xf32> to vector<16x32xf32>
    %233 = arith.mulf %231, %232 : vector<16x32xf32>
    %234 = arith.addf %223, %233 : vector<16x32xf32>
    %235 = vector.extract_strided_slice %109 {offsets = [10, 0], sizes = [1, 32], strides = [1, 1]} : vector<26x32xf32> to vector<1x32xf32>
    %c1_i32_77 = arith.constant 1 : i32
    %236 = tpu.dynamic_rotate %222 by %c1_i32_77 dim 0 : vector<16x32xf32>, i32 -> vector<16x32xf32>
    %c1_i32_78 = arith.constant 1 : i32
    %237 = vector.broadcast %c1_i32_78 : i32 to vector<16x1xi32>
    %238 = arith.cmpi sge, %108, %237 : vector<16x1xi32>
    %cst_79 = arith.constant 0.000000e+00 : f32
    %239 = vector.shape_cast %238 : vector<16x1xi1> to vector<16x1xi1>
    %240 = vector.broadcast %239 : vector<16x1xi1> to vector<16x32xi1>
    %241 = vector.broadcast %cst_79 : f32 to vector<16x32xf32>
    %242 = arith.select %240, %236, %241 : vector<16x32xi1>, vector<16x32xf32>
    %243 = vector.broadcast %235 : vector<1x32xf32> to vector<16x32xf32>
    %244 = arith.mulf %242, %243 : vector<16x32xf32>
    %245 = arith.addf %234, %244 : vector<16x32xf32>
    %246 = vector.extract_strided_slice %109 {offsets = [11, 0], sizes = [1, 32], strides = [1, 1]} : vector<26x32xf32> to vector<1x32xf32>
    %247 = vector.broadcast %246 : vector<1x32xf32> to vector<16x32xf32>
    %248 = arith.mulf %222, %247 : vector<16x32xf32>
    %249 = arith.addf %245, %248 : vector<16x32xf32>
    %250 = vector.extract_strided_slice %109 {offsets = [12, 0], sizes = [1, 32], strides = [1, 1]} : vector<26x32xf32> to vector<1x32xf32>
    %c15_i32_80 = arith.constant 15 : i32
    %251 = tpu.dynamic_rotate %222 by %c15_i32_80 dim 0 : vector<16x32xf32>, i32 -> vector<16x32xf32>
    %c15_i32_81 = arith.constant 15 : i32
    %252 = vector.broadcast %c15_i32_81 : i32 to vector<16x1xi32>
    %253 = arith.cmpi slt, %108, %252 : vector<16x1xi32>
    %cst_82 = arith.constant 0.000000e+00 : f32
    %254 = vector.shape_cast %253 : vector<16x1xi1> to vector<16x1xi1>
    %255 = vector.broadcast %254 : vector<16x1xi1> to vector<16x32xi1>
    %256 = vector.broadcast %cst_82 : f32 to vector<16x32xf32>
    %257 = arith.select %255, %251, %256 : vector<16x32xi1>, vector<16x32xf32>
    %258 = vector.broadcast %250 : vector<1x32xf32> to vector<16x32xf32>
    %259 = arith.mulf %257, %258 : vector<16x32xf32>
    %260 = arith.addf %249, %259 : vector<16x32xf32>
    %261 = vector.extract_strided_slice %109 {offsets = [13, 0], sizes = [1, 32], strides = [1, 1]} : vector<26x32xf32> to vector<1x32xf32>
    %c14_i32_83 = arith.constant 14 : i32
    %262 = tpu.dynamic_rotate %222 by %c14_i32_83 dim 0 : vector<16x32xf32>, i32 -> vector<16x32xf32>
    %c14_i32_84 = arith.constant 14 : i32
    %263 = vector.broadcast %c14_i32_84 : i32 to vector<16x1xi32>
    %264 = arith.cmpi slt, %108, %263 : vector<16x1xi32>
    %cst_85 = arith.constant 0.000000e+00 : f32
    %265 = vector.shape_cast %264 : vector<16x1xi1> to vector<16x1xi1>
    %266 = vector.broadcast %265 : vector<16x1xi1> to vector<16x32xi1>
    %267 = vector.broadcast %cst_85 : f32 to vector<16x32xf32>
    %268 = arith.select %266, %262, %267 : vector<16x32xi1>, vector<16x32xf32>
    %269 = vector.broadcast %261 : vector<1x32xf32> to vector<16x32xf32>
    %270 = arith.mulf %268, %269 : vector<16x32xf32>
    %271 = arith.addf %260, %270 : vector<16x32xf32>
    %272 = arith.truncf %271 : vector<16x32xf32> to vector<16x32xbf16>
    %273 = vector.extract_strided_slice %107 {offsets = [1, 0, 0], sizes = [1, 32, 32], strides = [1, 1, 1]} : vector<5x32x32xbf16> to vector<1x32x32xbf16>
    %274 = vector.shape_cast %273 : vector<1x32x32xbf16> to vector<32x32xbf16>
    %cst_86 = arith.constant dense<0.000000e+00> : vector<16x32xf32>
    %275 = tpu.matmul %272, %274, %cst_86 {dimension_numbers = #tpu.dot_dimension_numbers<[1], [0], [0], [1], [0, 0, 1, 1], [], []>} : vector<16x32xbf16>, vector<32x32xbf16>, vector<16x32xf32> -> vector<16x32xf32>
    %276 = vector.extract_strided_slice %109 {offsets = [15, 0], sizes = [1, 32], strides = [1, 1]} : vector<26x32xf32> to vector<1x32xf32>
    %277 = vector.broadcast %276 : vector<1x32xf32> to vector<16x32xf32>
    %278 = arith.addf %275, %277 : vector<16x32xf32>
    %cst_87 = arith.constant 0.000000e+00 : f32
    %279 = vector.broadcast %cst_87 : f32 to vector<16x32xf32>
    %280 = arith.maximumf %278, %279 : vector<16x32xf32>
    %281 = arith.addf %280, %196 : vector<16x32xf32>
    %282 = vector.extract_strided_slice %109 {offsets = [16, 0], sizes = [1, 32], strides = [1, 1]} : vector<26x32xf32> to vector<1x32xf32>
    %283 = vector.extract_strided_slice %109 {offsets = [17, 0], sizes = [1, 32], strides = [1, 1]} : vector<26x32xf32> to vector<1x32xf32>
    %cst_88 = arith.constant dense<0.000000e+00> : vector<16xf32>
    %284 = vector.multi_reduction <add>, %281, %cst_88 [1] : vector<16x32xf32> to vector<16xf32>
    %285 = vector.shape_cast %284 : vector<16xf32> to vector<16x1xf32>
    %cst_89 = arith.constant 3.200000e+01 : f32
    %286 = vector.broadcast %cst_89 : f32 to vector<16x1xf32>
    %287 = arith.divf %285, %286 : vector<16x1xf32>
    %288 = vector.broadcast %287 : vector<16x1xf32> to vector<16x32xf32>
    %289 = arith.subf %281, %288 : vector<16x32xf32>
    %290 = arith.mulf %289, %289 : vector<16x32xf32>
    %cst_90 = arith.constant dense<0.000000e+00> : vector<16xf32>
    %291 = vector.multi_reduction <add>, %290, %cst_90 [1] : vector<16x32xf32> to vector<16xf32>
    %292 = vector.shape_cast %291 : vector<16xf32> to vector<16x1xf32>
    %cst_91 = arith.constant 3.200000e+01 : f32
    %293 = vector.broadcast %cst_91 : f32 to vector<16x1xf32>
    %294 = arith.divf %292, %293 : vector<16x1xf32>
    %295 = vector.broadcast %287 : vector<16x1xf32> to vector<16x32xf32>
    %296 = arith.subf %281, %295 : vector<16x32xf32>
    %cst_92 = arith.constant 9.99999974E-6 : f32
    %297 = vector.broadcast %cst_92 : f32 to vector<16x1xf32>
    %298 = arith.addf %294, %297 : vector<16x1xf32>
    %299 = math.rsqrt %298 : vector<16x1xf32>
    %300 = vector.broadcast %299 : vector<16x1xf32> to vector<16x32xf32>
    %301 = arith.mulf %296, %300 : vector<16x32xf32>
    %302 = vector.broadcast %282 : vector<1x32xf32> to vector<16x32xf32>
    %303 = arith.mulf %301, %302 : vector<16x32xf32>
    %304 = vector.broadcast %283 : vector<1x32xf32> to vector<16x32xf32>
    %305 = arith.addf %303, %304 : vector<16x32xf32>
    %306 = vector.extract_strided_slice %109 {offsets = [18, 0], sizes = [1, 32], strides = [1, 1]} : vector<26x32xf32> to vector<1x32xf32>
    %307 = vector.extract_strided_slice %109 {offsets = [19, 0], sizes = [1, 32], strides = [1, 1]} : vector<26x32xf32> to vector<1x32xf32>
    %308 = vector.extract_strided_slice %109 {offsets = [20, 0], sizes = [1, 32], strides = [1, 1]} : vector<26x32xf32> to vector<1x32xf32>
    %309 = tpu.concatenate %306, %307, %308 in 1 : vector<1x32xf32>, vector<1x32xf32>, vector<1x32xf32> -> vector<1x96xf32>
    %310 = arith.truncf %305 : vector<16x32xf32> to vector<16x32xbf16>
    %cst_93 = arith.constant dense<0.000000e+00> : vector<16x96xf32>
    %311 = tpu.matmul %310, %110, %cst_93 {dimension_numbers = #tpu.dot_dimension_numbers<[1], [0], [0], [1], [0, 0, 1, 1], [], []>} : vector<16x32xbf16>, vector<32x96xbf16>, vector<16x96xf32> -> vector<16x96xf32>
    %312 = vector.broadcast %309 : vector<1x96xf32> to vector<16x96xf32>
    %313 = arith.addf %311, %312 : vector<16x96xf32>
    %314 = vector.extract_strided_slice %107 {offsets = [2, 0, 0], sizes = [1, 32, 32], strides = [1, 1, 1]} : vector<5x32x32xbf16> to vector<1x32x32xbf16>
    %315 = vector.shape_cast %314 : vector<1x32x32xbf16> to vector<32x32xbf16>
    %cst_94 = arith.constant 0.000000e+00 : f32
    %316 = vector.broadcast %cst_94 : f32 to vector<16x32xf32>
    %317 = vector.extract_strided_slice %313 {offsets = [0, 0], sizes = [16, 8], strides = [1, 1]} : vector<16x96xf32> to vector<16x8xf32>
    %318 = arith.truncf %317 : vector<16x8xf32> to vector<16x8xbf16>
    %319 = vector.extract_strided_slice %313 {offsets = [0, 32], sizes = [16, 8], strides = [1, 1]} : vector<16x96xf32> to vector<16x8xf32>
    %320 = arith.truncf %319 : vector<16x8xf32> to vector<16x8xbf16>
    %321 = vector.extract_strided_slice %313 {offsets = [0, 64], sizes = [16, 8], strides = [1, 1]} : vector<16x96xf32> to vector<16x8xf32>
    %322 = arith.truncf %321 : vector<16x8xf32> to vector<16x8xbf16>
    %cst_95 = arith.constant dense<0.000000e+00> : vector<16x16xf32>
    %323 = tpu.matmul %318, %320, %cst_95 {dimension_numbers = #tpu.dot_dimension_numbers<[1], [1], [0], [0], [0, 0, 1, 0], [], []>} : vector<16x8xbf16>, vector<16x8xbf16>, vector<16x16xf32> -> vector<16x16xf32>
    %cst_96 = arith.constant 0.353553385 : f32
    %324 = vector.broadcast %cst_96 : f32 to vector<16x16xf32>
    %325 = arith.mulf %323, %324 : vector<16x16xf32>
    %326 = vector.broadcast %101 : vector<1x16xf32> to vector<16x16xf32>
    %327 = arith.subf %325, %326 : vector<16x16xf32>
    %cst_97 = arith.constant dense<0xFF800000> : vector<16xf32>
    %328 = vector.multi_reduction <maximumf>, %327, %cst_97 [1] : vector<16x16xf32> to vector<16xf32>
    %329 = vector.shape_cast %328 : vector<16xf32> to vector<16x1xf32>
    %330 = vector.broadcast %329 : vector<16x1xf32> to vector<16x16xf32>
    %331 = arith.subf %327, %330 : vector<16x16xf32>
    %332 = math.exp %331 : vector<16x16xf32>
    %cst_98 = arith.constant dense<0.000000e+00> : vector<16xf32>
    %333 = vector.multi_reduction <add>, %332, %cst_98 [1] : vector<16x16xf32> to vector<16xf32>
    %334 = vector.shape_cast %333 : vector<16xf32> to vector<16x1xf32>
    %335 = tpu.reciprocal %334 {approx = true} : vector<16x1xf32> -> vector<16x1xf32>
    %336 = vector.broadcast %335 : vector<16x1xf32> to vector<16x16xf32>
    %337 = arith.mulf %332, %336 : vector<16x16xf32>
    %338 = arith.truncf %337 : vector<16x16xf32> to vector<16x16xbf16>
    %cst_99 = arith.constant dense<0.000000e+00> : vector<16x8xf32>
    %339 = tpu.matmul %338, %322, %cst_99 {dimension_numbers = #tpu.dot_dimension_numbers<[1], [0], [0], [1], [0, 0, 1, 1], [], []>} : vector<16x16xbf16>, vector<16x8xbf16>, vector<16x8xf32> -> vector<16x8xf32>
    %340 = arith.truncf %339 : vector<16x8xf32> to vector<16x8xbf16>
    %341 = vector.extract_strided_slice %315 {offsets = [0, 0], sizes = [8, 32], strides = [1, 1]} : vector<32x32xbf16> to vector<8x32xbf16>
    %cst_100 = arith.constant dense<0.000000e+00> : vector<16x32xf32>
    %342 = tpu.matmul %340, %341, %cst_100 {dimension_numbers = #tpu.dot_dimension_numbers<[1], [0], [0], [1], [0, 0, 1, 1], [], []>} : vector<16x8xbf16>, vector<8x32xbf16>, vector<16x32xf32> -> vector<16x32xf32>
    %343 = arith.addf %316, %342 : vector<16x32xf32>
    %344 = vector.extract_strided_slice %313 {offsets = [0, 8], sizes = [16, 8], strides = [1, 1]} : vector<16x96xf32> to vector<16x8xf32>
    %345 = arith.truncf %344 : vector<16x8xf32> to vector<16x8xbf16>
    %346 = vector.extract_strided_slice %313 {offsets = [0, 40], sizes = [16, 8], strides = [1, 1]} : vector<16x96xf32> to vector<16x8xf32>
    %347 = arith.truncf %346 : vector<16x8xf32> to vector<16x8xbf16>
    %348 = vector.extract_strided_slice %313 {offsets = [0, 72], sizes = [16, 8], strides = [1, 1]} : vector<16x96xf32> to vector<16x8xf32>
    %349 = arith.truncf %348 : vector<16x8xf32> to vector<16x8xbf16>
    %cst_101 = arith.constant dense<0.000000e+00> : vector<16x16xf32>
    %350 = tpu.matmul %345, %347, %cst_101 {dimension_numbers = #tpu.dot_dimension_numbers<[1], [1], [0], [0], [0, 0, 1, 0], [], []>} : vector<16x8xbf16>, vector<16x8xbf16>, vector<16x16xf32> -> vector<16x16xf32>
    %cst_102 = arith.constant 0.353553385 : f32
    %351 = vector.broadcast %cst_102 : f32 to vector<16x16xf32>
    %352 = arith.mulf %350, %351 : vector<16x16xf32>
    %353 = vector.broadcast %101 : vector<1x16xf32> to vector<16x16xf32>
    %354 = arith.subf %352, %353 : vector<16x16xf32>
    %cst_103 = arith.constant dense<0xFF800000> : vector<16xf32>
    %355 = vector.multi_reduction <maximumf>, %354, %cst_103 [1] : vector<16x16xf32> to vector<16xf32>
    %356 = vector.shape_cast %355 : vector<16xf32> to vector<16x1xf32>
    %357 = vector.broadcast %356 : vector<16x1xf32> to vector<16x16xf32>
    %358 = arith.subf %354, %357 : vector<16x16xf32>
    %359 = math.exp %358 : vector<16x16xf32>
    %cst_104 = arith.constant dense<0.000000e+00> : vector<16xf32>
    %360 = vector.multi_reduction <add>, %359, %cst_104 [1] : vector<16x16xf32> to vector<16xf32>
    %361 = vector.shape_cast %360 : vector<16xf32> to vector<16x1xf32>
    %362 = tpu.reciprocal %361 {approx = true} : vector<16x1xf32> -> vector<16x1xf32>
    %363 = vector.broadcast %362 : vector<16x1xf32> to vector<16x16xf32>
    %364 = arith.mulf %359, %363 : vector<16x16xf32>
    %365 = arith.truncf %364 : vector<16x16xf32> to vector<16x16xbf16>
    %cst_105 = arith.constant dense<0.000000e+00> : vector<16x8xf32>
    %366 = tpu.matmul %365, %349, %cst_105 {dimension_numbers = #tpu.dot_dimension_numbers<[1], [0], [0], [1], [0, 0, 1, 1], [], []>} : vector<16x16xbf16>, vector<16x8xbf16>, vector<16x8xf32> -> vector<16x8xf32>
    %367 = arith.truncf %366 : vector<16x8xf32> to vector<16x8xbf16>
    %368 = vector.extract_strided_slice %315 {offsets = [8, 0], sizes = [8, 32], strides = [1, 1]} : vector<32x32xbf16> to vector<8x32xbf16>
    %cst_106 = arith.constant dense<0.000000e+00> : vector<16x32xf32>
    %369 = tpu.matmul %367, %368, %cst_106 {dimension_numbers = #tpu.dot_dimension_numbers<[1], [0], [0], [1], [0, 0, 1, 1], [], []>} : vector<16x8xbf16>, vector<8x32xbf16>, vector<16x32xf32> -> vector<16x32xf32>
    %370 = arith.addf %343, %369 : vector<16x32xf32>
    %371 = vector.extract_strided_slice %313 {offsets = [0, 16], sizes = [16, 8], strides = [1, 1]} : vector<16x96xf32> to vector<16x8xf32>
    %372 = arith.truncf %371 : vector<16x8xf32> to vector<16x8xbf16>
    %373 = vector.extract_strided_slice %313 {offsets = [0, 48], sizes = [16, 8], strides = [1, 1]} : vector<16x96xf32> to vector<16x8xf32>
    %374 = arith.truncf %373 : vector<16x8xf32> to vector<16x8xbf16>
    %375 = vector.extract_strided_slice %313 {offsets = [0, 80], sizes = [16, 8], strides = [1, 1]} : vector<16x96xf32> to vector<16x8xf32>
    %376 = arith.truncf %375 : vector<16x8xf32> to vector<16x8xbf16>
    %cst_107 = arith.constant dense<0.000000e+00> : vector<16x16xf32>
    %377 = tpu.matmul %372, %374, %cst_107 {dimension_numbers = #tpu.dot_dimension_numbers<[1], [1], [0], [0], [0, 0, 1, 0], [], []>} : vector<16x8xbf16>, vector<16x8xbf16>, vector<16x16xf32> -> vector<16x16xf32>
    %cst_108 = arith.constant 0.353553385 : f32
    %378 = vector.broadcast %cst_108 : f32 to vector<16x16xf32>
    %379 = arith.mulf %377, %378 : vector<16x16xf32>
    %380 = vector.broadcast %101 : vector<1x16xf32> to vector<16x16xf32>
    %381 = arith.subf %379, %380 : vector<16x16xf32>
    %cst_109 = arith.constant dense<0xFF800000> : vector<16xf32>
    %382 = vector.multi_reduction <maximumf>, %381, %cst_109 [1] : vector<16x16xf32> to vector<16xf32>
    %383 = vector.shape_cast %382 : vector<16xf32> to vector<16x1xf32>
    %384 = vector.broadcast %383 : vector<16x1xf32> to vector<16x16xf32>
    %385 = arith.subf %381, %384 : vector<16x16xf32>
    %386 = math.exp %385 : vector<16x16xf32>
    %cst_110 = arith.constant dense<0.000000e+00> : vector<16xf32>
    %387 = vector.multi_reduction <add>, %386, %cst_110 [1] : vector<16x16xf32> to vector<16xf32>
    %388 = vector.shape_cast %387 : vector<16xf32> to vector<16x1xf32>
    %389 = tpu.reciprocal %388 {approx = true} : vector<16x1xf32> -> vector<16x1xf32>
    %390 = vector.broadcast %389 : vector<16x1xf32> to vector<16x16xf32>
    %391 = arith.mulf %386, %390 : vector<16x16xf32>
    %392 = arith.truncf %391 : vector<16x16xf32> to vector<16x16xbf16>
    %cst_111 = arith.constant dense<0.000000e+00> : vector<16x8xf32>
    %393 = tpu.matmul %392, %376, %cst_111 {dimension_numbers = #tpu.dot_dimension_numbers<[1], [0], [0], [1], [0, 0, 1, 1], [], []>} : vector<16x16xbf16>, vector<16x8xbf16>, vector<16x8xf32> -> vector<16x8xf32>
    %394 = arith.truncf %393 : vector<16x8xf32> to vector<16x8xbf16>
    %395 = vector.extract_strided_slice %315 {offsets = [16, 0], sizes = [8, 32], strides = [1, 1]} : vector<32x32xbf16> to vector<8x32xbf16>
    %cst_112 = arith.constant dense<0.000000e+00> : vector<16x32xf32>
    %396 = tpu.matmul %394, %395, %cst_112 {dimension_numbers = #tpu.dot_dimension_numbers<[1], [0], [0], [1], [0, 0, 1, 1], [], []>} : vector<16x8xbf16>, vector<8x32xbf16>, vector<16x32xf32> -> vector<16x32xf32>
    %397 = arith.addf %370, %396 : vector<16x32xf32>
    %398 = vector.extract_strided_slice %313 {offsets = [0, 24], sizes = [16, 8], strides = [1, 1]} : vector<16x96xf32> to vector<16x8xf32>
    %399 = arith.truncf %398 : vector<16x8xf32> to vector<16x8xbf16>
    %400 = vector.extract_strided_slice %313 {offsets = [0, 56], sizes = [16, 8], strides = [1, 1]} : vector<16x96xf32> to vector<16x8xf32>
    %401 = arith.truncf %400 : vector<16x8xf32> to vector<16x8xbf16>
    %402 = vector.extract_strided_slice %313 {offsets = [0, 88], sizes = [16, 8], strides = [1, 1]} : vector<16x96xf32> to vector<16x8xf32>
    %403 = arith.truncf %402 : vector<16x8xf32> to vector<16x8xbf16>
    %cst_113 = arith.constant dense<0.000000e+00> : vector<16x16xf32>
    %404 = tpu.matmul %399, %401, %cst_113 {dimension_numbers = #tpu.dot_dimension_numbers<[1], [1], [0], [0], [0, 0, 1, 0], [], []>} : vector<16x8xbf16>, vector<16x8xbf16>, vector<16x16xf32> -> vector<16x16xf32>
    %cst_114 = arith.constant 0.353553385 : f32
    %405 = vector.broadcast %cst_114 : f32 to vector<16x16xf32>
    %406 = arith.mulf %404, %405 : vector<16x16xf32>
    %407 = vector.broadcast %101 : vector<1x16xf32> to vector<16x16xf32>
    %408 = arith.subf %406, %407 : vector<16x16xf32>
    %cst_115 = arith.constant dense<0xFF800000> : vector<16xf32>
    %409 = vector.multi_reduction <maximumf>, %408, %cst_115 [1] : vector<16x16xf32> to vector<16xf32>
    %410 = vector.shape_cast %409 : vector<16xf32> to vector<16x1xf32>
    %411 = vector.broadcast %410 : vector<16x1xf32> to vector<16x16xf32>
    %412 = arith.subf %408, %411 : vector<16x16xf32>
    %413 = math.exp %412 : vector<16x16xf32>
    %cst_116 = arith.constant dense<0.000000e+00> : vector<16xf32>
    %414 = vector.multi_reduction <add>, %413, %cst_116 [1] : vector<16x16xf32> to vector<16xf32>
    %415 = vector.shape_cast %414 : vector<16xf32> to vector<16x1xf32>
    %416 = tpu.reciprocal %415 {approx = true} : vector<16x1xf32> -> vector<16x1xf32>
    %417 = vector.broadcast %416 : vector<16x1xf32> to vector<16x16xf32>
    %418 = arith.mulf %413, %417 : vector<16x16xf32>
    %419 = arith.truncf %418 : vector<16x16xf32> to vector<16x16xbf16>
    %cst_117 = arith.constant dense<0.000000e+00> : vector<16x8xf32>
    %420 = tpu.matmul %419, %403, %cst_117 {dimension_numbers = #tpu.dot_dimension_numbers<[1], [0], [0], [1], [0, 0, 1, 1], [], []>} : vector<16x16xbf16>, vector<16x8xbf16>, vector<16x8xf32> -> vector<16x8xf32>
    %421 = arith.truncf %420 : vector<16x8xf32> to vector<16x8xbf16>
    %422 = vector.extract_strided_slice %315 {offsets = [24, 0], sizes = [8, 32], strides = [1, 1]} : vector<32x32xbf16> to vector<8x32xbf16>
    %cst_118 = arith.constant dense<0.000000e+00> : vector<16x32xf32>
    %423 = tpu.matmul %421, %422, %cst_118 {dimension_numbers = #tpu.dot_dimension_numbers<[1], [0], [0], [1], [0, 0, 1, 1], [], []>} : vector<16x8xbf16>, vector<8x32xbf16>, vector<16x32xf32> -> vector<16x32xf32>
    %424 = arith.addf %397, %423 : vector<16x32xf32>
    %425 = vector.extract_strided_slice %109 {offsets = [21, 0], sizes = [1, 32], strides = [1, 1]} : vector<26x32xf32> to vector<1x32xf32>
    %426 = vector.broadcast %425 : vector<1x32xf32> to vector<16x32xf32>
    %427 = arith.addf %424, %426 : vector<16x32xf32>
    %428 = arith.addf %427, %281 : vector<16x32xf32>
    %429 = vector.extract_strided_slice %109 {offsets = [22, 0], sizes = [1, 32], strides = [1, 1]} : vector<26x32xf32> to vector<1x32xf32>
    %430 = vector.extract_strided_slice %109 {offsets = [23, 0], sizes = [1, 32], strides = [1, 1]} : vector<26x32xf32> to vector<1x32xf32>
    %cst_119 = arith.constant dense<0.000000e+00> : vector<16xf32>
    %431 = vector.multi_reduction <add>, %428, %cst_119 [1] : vector<16x32xf32> to vector<16xf32>
    %432 = vector.shape_cast %431 : vector<16xf32> to vector<16x1xf32>
    %cst_120 = arith.constant 3.200000e+01 : f32
    %433 = vector.broadcast %cst_120 : f32 to vector<16x1xf32>
    %434 = arith.divf %432, %433 : vector<16x1xf32>
    %435 = vector.broadcast %434 : vector<16x1xf32> to vector<16x32xf32>
    %436 = arith.subf %428, %435 : vector<16x32xf32>
    %437 = arith.mulf %436, %436 : vector<16x32xf32>
    %cst_121 = arith.constant dense<0.000000e+00> : vector<16xf32>
    %438 = vector.multi_reduction <add>, %437, %cst_121 [1] : vector<16x32xf32> to vector<16xf32>
    %439 = vector.shape_cast %438 : vector<16xf32> to vector<16x1xf32>
    %cst_122 = arith.constant 3.200000e+01 : f32
    %440 = vector.broadcast %cst_122 : f32 to vector<16x1xf32>
    %441 = arith.divf %439, %440 : vector<16x1xf32>
    %442 = vector.broadcast %434 : vector<16x1xf32> to vector<16x32xf32>
    %443 = arith.subf %428, %442 : vector<16x32xf32>
    %cst_123 = arith.constant 9.99999974E-6 : f32
    %444 = vector.broadcast %cst_123 : f32 to vector<16x1xf32>
    %445 = arith.addf %441, %444 : vector<16x1xf32>
    %446 = math.rsqrt %445 : vector<16x1xf32>
    %447 = vector.broadcast %446 : vector<16x1xf32> to vector<16x32xf32>
    %448 = arith.mulf %443, %447 : vector<16x32xf32>
    %449 = vector.broadcast %429 : vector<1x32xf32> to vector<16x32xf32>
    %450 = arith.mulf %448, %449 : vector<16x32xf32>
    %451 = vector.broadcast %430 : vector<1x32xf32> to vector<16x32xf32>
    %452 = arith.addf %450, %451 : vector<16x32xf32>
    %453 = arith.truncf %452 : vector<16x32xf32> to vector<16x32xbf16>
    %454 = vector.extract_strided_slice %107 {offsets = [3, 0, 0], sizes = [1, 32, 32], strides = [1, 1, 1]} : vector<5x32x32xbf16> to vector<1x32x32xbf16>
    %455 = vector.shape_cast %454 : vector<1x32x32xbf16> to vector<32x32xbf16>
    %cst_124 = arith.constant dense<0.000000e+00> : vector<16x32xf32>
    %456 = tpu.matmul %453, %455, %cst_124 {dimension_numbers = #tpu.dot_dimension_numbers<[1], [0], [0], [1], [0, 0, 1, 1], [], []>} : vector<16x32xbf16>, vector<32x32xbf16>, vector<16x32xf32> -> vector<16x32xf32>
    %457 = vector.extract_strided_slice %109 {offsets = [24, 0], sizes = [1, 32], strides = [1, 1]} : vector<26x32xf32> to vector<1x32xf32>
    %458 = vector.broadcast %457 : vector<1x32xf32> to vector<16x32xf32>
    %459 = arith.addf %456, %458 : vector<16x32xf32>
    %cst_125 = arith.constant 0.000000e+00 : f32
    %460 = vector.broadcast %cst_125 : f32 to vector<16x32xf32>
    %461 = arith.maximumf %459, %460 : vector<16x32xf32>
    %462 = arith.truncf %461 : vector<16x32xf32> to vector<16x32xbf16>
    %463 = vector.extract_strided_slice %107 {offsets = [4, 0, 0], sizes = [1, 32, 32], strides = [1, 1, 1]} : vector<5x32x32xbf16> to vector<1x32x32xbf16>
    %464 = vector.shape_cast %463 : vector<1x32x32xbf16> to vector<32x32xbf16>
    %cst_126 = arith.constant dense<0.000000e+00> : vector<16x32xf32>
    %465 = tpu.matmul %462, %464, %cst_126 {dimension_numbers = #tpu.dot_dimension_numbers<[1], [0], [0], [1], [0, 0, 1, 1], [], []>} : vector<16x32xbf16>, vector<32x32xbf16>, vector<16x32xf32> -> vector<16x32xf32>
    %466 = vector.extract_strided_slice %109 {offsets = [25, 0], sizes = [1, 32], strides = [1, 1]} : vector<26x32xf32> to vector<1x32xf32>
    %467 = vector.broadcast %466 : vector<1x32xf32> to vector<16x32xf32>
    %468 = arith.addf %465, %467 : vector<16x32xf32>
    %469 = arith.addf %468, %428 : vector<16x32xf32>
    %c0_127 = arith.constant 0 : index
    %c0_128 = arith.constant 0 : index
    %c0_129 = arith.constant 0 : index
    %470 = vector.load %arg13[%c0_127, %c0_128, %c0_129] : memref<1x16x32xf32, #tpu.memory_space<vmem>>, vector<1x16x32xf32>
    %471 = vector.shape_cast %470 : vector<1x16x32xf32> to vector<16x32xf32>
    %472 = vector.shape_cast %469 : vector<16x32xf32> to vector<1x16x32xf32>
    tpu.vector_store %arg13[%c0_127, %c0_128, %c0_129], %472 {strides = array<i32>} : memref<1x16x32xf32, #tpu.memory_space<vmem>>, vector<1x16x32xf32>,
    return
  }
  func.func @transform_0(%arg0: i32) -> (i32, i32, i32) {
    %c0_i32 = arith.constant 0 : i32
    %c0_i32_0 = arith.constant 0 : i32
    %c0_i32_1 = arith.constant 0 : i32
    return %arg0, %c0_i32, %c0_i32_0 : i32, i32, i32
  }
  func.func @transform_1(%arg0: i32) -> (i32, i32, i32) {
    %c0_i32 = arith.constant 0 : i32
    %c0_i32_0 = arith.constant 0 : i32
    %c0_i32_1 = arith.constant 0 : i32
    return %arg0, %c0_i32, %c0_i32_0 : i32, i32, i32
  }
  func.func @transform_2(%arg0: i32) -> (i32, i32, i32) {
    %c0_i32 = arith.constant 0 : i32
    %c0_i32_0 = arith.constant 0 : i32
    %c0_i32_1 = arith.constant 0 : i32
    return %arg0, %c0_i32, %c0_i32_0 : i32, i32, i32
  }
  func.func @transform_3(%arg0: i32) -> (i32, i32, i32) {
    %c0_i32 = arith.constant 0 : i32
    %c0_i32_0 = arith.constant 0 : i32
    %c0_i32_1 = arith.constant 0 : i32
    return %arg0, %c0_i32, %c0_i32_0 : i32, i32, i32
  }
  func.func @transform_4(%arg0: i32) -> (i32, i32) {
    %c0_i32 = arith.constant 0 : i32
    %c0_i32_0 = arith.constant 0 : i32
    %c0_i32_1 = arith.constant 0 : i32
    return %c0_i32, %c0_i32_0 : i32, i32
  }
  func.func @transform_5(%arg0: i32) -> (i32, i32) {
    %c0_i32 = arith.constant 0 : i32
    %c0_i32_0 = arith.constant 0 : i32
    %c0_i32_1 = arith.constant 0 : i32
    return %c0_i32, %c0_i32_0 : i32, i32
  }
  func.func @transform_6(%arg0: i32) -> (i32, i32) {
    %c0_i32 = arith.constant 0 : i32
    %c0_i32_0 = arith.constant 0 : i32
    %c0_i32_1 = arith.constant 0 : i32
    return %c0_i32, %c0_i32_0 : i32, i32
  }
  func.func @transform_7(%arg0: i32) -> (i32, i32) {
    %c0_i32 = arith.constant 0 : i32
    %c0_i32_0 = arith.constant 0 : i32
    %c0_i32_1 = arith.constant 0 : i32
    return %c0_i32, %c0_i32_0 : i32, i32
  }
  func.func @transform_8(%arg0: i32) -> (i32, i32, i32) {
    %c0_i32 = arith.constant 0 : i32
    %c0_i32_0 = arith.constant 0 : i32
    %c0_i32_1 = arith.constant 0 : i32
    %c0_i32_2 = arith.constant 0 : i32
    return %c0_i32, %c0_i32_0, %c0_i32_1 : i32, i32, i32
  }
  func.func @transform_9(%arg0: i32) -> (i32, i32, i32) {
    %c0_i32 = arith.constant 0 : i32
    %c0_i32_0 = arith.constant 0 : i32
    %c0_i32_1 = arith.constant 0 : i32
    %c0_i32_2 = arith.constant 0 : i32
    return %c0_i32, %c0_i32_0, %c0_i32_1 : i32, i32, i32
  }
  func.func @transform_10(%arg0: i32) -> (i32, i32, i32) {
    %c0_i32 = arith.constant 0 : i32
    %c0_i32_0 = arith.constant 0 : i32
    %c0_i32_1 = arith.constant 0 : i32
    %c0_i32_2 = arith.constant 0 : i32
    return %c0_i32, %c0_i32_0, %c0_i32_1 : i32, i32, i32
  }
  func.func @transform_11(%arg0: i32) -> (i32, i32, i32) {
    %c0_i32 = arith.constant 0 : i32
    %c0_i32_0 = arith.constant 0 : i32
    %c0_i32_1 = arith.constant 0 : i32
    %c0_i32_2 = arith.constant 0 : i32
    return %c0_i32, %c0_i32_0, %c0_i32_1 : i32, i32, i32
  }
  func.func @transform_12(%arg0: i32) -> (i32, i32, i32) {
    %c0_i32 = arith.constant 0 : i32
    %c0_i32_0 = arith.constant 0 : i32
    %c0_i32_1 = arith.constant 0 : i32
    return %arg0, %c0_i32, %c0_i32_0 : i32, i32, i32
  }
}

module attributes {stable_mosaic.version = 11 : i64} {
  func.func @_cq_kernel(%arg0: i32, %arg1: memref<1x16x32xf32, #tpu.memory_space<vmem>>, %arg2: memref<1x8x32xf32, #tpu.memory_space<vmem>>, %arg3: memref<1x16x1xf32, #tpu.memory_space<vmem>>, %arg4: memref<1x1x8xf32, #tpu.memory_space<vmem>>, %arg5: memref<5x32xf32, #tpu.memory_space<vmem>>, %arg6: memref<128x32xbf16, #tpu.memory_space<vmem>>, %arg7: memref<1x16x32xf32, #tpu.memory_space<vmem>>) attributes {dimension_semantics = [#tpu.dimension_semantics<parallel>], iteration_bounds = array<i64: 2>, scalar_prefetch = 0 : i64, scratch_operands = 0 : i64, tpu.core_type = #tpu.core_type<tc>, window_params = [{transform_indices = @transform_0, window_bounds = array<i64: 1, 16, 32>}, {transform_indices = @transform_1, window_bounds = array<i64: 1, 8, 32>}, {transform_indices = @transform_2, window_bounds = array<i64: 1, 16, 1>}, {transform_indices = @transform_3, window_bounds = array<i64: 1, 1, 8>}, {pipeline_mode = #tpu.pipeline_mode<synchronous>, transform_indices = @transform_4, window_bounds = array<i64: 5, 32>}, {pipeline_mode = #tpu.pipeline_mode<synchronous>, transform_indices = @transform_5, window_bounds = array<i64: 128, 32>}, {transform_indices = @transform_6, window_bounds = array<i64: 1, 16, 32>}]} {
    %c0 = arith.constant 0 : index
    %c0_0 = arith.constant 0 : index
    %c0_1 = arith.constant 0 : index
    %0 = vector.load %arg1[%c0, %c0_0, %c0_1] : memref<1x16x32xf32, #tpu.memory_space<vmem>>, vector<1x16x32xf32>
    %1 = vector.shape_cast %0 : vector<1x16x32xf32> to vector<16x32xf32>
    %c0_2 = arith.constant 0 : index
    %c0_3 = arith.constant 0 : index
    %c0_4 = arith.constant 0 : index
    %2 = vector.load %arg2[%c0_2, %c0_3, %c0_4] : memref<1x8x32xf32, #tpu.memory_space<vmem>>, vector<1x8x32xf32>
    %3 = vector.shape_cast %2 : vector<1x8x32xf32> to vector<8x32xf32>
    %c0_5 = arith.constant 0 : index
    %c0_6 = arith.constant 0 : index
    %4 = vector.load %arg5[%c0_5, %c0_6] : memref<5x32xf32, #tpu.memory_space<vmem>>, vector<5x32xf32>
    %5 = vector.extract_strided_slice %4 {offsets = [0, 0], sizes = [1, 32], strides = [1, 1]} : vector<5x32xf32> to vector<1x32xf32>
    %6 = vector.broadcast %5 : vector<1x32xf32> to vector<16x32xf32>
    %7 = arith.mulf %1, %6 : vector<16x32xf32>
    %cst = arith.constant dense<0.000000e+00> : vector<16xf32>
    %8 = vector.multi_reduction <add>, %7, %cst [1] : vector<16x32xf32> to vector<16xf32>
    %9 = vector.shape_cast %8 : vector<16xf32> to vector<16x1xf32>
    %10 = vector.extract_strided_slice %4 {offsets = [1, 0], sizes = [1, 32], strides = [1, 1]} : vector<5x32xf32> to vector<1x32xf32>
    %11 = vector.broadcast %10 : vector<1x32xf32> to vector<8x32xf32>
    %12 = arith.mulf %3, %11 : vector<8x32xf32>
    %cst_7 = arith.constant dense<0.000000e+00> : vector<8xf32>
    %13 = vector.multi_reduction <add>, %12, %cst_7 [1] : vector<8x32xf32> to vector<8xf32>
    %14 = vector.shape_cast %13 : vector<8xf32> to vector<8x1xf32>
    %15 = vector.extract_strided_slice %4 {offsets = [3, 0], sizes = [1, 1], strides = [1, 1]} : vector<5x32xf32> to vector<1x1xf32>
    %16 = vector.extract_strided_slice %4 {offsets = [2, 0], sizes = [1, 32], strides = [1, 1]} : vector<5x32xf32> to vector<1x32xf32>
    %17 = vector.broadcast %16 : vector<1x32xf32> to vector<16x32xf32>
    %18 = arith.mulf %1, %17 : vector<16x32xf32>
    %19 = vector.broadcast %15 : vector<1x1xf32> to vector<16x1xf32>
    %20 = arith.addf %9, %19 : vector<16x1xf32>
    %cst_8 = arith.constant 1.000000e+00 : f32
    %21 = vector.broadcast %cst_8 : f32 to vector<16x1xf32>
    %22 = tpu.concatenate %18, %20, %21 in 1 : vector<16x32xf32>, vector<16x1xf32>, vector<16x1xf32> -> vector<16x34xf32>
    %cst_9 = arith.constant 1.000000e+00 : f32
    %23 = vector.broadcast %cst_9 : f32 to vector<8x1xf32>
    %24 = tpu.concatenate %3, %23, %14 in 1 : vector<8x32xf32>, vector<8x1xf32>, vector<8x1xf32> -> vector<8x34xf32>
    %25 = arith.truncf %22 : vector<16x34xf32> to vector<16x34xbf16>
    %26 = arith.truncf %24 : vector<8x34xf32> to vector<8x34xbf16>
    %cst_10 = arith.constant dense<0.000000e+00> : vector<16x8xf32>
    %27 = tpu.matmul %25, %26, %cst_10 {dimension_numbers = #tpu.dot_dimension_numbers<[1], [1], [0], [0], [0, 0, 1, 0], [], []>} : vector<16x34xbf16>, vector<8x34xbf16>, vector<16x8xf32> -> vector<16x8xf32>
    %c0_11 = arith.constant 0 : index
    %c0_12 = arith.constant 0 : index
    %c0_13 = arith.constant 0 : index
    %28 = vector.load %arg4[%c0_11, %c0_12, %c0_13] : memref<1x1x8xf32, #tpu.memory_space<vmem>>, vector<1x1x8xf32>
    %29 = vector.shape_cast %28 : vector<1x1x8xf32> to vector<1x8xf32>
    %c0_14 = arith.constant 0 : index
    %c0_15 = arith.constant 0 : index
    %c0_16 = arith.constant 0 : index
    %30 = vector.load %arg3[%c0_14, %c0_15, %c0_16] : memref<1x16x1xf32, #tpu.memory_space<vmem>>, vector<1x16x1xf32>
    %31 = vector.shape_cast %30 : vector<1x16x1xf32> to vector<16x1xf32>
    %cst_17 = arith.constant 1.000000e+30 : f32
    %32 = vector.broadcast %cst_17 : f32 to vector<1x8xf32>
    %33 = arith.mulf %29, %32 : vector<1x8xf32>
    %34 = vector.broadcast %33 : vector<1x8xf32> to vector<16x8xf32>
    %35 = arith.subf %27, %34 : vector<16x8xf32>
    %cst_18 = arith.constant dense<0xFF800000> : vector<16xf32>
    %36 = vector.multi_reduction <maximumf>, %35, %cst_18 [1] : vector<16x8xf32> to vector<16xf32>
    %37 = vector.shape_cast %36 : vector<16xf32> to vector<16x1xf32>
    %38 = vector.broadcast %37 : vector<16x1xf32> to vector<16x8xf32>
    %39 = arith.subf %35, %38 : vector<16x8xf32>
    %40 = math.exp %39 : vector<16x8xf32>
    %cst_19 = arith.constant dense<0.000000e+00> : vector<16xf32>
    %41 = vector.multi_reduction <add>, %40, %cst_19 [1] : vector<16x8xf32> to vector<16xf32>
    %42 = vector.shape_cast %41 : vector<16xf32> to vector<16x1xf32>
    %43 = tpu.reciprocal %42 {approx = true} : vector<16x1xf32> -> vector<16x1xf32>
    %44 = vector.broadcast %43 : vector<16x1xf32> to vector<16x8xf32>
    %45 = arith.mulf %40, %44 : vector<16x8xf32>
    %cst_20 = arith.constant 1.000000e+30 : f32
    %46 = vector.broadcast %cst_20 : f32 to vector<16x1xf32>
    %47 = arith.mulf %31, %46 : vector<16x1xf32>
    %48 = vector.broadcast %47 : vector<16x1xf32> to vector<16x8xf32>
    %49 = arith.subf %27, %48 : vector<16x8xf32>
    %cst_21 = arith.constant dense<0xFF800000> : vector<8xf32>
    %50 = vector.multi_reduction <maximumf>, %49, %cst_21 [0] : vector<16x8xf32> to vector<8xf32>
    %51 = vector.shape_cast %50 : vector<8xf32> to vector<1x8xf32>
    %52 = vector.broadcast %51 : vector<1x8xf32> to vector<16x8xf32>
    %53 = arith.subf %49, %52 : vector<16x8xf32>
    %54 = math.exp %53 : vector<16x8xf32>
    %cst_22 = arith.constant dense<0.000000e+00> : vector<8xf32>
    %55 = vector.multi_reduction <add>, %54, %cst_22 [0] : vector<16x8xf32> to vector<8xf32>
    %56 = vector.shape_cast %55 : vector<8xf32> to vector<1x8xf32>
    %57 = tpu.reciprocal %56 {approx = true} : vector<1x8xf32> -> vector<1x8xf32>
    %58 = vector.broadcast %57 : vector<1x8xf32> to vector<16x8xf32>
    %59 = arith.mulf %54, %58 : vector<16x8xf32>
    %60 = arith.truncf %45 : vector<16x8xf32> to vector<16x8xbf16>
    %61 = arith.truncf %3 : vector<8x32xf32> to vector<8x32xbf16>
    %cst_23 = arith.constant dense<0.000000e+00> : vector<16x32xf32>
    %62 = tpu.matmul %60, %61, %cst_23 {dimension_numbers = #tpu.dot_dimension_numbers<[1], [0], [0], [1], [0, 0, 1, 1], [], []>} : vector<16x8xbf16>, vector<8x32xbf16>, vector<16x32xf32> -> vector<16x32xf32>
    %63 = arith.truncf %45 : vector<16x8xf32> to vector<16x8xbf16>
    %64 = arith.truncf %59 : vector<16x8xf32> to vector<16x8xbf16>
    %cst_24 = arith.constant dense<0.000000e+00> : vector<16x16xf32>
    %65 = tpu.matmul %63, %64, %cst_24 {dimension_numbers = #tpu.dot_dimension_numbers<[1], [1], [0], [0], [0, 0, 1, 0], [], []>} : vector<16x8xbf16>, vector<16x8xbf16>, vector<16x16xf32> -> vector<16x16xf32>
    %66 = arith.truncf %65 : vector<16x16xf32> to vector<16x16xbf16>
    %67 = arith.truncf %1 : vector<16x32xf32> to vector<16x32xbf16>
    %cst_25 = arith.constant dense<0.000000e+00> : vector<16x32xf32>
    %68 = tpu.matmul %66, %67, %cst_25 {dimension_numbers = #tpu.dot_dimension_numbers<[1], [0], [0], [1], [0, 0, 1, 1], [], []>} : vector<16x16xbf16>, vector<16x32xbf16>, vector<16x32xf32> -> vector<16x32xf32>
    %69 = arith.mulf %1, %62 : vector<16x32xf32>
    %70 = arith.mulf %1, %68 : vector<16x32xf32>
    %71 = tpu.concatenate %1, %62, %69, %70 in 1 : vector<16x32xf32>, vector<16x32xf32>, vector<16x32xf32>, vector<16x32xf32> -> vector<16x128xf32>
    %72 = arith.truncf %71 : vector<16x128xf32> to vector<16x128xbf16>
    %c0_26 = arith.constant 0 : index
    %c0_27 = arith.constant 0 : index
    %73 = vector.load %arg6[%c0_26, %c0_27] : memref<128x32xbf16, #tpu.memory_space<vmem>>, vector<128x32xbf16>
    %cst_28 = arith.constant dense<0.000000e+00> : vector<16x32xf32>
    %74 = tpu.matmul %72, %73, %cst_28 {dimension_numbers = #tpu.dot_dimension_numbers<[1], [0], [0], [1], [0, 0, 1, 1], [], []>} : vector<16x128xbf16>, vector<128x32xbf16>, vector<16x32xf32> -> vector<16x32xf32>
    %75 = vector.extract_strided_slice %4 {offsets = [4, 0], sizes = [1, 32], strides = [1, 1]} : vector<5x32xf32> to vector<1x32xf32>
    %76 = vector.broadcast %75 : vector<1x32xf32> to vector<16x32xf32>
    %77 = arith.addf %74, %76 : vector<16x32xf32>
    %c0_29 = arith.constant 0 : index
    %c0_30 = arith.constant 0 : index
    %c0_31 = arith.constant 0 : index
    %78 = vector.load %arg7[%c0_29, %c0_30, %c0_31] : memref<1x16x32xf32, #tpu.memory_space<vmem>>, vector<1x16x32xf32>
    %79 = vector.shape_cast %78 : vector<1x16x32xf32> to vector<16x32xf32>
    %80 = vector.shape_cast %77 : vector<16x32xf32> to vector<1x16x32xf32>
    tpu.vector_store %arg7[%c0_29, %c0_30, %c0_31], %80 {strides = array<i32>} : memref<1x16x32xf32, #tpu.memory_space<vmem>>, vector<1x16x32xf32>,
    return
  }
  func.func @transform_0(%arg0: i32) -> (i32, i32, i32) {
    %c0_i32 = arith.constant 0 : i32
    %c0_i32_0 = arith.constant 0 : i32
    %c0_i32_1 = arith.constant 0 : i32
    return %arg0, %c0_i32, %c0_i32_0 : i32, i32, i32
  }
  func.func @transform_1(%arg0: i32) -> (i32, i32, i32) {
    %c0_i32 = arith.constant 0 : i32
    %c0_i32_0 = arith.constant 0 : i32
    %c0_i32_1 = arith.constant 0 : i32
    return %arg0, %c0_i32, %c0_i32_0 : i32, i32, i32
  }
  func.func @transform_2(%arg0: i32) -> (i32, i32, i32) {
    %c0_i32 = arith.constant 0 : i32
    %c0_i32_0 = arith.constant 0 : i32
    %c0_i32_1 = arith.constant 0 : i32
    return %arg0, %c0_i32, %c0_i32_0 : i32, i32, i32
  }
  func.func @transform_3(%arg0: i32) -> (i32, i32, i32) {
    %c0_i32 = arith.constant 0 : i32
    %c0_i32_0 = arith.constant 0 : i32
    %c0_i32_1 = arith.constant 0 : i32
    return %arg0, %c0_i32, %c0_i32_0 : i32, i32, i32
  }
  func.func @transform_4(%arg0: i32) -> (i32, i32) {
    %c0_i32 = arith.constant 0 : i32
    %c0_i32_0 = arith.constant 0 : i32
    %c0_i32_1 = arith.constant 0 : i32
    return %c0_i32, %c0_i32_0 : i32, i32
  }
  func.func @transform_5(%arg0: i32) -> (i32, i32) {
    %c0_i32 = arith.constant 0 : i32
    %c0_i32_0 = arith.constant 0 : i32
    %c0_i32_1 = arith.constant 0 : i32
    return %c0_i32, %c0_i32_0 : i32, i32
  }
  func.func @transform_6(%arg0: i32) -> (i32, i32, i32) {
    %c0_i32 = arith.constant 0 : i32
    %c0_i32_0 = arith.constant 0 : i32
    %c0_i32_1 = arith.constant 0 : i32
    return %arg0, %c0_i32, %c0_i32_0 : i32, i32, i32
  }
}

module attributes {stable_mosaic.version = 11 : i64} {
  func.func @_model_output_kernel(%arg0: i32, %arg1: memref<1x16x32xf32, #tpu.memory_space<vmem>>, %arg2: memref<1x1x16xf32, #tpu.memory_space<vmem>>, %arg3: memref<1x16x1xf32, #tpu.memory_space<vmem>>, %arg4: memref<16x32xf32, #tpu.memory_space<vmem>>, %arg5: memref<1x26x32xf32, #tpu.memory_space<vmem>>, %arg6: memref<1x32x96xbf16, #tpu.memory_space<vmem>>, %arg7: memref<5x32x32xbf16, #tpu.memory_space<vmem>>, %arg8: memref<5x32xf32, #tpu.memory_space<vmem>>, %arg9: memref<1x16x2xf32, #tpu.memory_space<vmem>>) attributes {dimension_semantics = [#tpu.dimension_semantics<parallel>], iteration_bounds = array<i64: 2>, scalar_prefetch = 0 : i64, scratch_operands = 0 : i64, tpu.core_type = #tpu.core_type<tc>, window_params = [{transform_indices = @transform_0, window_bounds = array<i64: 1, 16, 32>}, {transform_indices = @transform_1, window_bounds = array<i64: 1, 1, 16>}, {transform_indices = @transform_2, window_bounds = array<i64: 1, 16, 1>}, {pipeline_mode = #tpu.pipeline_mode<synchronous>, transform_indices = @transform_3, window_bounds = array<i64: 16, 32>}, {pipeline_mode = #tpu.pipeline_mode<synchronous>, transform_indices = @transform_4, window_bounds = array<i64: 1, 26, 32>}, {pipeline_mode = #tpu.pipeline_mode<synchronous>, transform_indices = @transform_5, window_bounds = array<i64: 1, 32, 96>}, {pipeline_mode = #tpu.pipeline_mode<synchronous>, transform_indices = @transform_6, window_bounds = array<i64: 5, 32, 32>}, {pipeline_mode = #tpu.pipeline_mode<synchronous>, transform_indices = @transform_7, window_bounds = array<i64: 5, 32>}, {transform_indices = @transform_8, window_bounds = array<i64: 1, 16, 2>}]} {
    %c0 = arith.constant 0 : index
    %c0_0 = arith.constant 0 : index
    %c0_1 = arith.constant 0 : index
    %0 = vector.load %arg5[%c0, %c0_0, %c0_1] : memref<1x26x32xf32, #tpu.memory_space<vmem>>, vector<1x26x32xf32>
    %c0_2 = arith.constant 0 : index
    %c0_3 = arith.constant 0 : index
    %c0_4 = arith.constant 0 : index
    %1 = vector.load %arg6[%c0_2, %c0_3, %c0_4] : memref<1x32x96xbf16, #tpu.memory_space<vmem>>, vector<1x32x96xbf16>
    %c0_5 = arith.constant 0 : index
    %c0_6 = arith.constant 0 : index
    %c0_7 = arith.constant 0 : index
    %2 = vector.load %arg7[%c0_5, %c0_6, %c0_7] : memref<5x32x32xbf16, #tpu.memory_space<vmem>>, vector<5x32x32xbf16>
    %c0_8 = arith.constant 0 : index
    %c0_9 = arith.constant 0 : index
    %3 = vector.load %arg4[%c0_8, %c0_9] : memref<16x32xf32, #tpu.memory_space<vmem>>, vector<16x32xf32>
    %c0_10 = arith.constant 0 : index
    %c0_11 = arith.constant 0 : index
    %c0_12 = arith.constant 0 : index
    %4 = vector.load %arg2[%c0_10, %c0_11, %c0_12] : memref<1x1x16xf32, #tpu.memory_space<vmem>>, vector<1x1x16xf32>
    %5 = vector.shape_cast %4 : vector<1x1x16xf32> to vector<1x16xf32>
    %cst = arith.constant 1.000000e+30 : f32
    %6 = vector.broadcast %cst : f32 to vector<1x16xf32>
    %7 = arith.mulf %5, %6 : vector<1x16xf32>
    %c0_13 = arith.constant 0 : index
    %c0_14 = arith.constant 0 : index
    %c0_15 = arith.constant 0 : index
    %8 = vector.load %arg1[%c0_13, %c0_14, %c0_15] : memref<1x16x32xf32, #tpu.memory_space<vmem>>, vector<1x16x32xf32>
    %9 = vector.shape_cast %8 : vector<1x16x32xf32> to vector<16x32xf32>
    %10 = tpu.iota {dimensions = array<i32: 0>} : vector<16x1xi32>
    %11 = vector.shape_cast %0 : vector<1x26x32xf32> to vector<26x32xf32>
    %12 = vector.shape_cast %1 : vector<1x32x96xbf16> to vector<32x96xbf16>
    %13 = arith.addf %9, %3 : vector<16x32xf32>
    %14 = vector.extract_strided_slice %11 {offsets = [0, 0], sizes = [1, 32], strides = [1, 1]} : vector<26x32xf32> to vector<1x32xf32>
    %15 = vector.extract_strided_slice %11 {offsets = [2, 0], sizes = [1, 32], strides = [1, 1]} : vector<26x32xf32> to vector<1x32xf32>
    %cst_16 = arith.constant dense<0.000000e+00> : vector<16xf32>
    %16 = vector.multi_reduction <add>, %13, %cst_16 [1] : vector<16x32xf32> to vector<16xf32>
    %17 = vector.shape_cast %16 : vector<16xf32> to vector<16x1xf32>
    %cst_17 = arith.constant 3.200000e+01 : f32
    %18 = vector.broadcast %cst_17 : f32 to vector<16x1xf32>
    %19 = arith.divf %17, %18 : vector<16x1xf32>
    %20 = vector.broadcast %19 : vector<16x1xf32> to vector<16x32xf32>
    %21 = arith.subf %13, %20 : vector<16x32xf32>
    %22 = arith.mulf %21, %21 : vector<16x32xf32>
    %cst_18 = arith.constant dense<0.000000e+00> : vector<16xf32>
    %23 = vector.multi_reduction <add>, %22, %cst_18 [1] : vector<16x32xf32> to vector<16xf32>
    %24 = vector.shape_cast %23 : vector<16xf32> to vector<16x1xf32>
    %cst_19 = arith.constant 3.200000e+01 : f32
    %25 = vector.broadcast %cst_19 : f32 to vector<16x1xf32>
    %26 = arith.divf %24, %25 : vector<16x1xf32>
    %27 = vector.broadcast %19 : vector<16x1xf32> to vector<16x32xf32>
    %28 = arith.subf %13, %27 : vector<16x32xf32>
    %cst_20 = arith.constant 9.99999974E-6 : f32
    %29 = vector.broadcast %cst_20 : f32 to vector<16x1xf32>
    %30 = arith.addf %26, %29 : vector<16x1xf32>
    %31 = math.rsqrt %30 : vector<16x1xf32>
    %32 = vector.broadcast %31 : vector<16x1xf32> to vector<16x32xf32>
    %33 = arith.mulf %28, %32 : vector<16x32xf32>
    %34 = vector.broadcast %14 : vector<1x32xf32> to vector<16x32xf32>
    %35 = arith.mulf %33, %34 : vector<16x32xf32>
    %36 = vector.broadcast %15 : vector<1x32xf32> to vector<16x32xf32>
    %37 = arith.addf %35, %36 : vector<16x32xf32>
    %cst_21 = arith.constant 0.000000e+00 : f32
    %38 = vector.broadcast %cst_21 : f32 to vector<16x32xf32>
    %39 = vector.extract_strided_slice %11 {offsets = [4, 0], sizes = [1, 32], strides = [1, 1]} : vector<26x32xf32> to vector<1x32xf32>
    %c2_i32 = arith.constant 2 : i32
    %40 = tpu.dynamic_rotate %37 by %c2_i32 dim 0 : vector<16x32xf32>, i32 -> vector<16x32xf32>
    %c2_i32_22 = arith.constant 2 : i32
    %41 = vector.broadcast %c2_i32_22 : i32 to vector<16x1xi32>
    %42 = arith.cmpi sge, %10, %41 : vector<16x1xi32>
    %cst_23 = arith.constant 0.000000e+00 : f32
    %43 = vector.shape_cast %42 : vector<16x1xi1> to vector<16x1xi1>
    %44 = vector.broadcast %43 : vector<16x1xi1> to vector<16x32xi1>
    %45 = vector.broadcast %cst_23 : f32 to vector<16x32xf32>
    %46 = arith.select %44, %40, %45 : vector<16x32xi1>, vector<16x32xf32>
    %47 = vector.broadcast %39 : vector<1x32xf32> to vector<16x32xf32>
    %48 = arith.mulf %46, %47 : vector<16x32xf32>
    %49 = arith.addf %38, %48 : vector<16x32xf32>
    %50 = vector.extract_strided_slice %11 {offsets = [5, 0], sizes = [1, 32], strides = [1, 1]} : vector<26x32xf32> to vector<1x32xf32>
    %c1_i32 = arith.constant 1 : i32
    %51 = tpu.dynamic_rotate %37 by %c1_i32 dim 0 : vector<16x32xf32>, i32 -> vector<16x32xf32>
    %c1_i32_24 = arith.constant 1 : i32
    %52 = vector.broadcast %c1_i32_24 : i32 to vector<16x1xi32>
    %53 = arith.cmpi sge, %10, %52 : vector<16x1xi32>
    %cst_25 = arith.constant 0.000000e+00 : f32
    %54 = vector.shape_cast %53 : vector<16x1xi1> to vector<16x1xi1>
    %55 = vector.broadcast %54 : vector<16x1xi1> to vector<16x32xi1>
    %56 = vector.broadcast %cst_25 : f32 to vector<16x32xf32>
    %57 = arith.select %55, %51, %56 : vector<16x32xi1>, vector<16x32xf32>
    %58 = vector.broadcast %50 : vector<1x32xf32> to vector<16x32xf32>
    %59 = arith.mulf %57, %58 : vector<16x32xf32>
    %60 = arith.addf %49, %59 : vector<16x32xf32>
    %61 = vector.extract_strided_slice %11 {offsets = [6, 0], sizes = [1, 32], strides = [1, 1]} : vector<26x32xf32> to vector<1x32xf32>
    %62 = vector.broadcast %61 : vector<1x32xf32> to vector<16x32xf32>
    %63 = arith.mulf %37, %62 : vector<16x32xf32>
    %64 = arith.addf %60, %63 : vector<16x32xf32>
    %65 = vector.extract_strided_slice %11 {offsets = [7, 0], sizes = [1, 32], strides = [1, 1]} : vector<26x32xf32> to vector<1x32xf32>
    %c15_i32 = arith.constant 15 : i32
    %66 = tpu.dynamic_rotate %37 by %c15_i32 dim 0 : vector<16x32xf32>, i32 -> vector<16x32xf32>
    %c15_i32_26 = arith.constant 15 : i32
    %67 = vector.broadcast %c15_i32_26 : i32 to vector<16x1xi32>
    %68 = arith.cmpi slt, %10, %67 : vector<16x1xi32>
    %cst_27 = arith.constant 0.000000e+00 : f32
    %69 = vector.shape_cast %68 : vector<16x1xi1> to vector<16x1xi1>
    %70 = vector.broadcast %69 : vector<16x1xi1> to vector<16x32xi1>
    %71 = vector.broadcast %cst_27 : f32 to vector<16x32xf32>
    %72 = arith.select %70, %66, %71 : vector<16x32xi1>, vector<16x32xf32>
    %73 = vector.broadcast %65 : vector<1x32xf32> to vector<16x32xf32>
    %74 = arith.mulf %72, %73 : vector<16x32xf32>
    %75 = arith.addf %64, %74 : vector<16x32xf32>
    %76 = vector.extract_strided_slice %11 {offsets = [8, 0], sizes = [1, 32], strides = [1, 1]} : vector<26x32xf32> to vector<1x32xf32>
    %c14_i32 = arith.constant 14 : i32
    %77 = tpu.dynamic_rotate %37 by %c14_i32 dim 0 : vector<16x32xf32>, i32 -> vector<16x32xf32>
    %c14_i32_28 = arith.constant 14 : i32
    %78 = vector.broadcast %c14_i32_28 : i32 to vector<16x1xi32>
    %79 = arith.cmpi slt, %10, %78 : vector<16x1xi32>
    %cst_29 = arith.constant 0.000000e+00 : f32
    %80 = vector.shape_cast %79 : vector<16x1xi1> to vector<16x1xi1>
    %81 = vector.broadcast %80 : vector<16x1xi1> to vector<16x32xi1>
    %82 = vector.broadcast %cst_29 : f32 to vector<16x32xf32>
    %83 = arith.select %81, %77, %82 : vector<16x32xi1>, vector<16x32xf32>
    %84 = vector.broadcast %76 : vector<1x32xf32> to vector<16x32xf32>
    %85 = arith.mulf %83, %84 : vector<16x32xf32>
    %86 = arith.addf %75, %85 : vector<16x32xf32>
    %87 = arith.truncf %86 : vector<16x32xf32> to vector<16x32xbf16>
    %88 = vector.extract_strided_slice %2 {offsets = [0, 0, 0], sizes = [1, 32, 32], strides = [1, 1, 1]} : vector<5x32x32xbf16> to vector<1x32x32xbf16>
    %89 = vector.shape_cast %88 : vector<1x32x32xbf16> to vector<32x32xbf16>
    %cst_30 = arith.constant dense<0.000000e+00> : vector<16x32xf32>
    %90 = tpu.matmul %87, %89, %cst_30 {dimension_numbers = #tpu.dot_dimension_numbers<[1], [0], [0], [1], [0, 0, 1, 1], [], []>} : vector<16x32xbf16>, vector<32x32xbf16>, vector<16x32xf32> -> vector<16x32xf32>
    %91 = vector.extract_strided_slice %11 {offsets = [14, 0], sizes = [1, 32], strides = [1, 1]} : vector<26x32xf32> to vector<1x32xf32>
    %92 = vector.broadcast %91 : vector<1x32xf32> to vector<16x32xf32>
    %93 = arith.addf %90, %92 : vector<16x32xf32>
    %cst_31 = arith.constant 0.000000e+00 : f32
    %94 = vector.broadcast %cst_31 : f32 to vector<16x32xf32>
    %95 = arith.maximumf %93, %94 : vector<16x32xf32>
    %96 = arith.addf %95, %13 : vector<16x32xf32>
    %97 = vector.extract_strided_slice %11 {offsets = [1, 0], sizes = [1, 32], strides = [1, 1]} : vector<26x32xf32> to vector<1x32xf32>
    %98 = vector.extract_strided_slice %11 {offsets = [3, 0], sizes = [1, 32], strides = [1, 1]} : vector<26x32xf32> to vector<1x32xf32>
    %cst_32 = arith.constant dense<0.000000e+00> : vector<16xf32>
    %99 = vector.multi_reduction <add>, %96, %cst_32 [1] : vector<16x32xf32> to vector<16xf32>
    %100 = vector.shape_cast %99 : vector<16xf32> to vector<16x1xf32>
    %cst_33 = arith.constant 3.200000e+01 : f32
    %101 = vector.broadcast %cst_33 : f32 to vector<16x1xf32>
    %102 = arith.divf %100, %101 : vector<16x1xf32>
    %103 = vector.broadcast %102 : vector<16x1xf32> to vector<16x32xf32>
    %104 = arith.subf %96, %103 : vector<16x32xf32>
    %105 = arith.mulf %104, %104 : vector<16x32xf32>
    %cst_34 = arith.constant dense<0.000000e+00> : vector<16xf32>
    %106 = vector.multi_reduction <add>, %105, %cst_34 [1] : vector<16x32xf32> to vector<16xf32>
    %107 = vector.shape_cast %106 : vector<16xf32> to vector<16x1xf32>
    %cst_35 = arith.constant 3.200000e+01 : f32
    %108 = vector.broadcast %cst_35 : f32 to vector<16x1xf32>
    %109 = arith.divf %107, %108 : vector<16x1xf32>
    %110 = vector.broadcast %102 : vector<16x1xf32> to vector<16x32xf32>
    %111 = arith.subf %96, %110 : vector<16x32xf32>
    %cst_36 = arith.constant 9.99999974E-6 : f32
    %112 = vector.broadcast %cst_36 : f32 to vector<16x1xf32>
    %113 = arith.addf %109, %112 : vector<16x1xf32>
    %114 = math.rsqrt %113 : vector<16x1xf32>
    %115 = vector.broadcast %114 : vector<16x1xf32> to vector<16x32xf32>
    %116 = arith.mulf %111, %115 : vector<16x32xf32>
    %117 = vector.broadcast %97 : vector<1x32xf32> to vector<16x32xf32>
    %118 = arith.mulf %116, %117 : vector<16x32xf32>
    %119 = vector.broadcast %98 : vector<1x32xf32> to vector<16x32xf32>
    %120 = arith.addf %118, %119 : vector<16x32xf32>
    %cst_37 = arith.constant 0.000000e+00 : f32
    %121 = vector.broadcast %cst_37 : f32 to vector<16x32xf32>
    %122 = vector.extract_strided_slice %11 {offsets = [9, 0], sizes = [1, 32], strides = [1, 1]} : vector<26x32xf32> to vector<1x32xf32>
    %c2_i32_38 = arith.constant 2 : i32
    %123 = tpu.dynamic_rotate %120 by %c2_i32_38 dim 0 : vector<16x32xf32>, i32 -> vector<16x32xf32>
    %c2_i32_39 = arith.constant 2 : i32
    %124 = vector.broadcast %c2_i32_39 : i32 to vector<16x1xi32>
    %125 = arith.cmpi sge, %10, %124 : vector<16x1xi32>
    %cst_40 = arith.constant 0.000000e+00 : f32
    %126 = vector.shape_cast %125 : vector<16x1xi1> to vector<16x1xi1>
    %127 = vector.broadcast %126 : vector<16x1xi1> to vector<16x32xi1>
    %128 = vector.broadcast %cst_40 : f32 to vector<16x32xf32>
    %129 = arith.select %127, %123, %128 : vector<16x32xi1>, vector<16x32xf32>
    %130 = vector.broadcast %122 : vector<1x32xf32> to vector<16x32xf32>
    %131 = arith.mulf %129, %130 : vector<16x32xf32>
    %132 = arith.addf %121, %131 : vector<16x32xf32>
    %133 = vector.extract_strided_slice %11 {offsets = [10, 0], sizes = [1, 32], strides = [1, 1]} : vector<26x32xf32> to vector<1x32xf32>
    %c1_i32_41 = arith.constant 1 : i32
    %134 = tpu.dynamic_rotate %120 by %c1_i32_41 dim 0 : vector<16x32xf32>, i32 -> vector<16x32xf32>
    %c1_i32_42 = arith.constant 1 : i32
    %135 = vector.broadcast %c1_i32_42 : i32 to vector<16x1xi32>
    %136 = arith.cmpi sge, %10, %135 : vector<16x1xi32>
    %cst_43 = arith.constant 0.000000e+00 : f32
    %137 = vector.shape_cast %136 : vector<16x1xi1> to vector<16x1xi1>
    %138 = vector.broadcast %137 : vector<16x1xi1> to vector<16x32xi1>
    %139 = vector.broadcast %cst_43 : f32 to vector<16x32xf32>
    %140 = arith.select %138, %134, %139 : vector<16x32xi1>, vector<16x32xf32>
    %141 = vector.broadcast %133 : vector<1x32xf32> to vector<16x32xf32>
    %142 = arith.mulf %140, %141 : vector<16x32xf32>
    %143 = arith.addf %132, %142 : vector<16x32xf32>
    %144 = vector.extract_strided_slice %11 {offsets = [11, 0], sizes = [1, 32], strides = [1, 1]} : vector<26x32xf32> to vector<1x32xf32>
    %145 = vector.broadcast %144 : vector<1x32xf32> to vector<16x32xf32>
    %146 = arith.mulf %120, %145 : vector<16x32xf32>
    %147 = arith.addf %143, %146 : vector<16x32xf32>
    %148 = vector.extract_strided_slice %11 {offsets = [12, 0], sizes = [1, 32], strides = [1, 1]} : vector<26x32xf32> to vector<1x32xf32>
    %c15_i32_44 = arith.constant 15 : i32
    %149 = tpu.dynamic_rotate %120 by %c15_i32_44 dim 0 : vector<16x32xf32>, i32 -> vector<16x32xf32>
    %c15_i32_45 = arith.constant 15 : i32
    %150 = vector.broadcast %c15_i32_45 : i32 to vector<16x1xi32>
    %151 = arith.cmpi slt, %10, %150 : vector<16x1xi32>
    %cst_46 = arith.constant 0.000000e+00 : f32
    %152 = vector.shape_cast %151 : vector<16x1xi1> to vector<16x1xi1>
    %153 = vector.broadcast %152 : vector<16x1xi1> to vector<16x32xi1>
    %154 = vector.broadcast %cst_46 : f32 to vector<16x32xf32>
    %155 = arith.select %153, %149, %154 : vector<16x32xi1>, vector<16x32xf32>
    %156 = vector.broadcast %148 : vector<1x32xf32> to vector<16x32xf32>
    %157 = arith.mulf %155, %156 : vector<16x32xf32>
    %158 = arith.addf %147, %157 : vector<16x32xf32>
    %159 = vector.extract_strided_slice %11 {offsets = [13, 0], sizes = [1, 32], strides = [1, 1]} : vector<26x32xf32> to vector<1x32xf32>
    %c14_i32_47 = arith.constant 14 : i32
    %160 = tpu.dynamic_rotate %120 by %c14_i32_47 dim 0 : vector<16x32xf32>, i32 -> vector<16x32xf32>
    %c14_i32_48 = arith.constant 14 : i32
    %161 = vector.broadcast %c14_i32_48 : i32 to vector<16x1xi32>
    %162 = arith.cmpi slt, %10, %161 : vector<16x1xi32>
    %cst_49 = arith.constant 0.000000e+00 : f32
    %163 = vector.shape_cast %162 : vector<16x1xi1> to vector<16x1xi1>
    %164 = vector.broadcast %163 : vector<16x1xi1> to vector<16x32xi1>
    %165 = vector.broadcast %cst_49 : f32 to vector<16x32xf32>
    %166 = arith.select %164, %160, %165 : vector<16x32xi1>, vector<16x32xf32>
    %167 = vector.broadcast %159 : vector<1x32xf32> to vector<16x32xf32>
    %168 = arith.mulf %166, %167 : vector<16x32xf32>
    %169 = arith.addf %158, %168 : vector<16x32xf32>
    %170 = arith.truncf %169 : vector<16x32xf32> to vector<16x32xbf16>
    %171 = vector.extract_strided_slice %2 {offsets = [1, 0, 0], sizes = [1, 32, 32], strides = [1, 1, 1]} : vector<5x32x32xbf16> to vector<1x32x32xbf16>
    %172 = vector.shape_cast %171 : vector<1x32x32xbf16> to vector<32x32xbf16>
    %cst_50 = arith.constant dense<0.000000e+00> : vector<16x32xf32>
    %173 = tpu.matmul %170, %172, %cst_50 {dimension_numbers = #tpu.dot_dimension_numbers<[1], [0], [0], [1], [0, 0, 1, 1], [], []>} : vector<16x32xbf16>, vector<32x32xbf16>, vector<16x32xf32> -> vector<16x32xf32>
    %174 = vector.extract_strided_slice %11 {offsets = [15, 0], sizes = [1, 32], strides = [1, 1]} : vector<26x32xf32> to vector<1x32xf32>
    %175 = vector.broadcast %174 : vector<1x32xf32> to vector<16x32xf32>
    %176 = arith.addf %173, %175 : vector<16x32xf32>
    %cst_51 = arith.constant 0.000000e+00 : f32
    %177 = vector.broadcast %cst_51 : f32 to vector<16x32xf32>
    %178 = arith.maximumf %176, %177 : vector<16x32xf32>
    %179 = arith.addf %178, %96 : vector<16x32xf32>
    %180 = vector.extract_strided_slice %11 {offsets = [16, 0], sizes = [1, 32], strides = [1, 1]} : vector<26x32xf32> to vector<1x32xf32>
    %181 = vector.extract_strided_slice %11 {offsets = [17, 0], sizes = [1, 32], strides = [1, 1]} : vector<26x32xf32> to vector<1x32xf32>
    %cst_52 = arith.constant dense<0.000000e+00> : vector<16xf32>
    %182 = vector.multi_reduction <add>, %179, %cst_52 [1] : vector<16x32xf32> to vector<16xf32>
    %183 = vector.shape_cast %182 : vector<16xf32> to vector<16x1xf32>
    %cst_53 = arith.constant 3.200000e+01 : f32
    %184 = vector.broadcast %cst_53 : f32 to vector<16x1xf32>
    %185 = arith.divf %183, %184 : vector<16x1xf32>
    %186 = vector.broadcast %185 : vector<16x1xf32> to vector<16x32xf32>
    %187 = arith.subf %179, %186 : vector<16x32xf32>
    %188 = arith.mulf %187, %187 : vector<16x32xf32>
    %cst_54 = arith.constant dense<0.000000e+00> : vector<16xf32>
    %189 = vector.multi_reduction <add>, %188, %cst_54 [1] : vector<16x32xf32> to vector<16xf32>
    %190 = vector.shape_cast %189 : vector<16xf32> to vector<16x1xf32>
    %cst_55 = arith.constant 3.200000e+01 : f32
    %191 = vector.broadcast %cst_55 : f32 to vector<16x1xf32>
    %192 = arith.divf %190, %191 : vector<16x1xf32>
    %193 = vector.broadcast %185 : vector<16x1xf32> to vector<16x32xf32>
    %194 = arith.subf %179, %193 : vector<16x32xf32>
    %cst_56 = arith.constant 9.99999974E-6 : f32
    %195 = vector.broadcast %cst_56 : f32 to vector<16x1xf32>
    %196 = arith.addf %192, %195 : vector<16x1xf32>
    %197 = math.rsqrt %196 : vector<16x1xf32>
    %198 = vector.broadcast %197 : vector<16x1xf32> to vector<16x32xf32>
    %199 = arith.mulf %194, %198 : vector<16x32xf32>
    %200 = vector.broadcast %180 : vector<1x32xf32> to vector<16x32xf32>
    %201 = arith.mulf %199, %200 : vector<16x32xf32>
    %202 = vector.broadcast %181 : vector<1x32xf32> to vector<16x32xf32>
    %203 = arith.addf %201, %202 : vector<16x32xf32>
    %204 = vector.extract_strided_slice %11 {offsets = [18, 0], sizes = [1, 32], strides = [1, 1]} : vector<26x32xf32> to vector<1x32xf32>
    %205 = vector.extract_strided_slice %11 {offsets = [19, 0], sizes = [1, 32], strides = [1, 1]} : vector<26x32xf32> to vector<1x32xf32>
    %206 = vector.extract_strided_slice %11 {offsets = [20, 0], sizes = [1, 32], strides = [1, 1]} : vector<26x32xf32> to vector<1x32xf32>
    %207 = tpu.concatenate %204, %205, %206 in 1 : vector<1x32xf32>, vector<1x32xf32>, vector<1x32xf32> -> vector<1x96xf32>
    %208 = arith.truncf %203 : vector<16x32xf32> to vector<16x32xbf16>
    %cst_57 = arith.constant dense<0.000000e+00> : vector<16x96xf32>
    %209 = tpu.matmul %208, %12, %cst_57 {dimension_numbers = #tpu.dot_dimension_numbers<[1], [0], [0], [1], [0, 0, 1, 1], [], []>} : vector<16x32xbf16>, vector<32x96xbf16>, vector<16x96xf32> -> vector<16x96xf32>
    %210 = vector.broadcast %207 : vector<1x96xf32> to vector<16x96xf32>
    %211 = arith.addf %209, %210 : vector<16x96xf32>
    %212 = vector.extract_strided_slice %2 {offsets = [2, 0, 0], sizes = [1, 32, 32], strides = [1, 1, 1]} : vector<5x32x32xbf16> to vector<1x32x32xbf16>
    %213 = vector.shape_cast %212 : vector<1x32x32xbf16> to vector<32x32xbf16>
    %cst_58 = arith.constant 0.000000e+00 : f32
    %214 = vector.broadcast %cst_58 : f32 to vector<16x32xf32>
    %215 = vector.extract_strided_slice %211 {offsets = [0, 0], sizes = [16, 8], strides = [1, 1]} : vector<16x96xf32> to vector<16x8xf32>
    %216 = arith.truncf %215 : vector<16x8xf32> to vector<16x8xbf16>
    %217 = vector.extract_strided_slice %211 {offsets = [0, 32], sizes = [16, 8], strides = [1, 1]} : vector<16x96xf32> to vector<16x8xf32>
    %218 = arith.truncf %217 : vector<16x8xf32> to vector<16x8xbf16>
    %219 = vector.extract_strided_slice %211 {offsets = [0, 64], sizes = [16, 8], strides = [1, 1]} : vector<16x96xf32> to vector<16x8xf32>
    %220 = arith.truncf %219 : vector<16x8xf32> to vector<16x8xbf16>
    %cst_59 = arith.constant dense<0.000000e+00> : vector<16x16xf32>
    %221 = tpu.matmul %216, %218, %cst_59 {dimension_numbers = #tpu.dot_dimension_numbers<[1], [1], [0], [0], [0, 0, 1, 0], [], []>} : vector<16x8xbf16>, vector<16x8xbf16>, vector<16x16xf32> -> vector<16x16xf32>
    %cst_60 = arith.constant 0.353553385 : f32
    %222 = vector.broadcast %cst_60 : f32 to vector<16x16xf32>
    %223 = arith.mulf %221, %222 : vector<16x16xf32>
    %224 = vector.broadcast %7 : vector<1x16xf32> to vector<16x16xf32>
    %225 = arith.subf %223, %224 : vector<16x16xf32>
    %cst_61 = arith.constant dense<0xFF800000> : vector<16xf32>
    %226 = vector.multi_reduction <maximumf>, %225, %cst_61 [1] : vector<16x16xf32> to vector<16xf32>
    %227 = vector.shape_cast %226 : vector<16xf32> to vector<16x1xf32>
    %228 = vector.broadcast %227 : vector<16x1xf32> to vector<16x16xf32>
    %229 = arith.subf %225, %228 : vector<16x16xf32>
    %230 = math.exp %229 : vector<16x16xf32>
    %cst_62 = arith.constant dense<0.000000e+00> : vector<16xf32>
    %231 = vector.multi_reduction <add>, %230, %cst_62 [1] : vector<16x16xf32> to vector<16xf32>
    %232 = vector.shape_cast %231 : vector<16xf32> to vector<16x1xf32>
    %233 = tpu.reciprocal %232 {approx = true} : vector<16x1xf32> -> vector<16x1xf32>
    %234 = vector.broadcast %233 : vector<16x1xf32> to vector<16x16xf32>
    %235 = arith.mulf %230, %234 : vector<16x16xf32>
    %236 = arith.truncf %235 : vector<16x16xf32> to vector<16x16xbf16>
    %cst_63 = arith.constant dense<0.000000e+00> : vector<16x8xf32>
    %237 = tpu.matmul %236, %220, %cst_63 {dimension_numbers = #tpu.dot_dimension_numbers<[1], [0], [0], [1], [0, 0, 1, 1], [], []>} : vector<16x16xbf16>, vector<16x8xbf16>, vector<16x8xf32> -> vector<16x8xf32>
    %238 = arith.truncf %237 : vector<16x8xf32> to vector<16x8xbf16>
    %239 = vector.extract_strided_slice %213 {offsets = [0, 0], sizes = [8, 32], strides = [1, 1]} : vector<32x32xbf16> to vector<8x32xbf16>
    %cst_64 = arith.constant dense<0.000000e+00> : vector<16x32xf32>
    %240 = tpu.matmul %238, %239, %cst_64 {dimension_numbers = #tpu.dot_dimension_numbers<[1], [0], [0], [1], [0, 0, 1, 1], [], []>} : vector<16x8xbf16>, vector<8x32xbf16>, vector<16x32xf32> -> vector<16x32xf32>
    %241 = arith.addf %214, %240 : vector<16x32xf32>
    %242 = vector.extract_strided_slice %211 {offsets = [0, 8], sizes = [16, 8], strides = [1, 1]} : vector<16x96xf32> to vector<16x8xf32>
    %243 = arith.truncf %242 : vector<16x8xf32> to vector<16x8xbf16>
    %244 = vector.extract_strided_slice %211 {offsets = [0, 40], sizes = [16, 8], strides = [1, 1]} : vector<16x96xf32> to vector<16x8xf32>
    %245 = arith.truncf %244 : vector<16x8xf32> to vector<16x8xbf16>
    %246 = vector.extract_strided_slice %211 {offsets = [0, 72], sizes = [16, 8], strides = [1, 1]} : vector<16x96xf32> to vector<16x8xf32>
    %247 = arith.truncf %246 : vector<16x8xf32> to vector<16x8xbf16>
    %cst_65 = arith.constant dense<0.000000e+00> : vector<16x16xf32>
    %248 = tpu.matmul %243, %245, %cst_65 {dimension_numbers = #tpu.dot_dimension_numbers<[1], [1], [0], [0], [0, 0, 1, 0], [], []>} : vector<16x8xbf16>, vector<16x8xbf16>, vector<16x16xf32> -> vector<16x16xf32>
    %cst_66 = arith.constant 0.353553385 : f32
    %249 = vector.broadcast %cst_66 : f32 to vector<16x16xf32>
    %250 = arith.mulf %248, %249 : vector<16x16xf32>
    %251 = vector.broadcast %7 : vector<1x16xf32> to vector<16x16xf32>
    %252 = arith.subf %250, %251 : vector<16x16xf32>
    %cst_67 = arith.constant dense<0xFF800000> : vector<16xf32>
    %253 = vector.multi_reduction <maximumf>, %252, %cst_67 [1] : vector<16x16xf32> to vector<16xf32>
    %254 = vector.shape_cast %253 : vector<16xf32> to vector<16x1xf32>
    %255 = vector.broadcast %254 : vector<16x1xf32> to vector<16x16xf32>
    %256 = arith.subf %252, %255 : vector<16x16xf32>
    %257 = math.exp %256 : vector<16x16xf32>
    %cst_68 = arith.constant dense<0.000000e+00> : vector<16xf32>
    %258 = vector.multi_reduction <add>, %257, %cst_68 [1] : vector<16x16xf32> to vector<16xf32>
    %259 = vector.shape_cast %258 : vector<16xf32> to vector<16x1xf32>
    %260 = tpu.reciprocal %259 {approx = true} : vector<16x1xf32> -> vector<16x1xf32>
    %261 = vector.broadcast %260 : vector<16x1xf32> to vector<16x16xf32>
    %262 = arith.mulf %257, %261 : vector<16x16xf32>
    %263 = arith.truncf %262 : vector<16x16xf32> to vector<16x16xbf16>
    %cst_69 = arith.constant dense<0.000000e+00> : vector<16x8xf32>
    %264 = tpu.matmul %263, %247, %cst_69 {dimension_numbers = #tpu.dot_dimension_numbers<[1], [0], [0], [1], [0, 0, 1, 1], [], []>} : vector<16x16xbf16>, vector<16x8xbf16>, vector<16x8xf32> -> vector<16x8xf32>
    %265 = arith.truncf %264 : vector<16x8xf32> to vector<16x8xbf16>
    %266 = vector.extract_strided_slice %213 {offsets = [8, 0], sizes = [8, 32], strides = [1, 1]} : vector<32x32xbf16> to vector<8x32xbf16>
    %cst_70 = arith.constant dense<0.000000e+00> : vector<16x32xf32>
    %267 = tpu.matmul %265, %266, %cst_70 {dimension_numbers = #tpu.dot_dimension_numbers<[1], [0], [0], [1], [0, 0, 1, 1], [], []>} : vector<16x8xbf16>, vector<8x32xbf16>, vector<16x32xf32> -> vector<16x32xf32>
    %268 = arith.addf %241, %267 : vector<16x32xf32>
    %269 = vector.extract_strided_slice %211 {offsets = [0, 16], sizes = [16, 8], strides = [1, 1]} : vector<16x96xf32> to vector<16x8xf32>
    %270 = arith.truncf %269 : vector<16x8xf32> to vector<16x8xbf16>
    %271 = vector.extract_strided_slice %211 {offsets = [0, 48], sizes = [16, 8], strides = [1, 1]} : vector<16x96xf32> to vector<16x8xf32>
    %272 = arith.truncf %271 : vector<16x8xf32> to vector<16x8xbf16>
    %273 = vector.extract_strided_slice %211 {offsets = [0, 80], sizes = [16, 8], strides = [1, 1]} : vector<16x96xf32> to vector<16x8xf32>
    %274 = arith.truncf %273 : vector<16x8xf32> to vector<16x8xbf16>
    %cst_71 = arith.constant dense<0.000000e+00> : vector<16x16xf32>
    %275 = tpu.matmul %270, %272, %cst_71 {dimension_numbers = #tpu.dot_dimension_numbers<[1], [1], [0], [0], [0, 0, 1, 0], [], []>} : vector<16x8xbf16>, vector<16x8xbf16>, vector<16x16xf32> -> vector<16x16xf32>
    %cst_72 = arith.constant 0.353553385 : f32
    %276 = vector.broadcast %cst_72 : f32 to vector<16x16xf32>
    %277 = arith.mulf %275, %276 : vector<16x16xf32>
    %278 = vector.broadcast %7 : vector<1x16xf32> to vector<16x16xf32>
    %279 = arith.subf %277, %278 : vector<16x16xf32>
    %cst_73 = arith.constant dense<0xFF800000> : vector<16xf32>
    %280 = vector.multi_reduction <maximumf>, %279, %cst_73 [1] : vector<16x16xf32> to vector<16xf32>
    %281 = vector.shape_cast %280 : vector<16xf32> to vector<16x1xf32>
    %282 = vector.broadcast %281 : vector<16x1xf32> to vector<16x16xf32>
    %283 = arith.subf %279, %282 : vector<16x16xf32>
    %284 = math.exp %283 : vector<16x16xf32>
    %cst_74 = arith.constant dense<0.000000e+00> : vector<16xf32>
    %285 = vector.multi_reduction <add>, %284, %cst_74 [1] : vector<16x16xf32> to vector<16xf32>
    %286 = vector.shape_cast %285 : vector<16xf32> to vector<16x1xf32>
    %287 = tpu.reciprocal %286 {approx = true} : vector<16x1xf32> -> vector<16x1xf32>
    %288 = vector.broadcast %287 : vector<16x1xf32> to vector<16x16xf32>
    %289 = arith.mulf %284, %288 : vector<16x16xf32>
    %290 = arith.truncf %289 : vector<16x16xf32> to vector<16x16xbf16>
    %cst_75 = arith.constant dense<0.000000e+00> : vector<16x8xf32>
    %291 = tpu.matmul %290, %274, %cst_75 {dimension_numbers = #tpu.dot_dimension_numbers<[1], [0], [0], [1], [0, 0, 1, 1], [], []>} : vector<16x16xbf16>, vector<16x8xbf16>, vector<16x8xf32> -> vector<16x8xf32>
    %292 = arith.truncf %291 : vector<16x8xf32> to vector<16x8xbf16>
    %293 = vector.extract_strided_slice %213 {offsets = [16, 0], sizes = [8, 32], strides = [1, 1]} : vector<32x32xbf16> to vector<8x32xbf16>
    %cst_76 = arith.constant dense<0.000000e+00> : vector<16x32xf32>
    %294 = tpu.matmul %292, %293, %cst_76 {dimension_numbers = #tpu.dot_dimension_numbers<[1], [0], [0], [1], [0, 0, 1, 1], [], []>} : vector<16x8xbf16>, vector<8x32xbf16>, vector<16x32xf32> -> vector<16x32xf32>
    %295 = arith.addf %268, %294 : vector<16x32xf32>
    %296 = vector.extract_strided_slice %211 {offsets = [0, 24], sizes = [16, 8], strides = [1, 1]} : vector<16x96xf32> to vector<16x8xf32>
    %297 = arith.truncf %296 : vector<16x8xf32> to vector<16x8xbf16>
    %298 = vector.extract_strided_slice %211 {offsets = [0, 56], sizes = [16, 8], strides = [1, 1]} : vector<16x96xf32> to vector<16x8xf32>
    %299 = arith.truncf %298 : vector<16x8xf32> to vector<16x8xbf16>
    %300 = vector.extract_strided_slice %211 {offsets = [0, 88], sizes = [16, 8], strides = [1, 1]} : vector<16x96xf32> to vector<16x8xf32>
    %301 = arith.truncf %300 : vector<16x8xf32> to vector<16x8xbf16>
    %cst_77 = arith.constant dense<0.000000e+00> : vector<16x16xf32>
    %302 = tpu.matmul %297, %299, %cst_77 {dimension_numbers = #tpu.dot_dimension_numbers<[1], [1], [0], [0], [0, 0, 1, 0], [], []>} : vector<16x8xbf16>, vector<16x8xbf16>, vector<16x16xf32> -> vector<16x16xf32>
    %cst_78 = arith.constant 0.353553385 : f32
    %303 = vector.broadcast %cst_78 : f32 to vector<16x16xf32>
    %304 = arith.mulf %302, %303 : vector<16x16xf32>
    %305 = vector.broadcast %7 : vector<1x16xf32> to vector<16x16xf32>
    %306 = arith.subf %304, %305 : vector<16x16xf32>
    %cst_79 = arith.constant dense<0xFF800000> : vector<16xf32>
    %307 = vector.multi_reduction <maximumf>, %306, %cst_79 [1] : vector<16x16xf32> to vector<16xf32>
    %308 = vector.shape_cast %307 : vector<16xf32> to vector<16x1xf32>
    %309 = vector.broadcast %308 : vector<16x1xf32> to vector<16x16xf32>
    %310 = arith.subf %306, %309 : vector<16x16xf32>
    %311 = math.exp %310 : vector<16x16xf32>
    %cst_80 = arith.constant dense<0.000000e+00> : vector<16xf32>
    %312 = vector.multi_reduction <add>, %311, %cst_80 [1] : vector<16x16xf32> to vector<16xf32>
    %313 = vector.shape_cast %312 : vector<16xf32> to vector<16x1xf32>
    %314 = tpu.reciprocal %313 {approx = true} : vector<16x1xf32> -> vector<16x1xf32>
    %315 = vector.broadcast %314 : vector<16x1xf32> to vector<16x16xf32>
    %316 = arith.mulf %311, %315 : vector<16x16xf32>
    %317 = arith.truncf %316 : vector<16x16xf32> to vector<16x16xbf16>
    %cst_81 = arith.constant dense<0.000000e+00> : vector<16x8xf32>
    %318 = tpu.matmul %317, %301, %cst_81 {dimension_numbers = #tpu.dot_dimension_numbers<[1], [0], [0], [1], [0, 0, 1, 1], [], []>} : vector<16x16xbf16>, vector<16x8xbf16>, vector<16x8xf32> -> vector<16x8xf32>
    %319 = arith.truncf %318 : vector<16x8xf32> to vector<16x8xbf16>
    %320 = vector.extract_strided_slice %213 {offsets = [24, 0], sizes = [8, 32], strides = [1, 1]} : vector<32x32xbf16> to vector<8x32xbf16>
    %cst_82 = arith.constant dense<0.000000e+00> : vector<16x32xf32>
    %321 = tpu.matmul %319, %320, %cst_82 {dimension_numbers = #tpu.dot_dimension_numbers<[1], [0], [0], [1], [0, 0, 1, 1], [], []>} : vector<16x8xbf16>, vector<8x32xbf16>, vector<16x32xf32> -> vector<16x32xf32>
    %322 = arith.addf %295, %321 : vector<16x32xf32>
    %323 = vector.extract_strided_slice %11 {offsets = [21, 0], sizes = [1, 32], strides = [1, 1]} : vector<26x32xf32> to vector<1x32xf32>
    %324 = vector.broadcast %323 : vector<1x32xf32> to vector<16x32xf32>
    %325 = arith.addf %322, %324 : vector<16x32xf32>
    %326 = arith.addf %325, %179 : vector<16x32xf32>
    %327 = vector.extract_strided_slice %11 {offsets = [22, 0], sizes = [1, 32], strides = [1, 1]} : vector<26x32xf32> to vector<1x32xf32>
    %328 = vector.extract_strided_slice %11 {offsets = [23, 0], sizes = [1, 32], strides = [1, 1]} : vector<26x32xf32> to vector<1x32xf32>
    %cst_83 = arith.constant dense<0.000000e+00> : vector<16xf32>
    %329 = vector.multi_reduction <add>, %326, %cst_83 [1] : vector<16x32xf32> to vector<16xf32>
    %330 = vector.shape_cast %329 : vector<16xf32> to vector<16x1xf32>
    %cst_84 = arith.constant 3.200000e+01 : f32
    %331 = vector.broadcast %cst_84 : f32 to vector<16x1xf32>
    %332 = arith.divf %330, %331 : vector<16x1xf32>
    %333 = vector.broadcast %332 : vector<16x1xf32> to vector<16x32xf32>
    %334 = arith.subf %326, %333 : vector<16x32xf32>
    %335 = arith.mulf %334, %334 : vector<16x32xf32>
    %cst_85 = arith.constant dense<0.000000e+00> : vector<16xf32>
    %336 = vector.multi_reduction <add>, %335, %cst_85 [1] : vector<16x32xf32> to vector<16xf32>
    %337 = vector.shape_cast %336 : vector<16xf32> to vector<16x1xf32>
    %cst_86 = arith.constant 3.200000e+01 : f32
    %338 = vector.broadcast %cst_86 : f32 to vector<16x1xf32>
    %339 = arith.divf %337, %338 : vector<16x1xf32>
    %340 = vector.broadcast %332 : vector<16x1xf32> to vector<16x32xf32>
    %341 = arith.subf %326, %340 : vector<16x32xf32>
    %cst_87 = arith.constant 9.99999974E-6 : f32
    %342 = vector.broadcast %cst_87 : f32 to vector<16x1xf32>
    %343 = arith.addf %339, %342 : vector<16x1xf32>
    %344 = math.rsqrt %343 : vector<16x1xf32>
    %345 = vector.broadcast %344 : vector<16x1xf32> to vector<16x32xf32>
    %346 = arith.mulf %341, %345 : vector<16x32xf32>
    %347 = vector.broadcast %327 : vector<1x32xf32> to vector<16x32xf32>
    %348 = arith.mulf %346, %347 : vector<16x32xf32>
    %349 = vector.broadcast %328 : vector<1x32xf32> to vector<16x32xf32>
    %350 = arith.addf %348, %349 : vector<16x32xf32>
    %351 = arith.truncf %350 : vector<16x32xf32> to vector<16x32xbf16>
    %352 = vector.extract_strided_slice %2 {offsets = [3, 0, 0], sizes = [1, 32, 32], strides = [1, 1, 1]} : vector<5x32x32xbf16> to vector<1x32x32xbf16>
    %353 = vector.shape_cast %352 : vector<1x32x32xbf16> to vector<32x32xbf16>
    %cst_88 = arith.constant dense<0.000000e+00> : vector<16x32xf32>
    %354 = tpu.matmul %351, %353, %cst_88 {dimension_numbers = #tpu.dot_dimension_numbers<[1], [0], [0], [1], [0, 0, 1, 1], [], []>} : vector<16x32xbf16>, vector<32x32xbf16>, vector<16x32xf32> -> vector<16x32xf32>
    %355 = vector.extract_strided_slice %11 {offsets = [24, 0], sizes = [1, 32], strides = [1, 1]} : vector<26x32xf32> to vector<1x32xf32>
    %356 = vector.broadcast %355 : vector<1x32xf32> to vector<16x32xf32>
    %357 = arith.addf %354, %356 : vector<16x32xf32>
    %cst_89 = arith.constant 0.000000e+00 : f32
    %358 = vector.broadcast %cst_89 : f32 to vector<16x32xf32>
    %359 = arith.maximumf %357, %358 : vector<16x32xf32>
    %360 = arith.truncf %359 : vector<16x32xf32> to vector<16x32xbf16>
    %361 = vector.extract_strided_slice %2 {offsets = [4, 0, 0], sizes = [1, 32, 32], strides = [1, 1, 1]} : vector<5x32x32xbf16> to vector<1x32x32xbf16>
    %362 = vector.shape_cast %361 : vector<1x32x32xbf16> to vector<32x32xbf16>
    %cst_90 = arith.constant dense<0.000000e+00> : vector<16x32xf32>
    %363 = tpu.matmul %360, %362, %cst_90 {dimension_numbers = #tpu.dot_dimension_numbers<[1], [0], [0], [1], [0, 0, 1, 1], [], []>} : vector<16x32xbf16>, vector<32x32xbf16>, vector<16x32xf32> -> vector<16x32xf32>
    %364 = vector.extract_strided_slice %11 {offsets = [25, 0], sizes = [1, 32], strides = [1, 1]} : vector<26x32xf32> to vector<1x32xf32>
    %365 = vector.broadcast %364 : vector<1x32xf32> to vector<16x32xf32>
    %366 = arith.addf %363, %365 : vector<16x32xf32>
    %367 = arith.addf %366, %326 : vector<16x32xf32>
    %368 = tpu.iota {dimensions = array<i32: 0>} : vector<16x1xi32>
    %369 = vector.shape_cast %0 : vector<1x26x32xf32> to vector<26x32xf32>
    %370 = vector.shape_cast %1 : vector<1x32x96xbf16> to vector<32x96xbf16>
    %371 = arith.addf %367, %3 : vector<16x32xf32>
    %372 = vector.extract_strided_slice %369 {offsets = [0, 0], sizes = [1, 32], strides = [1, 1]} : vector<26x32xf32> to vector<1x32xf32>
    %373 = vector.extract_strided_slice %369 {offsets = [2, 0], sizes = [1, 32], strides = [1, 1]} : vector<26x32xf32> to vector<1x32xf32>
    %cst_91 = arith.constant dense<0.000000e+00> : vector<16xf32>
    %374 = vector.multi_reduction <add>, %371, %cst_91 [1] : vector<16x32xf32> to vector<16xf32>
    %375 = vector.shape_cast %374 : vector<16xf32> to vector<16x1xf32>
    %cst_92 = arith.constant 3.200000e+01 : f32
    %376 = vector.broadcast %cst_92 : f32 to vector<16x1xf32>
    %377 = arith.divf %375, %376 : vector<16x1xf32>
    %378 = vector.broadcast %377 : vector<16x1xf32> to vector<16x32xf32>
    %379 = arith.subf %371, %378 : vector<16x32xf32>
    %380 = arith.mulf %379, %379 : vector<16x32xf32>
    %cst_93 = arith.constant dense<0.000000e+00> : vector<16xf32>
    %381 = vector.multi_reduction <add>, %380, %cst_93 [1] : vector<16x32xf32> to vector<16xf32>
    %382 = vector.shape_cast %381 : vector<16xf32> to vector<16x1xf32>
    %cst_94 = arith.constant 3.200000e+01 : f32
    %383 = vector.broadcast %cst_94 : f32 to vector<16x1xf32>
    %384 = arith.divf %382, %383 : vector<16x1xf32>
    %385 = vector.broadcast %377 : vector<16x1xf32> to vector<16x32xf32>
    %386 = arith.subf %371, %385 : vector<16x32xf32>
    %cst_95 = arith.constant 9.99999974E-6 : f32
    %387 = vector.broadcast %cst_95 : f32 to vector<16x1xf32>
    %388 = arith.addf %384, %387 : vector<16x1xf32>
    %389 = math.rsqrt %388 : vector<16x1xf32>
    %390 = vector.broadcast %389 : vector<16x1xf32> to vector<16x32xf32>
    %391 = arith.mulf %386, %390 : vector<16x32xf32>
    %392 = vector.broadcast %372 : vector<1x32xf32> to vector<16x32xf32>
    %393 = arith.mulf %391, %392 : vector<16x32xf32>
    %394 = vector.broadcast %373 : vector<1x32xf32> to vector<16x32xf32>
    %395 = arith.addf %393, %394 : vector<16x32xf32>
    %cst_96 = arith.constant 0.000000e+00 : f32
    %396 = vector.broadcast %cst_96 : f32 to vector<16x32xf32>
    %397 = vector.extract_strided_slice %369 {offsets = [4, 0], sizes = [1, 32], strides = [1, 1]} : vector<26x32xf32> to vector<1x32xf32>
    %c2_i32_97 = arith.constant 2 : i32
    %398 = tpu.dynamic_rotate %395 by %c2_i32_97 dim 0 : vector<16x32xf32>, i32 -> vector<16x32xf32>
    %c2_i32_98 = arith.constant 2 : i32
    %399 = vector.broadcast %c2_i32_98 : i32 to vector<16x1xi32>
    %400 = arith.cmpi sge, %368, %399 : vector<16x1xi32>
    %cst_99 = arith.constant 0.000000e+00 : f32
    %401 = vector.shape_cast %400 : vector<16x1xi1> to vector<16x1xi1>
    %402 = vector.broadcast %401 : vector<16x1xi1> to vector<16x32xi1>
    %403 = vector.broadcast %cst_99 : f32 to vector<16x32xf32>
    %404 = arith.select %402, %398, %403 : vector<16x32xi1>, vector<16x32xf32>
    %405 = vector.broadcast %397 : vector<1x32xf32> to vector<16x32xf32>
    %406 = arith.mulf %404, %405 : vector<16x32xf32>
    %407 = arith.addf %396, %406 : vector<16x32xf32>
    %408 = vector.extract_strided_slice %369 {offsets = [5, 0], sizes = [1, 32], strides = [1, 1]} : vector<26x32xf32> to vector<1x32xf32>
    %c1_i32_100 = arith.constant 1 : i32
    %409 = tpu.dynamic_rotate %395 by %c1_i32_100 dim 0 : vector<16x32xf32>, i32 -> vector<16x32xf32>
    %c1_i32_101 = arith.constant 1 : i32
    %410 = vector.broadcast %c1_i32_101 : i32 to vector<16x1xi32>
    %411 = arith.cmpi sge, %368, %410 : vector<16x1xi32>
    %cst_102 = arith.constant 0.000000e+00 : f32
    %412 = vector.shape_cast %411 : vector<16x1xi1> to vector<16x1xi1>
    %413 = vector.broadcast %412 : vector<16x1xi1> to vector<16x32xi1>
    %414 = vector.broadcast %cst_102 : f32 to vector<16x32xf32>
    %415 = arith.select %413, %409, %414 : vector<16x32xi1>, vector<16x32xf32>
    %416 = vector.broadcast %408 : vector<1x32xf32> to vector<16x32xf32>
    %417 = arith.mulf %415, %416 : vector<16x32xf32>
    %418 = arith.addf %407, %417 : vector<16x32xf32>
    %419 = vector.extract_strided_slice %369 {offsets = [6, 0], sizes = [1, 32], strides = [1, 1]} : vector<26x32xf32> to vector<1x32xf32>
    %420 = vector.broadcast %419 : vector<1x32xf32> to vector<16x32xf32>
    %421 = arith.mulf %395, %420 : vector<16x32xf32>
    %422 = arith.addf %418, %421 : vector<16x32xf32>
    %423 = vector.extract_strided_slice %369 {offsets = [7, 0], sizes = [1, 32], strides = [1, 1]} : vector<26x32xf32> to vector<1x32xf32>
    %c15_i32_103 = arith.constant 15 : i32
    %424 = tpu.dynamic_rotate %395 by %c15_i32_103 dim 0 : vector<16x32xf32>, i32 -> vector<16x32xf32>
    %c15_i32_104 = arith.constant 15 : i32
    %425 = vector.broadcast %c15_i32_104 : i32 to vector<16x1xi32>
    %426 = arith.cmpi slt, %368, %425 : vector<16x1xi32>
    %cst_105 = arith.constant 0.000000e+00 : f32
    %427 = vector.shape_cast %426 : vector<16x1xi1> to vector<16x1xi1>
    %428 = vector.broadcast %427 : vector<16x1xi1> to vector<16x32xi1>
    %429 = vector.broadcast %cst_105 : f32 to vector<16x32xf32>
    %430 = arith.select %428, %424, %429 : vector<16x32xi1>, vector<16x32xf32>
    %431 = vector.broadcast %423 : vector<1x32xf32> to vector<16x32xf32>
    %432 = arith.mulf %430, %431 : vector<16x32xf32>
    %433 = arith.addf %422, %432 : vector<16x32xf32>
    %434 = vector.extract_strided_slice %369 {offsets = [8, 0], sizes = [1, 32], strides = [1, 1]} : vector<26x32xf32> to vector<1x32xf32>
    %c14_i32_106 = arith.constant 14 : i32
    %435 = tpu.dynamic_rotate %395 by %c14_i32_106 dim 0 : vector<16x32xf32>, i32 -> vector<16x32xf32>
    %c14_i32_107 = arith.constant 14 : i32
    %436 = vector.broadcast %c14_i32_107 : i32 to vector<16x1xi32>
    %437 = arith.cmpi slt, %368, %436 : vector<16x1xi32>
    %cst_108 = arith.constant 0.000000e+00 : f32
    %438 = vector.shape_cast %437 : vector<16x1xi1> to vector<16x1xi1>
    %439 = vector.broadcast %438 : vector<16x1xi1> to vector<16x32xi1>
    %440 = vector.broadcast %cst_108 : f32 to vector<16x32xf32>
    %441 = arith.select %439, %435, %440 : vector<16x32xi1>, vector<16x32xf32>
    %442 = vector.broadcast %434 : vector<1x32xf32> to vector<16x32xf32>
    %443 = arith.mulf %441, %442 : vector<16x32xf32>
    %444 = arith.addf %433, %443 : vector<16x32xf32>
    %445 = arith.truncf %444 : vector<16x32xf32> to vector<16x32xbf16>
    %446 = vector.extract_strided_slice %2 {offsets = [0, 0, 0], sizes = [1, 32, 32], strides = [1, 1, 1]} : vector<5x32x32xbf16> to vector<1x32x32xbf16>
    %447 = vector.shape_cast %446 : vector<1x32x32xbf16> to vector<32x32xbf16>
    %cst_109 = arith.constant dense<0.000000e+00> : vector<16x32xf32>
    %448 = tpu.matmul %445, %447, %cst_109 {dimension_numbers = #tpu.dot_dimension_numbers<[1], [0], [0], [1], [0, 0, 1, 1], [], []>} : vector<16x32xbf16>, vector<32x32xbf16>, vector<16x32xf32> -> vector<16x32xf32>
    %449 = vector.extract_strided_slice %369 {offsets = [14, 0], sizes = [1, 32], strides = [1, 1]} : vector<26x32xf32> to vector<1x32xf32>
    %450 = vector.broadcast %449 : vector<1x32xf32> to vector<16x32xf32>
    %451 = arith.addf %448, %450 : vector<16x32xf32>
    %cst_110 = arith.constant 0.000000e+00 : f32
    %452 = vector.broadcast %cst_110 : f32 to vector<16x32xf32>
    %453 = arith.maximumf %451, %452 : vector<16x32xf32>
    %454 = arith.addf %453, %371 : vector<16x32xf32>
    %455 = vector.extract_strided_slice %369 {offsets = [1, 0], sizes = [1, 32], strides = [1, 1]} : vector<26x32xf32> to vector<1x32xf32>
    %456 = vector.extract_strided_slice %369 {offsets = [3, 0], sizes = [1, 32], strides = [1, 1]} : vector<26x32xf32> to vector<1x32xf32>
    %cst_111 = arith.constant dense<0.000000e+00> : vector<16xf32>
    %457 = vector.multi_reduction <add>, %454, %cst_111 [1] : vector<16x32xf32> to vector<16xf32>
    %458 = vector.shape_cast %457 : vector<16xf32> to vector<16x1xf32>
    %cst_112 = arith.constant 3.200000e+01 : f32
    %459 = vector.broadcast %cst_112 : f32 to vector<16x1xf32>
    %460 = arith.divf %458, %459 : vector<16x1xf32>
    %461 = vector.broadcast %460 : vector<16x1xf32> to vector<16x32xf32>
    %462 = arith.subf %454, %461 : vector<16x32xf32>
    %463 = arith.mulf %462, %462 : vector<16x32xf32>
    %cst_113 = arith.constant dense<0.000000e+00> : vector<16xf32>
    %464 = vector.multi_reduction <add>, %463, %cst_113 [1] : vector<16x32xf32> to vector<16xf32>
    %465 = vector.shape_cast %464 : vector<16xf32> to vector<16x1xf32>
    %cst_114 = arith.constant 3.200000e+01 : f32
    %466 = vector.broadcast %cst_114 : f32 to vector<16x1xf32>
    %467 = arith.divf %465, %466 : vector<16x1xf32>
    %468 = vector.broadcast %460 : vector<16x1xf32> to vector<16x32xf32>
    %469 = arith.subf %454, %468 : vector<16x32xf32>
    %cst_115 = arith.constant 9.99999974E-6 : f32
    %470 = vector.broadcast %cst_115 : f32 to vector<16x1xf32>
    %471 = arith.addf %467, %470 : vector<16x1xf32>
    %472 = math.rsqrt %471 : vector<16x1xf32>
    %473 = vector.broadcast %472 : vector<16x1xf32> to vector<16x32xf32>
    %474 = arith.mulf %469, %473 : vector<16x32xf32>
    %475 = vector.broadcast %455 : vector<1x32xf32> to vector<16x32xf32>
    %476 = arith.mulf %474, %475 : vector<16x32xf32>
    %477 = vector.broadcast %456 : vector<1x32xf32> to vector<16x32xf32>
    %478 = arith.addf %476, %477 : vector<16x32xf32>
    %cst_116 = arith.constant 0.000000e+00 : f32
    %479 = vector.broadcast %cst_116 : f32 to vector<16x32xf32>
    %480 = vector.extract_strided_slice %369 {offsets = [9, 0], sizes = [1, 32], strides = [1, 1]} : vector<26x32xf32> to vector<1x32xf32>
    %c2_i32_117 = arith.constant 2 : i32
    %481 = tpu.dynamic_rotate %478 by %c2_i32_117 dim 0 : vector<16x32xf32>, i32 -> vector<16x32xf32>
    %c2_i32_118 = arith.constant 2 : i32
    %482 = vector.broadcast %c2_i32_118 : i32 to vector<16x1xi32>
    %483 = arith.cmpi sge, %368, %482 : vector<16x1xi32>
    %cst_119 = arith.constant 0.000000e+00 : f32
    %484 = vector.shape_cast %483 : vector<16x1xi1> to vector<16x1xi1>
    %485 = vector.broadcast %484 : vector<16x1xi1> to vector<16x32xi1>
    %486 = vector.broadcast %cst_119 : f32 to vector<16x32xf32>
    %487 = arith.select %485, %481, %486 : vector<16x32xi1>, vector<16x32xf32>
    %488 = vector.broadcast %480 : vector<1x32xf32> to vector<16x32xf32>
    %489 = arith.mulf %487, %488 : vector<16x32xf32>
    %490 = arith.addf %479, %489 : vector<16x32xf32>
    %491 = vector.extract_strided_slice %369 {offsets = [10, 0], sizes = [1, 32], strides = [1, 1]} : vector<26x32xf32> to vector<1x32xf32>
    %c1_i32_120 = arith.constant 1 : i32
    %492 = tpu.dynamic_rotate %478 by %c1_i32_120 dim 0 : vector<16x32xf32>, i32 -> vector<16x32xf32>
    %c1_i32_121 = arith.constant 1 : i32
    %493 = vector.broadcast %c1_i32_121 : i32 to vector<16x1xi32>
    %494 = arith.cmpi sge, %368, %493 : vector<16x1xi32>
    %cst_122 = arith.constant 0.000000e+00 : f32
    %495 = vector.shape_cast %494 : vector<16x1xi1> to vector<16x1xi1>
    %496 = vector.broadcast %495 : vector<16x1xi1> to vector<16x32xi1>
    %497 = vector.broadcast %cst_122 : f32 to vector<16x32xf32>
    %498 = arith.select %496, %492, %497 : vector<16x32xi1>, vector<16x32xf32>
    %499 = vector.broadcast %491 : vector<1x32xf32> to vector<16x32xf32>
    %500 = arith.mulf %498, %499 : vector<16x32xf32>
    %501 = arith.addf %490, %500 : vector<16x32xf32>
    %502 = vector.extract_strided_slice %369 {offsets = [11, 0], sizes = [1, 32], strides = [1, 1]} : vector<26x32xf32> to vector<1x32xf32>
    %503 = vector.broadcast %502 : vector<1x32xf32> to vector<16x32xf32>
    %504 = arith.mulf %478, %503 : vector<16x32xf32>
    %505 = arith.addf %501, %504 : vector<16x32xf32>
    %506 = vector.extract_strided_slice %369 {offsets = [12, 0], sizes = [1, 32], strides = [1, 1]} : vector<26x32xf32> to vector<1x32xf32>
    %c15_i32_123 = arith.constant 15 : i32
    %507 = tpu.dynamic_rotate %478 by %c15_i32_123 dim 0 : vector<16x32xf32>, i32 -> vector<16x32xf32>
    %c15_i32_124 = arith.constant 15 : i32
    %508 = vector.broadcast %c15_i32_124 : i32 to vector<16x1xi32>
    %509 = arith.cmpi slt, %368, %508 : vector<16x1xi32>
    %cst_125 = arith.constant 0.000000e+00 : f32
    %510 = vector.shape_cast %509 : vector<16x1xi1> to vector<16x1xi1>
    %511 = vector.broadcast %510 : vector<16x1xi1> to vector<16x32xi1>
    %512 = vector.broadcast %cst_125 : f32 to vector<16x32xf32>
    %513 = arith.select %511, %507, %512 : vector<16x32xi1>, vector<16x32xf32>
    %514 = vector.broadcast %506 : vector<1x32xf32> to vector<16x32xf32>
    %515 = arith.mulf %513, %514 : vector<16x32xf32>
    %516 = arith.addf %505, %515 : vector<16x32xf32>
    %517 = vector.extract_strided_slice %369 {offsets = [13, 0], sizes = [1, 32], strides = [1, 1]} : vector<26x32xf32> to vector<1x32xf32>
    %c14_i32_126 = arith.constant 14 : i32
    %518 = tpu.dynamic_rotate %478 by %c14_i32_126 dim 0 : vector<16x32xf32>, i32 -> vector<16x32xf32>
    %c14_i32_127 = arith.constant 14 : i32
    %519 = vector.broadcast %c14_i32_127 : i32 to vector<16x1xi32>
    %520 = arith.cmpi slt, %368, %519 : vector<16x1xi32>
    %cst_128 = arith.constant 0.000000e+00 : f32
    %521 = vector.shape_cast %520 : vector<16x1xi1> to vector<16x1xi1>
    %522 = vector.broadcast %521 : vector<16x1xi1> to vector<16x32xi1>
    %523 = vector.broadcast %cst_128 : f32 to vector<16x32xf32>
    %524 = arith.select %522, %518, %523 : vector<16x32xi1>, vector<16x32xf32>
    %525 = vector.broadcast %517 : vector<1x32xf32> to vector<16x32xf32>
    %526 = arith.mulf %524, %525 : vector<16x32xf32>
    %527 = arith.addf %516, %526 : vector<16x32xf32>
    %528 = arith.truncf %527 : vector<16x32xf32> to vector<16x32xbf16>
    %529 = vector.extract_strided_slice %2 {offsets = [1, 0, 0], sizes = [1, 32, 32], strides = [1, 1, 1]} : vector<5x32x32xbf16> to vector<1x32x32xbf16>
    %530 = vector.shape_cast %529 : vector<1x32x32xbf16> to vector<32x32xbf16>
    %cst_129 = arith.constant dense<0.000000e+00> : vector<16x32xf32>
    %531 = tpu.matmul %528, %530, %cst_129 {dimension_numbers = #tpu.dot_dimension_numbers<[1], [0], [0], [1], [0, 0, 1, 1], [], []>} : vector<16x32xbf16>, vector<32x32xbf16>, vector<16x32xf32> -> vector<16x32xf32>
    %532 = vector.extract_strided_slice %369 {offsets = [15, 0], sizes = [1, 32], strides = [1, 1]} : vector<26x32xf32> to vector<1x32xf32>
    %533 = vector.broadcast %532 : vector<1x32xf32> to vector<16x32xf32>
    %534 = arith.addf %531, %533 : vector<16x32xf32>
    %cst_130 = arith.constant 0.000000e+00 : f32
    %535 = vector.broadcast %cst_130 : f32 to vector<16x32xf32>
    %536 = arith.maximumf %534, %535 : vector<16x32xf32>
    %537 = arith.addf %536, %454 : vector<16x32xf32>
    %538 = vector.extract_strided_slice %369 {offsets = [16, 0], sizes = [1, 32], strides = [1, 1]} : vector<26x32xf32> to vector<1x32xf32>
    %539 = vector.extract_strided_slice %369 {offsets = [17, 0], sizes = [1, 32], strides = [1, 1]} : vector<26x32xf32> to vector<1x32xf32>
    %cst_131 = arith.constant dense<0.000000e+00> : vector<16xf32>
    %540 = vector.multi_reduction <add>, %537, %cst_131 [1] : vector<16x32xf32> to vector<16xf32>
    %541 = vector.shape_cast %540 : vector<16xf32> to vector<16x1xf32>
    %cst_132 = arith.constant 3.200000e+01 : f32
    %542 = vector.broadcast %cst_132 : f32 to vector<16x1xf32>
    %543 = arith.divf %541, %542 : vector<16x1xf32>
    %544 = vector.broadcast %543 : vector<16x1xf32> to vector<16x32xf32>
    %545 = arith.subf %537, %544 : vector<16x32xf32>
    %546 = arith.mulf %545, %545 : vector<16x32xf32>
    %cst_133 = arith.constant dense<0.000000e+00> : vector<16xf32>
    %547 = vector.multi_reduction <add>, %546, %cst_133 [1] : vector<16x32xf32> to vector<16xf32>
    %548 = vector.shape_cast %547 : vector<16xf32> to vector<16x1xf32>
    %cst_134 = arith.constant 3.200000e+01 : f32
    %549 = vector.broadcast %cst_134 : f32 to vector<16x1xf32>
    %550 = arith.divf %548, %549 : vector<16x1xf32>
    %551 = vector.broadcast %543 : vector<16x1xf32> to vector<16x32xf32>
    %552 = arith.subf %537, %551 : vector<16x32xf32>
    %cst_135 = arith.constant 9.99999974E-6 : f32
    %553 = vector.broadcast %cst_135 : f32 to vector<16x1xf32>
    %554 = arith.addf %550, %553 : vector<16x1xf32>
    %555 = math.rsqrt %554 : vector<16x1xf32>
    %556 = vector.broadcast %555 : vector<16x1xf32> to vector<16x32xf32>
    %557 = arith.mulf %552, %556 : vector<16x32xf32>
    %558 = vector.broadcast %538 : vector<1x32xf32> to vector<16x32xf32>
    %559 = arith.mulf %557, %558 : vector<16x32xf32>
    %560 = vector.broadcast %539 : vector<1x32xf32> to vector<16x32xf32>
    %561 = arith.addf %559, %560 : vector<16x32xf32>
    %562 = vector.extract_strided_slice %369 {offsets = [18, 0], sizes = [1, 32], strides = [1, 1]} : vector<26x32xf32> to vector<1x32xf32>
    %563 = vector.extract_strided_slice %369 {offsets = [19, 0], sizes = [1, 32], strides = [1, 1]} : vector<26x32xf32> to vector<1x32xf32>
    %564 = vector.extract_strided_slice %369 {offsets = [20, 0], sizes = [1, 32], strides = [1, 1]} : vector<26x32xf32> to vector<1x32xf32>
    %565 = tpu.concatenate %562, %563, %564 in 1 : vector<1x32xf32>, vector<1x32xf32>, vector<1x32xf32> -> vector<1x96xf32>
    %566 = arith.truncf %561 : vector<16x32xf32> to vector<16x32xbf16>
    %cst_136 = arith.constant dense<0.000000e+00> : vector<16x96xf32>
    %567 = tpu.matmul %566, %370, %cst_136 {dimension_numbers = #tpu.dot_dimension_numbers<[1], [0], [0], [1], [0, 0, 1, 1], [], []>} : vector<16x32xbf16>, vector<32x96xbf16>, vector<16x96xf32> -> vector<16x96xf32>
    %568 = vector.broadcast %565 : vector<1x96xf32> to vector<16x96xf32>
    %569 = arith.addf %567, %568 : vector<16x96xf32>
    %570 = vector.extract_strided_slice %2 {offsets = [2, 0, 0], sizes = [1, 32, 32], strides = [1, 1, 1]} : vector<5x32x32xbf16> to vector<1x32x32xbf16>
    %571 = vector.shape_cast %570 : vector<1x32x32xbf16> to vector<32x32xbf16>
    %cst_137 = arith.constant 0.000000e+00 : f32
    %572 = vector.broadcast %cst_137 : f32 to vector<16x32xf32>
    %573 = vector.extract_strided_slice %569 {offsets = [0, 0], sizes = [16, 8], strides = [1, 1]} : vector<16x96xf32> to vector<16x8xf32>
    %574 = arith.truncf %573 : vector<16x8xf32> to vector<16x8xbf16>
    %575 = vector.extract_strided_slice %569 {offsets = [0, 32], sizes = [16, 8], strides = [1, 1]} : vector<16x96xf32> to vector<16x8xf32>
    %576 = arith.truncf %575 : vector<16x8xf32> to vector<16x8xbf16>
    %577 = vector.extract_strided_slice %569 {offsets = [0, 64], sizes = [16, 8], strides = [1, 1]} : vector<16x96xf32> to vector<16x8xf32>
    %578 = arith.truncf %577 : vector<16x8xf32> to vector<16x8xbf16>
    %cst_138 = arith.constant dense<0.000000e+00> : vector<16x16xf32>
    %579 = tpu.matmul %574, %576, %cst_138 {dimension_numbers = #tpu.dot_dimension_numbers<[1], [1], [0], [0], [0, 0, 1, 0], [], []>} : vector<16x8xbf16>, vector<16x8xbf16>, vector<16x16xf32> -> vector<16x16xf32>
    %cst_139 = arith.constant 0.353553385 : f32
    %580 = vector.broadcast %cst_139 : f32 to vector<16x16xf32>
    %581 = arith.mulf %579, %580 : vector<16x16xf32>
    %582 = vector.broadcast %7 : vector<1x16xf32> to vector<16x16xf32>
    %583 = arith.subf %581, %582 : vector<16x16xf32>
    %cst_140 = arith.constant dense<0xFF800000> : vector<16xf32>
    %584 = vector.multi_reduction <maximumf>, %583, %cst_140 [1] : vector<16x16xf32> to vector<16xf32>
    %585 = vector.shape_cast %584 : vector<16xf32> to vector<16x1xf32>
    %586 = vector.broadcast %585 : vector<16x1xf32> to vector<16x16xf32>
    %587 = arith.subf %583, %586 : vector<16x16xf32>
    %588 = math.exp %587 : vector<16x16xf32>
    %cst_141 = arith.constant dense<0.000000e+00> : vector<16xf32>
    %589 = vector.multi_reduction <add>, %588, %cst_141 [1] : vector<16x16xf32> to vector<16xf32>
    %590 = vector.shape_cast %589 : vector<16xf32> to vector<16x1xf32>
    %591 = tpu.reciprocal %590 {approx = true} : vector<16x1xf32> -> vector<16x1xf32>
    %592 = vector.broadcast %591 : vector<16x1xf32> to vector<16x16xf32>
    %593 = arith.mulf %588, %592 : vector<16x16xf32>
    %594 = arith.truncf %593 : vector<16x16xf32> to vector<16x16xbf16>
    %cst_142 = arith.constant dense<0.000000e+00> : vector<16x8xf32>
    %595 = tpu.matmul %594, %578, %cst_142 {dimension_numbers = #tpu.dot_dimension_numbers<[1], [0], [0], [1], [0, 0, 1, 1], [], []>} : vector<16x16xbf16>, vector<16x8xbf16>, vector<16x8xf32> -> vector<16x8xf32>
    %596 = arith.truncf %595 : vector<16x8xf32> to vector<16x8xbf16>
    %597 = vector.extract_strided_slice %571 {offsets = [0, 0], sizes = [8, 32], strides = [1, 1]} : vector<32x32xbf16> to vector<8x32xbf16>
    %cst_143 = arith.constant dense<0.000000e+00> : vector<16x32xf32>
    %598 = tpu.matmul %596, %597, %cst_143 {dimension_numbers = #tpu.dot_dimension_numbers<[1], [0], [0], [1], [0, 0, 1, 1], [], []>} : vector<16x8xbf16>, vector<8x32xbf16>, vector<16x32xf32> -> vector<16x32xf32>
    %599 = arith.addf %572, %598 : vector<16x32xf32>
    %600 = vector.extract_strided_slice %569 {offsets = [0, 8], sizes = [16, 8], strides = [1, 1]} : vector<16x96xf32> to vector<16x8xf32>
    %601 = arith.truncf %600 : vector<16x8xf32> to vector<16x8xbf16>
    %602 = vector.extract_strided_slice %569 {offsets = [0, 40], sizes = [16, 8], strides = [1, 1]} : vector<16x96xf32> to vector<16x8xf32>
    %603 = arith.truncf %602 : vector<16x8xf32> to vector<16x8xbf16>
    %604 = vector.extract_strided_slice %569 {offsets = [0, 72], sizes = [16, 8], strides = [1, 1]} : vector<16x96xf32> to vector<16x8xf32>
    %605 = arith.truncf %604 : vector<16x8xf32> to vector<16x8xbf16>
    %cst_144 = arith.constant dense<0.000000e+00> : vector<16x16xf32>
    %606 = tpu.matmul %601, %603, %cst_144 {dimension_numbers = #tpu.dot_dimension_numbers<[1], [1], [0], [0], [0, 0, 1, 0], [], []>} : vector<16x8xbf16>, vector<16x8xbf16>, vector<16x16xf32> -> vector<16x16xf32>
    %cst_145 = arith.constant 0.353553385 : f32
    %607 = vector.broadcast %cst_145 : f32 to vector<16x16xf32>
    %608 = arith.mulf %606, %607 : vector<16x16xf32>
    %609 = vector.broadcast %7 : vector<1x16xf32> to vector<16x16xf32>
    %610 = arith.subf %608, %609 : vector<16x16xf32>
    %cst_146 = arith.constant dense<0xFF800000> : vector<16xf32>
    %611 = vector.multi_reduction <maximumf>, %610, %cst_146 [1] : vector<16x16xf32> to vector<16xf32>
    %612 = vector.shape_cast %611 : vector<16xf32> to vector<16x1xf32>
    %613 = vector.broadcast %612 : vector<16x1xf32> to vector<16x16xf32>
    %614 = arith.subf %610, %613 : vector<16x16xf32>
    %615 = math.exp %614 : vector<16x16xf32>
    %cst_147 = arith.constant dense<0.000000e+00> : vector<16xf32>
    %616 = vector.multi_reduction <add>, %615, %cst_147 [1] : vector<16x16xf32> to vector<16xf32>
    %617 = vector.shape_cast %616 : vector<16xf32> to vector<16x1xf32>
    %618 = tpu.reciprocal %617 {approx = true} : vector<16x1xf32> -> vector<16x1xf32>
    %619 = vector.broadcast %618 : vector<16x1xf32> to vector<16x16xf32>
    %620 = arith.mulf %615, %619 : vector<16x16xf32>
    %621 = arith.truncf %620 : vector<16x16xf32> to vector<16x16xbf16>
    %cst_148 = arith.constant dense<0.000000e+00> : vector<16x8xf32>
    %622 = tpu.matmul %621, %605, %cst_148 {dimension_numbers = #tpu.dot_dimension_numbers<[1], [0], [0], [1], [0, 0, 1, 1], [], []>} : vector<16x16xbf16>, vector<16x8xbf16>, vector<16x8xf32> -> vector<16x8xf32>
    %623 = arith.truncf %622 : vector<16x8xf32> to vector<16x8xbf16>
    %624 = vector.extract_strided_slice %571 {offsets = [8, 0], sizes = [8, 32], strides = [1, 1]} : vector<32x32xbf16> to vector<8x32xbf16>
    %cst_149 = arith.constant dense<0.000000e+00> : vector<16x32xf32>
    %625 = tpu.matmul %623, %624, %cst_149 {dimension_numbers = #tpu.dot_dimension_numbers<[1], [0], [0], [1], [0, 0, 1, 1], [], []>} : vector<16x8xbf16>, vector<8x32xbf16>, vector<16x32xf32> -> vector<16x32xf32>
    %626 = arith.addf %599, %625 : vector<16x32xf32>
    %627 = vector.extract_strided_slice %569 {offsets = [0, 16], sizes = [16, 8], strides = [1, 1]} : vector<16x96xf32> to vector<16x8xf32>
    %628 = arith.truncf %627 : vector<16x8xf32> to vector<16x8xbf16>
    %629 = vector.extract_strided_slice %569 {offsets = [0, 48], sizes = [16, 8], strides = [1, 1]} : vector<16x96xf32> to vector<16x8xf32>
    %630 = arith.truncf %629 : vector<16x8xf32> to vector<16x8xbf16>
    %631 = vector.extract_strided_slice %569 {offsets = [0, 80], sizes = [16, 8], strides = [1, 1]} : vector<16x96xf32> to vector<16x8xf32>
    %632 = arith.truncf %631 : vector<16x8xf32> to vector<16x8xbf16>
    %cst_150 = arith.constant dense<0.000000e+00> : vector<16x16xf32>
    %633 = tpu.matmul %628, %630, %cst_150 {dimension_numbers = #tpu.dot_dimension_numbers<[1], [1], [0], [0], [0, 0, 1, 0], [], []>} : vector<16x8xbf16>, vector<16x8xbf16>, vector<16x16xf32> -> vector<16x16xf32>
    %cst_151 = arith.constant 0.353553385 : f32
    %634 = vector.broadcast %cst_151 : f32 to vector<16x16xf32>
    %635 = arith.mulf %633, %634 : vector<16x16xf32>
    %636 = vector.broadcast %7 : vector<1x16xf32> to vector<16x16xf32>
    %637 = arith.subf %635, %636 : vector<16x16xf32>
    %cst_152 = arith.constant dense<0xFF800000> : vector<16xf32>
    %638 = vector.multi_reduction <maximumf>, %637, %cst_152 [1] : vector<16x16xf32> to vector<16xf32>
    %639 = vector.shape_cast %638 : vector<16xf32> to vector<16x1xf32>
    %640 = vector.broadcast %639 : vector<16x1xf32> to vector<16x16xf32>
    %641 = arith.subf %637, %640 : vector<16x16xf32>
    %642 = math.exp %641 : vector<16x16xf32>
    %cst_153 = arith.constant dense<0.000000e+00> : vector<16xf32>
    %643 = vector.multi_reduction <add>, %642, %cst_153 [1] : vector<16x16xf32> to vector<16xf32>
    %644 = vector.shape_cast %643 : vector<16xf32> to vector<16x1xf32>
    %645 = tpu.reciprocal %644 {approx = true} : vector<16x1xf32> -> vector<16x1xf32>
    %646 = vector.broadcast %645 : vector<16x1xf32> to vector<16x16xf32>
    %647 = arith.mulf %642, %646 : vector<16x16xf32>
    %648 = arith.truncf %647 : vector<16x16xf32> to vector<16x16xbf16>
    %cst_154 = arith.constant dense<0.000000e+00> : vector<16x8xf32>
    %649 = tpu.matmul %648, %632, %cst_154 {dimension_numbers = #tpu.dot_dimension_numbers<[1], [0], [0], [1], [0, 0, 1, 1], [], []>} : vector<16x16xbf16>, vector<16x8xbf16>, vector<16x8xf32> -> vector<16x8xf32>
    %650 = arith.truncf %649 : vector<16x8xf32> to vector<16x8xbf16>
    %651 = vector.extract_strided_slice %571 {offsets = [16, 0], sizes = [8, 32], strides = [1, 1]} : vector<32x32xbf16> to vector<8x32xbf16>
    %cst_155 = arith.constant dense<0.000000e+00> : vector<16x32xf32>
    %652 = tpu.matmul %650, %651, %cst_155 {dimension_numbers = #tpu.dot_dimension_numbers<[1], [0], [0], [1], [0, 0, 1, 1], [], []>} : vector<16x8xbf16>, vector<8x32xbf16>, vector<16x32xf32> -> vector<16x32xf32>
    %653 = arith.addf %626, %652 : vector<16x32xf32>
    %654 = vector.extract_strided_slice %569 {offsets = [0, 24], sizes = [16, 8], strides = [1, 1]} : vector<16x96xf32> to vector<16x8xf32>
    %655 = arith.truncf %654 : vector<16x8xf32> to vector<16x8xbf16>
    %656 = vector.extract_strided_slice %569 {offsets = [0, 56], sizes = [16, 8], strides = [1, 1]} : vector<16x96xf32> to vector<16x8xf32>
    %657 = arith.truncf %656 : vector<16x8xf32> to vector<16x8xbf16>
    %658 = vector.extract_strided_slice %569 {offsets = [0, 88], sizes = [16, 8], strides = [1, 1]} : vector<16x96xf32> to vector<16x8xf32>
    %659 = arith.truncf %658 : vector<16x8xf32> to vector<16x8xbf16>
    %cst_156 = arith.constant dense<0.000000e+00> : vector<16x16xf32>
    %660 = tpu.matmul %655, %657, %cst_156 {dimension_numbers = #tpu.dot_dimension_numbers<[1], [1], [0], [0], [0, 0, 1, 0], [], []>} : vector<16x8xbf16>, vector<16x8xbf16>, vector<16x16xf32> -> vector<16x16xf32>
    %cst_157 = arith.constant 0.353553385 : f32
    %661 = vector.broadcast %cst_157 : f32 to vector<16x16xf32>
    %662 = arith.mulf %660, %661 : vector<16x16xf32>
    %663 = vector.broadcast %7 : vector<1x16xf32> to vector<16x16xf32>
    %664 = arith.subf %662, %663 : vector<16x16xf32>
    %cst_158 = arith.constant dense<0xFF800000> : vector<16xf32>
    %665 = vector.multi_reduction <maximumf>, %664, %cst_158 [1] : vector<16x16xf32> to vector<16xf32>
    %666 = vector.shape_cast %665 : vector<16xf32> to vector<16x1xf32>
    %667 = vector.broadcast %666 : vector<16x1xf32> to vector<16x16xf32>
    %668 = arith.subf %664, %667 : vector<16x16xf32>
    %669 = math.exp %668 : vector<16x16xf32>
    %cst_159 = arith.constant dense<0.000000e+00> : vector<16xf32>
    %670 = vector.multi_reduction <add>, %669, %cst_159 [1] : vector<16x16xf32> to vector<16xf32>
    %671 = vector.shape_cast %670 : vector<16xf32> to vector<16x1xf32>
    %672 = tpu.reciprocal %671 {approx = true} : vector<16x1xf32> -> vector<16x1xf32>
    %673 = vector.broadcast %672 : vector<16x1xf32> to vector<16x16xf32>
    %674 = arith.mulf %669, %673 : vector<16x16xf32>
    %675 = arith.truncf %674 : vector<16x16xf32> to vector<16x16xbf16>
    %cst_160 = arith.constant dense<0.000000e+00> : vector<16x8xf32>
    %676 = tpu.matmul %675, %659, %cst_160 {dimension_numbers = #tpu.dot_dimension_numbers<[1], [0], [0], [1], [0, 0, 1, 1], [], []>} : vector<16x16xbf16>, vector<16x8xbf16>, vector<16x8xf32> -> vector<16x8xf32>
    %677 = arith.truncf %676 : vector<16x8xf32> to vector<16x8xbf16>
    %678 = vector.extract_strided_slice %571 {offsets = [24, 0], sizes = [8, 32], strides = [1, 1]} : vector<32x32xbf16> to vector<8x32xbf16>
    %cst_161 = arith.constant dense<0.000000e+00> : vector<16x32xf32>
    %679 = tpu.matmul %677, %678, %cst_161 {dimension_numbers = #tpu.dot_dimension_numbers<[1], [0], [0], [1], [0, 0, 1, 1], [], []>} : vector<16x8xbf16>, vector<8x32xbf16>, vector<16x32xf32> -> vector<16x32xf32>
    %680 = arith.addf %653, %679 : vector<16x32xf32>
    %681 = vector.extract_strided_slice %369 {offsets = [21, 0], sizes = [1, 32], strides = [1, 1]} : vector<26x32xf32> to vector<1x32xf32>
    %682 = vector.broadcast %681 : vector<1x32xf32> to vector<16x32xf32>
    %683 = arith.addf %680, %682 : vector<16x32xf32>
    %684 = arith.addf %683, %537 : vector<16x32xf32>
    %685 = vector.extract_strided_slice %369 {offsets = [22, 0], sizes = [1, 32], strides = [1, 1]} : vector<26x32xf32> to vector<1x32xf32>
    %686 = vector.extract_strided_slice %369 {offsets = [23, 0], sizes = [1, 32], strides = [1, 1]} : vector<26x32xf32> to vector<1x32xf32>
    %cst_162 = arith.constant dense<0.000000e+00> : vector<16xf32>
    %687 = vector.multi_reduction <add>, %684, %cst_162 [1] : vector<16x32xf32> to vector<16xf32>
    %688 = vector.shape_cast %687 : vector<16xf32> to vector<16x1xf32>
    %cst_163 = arith.constant 3.200000e+01 : f32
    %689 = vector.broadcast %cst_163 : f32 to vector<16x1xf32>
    %690 = arith.divf %688, %689 : vector<16x1xf32>
    %691 = vector.broadcast %690 : vector<16x1xf32> to vector<16x32xf32>
    %692 = arith.subf %684, %691 : vector<16x32xf32>
    %693 = arith.mulf %692, %692 : vector<16x32xf32>
    %cst_164 = arith.constant dense<0.000000e+00> : vector<16xf32>
    %694 = vector.multi_reduction <add>, %693, %cst_164 [1] : vector<16x32xf32> to vector<16xf32>
    %695 = vector.shape_cast %694 : vector<16xf32> to vector<16x1xf32>
    %cst_165 = arith.constant 3.200000e+01 : f32
    %696 = vector.broadcast %cst_165 : f32 to vector<16x1xf32>
    %697 = arith.divf %695, %696 : vector<16x1xf32>
    %698 = vector.broadcast %690 : vector<16x1xf32> to vector<16x32xf32>
    %699 = arith.subf %684, %698 : vector<16x32xf32>
    %cst_166 = arith.constant 9.99999974E-6 : f32
    %700 = vector.broadcast %cst_166 : f32 to vector<16x1xf32>
    %701 = arith.addf %697, %700 : vector<16x1xf32>
    %702 = math.rsqrt %701 : vector<16x1xf32>
    %703 = vector.broadcast %702 : vector<16x1xf32> to vector<16x32xf32>
    %704 = arith.mulf %699, %703 : vector<16x32xf32>
    %705 = vector.broadcast %685 : vector<1x32xf32> to vector<16x32xf32>
    %706 = arith.mulf %704, %705 : vector<16x32xf32>
    %707 = vector.broadcast %686 : vector<1x32xf32> to vector<16x32xf32>
    %708 = arith.addf %706, %707 : vector<16x32xf32>
    %709 = arith.truncf %708 : vector<16x32xf32> to vector<16x32xbf16>
    %710 = vector.extract_strided_slice %2 {offsets = [3, 0, 0], sizes = [1, 32, 32], strides = [1, 1, 1]} : vector<5x32x32xbf16> to vector<1x32x32xbf16>
    %711 = vector.shape_cast %710 : vector<1x32x32xbf16> to vector<32x32xbf16>
    %cst_167 = arith.constant dense<0.000000e+00> : vector<16x32xf32>
    %712 = tpu.matmul %709, %711, %cst_167 {dimension_numbers = #tpu.dot_dimension_numbers<[1], [0], [0], [1], [0, 0, 1, 1], [], []>} : vector<16x32xbf16>, vector<32x32xbf16>, vector<16x32xf32> -> vector<16x32xf32>
    %713 = vector.extract_strided_slice %369 {offsets = [24, 0], sizes = [1, 32], strides = [1, 1]} : vector<26x32xf32> to vector<1x32xf32>
    %714 = vector.broadcast %713 : vector<1x32xf32> to vector<16x32xf32>
    %715 = arith.addf %712, %714 : vector<16x32xf32>
    %cst_168 = arith.constant 0.000000e+00 : f32
    %716 = vector.broadcast %cst_168 : f32 to vector<16x32xf32>
    %717 = arith.maximumf %715, %716 : vector<16x32xf32>
    %718 = arith.truncf %717 : vector<16x32xf32> to vector<16x32xbf16>
    %719 = vector.extract_strided_slice %2 {offsets = [4, 0, 0], sizes = [1, 32, 32], strides = [1, 1, 1]} : vector<5x32x32xbf16> to vector<1x32x32xbf16>
    %720 = vector.shape_cast %719 : vector<1x32x32xbf16> to vector<32x32xbf16>
    %cst_169 = arith.constant dense<0.000000e+00> : vector<16x32xf32>
    %721 = tpu.matmul %718, %720, %cst_169 {dimension_numbers = #tpu.dot_dimension_numbers<[1], [0], [0], [1], [0, 0, 1, 1], [], []>} : vector<16x32xbf16>, vector<32x32xbf16>, vector<16x32xf32> -> vector<16x32xf32>
    %722 = vector.extract_strided_slice %369 {offsets = [25, 0], sizes = [1, 32], strides = [1, 1]} : vector<26x32xf32> to vector<1x32xf32>
    %723 = vector.broadcast %722 : vector<1x32xf32> to vector<16x32xf32>
    %724 = arith.addf %721, %723 : vector<16x32xf32>
    %725 = arith.addf %724, %684 : vector<16x32xf32>
    %726 = tpu.iota {dimensions = array<i32: 0>} : vector<16x1xi32>
    %727 = vector.shape_cast %0 : vector<1x26x32xf32> to vector<26x32xf32>
    %728 = vector.shape_cast %1 : vector<1x32x96xbf16> to vector<32x96xbf16>
    %729 = arith.addf %725, %3 : vector<16x32xf32>
    %730 = vector.extract_strided_slice %727 {offsets = [0, 0], sizes = [1, 32], strides = [1, 1]} : vector<26x32xf32> to vector<1x32xf32>
    %731 = vector.extract_strided_slice %727 {offsets = [2, 0], sizes = [1, 32], strides = [1, 1]} : vector<26x32xf32> to vector<1x32xf32>
    %cst_170 = arith.constant dense<0.000000e+00> : vector<16xf32>
    %732 = vector.multi_reduction <add>, %729, %cst_170 [1] : vector<16x32xf32> to vector<16xf32>
    %733 = vector.shape_cast %732 : vector<16xf32> to vector<16x1xf32>
    %cst_171 = arith.constant 3.200000e+01 : f32
    %734 = vector.broadcast %cst_171 : f32 to vector<16x1xf32>
    %735 = arith.divf %733, %734 : vector<16x1xf32>
    %736 = vector.broadcast %735 : vector<16x1xf32> to vector<16x32xf32>
    %737 = arith.subf %729, %736 : vector<16x32xf32>
    %738 = arith.mulf %737, %737 : vector<16x32xf32>
    %cst_172 = arith.constant dense<0.000000e+00> : vector<16xf32>
    %739 = vector.multi_reduction <add>, %738, %cst_172 [1] : vector<16x32xf32> to vector<16xf32>
    %740 = vector.shape_cast %739 : vector<16xf32> to vector<16x1xf32>
    %cst_173 = arith.constant 3.200000e+01 : f32
    %741 = vector.broadcast %cst_173 : f32 to vector<16x1xf32>
    %742 = arith.divf %740, %741 : vector<16x1xf32>
    %743 = vector.broadcast %735 : vector<16x1xf32> to vector<16x32xf32>
    %744 = arith.subf %729, %743 : vector<16x32xf32>
    %cst_174 = arith.constant 9.99999974E-6 : f32
    %745 = vector.broadcast %cst_174 : f32 to vector<16x1xf32>
    %746 = arith.addf %742, %745 : vector<16x1xf32>
    %747 = math.rsqrt %746 : vector<16x1xf32>
    %748 = vector.broadcast %747 : vector<16x1xf32> to vector<16x32xf32>
    %749 = arith.mulf %744, %748 : vector<16x32xf32>
    %750 = vector.broadcast %730 : vector<1x32xf32> to vector<16x32xf32>
    %751 = arith.mulf %749, %750 : vector<16x32xf32>
    %752 = vector.broadcast %731 : vector<1x32xf32> to vector<16x32xf32>
    %753 = arith.addf %751, %752 : vector<16x32xf32>
    %cst_175 = arith.constant 0.000000e+00 : f32
    %754 = vector.broadcast %cst_175 : f32 to vector<16x32xf32>
    %755 = vector.extract_strided_slice %727 {offsets = [4, 0], sizes = [1, 32], strides = [1, 1]} : vector<26x32xf32> to vector<1x32xf32>
    %c2_i32_176 = arith.constant 2 : i32
    %756 = tpu.dynamic_rotate %753 by %c2_i32_176 dim 0 : vector<16x32xf32>, i32 -> vector<16x32xf32>
    %c2_i32_177 = arith.constant 2 : i32
    %757 = vector.broadcast %c2_i32_177 : i32 to vector<16x1xi32>
    %758 = arith.cmpi sge, %726, %757 : vector<16x1xi32>
    %cst_178 = arith.constant 0.000000e+00 : f32
    %759 = vector.shape_cast %758 : vector<16x1xi1> to vector<16x1xi1>
    %760 = vector.broadcast %759 : vector<16x1xi1> to vector<16x32xi1>
    %761 = vector.broadcast %cst_178 : f32 to vector<16x32xf32>
    %762 = arith.select %760, %756, %761 : vector<16x32xi1>, vector<16x32xf32>
    %763 = vector.broadcast %755 : vector<1x32xf32> to vector<16x32xf32>
    %764 = arith.mulf %762, %763 : vector<16x32xf32>
    %765 = arith.addf %754, %764 : vector<16x32xf32>
    %766 = vector.extract_strided_slice %727 {offsets = [5, 0], sizes = [1, 32], strides = [1, 1]} : vector<26x32xf32> to vector<1x32xf32>
    %c1_i32_179 = arith.constant 1 : i32
    %767 = tpu.dynamic_rotate %753 by %c1_i32_179 dim 0 : vector<16x32xf32>, i32 -> vector<16x32xf32>
    %c1_i32_180 = arith.constant 1 : i32
    %768 = vector.broadcast %c1_i32_180 : i32 to vector<16x1xi32>
    %769 = arith.cmpi sge, %726, %768 : vector<16x1xi32>
    %cst_181 = arith.constant 0.000000e+00 : f32
    %770 = vector.shape_cast %769 : vector<16x1xi1> to vector<16x1xi1>
    %771 = vector.broadcast %770 : vector<16x1xi1> to vector<16x32xi1>
    %772 = vector.broadcast %cst_181 : f32 to vector<16x32xf32>
    %773 = arith.select %771, %767, %772 : vector<16x32xi1>, vector<16x32xf32>
    %774 = vector.broadcast %766 : vector<1x32xf32> to vector<16x32xf32>
    %775 = arith.mulf %773, %774 : vector<16x32xf32>
    %776 = arith.addf %765, %775 : vector<16x32xf32>
    %777 = vector.extract_strided_slice %727 {offsets = [6, 0], sizes = [1, 32], strides = [1, 1]} : vector<26x32xf32> to vector<1x32xf32>
    %778 = vector.broadcast %777 : vector<1x32xf32> to vector<16x32xf32>
    %779 = arith.mulf %753, %778 : vector<16x32xf32>
    %780 = arith.addf %776, %779 : vector<16x32xf32>
    %781 = vector.extract_strided_slice %727 {offsets = [7, 0], sizes = [1, 32], strides = [1, 1]} : vector<26x32xf32> to vector<1x32xf32>
    %c15_i32_182 = arith.constant 15 : i32
    %782 = tpu.dynamic_rotate %753 by %c15_i32_182 dim 0 : vector<16x32xf32>, i32 -> vector<16x32xf32>
    %c15_i32_183 = arith.constant 15 : i32
    %783 = vector.broadcast %c15_i32_183 : i32 to vector<16x1xi32>
    %784 = arith.cmpi slt, %726, %783 : vector<16x1xi32>
    %cst_184 = arith.constant 0.000000e+00 : f32
    %785 = vector.shape_cast %784 : vector<16x1xi1> to vector<16x1xi1>
    %786 = vector.broadcast %785 : vector<16x1xi1> to vector<16x32xi1>
    %787 = vector.broadcast %cst_184 : f32 to vector<16x32xf32>
    %788 = arith.select %786, %782, %787 : vector<16x32xi1>, vector<16x32xf32>
    %789 = vector.broadcast %781 : vector<1x32xf32> to vector<16x32xf32>
    %790 = arith.mulf %788, %789 : vector<16x32xf32>
    %791 = arith.addf %780, %790 : vector<16x32xf32>
    %792 = vector.extract_strided_slice %727 {offsets = [8, 0], sizes = [1, 32], strides = [1, 1]} : vector<26x32xf32> to vector<1x32xf32>
    %c14_i32_185 = arith.constant 14 : i32
    %793 = tpu.dynamic_rotate %753 by %c14_i32_185 dim 0 : vector<16x32xf32>, i32 -> vector<16x32xf32>
    %c14_i32_186 = arith.constant 14 : i32
    %794 = vector.broadcast %c14_i32_186 : i32 to vector<16x1xi32>
    %795 = arith.cmpi slt, %726, %794 : vector<16x1xi32>
    %cst_187 = arith.constant 0.000000e+00 : f32
    %796 = vector.shape_cast %795 : vector<16x1xi1> to vector<16x1xi1>
    %797 = vector.broadcast %796 : vector<16x1xi1> to vector<16x32xi1>
    %798 = vector.broadcast %cst_187 : f32 to vector<16x32xf32>
    %799 = arith.select %797, %793, %798 : vector<16x32xi1>, vector<16x32xf32>
    %800 = vector.broadcast %792 : vector<1x32xf32> to vector<16x32xf32>
    %801 = arith.mulf %799, %800 : vector<16x32xf32>
    %802 = arith.addf %791, %801 : vector<16x32xf32>
    %803 = arith.truncf %802 : vector<16x32xf32> to vector<16x32xbf16>
    %804 = vector.extract_strided_slice %2 {offsets = [0, 0, 0], sizes = [1, 32, 32], strides = [1, 1, 1]} : vector<5x32x32xbf16> to vector<1x32x32xbf16>
    %805 = vector.shape_cast %804 : vector<1x32x32xbf16> to vector<32x32xbf16>
    %cst_188 = arith.constant dense<0.000000e+00> : vector<16x32xf32>
    %806 = tpu.matmul %803, %805, %cst_188 {dimension_numbers = #tpu.dot_dimension_numbers<[1], [0], [0], [1], [0, 0, 1, 1], [], []>} : vector<16x32xbf16>, vector<32x32xbf16>, vector<16x32xf32> -> vector<16x32xf32>
    %807 = vector.extract_strided_slice %727 {offsets = [14, 0], sizes = [1, 32], strides = [1, 1]} : vector<26x32xf32> to vector<1x32xf32>
    %808 = vector.broadcast %807 : vector<1x32xf32> to vector<16x32xf32>
    %809 = arith.addf %806, %808 : vector<16x32xf32>
    %cst_189 = arith.constant 0.000000e+00 : f32
    %810 = vector.broadcast %cst_189 : f32 to vector<16x32xf32>
    %811 = arith.maximumf %809, %810 : vector<16x32xf32>
    %812 = arith.addf %811, %729 : vector<16x32xf32>
    %813 = vector.extract_strided_slice %727 {offsets = [1, 0], sizes = [1, 32], strides = [1, 1]} : vector<26x32xf32> to vector<1x32xf32>
    %814 = vector.extract_strided_slice %727 {offsets = [3, 0], sizes = [1, 32], strides = [1, 1]} : vector<26x32xf32> to vector<1x32xf32>
    %cst_190 = arith.constant dense<0.000000e+00> : vector<16xf32>
    %815 = vector.multi_reduction <add>, %812, %cst_190 [1] : vector<16x32xf32> to vector<16xf32>
    %816 = vector.shape_cast %815 : vector<16xf32> to vector<16x1xf32>
    %cst_191 = arith.constant 3.200000e+01 : f32
    %817 = vector.broadcast %cst_191 : f32 to vector<16x1xf32>
    %818 = arith.divf %816, %817 : vector<16x1xf32>
    %819 = vector.broadcast %818 : vector<16x1xf32> to vector<16x32xf32>
    %820 = arith.subf %812, %819 : vector<16x32xf32>
    %821 = arith.mulf %820, %820 : vector<16x32xf32>
    %cst_192 = arith.constant dense<0.000000e+00> : vector<16xf32>
    %822 = vector.multi_reduction <add>, %821, %cst_192 [1] : vector<16x32xf32> to vector<16xf32>
    %823 = vector.shape_cast %822 : vector<16xf32> to vector<16x1xf32>
    %cst_193 = arith.constant 3.200000e+01 : f32
    %824 = vector.broadcast %cst_193 : f32 to vector<16x1xf32>
    %825 = arith.divf %823, %824 : vector<16x1xf32>
    %826 = vector.broadcast %818 : vector<16x1xf32> to vector<16x32xf32>
    %827 = arith.subf %812, %826 : vector<16x32xf32>
    %cst_194 = arith.constant 9.99999974E-6 : f32
    %828 = vector.broadcast %cst_194 : f32 to vector<16x1xf32>
    %829 = arith.addf %825, %828 : vector<16x1xf32>
    %830 = math.rsqrt %829 : vector<16x1xf32>
    %831 = vector.broadcast %830 : vector<16x1xf32> to vector<16x32xf32>
    %832 = arith.mulf %827, %831 : vector<16x32xf32>
    %833 = vector.broadcast %813 : vector<1x32xf32> to vector<16x32xf32>
    %834 = arith.mulf %832, %833 : vector<16x32xf32>
    %835 = vector.broadcast %814 : vector<1x32xf32> to vector<16x32xf32>
    %836 = arith.addf %834, %835 : vector<16x32xf32>
    %cst_195 = arith.constant 0.000000e+00 : f32
    %837 = vector.broadcast %cst_195 : f32 to vector<16x32xf32>
    %838 = vector.extract_strided_slice %727 {offsets = [9, 0], sizes = [1, 32], strides = [1, 1]} : vector<26x32xf32> to vector<1x32xf32>
    %c2_i32_196 = arith.constant 2 : i32
    %839 = tpu.dynamic_rotate %836 by %c2_i32_196 dim 0 : vector<16x32xf32>, i32 -> vector<16x32xf32>
    %c2_i32_197 = arith.constant 2 : i32
    %840 = vector.broadcast %c2_i32_197 : i32 to vector<16x1xi32>
    %841 = arith.cmpi sge, %726, %840 : vector<16x1xi32>
    %cst_198 = arith.constant 0.000000e+00 : f32
    %842 = vector.shape_cast %841 : vector<16x1xi1> to vector<16x1xi1>
    %843 = vector.broadcast %842 : vector<16x1xi1> to vector<16x32xi1>
    %844 = vector.broadcast %cst_198 : f32 to vector<16x32xf32>
    %845 = arith.select %843, %839, %844 : vector<16x32xi1>, vector<16x32xf32>
    %846 = vector.broadcast %838 : vector<1x32xf32> to vector<16x32xf32>
    %847 = arith.mulf %845, %846 : vector<16x32xf32>
    %848 = arith.addf %837, %847 : vector<16x32xf32>
    %849 = vector.extract_strided_slice %727 {offsets = [10, 0], sizes = [1, 32], strides = [1, 1]} : vector<26x32xf32> to vector<1x32xf32>
    %c1_i32_199 = arith.constant 1 : i32
    %850 = tpu.dynamic_rotate %836 by %c1_i32_199 dim 0 : vector<16x32xf32>, i32 -> vector<16x32xf32>
    %c1_i32_200 = arith.constant 1 : i32
    %851 = vector.broadcast %c1_i32_200 : i32 to vector<16x1xi32>
    %852 = arith.cmpi sge, %726, %851 : vector<16x1xi32>
    %cst_201 = arith.constant 0.000000e+00 : f32
    %853 = vector.shape_cast %852 : vector<16x1xi1> to vector<16x1xi1>
    %854 = vector.broadcast %853 : vector<16x1xi1> to vector<16x32xi1>
    %855 = vector.broadcast %cst_201 : f32 to vector<16x32xf32>
    %856 = arith.select %854, %850, %855 : vector<16x32xi1>, vector<16x32xf32>
    %857 = vector.broadcast %849 : vector<1x32xf32> to vector<16x32xf32>
    %858 = arith.mulf %856, %857 : vector<16x32xf32>
    %859 = arith.addf %848, %858 : vector<16x32xf32>
    %860 = vector.extract_strided_slice %727 {offsets = [11, 0], sizes = [1, 32], strides = [1, 1]} : vector<26x32xf32> to vector<1x32xf32>
    %861 = vector.broadcast %860 : vector<1x32xf32> to vector<16x32xf32>
    %862 = arith.mulf %836, %861 : vector<16x32xf32>
    %863 = arith.addf %859, %862 : vector<16x32xf32>
    %864 = vector.extract_strided_slice %727 {offsets = [12, 0], sizes = [1, 32], strides = [1, 1]} : vector<26x32xf32> to vector<1x32xf32>
    %c15_i32_202 = arith.constant 15 : i32
    %865 = tpu.dynamic_rotate %836 by %c15_i32_202 dim 0 : vector<16x32xf32>, i32 -> vector<16x32xf32>
    %c15_i32_203 = arith.constant 15 : i32
    %866 = vector.broadcast %c15_i32_203 : i32 to vector<16x1xi32>
    %867 = arith.cmpi slt, %726, %866 : vector<16x1xi32>
    %cst_204 = arith.constant 0.000000e+00 : f32
    %868 = vector.shape_cast %867 : vector<16x1xi1> to vector<16x1xi1>
    %869 = vector.broadcast %868 : vector<16x1xi1> to vector<16x32xi1>
    %870 = vector.broadcast %cst_204 : f32 to vector<16x32xf32>
    %871 = arith.select %869, %865, %870 : vector<16x32xi1>, vector<16x32xf32>
    %872 = vector.broadcast %864 : vector<1x32xf32> to vector<16x32xf32>
    %873 = arith.mulf %871, %872 : vector<16x32xf32>
    %874 = arith.addf %863, %873 : vector<16x32xf32>
    %875 = vector.extract_strided_slice %727 {offsets = [13, 0], sizes = [1, 32], strides = [1, 1]} : vector<26x32xf32> to vector<1x32xf32>
    %c14_i32_205 = arith.constant 14 : i32
    %876 = tpu.dynamic_rotate %836 by %c14_i32_205 dim 0 : vector<16x32xf32>, i32 -> vector<16x32xf32>
    %c14_i32_206 = arith.constant 14 : i32
    %877 = vector.broadcast %c14_i32_206 : i32 to vector<16x1xi32>
    %878 = arith.cmpi slt, %726, %877 : vector<16x1xi32>
    %cst_207 = arith.constant 0.000000e+00 : f32
    %879 = vector.shape_cast %878 : vector<16x1xi1> to vector<16x1xi1>
    %880 = vector.broadcast %879 : vector<16x1xi1> to vector<16x32xi1>
    %881 = vector.broadcast %cst_207 : f32 to vector<16x32xf32>
    %882 = arith.select %880, %876, %881 : vector<16x32xi1>, vector<16x32xf32>
    %883 = vector.broadcast %875 : vector<1x32xf32> to vector<16x32xf32>
    %884 = arith.mulf %882, %883 : vector<16x32xf32>
    %885 = arith.addf %874, %884 : vector<16x32xf32>
    %886 = arith.truncf %885 : vector<16x32xf32> to vector<16x32xbf16>
    %887 = vector.extract_strided_slice %2 {offsets = [1, 0, 0], sizes = [1, 32, 32], strides = [1, 1, 1]} : vector<5x32x32xbf16> to vector<1x32x32xbf16>
    %888 = vector.shape_cast %887 : vector<1x32x32xbf16> to vector<32x32xbf16>
    %cst_208 = arith.constant dense<0.000000e+00> : vector<16x32xf32>
    %889 = tpu.matmul %886, %888, %cst_208 {dimension_numbers = #tpu.dot_dimension_numbers<[1], [0], [0], [1], [0, 0, 1, 1], [], []>} : vector<16x32xbf16>, vector<32x32xbf16>, vector<16x32xf32> -> vector<16x32xf32>
    %890 = vector.extract_strided_slice %727 {offsets = [15, 0], sizes = [1, 32], strides = [1, 1]} : vector<26x32xf32> to vector<1x32xf32>
    %891 = vector.broadcast %890 : vector<1x32xf32> to vector<16x32xf32>
    %892 = arith.addf %889, %891 : vector<16x32xf32>
    %cst_209 = arith.constant 0.000000e+00 : f32
    %893 = vector.broadcast %cst_209 : f32 to vector<16x32xf32>
    %894 = arith.maximumf %892, %893 : vector<16x32xf32>
    %895 = arith.addf %894, %812 : vector<16x32xf32>
    %896 = vector.extract_strided_slice %727 {offsets = [16, 0], sizes = [1, 32], strides = [1, 1]} : vector<26x32xf32> to vector<1x32xf32>
    %897 = vector.extract_strided_slice %727 {offsets = [17, 0], sizes = [1, 32], strides = [1, 1]} : vector<26x32xf32> to vector<1x32xf32>
    %cst_210 = arith.constant dense<0.000000e+00> : vector<16xf32>
    %898 = vector.multi_reduction <add>, %895, %cst_210 [1] : vector<16x32xf32> to vector<16xf32>
    %899 = vector.shape_cast %898 : vector<16xf32> to vector<16x1xf32>
    %cst_211 = arith.constant 3.200000e+01 : f32
    %900 = vector.broadcast %cst_211 : f32 to vector<16x1xf32>
    %901 = arith.divf %899, %900 : vector<16x1xf32>
    %902 = vector.broadcast %901 : vector<16x1xf32> to vector<16x32xf32>
    %903 = arith.subf %895, %902 : vector<16x32xf32>
    %904 = arith.mulf %903, %903 : vector<16x32xf32>
    %cst_212 = arith.constant dense<0.000000e+00> : vector<16xf32>
    %905 = vector.multi_reduction <add>, %904, %cst_212 [1] : vector<16x32xf32> to vector<16xf32>
    %906 = vector.shape_cast %905 : vector<16xf32> to vector<16x1xf32>
    %cst_213 = arith.constant 3.200000e+01 : f32
    %907 = vector.broadcast %cst_213 : f32 to vector<16x1xf32>
    %908 = arith.divf %906, %907 : vector<16x1xf32>
    %909 = vector.broadcast %901 : vector<16x1xf32> to vector<16x32xf32>
    %910 = arith.subf %895, %909 : vector<16x32xf32>
    %cst_214 = arith.constant 9.99999974E-6 : f32
    %911 = vector.broadcast %cst_214 : f32 to vector<16x1xf32>
    %912 = arith.addf %908, %911 : vector<16x1xf32>
    %913 = math.rsqrt %912 : vector<16x1xf32>
    %914 = vector.broadcast %913 : vector<16x1xf32> to vector<16x32xf32>
    %915 = arith.mulf %910, %914 : vector<16x32xf32>
    %916 = vector.broadcast %896 : vector<1x32xf32> to vector<16x32xf32>
    %917 = arith.mulf %915, %916 : vector<16x32xf32>
    %918 = vector.broadcast %897 : vector<1x32xf32> to vector<16x32xf32>
    %919 = arith.addf %917, %918 : vector<16x32xf32>
    %920 = vector.extract_strided_slice %727 {offsets = [18, 0], sizes = [1, 32], strides = [1, 1]} : vector<26x32xf32> to vector<1x32xf32>
    %921 = vector.extract_strided_slice %727 {offsets = [19, 0], sizes = [1, 32], strides = [1, 1]} : vector<26x32xf32> to vector<1x32xf32>
    %922 = vector.extract_strided_slice %727 {offsets = [20, 0], sizes = [1, 32], strides = [1, 1]} : vector<26x32xf32> to vector<1x32xf32>
    %923 = tpu.concatenate %920, %921, %922 in 1 : vector<1x32xf32>, vector<1x32xf32>, vector<1x32xf32> -> vector<1x96xf32>
    %924 = arith.truncf %919 : vector<16x32xf32> to vector<16x32xbf16>
    %cst_215 = arith.constant dense<0.000000e+00> : vector<16x96xf32>
    %925 = tpu.matmul %924, %728, %cst_215 {dimension_numbers = #tpu.dot_dimension_numbers<[1], [0], [0], [1], [0, 0, 1, 1], [], []>} : vector<16x32xbf16>, vector<32x96xbf16>, vector<16x96xf32> -> vector<16x96xf32>
    %926 = vector.broadcast %923 : vector<1x96xf32> to vector<16x96xf32>
    %927 = arith.addf %925, %926 : vector<16x96xf32>
    %928 = vector.extract_strided_slice %2 {offsets = [2, 0, 0], sizes = [1, 32, 32], strides = [1, 1, 1]} : vector<5x32x32xbf16> to vector<1x32x32xbf16>
    %929 = vector.shape_cast %928 : vector<1x32x32xbf16> to vector<32x32xbf16>
    %cst_216 = arith.constant 0.000000e+00 : f32
    %930 = vector.broadcast %cst_216 : f32 to vector<16x32xf32>
    %931 = vector.extract_strided_slice %927 {offsets = [0, 0], sizes = [16, 8], strides = [1, 1]} : vector<16x96xf32> to vector<16x8xf32>
    %932 = arith.truncf %931 : vector<16x8xf32> to vector<16x8xbf16>
    %933 = vector.extract_strided_slice %927 {offsets = [0, 32], sizes = [16, 8], strides = [1, 1]} : vector<16x96xf32> to vector<16x8xf32>
    %934 = arith.truncf %933 : vector<16x8xf32> to vector<16x8xbf16>
    %935 = vector.extract_strided_slice %927 {offsets = [0, 64], sizes = [16, 8], strides = [1, 1]} : vector<16x96xf32> to vector<16x8xf32>
    %936 = arith.truncf %935 : vector<16x8xf32> to vector<16x8xbf16>
    %cst_217 = arith.constant dense<0.000000e+00> : vector<16x16xf32>
    %937 = tpu.matmul %932, %934, %cst_217 {dimension_numbers = #tpu.dot_dimension_numbers<[1], [1], [0], [0], [0, 0, 1, 0], [], []>} : vector<16x8xbf16>, vector<16x8xbf16>, vector<16x16xf32> -> vector<16x16xf32>
    %cst_218 = arith.constant 0.353553385 : f32
    %938 = vector.broadcast %cst_218 : f32 to vector<16x16xf32>
    %939 = arith.mulf %937, %938 : vector<16x16xf32>
    %940 = vector.broadcast %7 : vector<1x16xf32> to vector<16x16xf32>
    %941 = arith.subf %939, %940 : vector<16x16xf32>
    %cst_219 = arith.constant dense<0xFF800000> : vector<16xf32>
    %942 = vector.multi_reduction <maximumf>, %941, %cst_219 [1] : vector<16x16xf32> to vector<16xf32>
    %943 = vector.shape_cast %942 : vector<16xf32> to vector<16x1xf32>
    %944 = vector.broadcast %943 : vector<16x1xf32> to vector<16x16xf32>
    %945 = arith.subf %941, %944 : vector<16x16xf32>
    %946 = math.exp %945 : vector<16x16xf32>
    %cst_220 = arith.constant dense<0.000000e+00> : vector<16xf32>
    %947 = vector.multi_reduction <add>, %946, %cst_220 [1] : vector<16x16xf32> to vector<16xf32>
    %948 = vector.shape_cast %947 : vector<16xf32> to vector<16x1xf32>
    %949 = tpu.reciprocal %948 {approx = true} : vector<16x1xf32> -> vector<16x1xf32>
    %950 = vector.broadcast %949 : vector<16x1xf32> to vector<16x16xf32>
    %951 = arith.mulf %946, %950 : vector<16x16xf32>
    %952 = arith.truncf %951 : vector<16x16xf32> to vector<16x16xbf16>
    %cst_221 = arith.constant dense<0.000000e+00> : vector<16x8xf32>
    %953 = tpu.matmul %952, %936, %cst_221 {dimension_numbers = #tpu.dot_dimension_numbers<[1], [0], [0], [1], [0, 0, 1, 1], [], []>} : vector<16x16xbf16>, vector<16x8xbf16>, vector<16x8xf32> -> vector<16x8xf32>
    %954 = arith.truncf %953 : vector<16x8xf32> to vector<16x8xbf16>
    %955 = vector.extract_strided_slice %929 {offsets = [0, 0], sizes = [8, 32], strides = [1, 1]} : vector<32x32xbf16> to vector<8x32xbf16>
    %cst_222 = arith.constant dense<0.000000e+00> : vector<16x32xf32>
    %956 = tpu.matmul %954, %955, %cst_222 {dimension_numbers = #tpu.dot_dimension_numbers<[1], [0], [0], [1], [0, 0, 1, 1], [], []>} : vector<16x8xbf16>, vector<8x32xbf16>, vector<16x32xf32> -> vector<16x32xf32>
    %957 = arith.addf %930, %956 : vector<16x32xf32>
    %958 = vector.extract_strided_slice %927 {offsets = [0, 8], sizes = [16, 8], strides = [1, 1]} : vector<16x96xf32> to vector<16x8xf32>
    %959 = arith.truncf %958 : vector<16x8xf32> to vector<16x8xbf16>
    %960 = vector.extract_strided_slice %927 {offsets = [0, 40], sizes = [16, 8], strides = [1, 1]} : vector<16x96xf32> to vector<16x8xf32>
    %961 = arith.truncf %960 : vector<16x8xf32> to vector<16x8xbf16>
    %962 = vector.extract_strided_slice %927 {offsets = [0, 72], sizes = [16, 8], strides = [1, 1]} : vector<16x96xf32> to vector<16x8xf32>
    %963 = arith.truncf %962 : vector<16x8xf32> to vector<16x8xbf16>
    %cst_223 = arith.constant dense<0.000000e+00> : vector<16x16xf32>
    %964 = tpu.matmul %959, %961, %cst_223 {dimension_numbers = #tpu.dot_dimension_numbers<[1], [1], [0], [0], [0, 0, 1, 0], [], []>} : vector<16x8xbf16>, vector<16x8xbf16>, vector<16x16xf32> -> vector<16x16xf32>
    %cst_224 = arith.constant 0.353553385 : f32
    %965 = vector.broadcast %cst_224 : f32 to vector<16x16xf32>
    %966 = arith.mulf %964, %965 : vector<16x16xf32>
    %967 = vector.broadcast %7 : vector<1x16xf32> to vector<16x16xf32>
    %968 = arith.subf %966, %967 : vector<16x16xf32>
    %cst_225 = arith.constant dense<0xFF800000> : vector<16xf32>
    %969 = vector.multi_reduction <maximumf>, %968, %cst_225 [1] : vector<16x16xf32> to vector<16xf32>
    %970 = vector.shape_cast %969 : vector<16xf32> to vector<16x1xf32>
    %971 = vector.broadcast %970 : vector<16x1xf32> to vector<16x16xf32>
    %972 = arith.subf %968, %971 : vector<16x16xf32>
    %973 = math.exp %972 : vector<16x16xf32>
    %cst_226 = arith.constant dense<0.000000e+00> : vector<16xf32>
    %974 = vector.multi_reduction <add>, %973, %cst_226 [1] : vector<16x16xf32> to vector<16xf32>
    %975 = vector.shape_cast %974 : vector<16xf32> to vector<16x1xf32>
    %976 = tpu.reciprocal %975 {approx = true} : vector<16x1xf32> -> vector<16x1xf32>
    %977 = vector.broadcast %976 : vector<16x1xf32> to vector<16x16xf32>
    %978 = arith.mulf %973, %977 : vector<16x16xf32>
    %979 = arith.truncf %978 : vector<16x16xf32> to vector<16x16xbf16>
    %cst_227 = arith.constant dense<0.000000e+00> : vector<16x8xf32>
    %980 = tpu.matmul %979, %963, %cst_227 {dimension_numbers = #tpu.dot_dimension_numbers<[1], [0], [0], [1], [0, 0, 1, 1], [], []>} : vector<16x16xbf16>, vector<16x8xbf16>, vector<16x8xf32> -> vector<16x8xf32>
    %981 = arith.truncf %980 : vector<16x8xf32> to vector<16x8xbf16>
    %982 = vector.extract_strided_slice %929 {offsets = [8, 0], sizes = [8, 32], strides = [1, 1]} : vector<32x32xbf16> to vector<8x32xbf16>
    %cst_228 = arith.constant dense<0.000000e+00> : vector<16x32xf32>
    %983 = tpu.matmul %981, %982, %cst_228 {dimension_numbers = #tpu.dot_dimension_numbers<[1], [0], [0], [1], [0, 0, 1, 1], [], []>} : vector<16x8xbf16>, vector<8x32xbf16>, vector<16x32xf32> -> vector<16x32xf32>
    %984 = arith.addf %957, %983 : vector<16x32xf32>
    %985 = vector.extract_strided_slice %927 {offsets = [0, 16], sizes = [16, 8], strides = [1, 1]} : vector<16x96xf32> to vector<16x8xf32>
    %986 = arith.truncf %985 : vector<16x8xf32> to vector<16x8xbf16>
    %987 = vector.extract_strided_slice %927 {offsets = [0, 48], sizes = [16, 8], strides = [1, 1]} : vector<16x96xf32> to vector<16x8xf32>
    %988 = arith.truncf %987 : vector<16x8xf32> to vector<16x8xbf16>
    %989 = vector.extract_strided_slice %927 {offsets = [0, 80], sizes = [16, 8], strides = [1, 1]} : vector<16x96xf32> to vector<16x8xf32>
    %990 = arith.truncf %989 : vector<16x8xf32> to vector<16x8xbf16>
    %cst_229 = arith.constant dense<0.000000e+00> : vector<16x16xf32>
    %991 = tpu.matmul %986, %988, %cst_229 {dimension_numbers = #tpu.dot_dimension_numbers<[1], [1], [0], [0], [0, 0, 1, 0], [], []>} : vector<16x8xbf16>, vector<16x8xbf16>, vector<16x16xf32> -> vector<16x16xf32>
    %cst_230 = arith.constant 0.353553385 : f32
    %992 = vector.broadcast %cst_230 : f32 to vector<16x16xf32>
    %993 = arith.mulf %991, %992 : vector<16x16xf32>
    %994 = vector.broadcast %7 : vector<1x16xf32> to vector<16x16xf32>
    %995 = arith.subf %993, %994 : vector<16x16xf32>
    %cst_231 = arith.constant dense<0xFF800000> : vector<16xf32>
    %996 = vector.multi_reduction <maximumf>, %995, %cst_231 [1] : vector<16x16xf32> to vector<16xf32>
    %997 = vector.shape_cast %996 : vector<16xf32> to vector<16x1xf32>
    %998 = vector.broadcast %997 : vector<16x1xf32> to vector<16x16xf32>
    %999 = arith.subf %995, %998 : vector<16x16xf32>
    %1000 = math.exp %999 : vector<16x16xf32>
    %cst_232 = arith.constant dense<0.000000e+00> : vector<16xf32>
    %1001 = vector.multi_reduction <add>, %1000, %cst_232 [1] : vector<16x16xf32> to vector<16xf32>
    %1002 = vector.shape_cast %1001 : vector<16xf32> to vector<16x1xf32>
    %1003 = tpu.reciprocal %1002 {approx = true} : vector<16x1xf32> -> vector<16x1xf32>
    %1004 = vector.broadcast %1003 : vector<16x1xf32> to vector<16x16xf32>
    %1005 = arith.mulf %1000, %1004 : vector<16x16xf32>
    %1006 = arith.truncf %1005 : vector<16x16xf32> to vector<16x16xbf16>
    %cst_233 = arith.constant dense<0.000000e+00> : vector<16x8xf32>
    %1007 = tpu.matmul %1006, %990, %cst_233 {dimension_numbers = #tpu.dot_dimension_numbers<[1], [0], [0], [1], [0, 0, 1, 1], [], []>} : vector<16x16xbf16>, vector<16x8xbf16>, vector<16x8xf32> -> vector<16x8xf32>
    %1008 = arith.truncf %1007 : vector<16x8xf32> to vector<16x8xbf16>
    %1009 = vector.extract_strided_slice %929 {offsets = [16, 0], sizes = [8, 32], strides = [1, 1]} : vector<32x32xbf16> to vector<8x32xbf16>
    %cst_234 = arith.constant dense<0.000000e+00> : vector<16x32xf32>
    %1010 = tpu.matmul %1008, %1009, %cst_234 {dimension_numbers = #tpu.dot_dimension_numbers<[1], [0], [0], [1], [0, 0, 1, 1], [], []>} : vector<16x8xbf16>, vector<8x32xbf16>, vector<16x32xf32> -> vector<16x32xf32>
    %1011 = arith.addf %984, %1010 : vector<16x32xf32>
    %1012 = vector.extract_strided_slice %927 {offsets = [0, 24], sizes = [16, 8], strides = [1, 1]} : vector<16x96xf32> to vector<16x8xf32>
    %1013 = arith.truncf %1012 : vector<16x8xf32> to vector<16x8xbf16>
    %1014 = vector.extract_strided_slice %927 {offsets = [0, 56], sizes = [16, 8], strides = [1, 1]} : vector<16x96xf32> to vector<16x8xf32>
    %1015 = arith.truncf %1014 : vector<16x8xf32> to vector<16x8xbf16>
    %1016 = vector.extract_strided_slice %927 {offsets = [0, 88], sizes = [16, 8], strides = [1, 1]} : vector<16x96xf32> to vector<16x8xf32>
    %1017 = arith.truncf %1016 : vector<16x8xf32> to vector<16x8xbf16>
    %cst_235 = arith.constant dense<0.000000e+00> : vector<16x16xf32>
    %1018 = tpu.matmul %1013, %1015, %cst_235 {dimension_numbers = #tpu.dot_dimension_numbers<[1], [1], [0], [0], [0, 0, 1, 0], [], []>} : vector<16x8xbf16>, vector<16x8xbf16>, vector<16x16xf32> -> vector<16x16xf32>
    %cst_236 = arith.constant 0.353553385 : f32
    %1019 = vector.broadcast %cst_236 : f32 to vector<16x16xf32>
    %1020 = arith.mulf %1018, %1019 : vector<16x16xf32>
    %1021 = vector.broadcast %7 : vector<1x16xf32> to vector<16x16xf32>
    %1022 = arith.subf %1020, %1021 : vector<16x16xf32>
    %cst_237 = arith.constant dense<0xFF800000> : vector<16xf32>
    %1023 = vector.multi_reduction <maximumf>, %1022, %cst_237 [1] : vector<16x16xf32> to vector<16xf32>
    %1024 = vector.shape_cast %1023 : vector<16xf32> to vector<16x1xf32>
    %1025 = vector.broadcast %1024 : vector<16x1xf32> to vector<16x16xf32>
    %1026 = arith.subf %1022, %1025 : vector<16x16xf32>
    %1027 = math.exp %1026 : vector<16x16xf32>
    %cst_238 = arith.constant dense<0.000000e+00> : vector<16xf32>
    %1028 = vector.multi_reduction <add>, %1027, %cst_238 [1] : vector<16x16xf32> to vector<16xf32>
    %1029 = vector.shape_cast %1028 : vector<16xf32> to vector<16x1xf32>
    %1030 = tpu.reciprocal %1029 {approx = true} : vector<16x1xf32> -> vector<16x1xf32>
    %1031 = vector.broadcast %1030 : vector<16x1xf32> to vector<16x16xf32>
    %1032 = arith.mulf %1027, %1031 : vector<16x16xf32>
    %1033 = arith.truncf %1032 : vector<16x16xf32> to vector<16x16xbf16>
    %cst_239 = arith.constant dense<0.000000e+00> : vector<16x8xf32>
    %1034 = tpu.matmul %1033, %1017, %cst_239 {dimension_numbers = #tpu.dot_dimension_numbers<[1], [0], [0], [1], [0, 0, 1, 1], [], []>} : vector<16x16xbf16>, vector<16x8xbf16>, vector<16x8xf32> -> vector<16x8xf32>
    %1035 = arith.truncf %1034 : vector<16x8xf32> to vector<16x8xbf16>
    %1036 = vector.extract_strided_slice %929 {offsets = [24, 0], sizes = [8, 32], strides = [1, 1]} : vector<32x32xbf16> to vector<8x32xbf16>
    %cst_240 = arith.constant dense<0.000000e+00> : vector<16x32xf32>
    %1037 = tpu.matmul %1035, %1036, %cst_240 {dimension_numbers = #tpu.dot_dimension_numbers<[1], [0], [0], [1], [0, 0, 1, 1], [], []>} : vector<16x8xbf16>, vector<8x32xbf16>, vector<16x32xf32> -> vector<16x32xf32>
    %1038 = arith.addf %1011, %1037 : vector<16x32xf32>
    %1039 = vector.extract_strided_slice %727 {offsets = [21, 0], sizes = [1, 32], strides = [1, 1]} : vector<26x32xf32> to vector<1x32xf32>
    %1040 = vector.broadcast %1039 : vector<1x32xf32> to vector<16x32xf32>
    %1041 = arith.addf %1038, %1040 : vector<16x32xf32>
    %1042 = arith.addf %1041, %895 : vector<16x32xf32>
    %1043 = vector.extract_strided_slice %727 {offsets = [22, 0], sizes = [1, 32], strides = [1, 1]} : vector<26x32xf32> to vector<1x32xf32>
    %1044 = vector.extract_strided_slice %727 {offsets = [23, 0], sizes = [1, 32], strides = [1, 1]} : vector<26x32xf32> to vector<1x32xf32>
    %cst_241 = arith.constant dense<0.000000e+00> : vector<16xf32>
    %1045 = vector.multi_reduction <add>, %1042, %cst_241 [1] : vector<16x32xf32> to vector<16xf32>
    %1046 = vector.shape_cast %1045 : vector<16xf32> to vector<16x1xf32>
    %cst_242 = arith.constant 3.200000e+01 : f32
    %1047 = vector.broadcast %cst_242 : f32 to vector<16x1xf32>
    %1048 = arith.divf %1046, %1047 : vector<16x1xf32>
    %1049 = vector.broadcast %1048 : vector<16x1xf32> to vector<16x32xf32>
    %1050 = arith.subf %1042, %1049 : vector<16x32xf32>
    %1051 = arith.mulf %1050, %1050 : vector<16x32xf32>
    %cst_243 = arith.constant dense<0.000000e+00> : vector<16xf32>
    %1052 = vector.multi_reduction <add>, %1051, %cst_243 [1] : vector<16x32xf32> to vector<16xf32>
    %1053 = vector.shape_cast %1052 : vector<16xf32> to vector<16x1xf32>
    %cst_244 = arith.constant 3.200000e+01 : f32
    %1054 = vector.broadcast %cst_244 : f32 to vector<16x1xf32>
    %1055 = arith.divf %1053, %1054 : vector<16x1xf32>
    %1056 = vector.broadcast %1048 : vector<16x1xf32> to vector<16x32xf32>
    %1057 = arith.subf %1042, %1056 : vector<16x32xf32>
    %cst_245 = arith.constant 9.99999974E-6 : f32
    %1058 = vector.broadcast %cst_245 : f32 to vector<16x1xf32>
    %1059 = arith.addf %1055, %1058 : vector<16x1xf32>
    %1060 = math.rsqrt %1059 : vector<16x1xf32>
    %1061 = vector.broadcast %1060 : vector<16x1xf32> to vector<16x32xf32>
    %1062 = arith.mulf %1057, %1061 : vector<16x32xf32>
    %1063 = vector.broadcast %1043 : vector<1x32xf32> to vector<16x32xf32>
    %1064 = arith.mulf %1062, %1063 : vector<16x32xf32>
    %1065 = vector.broadcast %1044 : vector<1x32xf32> to vector<16x32xf32>
    %1066 = arith.addf %1064, %1065 : vector<16x32xf32>
    %1067 = arith.truncf %1066 : vector<16x32xf32> to vector<16x32xbf16>
    %1068 = vector.extract_strided_slice %2 {offsets = [3, 0, 0], sizes = [1, 32, 32], strides = [1, 1, 1]} : vector<5x32x32xbf16> to vector<1x32x32xbf16>
    %1069 = vector.shape_cast %1068 : vector<1x32x32xbf16> to vector<32x32xbf16>
    %cst_246 = arith.constant dense<0.000000e+00> : vector<16x32xf32>
    %1070 = tpu.matmul %1067, %1069, %cst_246 {dimension_numbers = #tpu.dot_dimension_numbers<[1], [0], [0], [1], [0, 0, 1, 1], [], []>} : vector<16x32xbf16>, vector<32x32xbf16>, vector<16x32xf32> -> vector<16x32xf32>
    %1071 = vector.extract_strided_slice %727 {offsets = [24, 0], sizes = [1, 32], strides = [1, 1]} : vector<26x32xf32> to vector<1x32xf32>
    %1072 = vector.broadcast %1071 : vector<1x32xf32> to vector<16x32xf32>
    %1073 = arith.addf %1070, %1072 : vector<16x32xf32>
    %cst_247 = arith.constant 0.000000e+00 : f32
    %1074 = vector.broadcast %cst_247 : f32 to vector<16x32xf32>
    %1075 = arith.maximumf %1073, %1074 : vector<16x32xf32>
    %1076 = arith.truncf %1075 : vector<16x32xf32> to vector<16x32xbf16>
    %1077 = vector.extract_strided_slice %2 {offsets = [4, 0, 0], sizes = [1, 32, 32], strides = [1, 1, 1]} : vector<5x32x32xbf16> to vector<1x32x32xbf16>
    %1078 = vector.shape_cast %1077 : vector<1x32x32xbf16> to vector<32x32xbf16>
    %cst_248 = arith.constant dense<0.000000e+00> : vector<16x32xf32>
    %1079 = tpu.matmul %1076, %1078, %cst_248 {dimension_numbers = #tpu.dot_dimension_numbers<[1], [0], [0], [1], [0, 0, 1, 1], [], []>} : vector<16x32xbf16>, vector<32x32xbf16>, vector<16x32xf32> -> vector<16x32xf32>
    %1080 = vector.extract_strided_slice %727 {offsets = [25, 0], sizes = [1, 32], strides = [1, 1]} : vector<26x32xf32> to vector<1x32xf32>
    %1081 = vector.broadcast %1080 : vector<1x32xf32> to vector<16x32xf32>
    %1082 = arith.addf %1079, %1081 : vector<16x32xf32>
    %1083 = arith.addf %1082, %1042 : vector<16x32xf32>
    %c0_249 = arith.constant 0 : index
    %c0_250 = arith.constant 0 : index
    %1084 = vector.load %arg8[%c0_249, %c0_250] : memref<5x32xf32, #tpu.memory_space<vmem>>, vector<5x32xf32>
    %c0_251 = arith.constant 0 : index
    %c0_252 = arith.constant 0 : index
    %c0_253 = arith.constant 0 : index
    %1085 = vector.load %arg3[%c0_251, %c0_252, %c0_253] : memref<1x16x1xf32, #tpu.memory_space<vmem>>, vector<1x16x1xf32>
    %1086 = vector.shape_cast %1085 : vector<1x16x1xf32> to vector<16x1xf32>
    %cst_254 = arith.constant 1.000000e+30 : f32
    %1087 = vector.broadcast %cst_254 : f32 to vector<16x1xf32>
    %1088 = arith.mulf %1086, %1087 : vector<16x1xf32>
    %1089 = vector.extract_strided_slice %1084 {offsets = [0, 0], sizes = [1, 32], strides = [1, 1]} : vector<5x32xf32> to vector<1x32xf32>
    %1090 = vector.broadcast %1089 : vector<1x32xf32> to vector<16x32xf32>
    %1091 = arith.mulf %367, %1090 : vector<16x32xf32>
    %cst_255 = arith.constant dense<0.000000e+00> : vector<16xf32>
    %1092 = vector.multi_reduction <add>, %1091, %cst_255 [1] : vector<16x32xf32> to vector<16xf32>
    %1093 = vector.shape_cast %1092 : vector<16xf32> to vector<16x1xf32>
    %1094 = vector.extract_strided_slice %1084 {offsets = [1, 0], sizes = [1, 32], strides = [1, 1]} : vector<5x32xf32> to vector<1x32xf32>
    %1095 = vector.broadcast %1094 : vector<1x32xf32> to vector<16x32xf32>
    %1096 = arith.mulf %725, %1095 : vector<16x32xf32>
    %cst_256 = arith.constant dense<0.000000e+00> : vector<16xf32>
    %1097 = vector.multi_reduction <add>, %1096, %cst_256 [1] : vector<16x32xf32> to vector<16xf32>
    %1098 = vector.shape_cast %1097 : vector<16xf32> to vector<16x1xf32>
    %1099 = arith.addf %1093, %1098 : vector<16x1xf32>
    %1100 = vector.extract_strided_slice %1084 {offsets = [4, 0], sizes = [1, 1], strides = [1, 1]} : vector<5x32xf32> to vector<1x1xf32>
    %1101 = vector.broadcast %1100 : vector<1x1xf32> to vector<16x1xf32>
    %1102 = arith.addf %1099, %1101 : vector<16x1xf32>
    %1103 = arith.subf %1102, %1088 : vector<16x1xf32>
    %1104 = vector.extract_strided_slice %1084 {offsets = [2, 0], sizes = [1, 32], strides = [1, 1]} : vector<5x32xf32> to vector<1x32xf32>
    %1105 = vector.broadcast %1104 : vector<1x32xf32> to vector<16x32xf32>
    %1106 = arith.mulf %367, %1105 : vector<16x32xf32>
    %cst_257 = arith.constant dense<0.000000e+00> : vector<16xf32>
    %1107 = vector.multi_reduction <add>, %1106, %cst_257 [1] : vector<16x32xf32> to vector<16xf32>
    %1108 = vector.shape_cast %1107 : vector<16xf32> to vector<16x1xf32>
    %1109 = vector.extract_strided_slice %1084 {offsets = [3, 0], sizes = [1, 32], strides = [1, 1]} : vector<5x32xf32> to vector<1x32xf32>
    %1110 = vector.broadcast %1109 : vector<1x32xf32> to vector<16x32xf32>
    %1111 = arith.mulf %1083, %1110 : vector<16x32xf32>
    %cst_258 = arith.constant dense<0.000000e+00> : vector<16xf32>
    %1112 = vector.multi_reduction <add>, %1111, %cst_258 [1] : vector<16x32xf32> to vector<16xf32>
    %1113 = vector.shape_cast %1112 : vector<16xf32> to vector<16x1xf32>
    %1114 = arith.addf %1108, %1113 : vector<16x1xf32>
    %1115 = vector.extract_strided_slice %1084 {offsets = [4, 1], sizes = [1, 1], strides = [1, 1]} : vector<5x32xf32> to vector<1x1xf32>
    %1116 = vector.broadcast %1115 : vector<1x1xf32> to vector<16x1xf32>
    %1117 = arith.addf %1114, %1116 : vector<16x1xf32>
    %1118 = arith.subf %1117, %1088 : vector<16x1xf32>
    %1119 = tpu.concatenate %1103, %1118 in 1 : vector<16x1xf32>, vector<16x1xf32> -> vector<16x2xf32>
    %cst_259 = arith.constant dense<0xFF800000> : vector<2xf32>
    %1120 = vector.multi_reduction <maximumf>, %1119, %cst_259 [0] : vector<16x2xf32> to vector<2xf32>
    %1121 = vector.shape_cast %1120 : vector<2xf32> to vector<1x2xf32>
    %1122 = vector.broadcast %1121 : vector<1x2xf32> to vector<16x2xf32>
    %1123 = arith.subf %1119, %1122 : vector<16x2xf32>
    %1124 = math.exp %1123 : vector<16x2xf32>
    %cst_260 = arith.constant dense<0.000000e+00> : vector<2xf32>
    %1125 = vector.multi_reduction <add>, %1124, %cst_260 [0] : vector<16x2xf32> to vector<2xf32>
    %1126 = vector.shape_cast %1125 : vector<2xf32> to vector<1x2xf32>
    %1127 = math.log %1126 : vector<1x2xf32>
    %1128 = vector.broadcast %1127 : vector<1x2xf32> to vector<16x2xf32>
    %1129 = arith.subf %1123, %1128 : vector<16x2xf32>
    %c0_261 = arith.constant 0 : index
    %c0_262 = arith.constant 0 : index
    %c0_263 = arith.constant 0 : index
    %1130 = vector.load %arg9[%c0_261, %c0_262, %c0_263] : memref<1x16x2xf32, #tpu.memory_space<vmem>>, vector<1x16x2xf32>
    %1131 = vector.shape_cast %1130 : vector<1x16x2xf32> to vector<16x2xf32>
    %1132 = vector.shape_cast %1129 : vector<16x2xf32> to vector<1x16x2xf32>
    tpu.vector_store %arg9[%c0_261, %c0_262, %c0_263], %1132 {strides = array<i32>} : memref<1x16x2xf32, #tpu.memory_space<vmem>>, vector<1x16x2xf32>,
    return
  }
  func.func @transform_0(%arg0: i32) -> (i32, i32, i32) {
    %c0_i32 = arith.constant 0 : i32
    %c0_i32_0 = arith.constant 0 : i32
    %c0_i32_1 = arith.constant 0 : i32
    return %arg0, %c0_i32, %c0_i32_0 : i32, i32, i32
  }
  func.func @transform_1(%arg0: i32) -> (i32, i32, i32) {
    %c0_i32 = arith.constant 0 : i32
    %c0_i32_0 = arith.constant 0 : i32
    %c0_i32_1 = arith.constant 0 : i32
    return %arg0, %c0_i32, %c0_i32_0 : i32, i32, i32
  }
  func.func @transform_2(%arg0: i32) -> (i32, i32, i32) {
    %c0_i32 = arith.constant 0 : i32
    %c0_i32_0 = arith.constant 0 : i32
    %c0_i32_1 = arith.constant 0 : i32
    return %arg0, %c0_i32, %c0_i32_0 : i32, i32, i32
  }
  func.func @transform_3(%arg0: i32) -> (i32, i32) {
    %c0_i32 = arith.constant 0 : i32
    %c0_i32_0 = arith.constant 0 : i32
    %c0_i32_1 = arith.constant 0 : i32
    return %c0_i32, %c0_i32_0 : i32, i32
  }
  func.func @transform_4(%arg0: i32) -> (i32, i32, i32) {
    %c0_i32 = arith.constant 0 : i32
    %c0_i32_0 = arith.constant 0 : i32
    %c0_i32_1 = arith.constant 0 : i32
    %c0_i32_2 = arith.constant 0 : i32
    return %c0_i32, %c0_i32_0, %c0_i32_1 : i32, i32, i32
  }
  func.func @transform_5(%arg0: i32) -> (i32, i32, i32) {
    %c0_i32 = arith.constant 0 : i32
    %c0_i32_0 = arith.constant 0 : i32
    %c0_i32_1 = arith.constant 0 : i32
    %c0_i32_2 = arith.constant 0 : i32
    return %c0_i32, %c0_i32_0, %c0_i32_1 : i32, i32, i32
  }
  func.func @transform_6(%arg0: i32) -> (i32, i32, i32) {
    %c0_i32 = arith.constant 0 : i32
    %c0_i32_0 = arith.constant 0 : i32
    %c0_i32_1 = arith.constant 0 : i32
    %c0_i32_2 = arith.constant 0 : i32
    return %c0_i32, %c0_i32_0, %c0_i32_1 : i32, i32, i32
  }
  func.func @transform_7(%arg0: i32) -> (i32, i32) {
    %c0_i32 = arith.constant 0 : i32
    %c0_i32_0 = arith.constant 0 : i32
    %c0_i32_1 = arith.constant 0 : i32
    return %c0_i32, %c0_i32_0 : i32, i32
  }
  func.func @transform_8(%arg0: i32) -> (i32, i32, i32) {
    %c0_i32 = arith.constant 0 : i32
    %c0_i32_0 = arith.constant 0 : i32
    %c0_i32_1 = arith.constant 0 : i32
    return %arg0, %c0_i32, %c0_i32_0 : i32, i32, i32
  }
}

</mosaic_0001>

<bundles_post_ra>
// kernel: _lambda_.4
= control target key start
LH: loop header
LB: loop body
LE: loop exit
PB: predicated region body
PF: predicated region fallthrough
CT: control target
= control target key end

     0   :  { %s1057_s21 = smov 0   ;;  %s1214_s0 = inlined_call_operand.vmem [shape: f32[2,16,32], index: 0, kind: input, shape index: {}]   ;;  %s1215_s1 = inlined_call_operand.vmem [shape: f32[2,8,32], index: 1, kind: input, shape index: {}]   ;;  %s1216_s2 = inlined_call_operand.vmem [shape: f32[2,16,1], index: 2, kind: input, shape index: {}]   ;;  %s1217_s3 = inlined_call_operand.vmem [shape: f32[2,1,8], index: 3, kind: input, shape index: {}]   ;;  %s1218_s4 = inlined_call_operand.vmem [shape: f32[5,32], index: 4, kind: input, shape index: {}]   ;;  %s1219_s5 = inlined_call_operand.vmem [shape: bf16[128,32], index: 5, kind: input, shape index: {}]   ;;  %s1220_s6 = inlined_call_operand.vmem [shape: f32[2,16,32], index: 6, kind: output, shape index: {}]  }
   0x1 LB: > { %s860_s22 = sadd.s32 4294967295, %s1014_s21   ;;  %p864_p0 = scmp.ge.s32.totalorder %s1014_s21, 1  ;;  %s1014_s21 = sphi %s1057_s21, %s16_s21  }
   0x2   : > { %p239_p1 = scmp.lt.s32.totalorder %s1014_s21, 3 }
   0x4   : > { %p240_p2 = pnand %p864_p0, %p239_p1 }
   0x5   : > { %p281_p3 = scmp.lt.s32.totalorder (!%p240_p2), %s860_s22, 1  ;;  %s1019_s12 = smov (!%p240_p2), 32  }
   0x6   : > { %243 = sbr.rel (%p240_p2) target bundleno = 1530 (0x5fa), region = 44  ;;  %s1020_s16 = smov (!%p240_p2), 64  }
   0xb   : > { %v308_v0 = vlaneseq  ;;  %v1068_v1 = vld [vmem:[%s1218_s4] sm:$0x1f]  ;;  %s1222_s22 = smov (!%p281_p3, %s860_s22), 1  ;;  %vm314_vm0 = vcmask 261120   ;;  %v1016_v16 = vmov 0.0   ;;  %vm351_vm1 = vcmask 269312  }
   0xc   : > { %s1075_s25 = sshll.u32 %s1222_s22, 4  ;;  %s867_s26 = sshll.u32 %s1222_s22, 3  ;;  %906 = vmatprep.subr.bf16.mxu0 %v1016_v16  ;;  %930 = vmatprep.subr.bf16.mxu1 %v1016_v16  ;;  %vm1017_vm2 = vmmov 0   ;;  %vm358_vm3 = vcmask 277504   ;;  %v1018_v24 = vmov 0   ;;  %vm418_vm4 = vcmask 64512  }
   0xd   : > { %v1072_v2 = vshrl.u32 %v308_v0, 7  ;;  %s285_s29 = scalar_lea.vmem %s1214_s0, %s1075_s25  ;;  %s289_s8 = scalar_lea.vmem %s1215_s1, %s867_s26  ;;  %908 = vmatprep.mubr.msk.bf16.mxu0 %vm1017_vm2, %v1016_v16  ;;  %946 = vmatprep.mubr.msk.bf16.mxu1 %vm1017_vm2, %v1016_v16  ;;  %vm487_vm5 = vcmask 1043456   ;;  %vm579_vm6 = vcmask 130048   ;;  %vm654_vm7 = vcmask 523264  }
   0xe   : > { %v1087_v5 = vld [vmem:[%s285_s29] sm:$0xff]  ;;  %v1092_v7 = vld [vmem:[%s285_s29 + $0x8] sm:$0xff]  ;;  %970 = vset.pattern.permute.xlu1 %v1018_v24  ;;  %s1118_s11 = scalar_lea.vmem %s1216_s2, %s1075_s25  ;;  %969 = vset.pattern.permute.xlu0 %v1018_v24  ;;  %s297_s15 = scalar_lea.vmem %s1217_s3, %s1222_s22  ;;  %vm657_vm8 = vcmask 785408  }
   0xf   : > { %v310_v3 = vsub.s32 0, %v1072_v2  ;;  %v323_v4 = vsub.s32 1, %v1072_v2  ;;  %v1094_v8 = vld [vmem:[%s289_s8] sm:$0xff]  ;;  %v337_v17 = vsub.s32 3, %v1072_v2  ;;  %v408_v29 = vld [vmem:[%s1118_s11 + $0x8] sm:$0xff]  ;;  %v331_v32 = vsub.s32 2, %v1072_v2  ;;  %s302_s14 = scalar_lea.vmem %s1220_s6, %s1075_s25 }
  0x10   : > { %v354_v18 = vsel %vm314_vm0, %v1094_v8, 1.0  ;;  %v442_v31 = vmul.f32 1e+30, %v408_v29  ;;  %v406_v44 = vld [vmem:[%s297_s15] sm:$0x1] }
  0x11   : > { %v311_v6 = vrot.slane %v1068_v1, %v310_v3  ;;  %v324_v9 = vrot.slane %v1068_v1, %v323_v4  ;;  %v338_v21 = vrot.slane %v1068_v1, %v337_v17  ;;  %v332_v33 = vrot.slane %v1068_v1, %v331_v32  ;;  %v407_v55 = vld [vmem:[%s1118_s11] sm:$0xff]  ;;  %s1021_s11 = smov 96  }
  0x12   : > { %v409_v45 = vmul.f32 1e+30, %v406_v44  ;;  %v441_v56 = vmul.f32 1e+30, %v407_v55 }
  0x13   : > { %v312_v10 = vmul.f32 %v311_v6, %v1087_v5  ;;  %v313_v11 = vmul.f32 %v311_v6, %v1092_v7  ;;  %v325_v12 = vmul.f32 %v324_v9, %v1094_v8  ;;  %v333_v34 = vmul.f32 %v332_v33, %v1087_v5 }
  0x14   : > { %v334_v35 = vmul.f32 %v332_v33, %v1092_v7  ;;  %v414_v46 = vrot.slane %v409_v45, %v310_v3  ;;  %v483_v6 = vpack.c.bf16 %v1094_v8, %v1094_v8 }
  0x15   : > { %v315_v13 = vsel %vm314_vm0, %v312_v10, 0.0  ;;  %v326_v14 = vsel %vm314_vm0, %v325_v12, 0.0  ;;  %v318_v15 = vsel %vm314_vm0, %v313_v11, 0.0 }
  0x16   : > { %316 = vadd.xlane.f32.xlu0 %v315_v13  ;;  %327 = vadd.xlane.f32.xlu1 %v326_v14  ;;  %v489_v9 = vsel %vm487_vm5, %v483_v6, 0  ;;  %v989_v6 = vld [vmem:[%s1219_s5 + $0x20] sm:$0xff]  }
  0x1a   : > { %319 = vadd.xlane.f32.xlu0 %v318_v15 }
  0x9f   : > { %v317_v19 = vpop.xlane.xlu0 %316  ;;  %v328_v20 = vpop.xlane.xlu1 %327 }
  0xa0   : > { %v355_v22 = vsel %vm351_vm1, %v354_v18, %v328_v20  ;;  %v339_v27 = vadd.f32 %v338_v21, %v317_v19 }
  0xa1   : > { %v357_v23 = vpack.c.bf16 %v355_v22, %v355_v22 }
  0xa3   : > { %v320_v25 = vpop.xlane.xlu0 %319  ;;  %v363_v26 = vsel %vm358_vm3, %v357_v23, 0 }
  0xa4   : > { %v340_v28 = vadd.f32 %v338_v21, %v320_v25  ;;  %907 = vmatpush3.bf16.xpose.msra.mxu0 %v363_v26 }
  0xa5   : > { %912 = vmatprep.subr.bf16.mxu0 %v1016_v16 }
  0xa6   : > { %v964_v30 = vpack.i.bf16 %v340_v28, %v339_v27 }
  0xa8   : > { %965 = vrot.lane.b32.xlu1 %v964_v30, %s1019_s12 }
  0xac   : > { %450 = vperm.xlu1 %970, %v442_v31  }
 0x11a   : > { %v966_v36 = vpop.permute.xlu1 %965 }
 0x11b   : > { %v968_v37 = vunpack.i.h.bf16 %v966_v36  ;;  %v967_v38 = vunpack.i.l.bf16 %v966_v36 }
 0x11d   : > { %v350_v39 = vsel %vm314_vm0, %v334_v35, %v968_v37  ;;  %v349_v40 = vsel %vm314_vm0, %v333_v34, %v967_v38 }
 0x11e   : > { %v353_v41 = vsel %vm351_vm1, %v350_v39, 1.0  ;;  %v352_v42 = vsel %vm351_vm1, %v349_v40, 1.0 }
 0x11f   : > { %v356_v43 = vpack.c.bf16 %v353_v41, %v352_v42 }
 0x121   : > { %909 = vmatmul.mubr.msk.bf16.vlgmr.msra.gmra.mxu0 %vm358_vm3, %v356_v43 }
 0x122   : > { %914 = vmatprep.mubr.msk.bf16.mxu0 %vm1017_vm2, %v1016_v16  ;;  %913 = vmatpush3.bf16.msra.mxu0 %v489_v9  ;;  %v990_v9 = vld [vmem:[%s1219_s5 + $0x18] sm:$0xff]  }
 0x123   : > { %918 = vmatprep.subr.bf16.mxu0 %v1016_v16 }
 0x127   : > { %v451_v11 = vpop.permute.xlu1 %450 }
 0x1e1   : > { %v399_v47 = vpop.f32.mrf.mxu0 }
 0x1e2   : > { %v416_v48 = vsub.f32 %v399_v47, %v414_v46 }
 0x1e3   : > { %v910_v49 = vpop.f32.mrf.mxu0 }
 0x1e4   : > { %v419_v50 = vsel %vm418_vm4, %v416_v48, -inf }
 0x1e5   : > { %420 = vmax.xlane.f32.xlu0 %v419_v50  ;;  %v402_v51 = vpop.f32.mrf.mxu0  ;;  %v578_v50 = vpack.c.bf16 %v1092_v7, %v1087_v5 }
 0x1e6   : > { %v417_v52 = vsub.f32 %v402_v51, %v414_v46  ;;  %v454_v13 = vsub.f32 %v402_v51, %v451_v11  ;;  %v992_v11 = vld [vmem:[%s1219_s5 + $0x8] sm:$0xff]  }
 0x1e7   : > { %v911_v53 = vpop.f32.mrf.mxu0 }
 0x1e8   : > { %v422_v54 = vsel %vm418_vm4, %v417_v52, -inf  ;;  %v456_v15 = vsel %vm418_vm4, %v454_v13, -inf }
 0x1e9   : > { %423 = vmax.xlane.f32.xlu0 %v422_v54 }
 0x1ff   : > { %445 = vperm.xlu0 %969, %v441_v56  }
 0x26e   : > { %v421_v57 = vpop.xlane.xlu0 %420 }
 0x26f   : > { %v425_v58 = vsub.f32 %v416_v48, %v421_v57 }
 0x271   : > { %v427_v59 = vmul.f32 1.442695, %v425_v58 }
 0x272   : > { %v424_v60 = vpop.xlane.xlu0 %423 }
 0x273   : > { %994 = vpow2.f32 %v427_v59  ;;  %v426_v61 = vsub.f32 %v417_v52, %v424_v60 }
 0x275   : > { %v429_v62 = vmul.f32 1.442695, %v426_v61 }
 0x277   : > { %996 = vpow2.f32 %v429_v62 }
 0x27a   : > { %v446_v10 = vpop.permute.xlu0 %445 }
 0x27b   : > { %v453_v12 = vsub.f32 %v399_v47, %v446_v10  ;;  %v991_v10 = vld [vmem:[%s1219_s5 + $0x10] sm:$0xff]  }
 0x27d   : > { %v455_v14 = vsel %vm418_vm4, %v453_v12, -inf }
 0x27e   : > { %v457_v17 = vmax.f32 %v455_v14, %v456_v15 }
 0x280   : > { %v995_v63 = vpop.eup %994  ;;  %v458_v18 = vrot.slane %v457_v17, 4 }
 0x281   : > { %v431_v0 = vsel %vm418_vm4, %v995_v63, 0.0 }
 0x282   : > { %432 = vadd.xlane.f32.xlu1 %v431_v0  ;;  %v459_v19 = vmax.f32 %v457_v17, %v458_v18  ;;  %v986_v0 = vld [vmem:[%s1219_s5 + $0x38] sm:$0xff]  }
 0x283   : > { %931 = vmatpush3.bf16.msra.mxu1 %v986_v0 }
 0x284   : > { %v997_v3 = vpop.eup %996  ;;  %v460_v20 = vrot.slane %v459_v19, 2  ;;  %932 = vmatprep.subr.bf16.mxu1 %v1016_v16 }
 0x285   : > { %v434_v4 = vsel %vm418_vm4, %v997_v3, 0.0 }
 0x286   : > { %435 = vadd.xlane.f32.xlu0 %v434_v4  ;;  %v461_v21 = vmax.f32 %v459_v19, %v460_v20  ;;  %v988_v4 = vld [vmem:[%s1219_s5 + $0x28] sm:$0xff]  }
 0x288   : > { %v462_v22 = vrot.slane %v461_v21, 1 }
 0x28a   : > { %v463_v8 = vmax.f32 %v461_v21, %v462_v22 }
 0x28c   : > { %v464_v23 = vsub.f32 %v453_v12, %v463_v8  ;;  %v465_v24 = vsub.f32 %v454_v13, %v463_v8  ;;  %v993_v12 = vld [vmem:[%s1219_s5] sm:$0xff]  }
 0x28e   : > { %v466_v25 = vmul.f32 1.442695, %v464_v23  ;;  %v468_v26 = vmul.f32 1.442695, %v465_v24 }
 0x290   : > { %998 = vpow2.f32 %v466_v25 }
 0x291   : > { %1000 = vpow2.f32 %v468_v26 }
 0x29d   : > { %v999_v27 = vpop.eup %998 }
 0x29e   : > { %v1001_v28 = vpop.eup %1000  ;;  %v470_v29 = vsel %vm418_vm4, %v999_v27, 0.0 }
 0x29f   : > { %v471_v30 = vsel %vm418_vm4, %v1001_v28, 0.0 }
 0x2a0   : > { %v472_v31 = vadd.f32 %v471_v30, %v470_v29 }
 0x2a2   : > { %v473_v32 = vrot.slane %v472_v31, 4 }
 0x2a4   : > { %v474_v33 = vadd.f32 %v473_v32, %v472_v31 }
 0x2a6   : > { %v475_v34 = vrot.slane %v474_v33, 2 }
 0x2a8   : > { %v476_v35 = vadd.f32 %v475_v34, %v474_v33 }
 0x2aa   : > { %v477_v36 = vrot.slane %v476_v35, 1 }
 0x2ac   : > { %v478_v37 = vadd.f32 %v477_v36, %v476_v35  ;;  %v679_v35 = vsub.s32 4, %v1072_v2 }
 0x2ae   : > { %1002 = vrcp.f32 %v478_v37  ;;  %v680_v36 = vrot.slane %v1068_v1, %v679_v35 }
 0x2bb   : > { %v1003_v40 = vpop.eup %1002 }
 0x2bc   : > { %v480_v41 = vmul.f32 %v1003_v40, %v999_v27  ;;  %v481_v42 = vmul.f32 %v1003_v40, %v1001_v28 }
 0x2be   : > { %v532_v47 = vpack.c.bf16 %v481_v42, %v480_v41 }
 0x2c0   : > { %v534_v49 = vsel %vm418_vm4, %v532_v47, 0 }
 0x30b   : > { %v433_v38 = vpop.xlane.xlu1 %432 }
 0x30c   : > { %1004 = vrcp.f32 %v433_v38 }
 0x30f   : > { %v436_v39 = vpop.xlane.xlu0 %435 }
 0x310   : > { %1006 = vrcp.f32 %v436_v39 }
 0x319   : > { %v1005_v43 = vpop.eup %1004 }
 0x31a   : > { %v439_v46 = vmul.f32 %v1005_v43, %v995_v63 }
 0x31d   : > { %v1007_v44 = vpop.eup %1006 }
 0x31e   : > { %v440_v45 = vmul.f32 %v1007_v44, %v997_v3  ;;  %v987_v3 = vld [vmem:[%s1219_s5 + $0x30] sm:$0xff]  }
 0x31f   : > { %933 = vmatpush3.bf16.msra.mxu1 %v987_v3 }
 0x320   : > { %v482_v48 = vpack.c.bf16 %v440_v45, %v439_v46  ;;  %934 = vmatprep.subr.bf16.mxu1 %v1016_v16 }
 0x322   : > { %915 = vmatmul.mubr.msk.bf16.vlgmr.msra.gmra.mxu0 %vm418_vm4, %v482_v48 }
 0x323   : > { %919 = vmatpush3.bf16.xpose.msra.mxu0 %v534_v49  ;;  %920 = vmatprep.mubr.msk.bf16.mxu0 %vm1017_vm2, %v1016_v16 }
 0x324   : > { %924 = vmatprep.subr.bf16.mxu0 %v1016_v16  ;;  %935 = vmatpush3.bf16.msra.mxu1 %v988_v4 }
 0x325   : > { %936 = vmatprep.subr.bf16.mxu1 %v1016_v16 }
 0x328   : > { %937 = vmatpush3.bf16.msra.mxu1 %v989_v6 }
 0x329   : > { %938 = vmatprep.subr.bf16.mxu1 %v1016_v16 }
 0x32a   : > { %921 = vmatmul.mubr.msk.bf16.vlgmr.msra.gmra.mxu0 %vm418_vm4, %v482_v48 }
 0x32b   : > { %926 = vmatprep.mubr.msk.bf16.mxu0 %vm1017_vm2, %v1016_v16  ;;  %925 = vmatpush3.bf16.msra.mxu0 %v578_v50 }
 0x32c   : > { %939 = vmatpush3.bf16.msra.mxu1 %v990_v9 }
 0x32d   : > { %940 = vmatprep.subr.bf16.mxu1 %v1016_v16 }
 0x330   : > { %941 = vmatpush3.bf16.msra.mxu1 %v991_v10 }
 0x331   : > { %942 = vmatprep.subr.bf16.mxu1 %v1016_v16 }
 0x334   : > { %943 = vmatpush3.bf16.msra.mxu1 %v992_v11 }
 0x335   : > { %944 = vmatprep.subr.bf16.mxu1 %v1016_v16 }
 0x338   : > { %945 = vmatpush3.bf16.msra.mxu1 %v993_v12 }
 0x3e2   : > { %v525_v51 = vpop.f32.mrf.mxu0 }
 0x3e3   : > { %v624_v57 = vmul.f32 %v525_v51, %v1087_v5 }
 0x3e4   : > { %v916_v52 = vpop.f32.mrf.mxu0 }
 0x3e6   : > { %v528_v53 = vpop.f32.mrf.mxu0 }
 0x3e7   : > { %v971_v54 = vpack.i.bf16 %v528_v53, %v525_v51  ;;  %v625_v55 = vmul.f32 %v528_v53, %v1092_v7 }
 0x3e8   : > { %v917_v56 = vpop.f32.mrf.mxu0 }
 0x3e9   : > { %972 = vrot.lane.b32.xlu1 %v971_v54, %s1019_s12  ;;  %v976_v59 = vpack.i.bf16 %v625_v55, %v624_v57 }
 0x3ea   : > { %v570_v58 = vpop.f32.mrf.mxu0 }
 0x3ec   : > { %v922_v60 = vpop.f32.mrf.mxu0 }
 0x3ed   : > { %977 = vrot.lane.b32.xlu1 %v976_v59, %s1020_s16 }
 0x3ee   : > { %v573_v61 = vpop.f32.mrf.mxu0 }
 0x3ef   : > { %v577_v62 = vpack.c.bf16 %v573_v61, %v570_v58 }
 0x3f0   : > { %v923_v63 = vpop.f32.mrf.mxu0 }
 0x3f1   : > { %927 = vmatmul.mubr.msk.bf16.vlgmr.msra.gmra.mxu0 %vm579_vm6, %v577_v62 }
 0x45b   : > { %v973_v21 = vpop.permute.xlu1 %972 }
 0x45c   : > { %v975_v8 = vunpack.i.h.bf16 %v973_v21  ;;  %v974_v16 = vunpack.i.l.bf16 %v973_v21 }
 0x45e   : > { %v653_v26 = vsel %vm314_vm0, %v1092_v7, %v975_v8  ;;  %v652_v27 = vsel %vm314_vm0, %v1087_v5, %v974_v16 }
 0x45f   : > { %v978_v22 = vpop.permute.xlu1 %977 }
 0x460   : > { %v980_v23 = vunpack.i.h.bf16 %v978_v22  ;;  %v979_v24 = vunpack.i.l.bf16 %v978_v22 }
 0x462   : > { %v656_v30 = vsel %vm654_vm7, %v653_v26, %v980_v23  ;;  %v655_v31 = vsel %vm654_vm7, %v652_v27, %v979_v24 }
 0x4b1   : > { %v617_v13 = vpop.f32.mrf.mxu0 }
 0x4b2   : > { %v626_v17 = vmul.f32 %v617_v13, %v1087_v5 }
 0x4b3   : > { %v928_v14 = vpop.f32.mrf.mxu0 }
 0x4b5   : > { %v620_v15 = vpop.f32.mrf.mxu0 }
 0x4b6   : > { %v627_v18 = vmul.f32 %v620_v15, %v1092_v7 }
 0x4b7   : > { %v929_v19 = vpop.f32.mrf.mxu0 }
 0x4b8   : > { %v981_v20 = vpack.i.bf16 %v627_v18, %v626_v17 }
 0x4ba   : > { %982 = vrot.lane.b32.xlu1 %v981_v20, %s1021_s11 }
 0x52c   : > { %v983_v25 = vpop.permute.xlu1 %982 }
 0x52d   : > { %v985_v28 = vunpack.i.h.bf16 %v983_v25  ;;  %v984_v29 = vunpack.i.l.bf16 %v983_v25 }
 0x52f   : > { %v658_v32 = vsel %vm657_vm8, %v655_v31, %v984_v29  ;;  %v659_v33 = vsel %vm657_vm8, %v656_v30, %v985_v28 }
 0x530   : > { %v660_v34 = vpack.c.bf16 %v659_v33, %v658_v32 }
 0x532   : > { %947 = vmatmul.mubr.bf16.vlgmr.msra.gmra.mxu1 %v660_v34 }
 0x5f2   : > { %v763_v7 = vpop.f32.mrf.mxu1 }
 0x5f3   : > { %v764_v37 = vadd.f32 %v763_v7, %v680_v36 }
 0x5f4   : > { %v948_v38 = vpop.f32.mrf.mxu1 }
 0x5f5   : > { %770 = vst.msk [vmem:[%s302_s14] sm:$0xff] %vm314_vm0, %v764_v37 }
 0x5f6   : > { %v766_v5 = vpop.f32.mrf.mxu1 }
 0x5f7   : > { %v767_v39 = vadd.f32 %v766_v5, %v680_v36 }
 0x5f8   : > { %v949_v40 = vpop.f32.mrf.mxu1 }
 0x5f9   : > { %771 = vst.msk [vmem:[%s302_s14 + $0x8] sm:$0xff] %vm314_vm0, %v767_v39 }
 0x5fa PF: > { %s16_s21 = sadd.s32 1, %s1014_s21  }
 0x5fb   : > { %p13_p4 = scmp.ge.s32.totalorder %s16_s21, 4  }
 0x5fd   :  { %15 = sbr.rel (!%p13_p4) target bundleno = 1 (0x1), region = 83 }

// kernel: _lambda_.3
= control target key start
LH: loop header
LB: loop body
LE: loop exit
PB: predicated region body
PF: predicated region fallthrough
CT: control target
= control target key end

     0   :  { %s2981_s21 = smov 0   ;;  %s3509_s0 = inlined_call_operand.vmem [shape: f32[4,64,16], index: 0, kind: input, shape index: {}]   ;;  %s3510_s1 = inlined_call_operand.vmem [shape: f32[4,16,32], index: 1, kind: input, shape index: {}]   ;;  %s3511_s2 = inlined_call_operand.vmem [shape: f32[4,1,16], index: 2, kind: input, shape index: {}]   ;;  %s3512_s3 = inlined_call_operand.vmem [shape: f32[4,16,1], index: 3, kind: input, shape index: {}]   ;;  %s3513_s4 = inlined_call_operand.vmem [shape: f32[16,32], index: 4, kind: input, shape index: {}]   ;;  %s3514_s5 = inlined_call_operand.vmem [shape: f32[6,32], index: 5, kind: input, shape index: {}]   ;;  %s3515_s6 = inlined_call_operand.vmem [shape: bf16[16,32], index: 6, kind: input, shape index: {}]   ;;  %s3516_s7 = inlined_call_operand.vmem [shape: bf16[64,32], index: 7, kind: input, shape index: {}]   ;;  %s3517_s8 = inlined_call_operand.vmem [shape: bf16[4,32,32], index: 8, kind: input, shape index: {}]   ;;  %s3518_s9 = inlined_call_operand.vmem [shape: f32[1,26,32], index: 9, kind: input, shape index: {}]   ;;  %s3519_s10 = inlined_call_operand.vmem [shape: bf16[1,32,96], index: 10, kind: input, shape index: {}]   ;;  %s3520_s11 = inlined_call_operand.vmem [shape: bf16[5,32,32], index: 11, kind: input, shape index: {}]   ;;  %s3521_s12 = inlined_call_operand.vmem [shape: f32[4,16,32], index: 12, kind: output, shape index: {}]  }
   0x1 LB: > { %s2481_s22 = sadd.s32 4294967295, %s2899_s21   ;;  %p2485_p0 = scmp.ge.s32.totalorder %s2899_s21, 1  ;;  %s2899_s21 = sphi %s2981_s21, %s22_s21  }
   0x2   : > { %p390_p1 = scmp.lt.s32.totalorder %s2899_s21, 5 }
   0x4   : > { %p391_p2 = pnand %p2485_p0, %p390_p1 }
   0x5   : > { %p445_p3 = scmp.lt.s32.totalorder (!%p391_p2), %s2481_s22, 3  ;;  %s2901_s15 = smov (!%p391_p2), 32  }
   0x6   : > { %394 = sbr.rel (%p391_p2) target bundleno = 5506 (0x1582), region = 68  ;;  %s2905_s27 = smov (!%p391_p2), 64  }
   0x7   : > { %s2908_s30 = smov (!%p391_p2), 120   ;;  %s2910_s17 = smov (!%p391_p2), 80  }
   0x8   : > { %s2911_s18 = smov (!%p391_p2), 112   ;;  %s2913_s26 = smov (!%p391_p2), 48  }
   0xb   : > { %v2806_v0 = vld [vmem:[%s3515_s6] sm:$0xff]   ;;  %s3523_s22 = smov (!%p445_p3, %s2481_s22), 3  ;;  %vm490_vm0 = vcmask 130048   ;;  %v2807_v16 = vld [vmem:[%s3516_s7 + $0x18] sm:$0xff]   ;;  %v2902_v17 = vmov 0.0   ;;  %v2808_v18 = vld [vmem:[%s3516_s7 + $0x10] sm:$0xff]   ;;  %v574_v22 = vlaneseq }
   0xc   : > { %2610 = vmatprep.subr.bf16.mxu0 %v2806_v0  ;;  %s2545_s25 = sshll.u32 %s3523_s22, 6  ;;  %s2999_s29 = sshll.u32 %s3523_s22, 4  ;;  %2620 = vmatprep.subr.bf16.mxu1 %v2902_v17  ;;  %v2809_v19 = vld [vmem:[%s3516_s7 + $0x8] sm:$0xff]   ;;  %v2810_v20 = vld [vmem:[%s3516_s7] sm:$0xff]   ;;  %vm2903_vm1 = vmmov 0   ;;  %vm592_vm2 = vcmask 261120  }
   0xd   : > { %2611 = vmatpush3.bf16.msra.mxu0 %v2806_v0  ;;  %s449_s28 = scalar_lea.vmem %s3509_s0, %s2545_s25  ;;  %s454_s14 = scalar_lea.vmem %s3510_s1, %s2999_s29  ;;  %2621 = vmatpush3.bf16.msra.mxu1 %v2807_v16  ;;  %v2811_v21 = vld [vmem:[%s3517_s8 + $0x8] sm:$0xff]   ;;  %v3036_v25 = vshrl.u32 %v574_v22, 7  ;;  %v3044_v30 = vld [vmem:[%s3514_s5] sm:$0x3f]  ;;  %vm632_vm3 = vcmask 523264   ;;  %v2815_v63 = vld [vmem:[%s3517_s8 + $0x18] sm:$0xff]  }
   0xe   : > { %v470_v1 = vld [vmem:[%s449_s28] sm:$0xff]  ;;  %v471_v2 = vld [vmem:[%s449_s28 + $0x8] sm:$0xff]  ;;  %v472_v3 = vld [vmem:[%s449_s28 + $0x10] sm:$0xff]  ;;  %2632 = vmatprep.subr.bf16.mxu0 %v2902_v17  ;;  %2622 = vmatprep.subr.bf16.mxu1 %v2902_v17  ;;  %s462_s20 = scalar_lea.vmem %s3512_s3, %s2999_s29  ;;  %s457_s16 = scalar_lea.vmem %s3511_s2, %s3523_s22 }
   0xf   : > { %v478_v4 = vpack.c.bf16 %v471_v2, %v470_v1  ;;  %v473_v5 = vld [vmem:[%s449_s28 + $0x18] sm:$0xff]  ;;  %v474_v6 = vld [vmem:[%s449_s28 + $0x20] sm:$0xff]  ;;  %v475_v7 = vld [vmem:[%s449_s28 + $0x28] sm:$0xff]  ;;  %2628 = vmatprep.mubr.msk.bf16.mxu1 %vm2903_vm1, %v2902_v17  ;;  %v3039_v28 = vsub.s32 0, %v3036_v25  ;;  %v3066_v54 = vsub.s32 1, %v3036_v25  ;;  %vm1081_vm8 = vcmp.lt.s32.totalorder %v3036_v25, 2 }
  0x10   : > { %v479_v8 = vpack.c.bf16 %v473_v5, %v472_v3  ;;  %v480_v9 = vpack.c.bf16 %v475_v7, %v474_v6  ;;  %v582_v10 = vld [vmem:[%s454_s14] sm:$0xff]  ;;  %v476_v11 = vld [vmem:[%s449_s28 + $0x30] sm:$0xff]  ;;  %v477_v12 = vld [vmem:[%s449_s28 + $0x38] sm:$0xff]  ;;  %v3096_v3 = vsub.s32 2, %v3036_v25  ;;  %vm1084_vm9 = vcmp.ge.s32.totalorder %v3036_v25, 2  ;;  %s2907_s28 = smov 96  }
  0x11   : > { %2612 = vmatprep.mubr.msk.bf16.mxu0 %vm490_vm0, %v478_v4  ;;  %v583_v13 = vld [vmem:[%s454_s14 + $0x8] sm:$0xff]  ;;  %v481_v15 = vpack.c.bf16 %v477_v12, %v476_v11  ;;  %2623 = vmatpush3.bf16.msra.mxu1 %v2808_v18  ;;  %v577_v34 = vrot.slane %v3044_v30, %v3039_v28  ;;  %v2812_v52 = vld [vmem:[%s3517_s8] sm:$0xff]   ;;  %v607_v56 = vrot.slane %v3044_v30, %v3066_v54  ;;  %v2816_v0 = vld [vmem:[%s3517_s8 + $0x38] sm:$0xff]   ;;  %vm1102_vm10 = vcmp.lt.s32.totalorder %v3036_v25, 1  ;;  %s2909_s22 = smov 56   ;;  %s2912_s25 = smov 72  }
  0x12   : > { %2613 = vmatmul.mubr.msk.bf16.vlgmr.msra.gmra.mxu0 %vm490_vm0, %v479_v8  ;;  %v2799_v14 = vpack.i.bf16 %v583_v13, %v582_v10  ;;  %2624 = vmatprep.subr.bf16.mxu1 %v2902_v17  ;;  %v2813_v51 = vld [vmem:[%s3517_s8 + $0x28] sm:$0xff]   ;;  %v2814_v53 = vld [vmem:[%s3517_s8 + $0x20] sm:$0xff]   ;;  %v2817_v1 = vld [vmem:[%s3517_s8 + $0x10] sm:$0xff]   ;;  %v697_v4 = vrot.slane %v3044_v30, %v3096_v3  ;;  %vm1105_vm11 = vcmp.ge.s32.totalorder %v3036_v25, 1  ;;  %vm1131_vm12 = vcmp.lt.s32.totalorder %v3036_v25, 7 }
  0x13   : > { %2616 = vmatprep.mubr.msk.bf16.mxu0 %vm490_vm0, %v480_v9  ;;  %2633 = vmatpush3.bf16.msra.mxu0 %v2811_v21  ;;  %v2818_v2 = vld [vmem:[%s3517_s8 + $0x30] sm:$0xff]   ;;  %vm1152_vm14 = vcmp.lt.s32.totalorder %v3036_v25, 6 }
  0x14   : > { %2800 = vrot.lane.b32.xlu0 %v2799_v14, %s2901_s15  ;;  %2634 = vmatprep.subr.bf16.mxu0 %v2902_v17 }
  0x15   : > { %2625 = vmatpush3.bf16.msra.mxu1 %v2809_v19 }
  0x16   : > { %2626 = vmatprep.subr.bf16.mxu1 %v2902_v17 }
  0x17   : > { %2635 = vmatpush3.bf16.msra.mxu0 %v2812_v52 }
  0x18   : > { %2648 = vmatprep.subr.bf16.mxu0 %v2902_v17 }
  0x19   : > { %2627 = vmatpush3.bf16.msra.mxu1 %v2810_v20 }
  0x1a   : > { %2617 = vmatmul.mubr.msk.bf16.gmra.mxu0 %vm490_vm0, %v481_v15  ;;  %2640 = vmatprep.subr.bf16.mxu1 %v2902_v17 }
  0x1b   : > { %2636 = vmatprep.mubr.msk.bf16.mxu0 %vm2903_vm1, %v2902_v17 }
  0x86   : > { %v2801_v41 = vpop.permute.xlu0 %2800 }
  0x87   : > { %v2803_v45 = vunpack.i.h.bf16 %v2801_v41  ;;  %v2802_v46 = vunpack.i.l.bf16 %v2801_v41 }
  0xd2   : > { %v2614_v23 = vpop.f32.mrf.mxu0 }
  0xd4   : > { %v537_v24 = vpop.f32.mrf.mxu0 }
  0xd5   : > { %v568_v31 = vmax.f32 %v537_v24, %v2614_v23 }
  0xd6   : > { %v2615_v26 = vpop.f32.mrf.mxu0 }
  0xd8   : > { %v540_v27 = vpop.f32.mrf.mxu0 }
  0xd9   : > { %v569_v36 = vmax.f32 %v540_v27, %v2615_v26  ;;  %v3101_v27 = vsub.s32 4, %v3036_v25 }
  0xda   : > { %v2618_v29 = vpop.f32.mrf.mxu0 }
  0xdc   : > { %v553_v32 = vpop.f32.mrf.mxu0 }
  0xdd   : > { %v570_v33 = vmax.f32 %v568_v31, %v553_v32  ;;  %v777_v31 = vrot.slane %v3044_v30, %v3101_v27 }
  0xde   : > { %v2619_v35 = vpop.f32.mrf.mxu0 }
  0xdf   : > { %v572_v37 = vmax.f32 %v570_v33, %v2618_v29 }
  0xe0   : > { %v556_v38 = vpop.f32.mrf.mxu0 }
  0xe1   : > { %v578_v39 = vadd.f32 %v577_v34, %v572_v37  ;;  %v571_v40 = vmax.f32 %v569_v36, %v556_v38 }
  0xe3   : > { %v573_v42 = vmax.f32 %v571_v40, %v2619_v35  ;;  %v580_v43 = vmax.f32 %v578_v39, 0.0 }
  0xe5   : > { %v579_v44 = vadd.f32 %v577_v34, %v573_v42  ;;  %v593_v48 = vsel %vm592_vm2, %v580_v43, %v2802_v46 }
  0xe7   : > { %v581_v47 = vmax.f32 %v579_v44, 0.0 }
  0xe9   : > { %v594_v49 = vsel %vm592_vm2, %v581_v47, %v2803_v45 }
  0xea   : > { %v595_v50 = vpack.c.bf16 %v594_v49, %v593_v48 }
  0xec   : > { %2629 = vmatmul.mubr.msk.bf16.vlgmr.msra.gmra.mxu1 %vm632_vm3, %v595_v50  ;;  %v2904_v50 = vmov 0  }
  0xed   : > { %2644 = vmatprep.mubr.msk.bf16.mxu1 %vm2903_vm1, %v2902_v17  ;;  %2641 = vmatpush3.bf16.msra.mxu1 %v2813_v51  ;;  %v3113_v51 = vsub.s32 3, %v3036_v25 }
  0xee   : > { %2642 = vmatprep.subr.bf16.mxu1 %v2902_v17  ;;  %2804 = vset.pattern.permute.xlu1 %v2904_v50 }
  0xef   : > { %2805 = vset.pattern.permute.xlu0 %v2904_v50  ;;  %v845_v52 = vrot.slane %v3044_v30, %v3113_v51 }
  0xf1   : > { %2643 = vmatpush3.bf16.msra.mxu1 %v2814_v53 }
  0xf2   : > { %2656 = vmatprep.subr.bf16.mxu1 %v2902_v17 }
 0x1ac   : > { %v670_v55 = vpop.f32.mrf.mxu1 }
 0x1ad   : > { %v671_v59 = vadd.f32 %v670_v55, %v607_v56 }
 0x1ae   : > { %v2630_v57 = vpop.f32.mrf.mxu1 }
 0x1b0   : > { %v673_v58 = vpop.f32.mrf.mxu1 }
 0x1b1   : > { %v3070_v60 = vadd.f32 %v673_v58, %v607_v56 }
 0x1b2   : > { %v2631_v61 = vpop.f32.mrf.mxu1 }
 0x1b3   : > { %v693_v62 = vpack.c.bf16 %v3070_v60, %v671_v59 }
 0x1b5   : > { %2637 = vmatmul.mubr.msk.bf16.vlgmr.msra.gmra.mxu0 %vm592_vm2, %v693_v62  ;;  %2645 = vmatmul.mubr.msk.bf16.vlgmr.msra.gmra.mxu1 %vm592_vm2, %v693_v62 }
 0x1b6   : > { %2652 = vmatprep.mubr.msk.bf16.mxu0 %vm2903_vm1, %v2902_v17  ;;  %2660 = vmatprep.mubr.msk.bf16.mxu1 %vm2903_vm1, %v2902_v17 }
 0x1b7   : > { %2649 = vmatpush3.bf16.msra.mxu0 %v2815_v63  ;;  %2657 = vmatpush3.bf16.msra.mxu1 %v2816_v0 }
 0x1b8   : > { %2650 = vmatprep.subr.bf16.mxu0 %v2902_v17  ;;  %2658 = vmatprep.subr.bf16.mxu1 %v2902_v17 }
 0x1bb   : > { %2651 = vmatpush3.bf16.msra.mxu0 %v2817_v1  ;;  %2659 = vmatpush3.bf16.msra.mxu1 %v2818_v2 }
 0x1bc   : > { %2664 = vmatprep.subr.bf16.mxu0 %v2902_v17  ;;  %2672 = vmatprep.subr.bf16.mxu1 %v2902_v17 }
 0x275   : > { %v747_v5 = vpop.f32.mrf.mxu0  ;;  %v824_v6 = vpop.f32.mrf.mxu1 }
 0x276   : > { %v748_v7 = vadd.f32 %v747_v5, %v697_v4  ;;  %v825_v35 = vadd.f32 %v824_v6, %v777_v31 }
 0x277   : > { %v2638_v8 = vpop.f32.mrf.mxu0  ;;  %v2646_v9 = vpop.f32.mrf.mxu1 }
 0x278   : > { %v754_v10 = vand.u32 2147483647, %v748_v7  ;;  %vm762_vm4 = vcmp.ge.f32.partialorder %v748_v7, 0.0  ;;  %v831_v40 = vmax.f32 %v825_v35, 0.0 }
 0x279   : > { %v750_v11 = vpop.f32.mrf.mxu0  ;;  %v827_v12 = vpop.f32.mrf.mxu1 }
 0x27a   : > { %v756_v13 = vsub.f32 0.0, %v754_v10  ;;  %v751_v14 = vadd.f32 %v750_v11, %v697_v4  ;;  %v828_v37 = vadd.f32 %v827_v12, %v777_v31  ;;  %v3118_v11 = vsub.s32 5, %v3036_v25 }
 0x27b   : > { %v2639_v15 = vpop.f32.mrf.mxu0  ;;  %v2647_v16 = vpop.f32.mrf.mxu1 }
 0x27c   : > { %v758_v18 = vmul.f32 1.442695, %v756_v13  ;;  %v755_v19 = vand.u32 2147483647, %v751_v14  ;;  %vm763_vm5 = vcmp.ge.f32.partialorder %v751_v14, 0.0  ;;  %v832_v42 = vmax.f32 %v828_v37, 0.0 }
 0x27d   : > { %v925_v12 = vrot.slane %v3044_v30, %v3118_v11 }
 0x27e   : > { %2829 = vpow2.f32 %v758_v18  ;;  %v757_v20 = vsub.f32 0.0, %v755_v19 }
 0x280   : > { %v760_v21 = vmul.f32 1.442695, %v757_v20 }
 0x282   : > { %2831 = vpow2.f32 %v760_v21 }
 0x28b   : > { %v2830_v22 = vpop.eup %2829 }
 0x28c   : > { %v764_v23 = vadd.f32 1.0, %v2830_v22 }
 0x28e   : > { %2833 = vrcp.f32 %v764_v23 }
 0x28f   : > { %v2832_v24 = vpop.eup %2831 }
 0x290   : > { %v765_v26 = vadd.f32 1.0, %v2832_v24 }
 0x292   : > { %2835 = vrcp.f32 %v765_v26 }
 0x29b   : > { %v2834_v29 = vpop.eup %2833 }
 0x29c   : > { %v770_v32 = vmul.f32 %v2834_v29, %v2830_v22 }
 0x29e   : > { %v772_v33 = vsel %vm762_vm4, %v2834_v29, %v770_v32  ;;  %v993_v29 = vld [vmem:[%s3513_s4] sm:$0xff]  ;;  %vm1777_vm4 = vcmask 1043456  }
 0x29f   : > { %v2836_v34 = vpop.eup %2835  ;;  %v835_v36 = vsub.f32 1.0, %v772_v33  ;;  %v833_v44 = vmul.f32 %v831_v40, %v772_v33 }
 0x2a0   : > { %v771_v38 = vmul.f32 %v2836_v34, %v2832_v24 }
 0x2a1   : > { %v837_v41 = vmul.f32 %v835_v36, %v671_v59  ;;  %v994_v36 = vld [vmem:[%s3513_s4 + $0x8] sm:$0xff] }
 0x2a2   : > { %v773_v39 = vsel %vm763_vm5, %v2836_v34, %v771_v38 }
 0x2a3   : > { %v836_v43 = vsub.f32 1.0, %v773_v39  ;;  %v834_v45 = vmul.f32 %v832_v42, %v773_v39  ;;  %v839_v47 = vadd.f32 %v837_v41, %v833_v44  ;;  %v991_v41 = vld [vmem:[%s462_s20] sm:$0xff] }
 0x2a5   : > { %v838_v46 = vmul.f32 %v836_v43, %v3070_v60 }
 0x2a7   : > { %v840_v48 = vadd.f32 %v838_v46, %v834_v45 }
 0x2a9   : > { %v841_v49 = vpack.c.bf16 %v840_v48, %v839_v47 }
 0x2ab   : > { %2653 = vmatmul.mubr.msk.bf16.vlgmr.msra.gmra.mxu0 %vm592_vm2, %v841_v49  ;;  %2661 = vmatmul.mubr.msk.bf16.vlgmr.msra.gmra.mxu1 %vm592_vm2, %v841_v49 }
 0x2ac   : > { %2668 = vmatprep.mubr.msk.bf16.mxu0 %vm2903_vm1, %v2902_v17  ;;  %2676 = vmatprep.mubr.msk.bf16.mxu1 %vm2903_vm1, %v2902_v17 }
 0x36b   : > { %v895_v53 = vpop.f32.mrf.mxu0  ;;  %v972_v55 = vpop.f32.mrf.mxu1 }
 0x36c   : > { %v896_v56 = vadd.f32 %v895_v53, %v845_v52  ;;  %v973_v14 = vadd.f32 %v972_v55, %v925_v12  ;;  %v992_v53 = vld [vmem:[%s462_s20 + $0x8] sm:$0xff] }
 0x36d   : > { %v2654_v57 = vpop.f32.mrf.mxu0  ;;  %v2662_v58 = vpop.f32.mrf.mxu1  ;;  %v2819_v55 = vld [vmem:[%s3520_s11 + $0x8] sm:$0xff]  }
 0x36e   : > { %v902_v59 = vand.u32 2147483647, %v896_v56  ;;  %vm910_vm6 = vcmp.ge.f32.partialorder %v896_v56, 0.0  ;;  %v979_v19 = vmax.f32 %v973_v14, 0.0  ;;  %2665 = vmatpush3.bf16.msra.mxu0 %v2819_v55  ;;  %v2820_v56 = vld [vmem:[%s3520_s11] sm:$0xff]   ;;  %v3168_v14 = vadd.s32 8, %v3036_v25 }
 0x36f   : > { %v898_v60 = vpop.f32.mrf.mxu0  ;;  %v975_v61 = vpop.f32.mrf.mxu1  ;;  %2666 = vmatprep.subr.bf16.mxu0 %v2902_v17 }
 0x370   : > { %v904_v62 = vsub.f32 0.0, %v902_v59  ;;  %v899_v63 = vadd.f32 %v898_v60, %v845_v52  ;;  %v976_v21 = vadd.f32 %v975_v61, %v925_v12  ;;  %vm1135_vm13 = vcmp.lt.s32.totalorder %v3168_v14, 15 }
 0x371   : > { %v2655_v0 = vpop.f32.mrf.mxu0  ;;  %v2663_v1 = vpop.f32.mrf.mxu1  ;;  %vm1156_vm15 = vcmp.lt.s32.totalorder %v3168_v14, 14 }
 0x372   : > { %v906_v2 = vmul.f32 1.442695, %v904_v62  ;;  %v903_v4 = vand.u32 2147483647, %v899_v63  ;;  %vm911_vm7 = vcmp.ge.f32.partialorder %v899_v63, 0.0  ;;  %v980_v31 = vmax.f32 %v976_v21, 0.0  ;;  %2667 = vmatpush3.bf16.msra.mxu0 %v2820_v56 }
 0x373   : > { %2680 = vmatprep.subr.bf16.mxu0 %v2902_v17  ;;  %v3157_v0 = vld [vmem:[%s3518_s9] sm:$0xff] }
 0x374   : > { %2837 = vpow2.f32 %v906_v2  ;;  %v905_v5 = vsub.f32 0.0, %v903_v4  ;;  %v1058_v1 = vrot.slane %v3157_v0, %v3039_v28 }
 0x376   : > { %v908_v6 = vmul.f32 1.442695, %v905_v5  ;;  %v1064_v5 = vrot.slane %v3157_v0, %v3096_v3 }
 0x378   : > { %2839 = vpow2.f32 %v908_v6 }
 0x381   : > { %v2838_v7 = vpop.eup %2837 }
 0x382   : > { %v912_v8 = vadd.f32 1.0, %v2838_v7 }
 0x384   : > { %2841 = vrcp.f32 %v912_v8 }
 0x385   : > { %v2840_v9 = vpop.eup %2839 }
 0x386   : > { %v913_v10 = vadd.f32 1.0, %v2840_v9 }
 0x388   : > { %2843 = vrcp.f32 %v913_v10  ;;  %v3164_v10 = vsub.s32 6, %v3036_v25 }
 0x391   : > { %v2842_v13 = vpop.eup %2841 }
 0x392   : > { %v918_v15 = vmul.f32 %v2842_v13, %v2838_v7 }
 0x394   : > { %v920_v16 = vsel %vm910_vm6, %v2842_v13, %v918_v15  ;;  %v3171_v15 = vsub.s32 7, %v3036_v25 }
 0x395   : > { %v2844_v18 = vpop.eup %2843  ;;  %v983_v20 = vsub.f32 1.0, %v920_v16  ;;  %v981_v23 = vmul.f32 %v979_v19, %v920_v16  ;;  %v1095_v16 = vrot.slane %v3157_v0, %v3101_v27  ;;  %v1116_v19 = vrot.slane %v3157_v0, %v3118_v11 }
 0x396   : > { %v919_v22 = vmul.f32 %v2844_v18, %v2840_v9 }
 0x397   : > { %v985_v24 = vmul.f32 %v983_v20, %v839_v47  ;;  %v1124_v20 = vrot.slane %v3157_v0, %v3164_v10 }
 0x398   : > { %v921_v26 = vsel %vm911_vm7, %v2844_v18, %v919_v22  ;;  %v3186_v22 = vld [vmem:[%s3518_s9 + $0x8] sm:$0xff] }
 0x399   : > { %v987_v30 = vadd.f32 %v985_v24, %v981_v23  ;;  %v984_v32 = vsub.f32 1.0, %v921_v26  ;;  %v982_v33 = vmul.f32 %v980_v31, %v921_v26  ;;  %v1145_v26 = vrot.slane %v3157_v0, %v3171_v15 }
 0x39a   : > { %v1344_v25 = vrot.slane %v3186_v22, %v3171_v15 }
 0x39b   : > { %v986_v34 = vmul.f32 %v984_v32, %v840_v48  ;;  %v3125_v35 = vadd.f32 %v993_v29, %v987_v30 }
 0x39d   : > { %v988_v37 = vadd.f32 %v986_v34, %v982_v33  ;;  %v1028_v38 = vsel %vm592_vm2, %v3125_v35, 0.0 }
 0x39e   : > { %1029 = vadd.xlane.f32.xlu0 %v1028_v38 }
 0x39f   : > { %v3132_v39 = vadd.f32 %v994_v36, %v988_v37  ;;  %v1166_v36 = vrot.slane %v3186_v22, %v3039_v28 }
 0x3a1   : > { %v1031_v40 = vsel %vm592_vm2, %v3132_v39, 0.0 }
 0x3a2   : > { %1032 = vadd.xlane.f32.xlu1 %v1031_v40 }
 0x3b3   : > { %1069 = vperm.xlu1 %2804, %v991_v41  }
 0x427   : > { %v1030_v42 = vpop.xlane.xlu0 %1029 }
 0x428   : > { %v1035_v43 = vmul.f32 0.03125, %v1030_v42 }
 0x42a   : > { %v1037_v44 = vsub.f32 %v3125_v35, %v1035_v43 }
 0x42b   : > { %v1033_v45 = vpop.xlane.xlu1 %1032 }
 0x42c   : > { %v1036_v46 = vmul.f32 0.03125, %v1033_v45  ;;  %v1039_v47 = vmul.f32 %v1037_v44, %v1037_v44 }
 0x42e   : > { %v1038_v48 = vsub.f32 %v3132_v39, %v1036_v46  ;;  %v1041_v49 = vsel %vm592_vm2, %v1039_v47, 0.0 }
 0x42f   : > { %1042 = vadd.xlane.f32.xlu1 %v1041_v49  ;;  %v3152_v57 = vpop.permute.xlu1 %1069 }
 0x430   : > { %v1040_v50 = vmul.f32 %v1038_v48, %v1038_v48 }
 0x432   : > { %v1044_v52 = vsel %vm592_vm2, %v1040_v50, 0.0 }
 0x433   : > { %1045 = vadd.xlane.f32.xlu1 %v1044_v52 }
 0x444   : > { %1074 = vperm.xlu1 %2804, %v992_v53  }
 0x4b8   : > { %v1043_v58 = vpop.xlane.xlu1 %1042 }
 0x4b9   : > { %v1047_v59 = vmul.f32 0.03125, %v1043_v58 }
 0x4bb   : > { %v1049_v60 = vadd.f32 1e-05, %v1047_v59 }
 0x4bc   : > { %v1046_v61 = vpop.xlane.xlu1 %1045 }
 0x4bd   : > { %2845 = vrsqrt.f32 %v1049_v60  ;;  %v1048_v62 = vmul.f32 0.03125, %v1046_v61 }
 0x4bf   : > { %v1050_v63 = vadd.f32 1e-05, %v1048_v62 }
 0x4c0   : > { %v3181_v21 = vpop.permute.xlu1 %1074 }
 0x4c1   : > { %2847 = vrsqrt.f32 %v1050_v63 }
 0x4ca   : > { %v2846_v2 = vpop.eup %2845 }
 0x4cb   : > { %v1053_v4 = vmul.f32 %v2846_v2, %v1037_v44 }
 0x4cd   : > { %v1059_v6 = vmul.f32 %v1058_v1, %v1053_v4 }
 0x4ce   : > { %v2848_v7 = vpop.eup %2847 }
 0x4cf   : > { %v1054_v8 = vmul.f32 %v2848_v7, %v1038_v48  ;;  %v1065_v9 = vadd.f32 %v1064_v5, %v1059_v6 }
 0x4d1   : > { %v1060_v12 = vmul.f32 %v1058_v1, %v1054_v8  ;;  %v1077_v13 = vmul.f32 %v3152_v57, %v1065_v9 }
 0x4d3   : > { %v1066_v18 = vadd.f32 %v1064_v5, %v1060_v12  ;;  %v1079_v24 = vrot.slane %v1077_v13, 6  ;;  %v1100_v29 = vrot.slane %v1077_v13, 7  ;;  %v1129_v33 = vrot.slane %v1077_v13, 1 }
 0x4d4   : > { %v1150_v49 = vrot.slane %v1077_v13, 2  ;;  %v1125_v56 = vmul.f32 %v1124_v20, %v1077_v13  ;;  %v1175_v13 = vrot.slane %v3186_v22, %v3164_v10 }
 0x4d5   : > { %v1078_v23 = vmul.f32 %v3181_v21, %v1066_v18 }
 0x4d7   : > { %v1080_v30 = vrot.slane %v1078_v23, 6  ;;  %v1101_v31 = vrot.slane %v1078_v23, 7  ;;  %v1130_v32 = vrot.slane %v1078_v23, 1  ;;  %v1151_v34 = vrot.slane %v1078_v23, 2 }
 0x4d8   : > { %v1126_v52 = vmul.f32 %v1124_v20, %v1078_v23 }
 0x4d9   : > { %v1082_v37 = vsel %vm1081_vm8, %v1079_v24, %v1080_v30  ;;  %v1083_v38 = vsel %vm1081_vm8, %v1080_v30, %v1079_v24  ;;  %v1103_v40 = vsel %vm1102_vm10, %v1100_v29, %v1101_v31  ;;  %v1104_v41 = vsel %vm1102_vm10, %v1101_v31, %v1100_v29 }
 0x4da   : > { %v1090_v42 = vsel %vm1084_vm9, %v1083_v38, 0.0  ;;  %v1097_v43 = vmul.f32 %v1095_v16, %v1082_v37  ;;  %v1111_v44 = vsel %vm1105_vm11, %v1104_v41, 0.0  ;;  %v1118_v45 = vmul.f32 %v1116_v19, %v1103_v40 }
 0x4db   : > { %v1096_v46 = vmul.f32 %v1095_v16, %v1090_v42  ;;  %v1117_v47 = vmul.f32 %v1116_v19, %v1111_v44  ;;  %v1133_v48 = vsel %vm1131_vm12, %v1130_v32, %v1129_v33  ;;  %v1132_v53 = vsel %vm1131_vm12, %v1129_v33, %v1130_v32  ;;  %v2821_v44 = vld [vmem:[%s3520_s11 + $0x18] sm:$0xff]  }
 0x4dc   : > { %v1120_v50 = vadd.f32 %v1118_v45, %v1097_v43  ;;  %v1141_v55 = vsel %vm1135_vm13, %v1133_v48, 0.0  ;;  %v1154_v59 = vsel %vm1152_vm14, %v1151_v34, %v1150_v49  ;;  %v1153_v62 = vsel %vm1152_vm14, %v1150_v49, %v1151_v34  ;;  %2673 = vmatpush3.bf16.msra.mxu1 %v2821_v44  ;;  %v2822_v45 = vld [vmem:[%s3520_s11 + $0x10] sm:$0xff]  }
 0x4dd   : > { %v1119_v58 = vadd.f32 %v1117_v47, %v1096_v46  ;;  %v1147_v61 = vmul.f32 %v1145_v26, %v1141_v55  ;;  %v1162_v63 = vsel %vm1156_vm15, %v1154_v59, 0.0  ;;  %v1146_v2 = vmul.f32 %v1145_v26, %v1132_v53  ;;  %2674 = vmatprep.subr.bf16.mxu1 %v2902_v17 }
 0x4de   : > { %v1128_v60 = vadd.f32 %v1126_v52, %v1120_v50  ;;  %v1168_v5 = vmul.f32 %v1166_v36, %v1162_v63  ;;  %v1167_v7 = vmul.f32 %v1166_v36, %v1153_v62  ;;  %v1265_v53 = vrot.slane %v3157_v0, %v3066_v54 }
 0x4df   : > { %v1127_v1 = vadd.f32 %v1125_v56, %v1119_v58  ;;  %v1271_v56 = vrot.slane %v3157_v0, %v3113_v51  ;;  %v1285_v0 = vrot.slane %v3186_v22, %v3066_v54 }
 0x4e0   : > { %v1149_v4 = vadd.f32 %v1147_v61, %v1128_v60  ;;  %2675 = vmatpush3.bf16.msra.mxu1 %v2822_v45 }
 0x4e1   : > { %v1148_v6 = vadd.f32 %v1146_v2, %v1127_v1  ;;  %2688 = vmatprep.subr.bf16.mxu1 %v2902_v17 }
 0x4e2   : > { %v1170_v8 = vadd.f32 %v1168_v5, %v1149_v4  ;;  %v1299_v5 = vrot.slane %v3186_v22, %v3096_v3 }
 0x4e3   : > { %v1169_v9 = vadd.f32 %v1167_v7, %v1148_v6  ;;  %v1321_v6 = vrot.slane %v3186_v22, %v3101_v27 }
 0x4e5   : > { %v1171_v12 = vpack.c.bf16 %v1170_v8, %v1169_v9 }
 0x4e7   : > { %2669 = vmatmul.mubr.msk.bf16.vlgmr.msra.gmra.mxu0 %vm592_vm2, %v1171_v12 }
 0x4e8   : > { %2684 = vmatprep.mubr.msk.bf16.mxu0 %vm2903_vm1, %v2902_v17 }
 0x5a7   : > { %v1225_v16 = vpop.f32.mrf.mxu0 }
 0x5a8   : > { %v1226_v18 = vadd.f32 %v1225_v16, %v1175_v13 }
 0x5a9   : > { %v2670_v19 = vpop.f32.mrf.mxu0 }
 0x5aa   : > { %v1232_v20 = vmax.f32 %v1226_v18, 0.0 }
 0x5ab   : > { %v1228_v23 = vpop.f32.mrf.mxu0 }
 0x5ac   : > { %v3229_v24 = vadd.f32 %v1232_v20, %v3125_v35  ;;  %v1229_v26 = vadd.f32 %v1228_v23, %v1175_v13 }
 0x5ad   : > { %v2671_v29 = vpop.f32.mrf.mxu0 }
 0x5ae   : > { %v1233_v30 = vmax.f32 %v1229_v26, 0.0  ;;  %v1236_v31 = vsel %vm592_vm2, %v3229_v24, 0.0 }
 0x5af   : > { %1237 = vadd.xlane.f32.xlu1 %v1236_v31 }
 0x5b0   : > { %v3234_v32 = vadd.f32 %v1233_v30, %v3132_v39 }
 0x5b2   : > { %v1239_v33 = vsel %vm592_vm2, %v3234_v32, 0.0 }
 0x5b3   : > { %1240 = vadd.xlane.f32.xlu0 %v1239_v33 }
 0x638   : > { %v1238_v34 = vpop.xlane.xlu1 %1237 }
 0x639   : > { %v1242_v36 = vmul.f32 0.03125, %v1238_v34 }
 0x63b   : > { %v1244_v37 = vsub.f32 %v3229_v24, %v1242_v36 }
 0x63c   : > { %v1241_v35 = vpop.xlane.xlu0 %1240 }
 0x63d   : > { %v1243_v38 = vmul.f32 0.03125, %v1241_v35  ;;  %v1246_v40 = vmul.f32 %v1244_v37, %v1244_v37 }
 0x63f   : > { %v1245_v41 = vsub.f32 %v3234_v32, %v1243_v38  ;;  %v1248_v42 = vsel %vm592_vm2, %v1246_v40, 0.0 }
 0x640   : > { %1249 = vadd.xlane.f32.xlu0 %v1248_v42 }
 0x641   : > { %v1247_v43 = vmul.f32 %v1245_v41, %v1245_v41 }
 0x643   : > { %v1251_v39 = vsel %vm592_vm2, %v1247_v43, 0.0 }
 0x644   : > { %1252 = vadd.xlane.f32.xlu0 %v1251_v39 }
 0x6c9   : > { %v1250_v46 = vpop.xlane.xlu0 %1249 }
 0x6ca   : > { %v1254_v47 = vmul.f32 0.03125, %v1250_v46 }
 0x6cc   : > { %v1256_v48 = vadd.f32 1e-05, %v1254_v47 }
 0x6cd   : > { %v1253_v49 = vpop.xlane.xlu0 %1252 }
 0x6ce   : > { %2849 = vrsqrt.f32 %v1256_v48  ;;  %v1255_v50 = vmul.f32 0.03125, %v1253_v49 }
 0x6d0   : > { %v1257_v52 = vadd.f32 1e-05, %v1255_v50 }
 0x6d2   : > { %2851 = vrsqrt.f32 %v1257_v52 }
 0x6db   : > { %v2850_v55 = vpop.eup %2849 }
 0x6dc   : > { %v1260_v58 = vmul.f32 %v2850_v55, %v1244_v37 }
 0x6de   : > { %v1266_v59 = vmul.f32 %v1265_v53, %v1260_v58 }
 0x6df   : > { %v2852_v60 = vpop.eup %2851 }
 0x6e0   : > { %v1272_v61 = vadd.f32 %v1271_v56, %v1266_v59  ;;  %v1261_v62 = vmul.f32 %v2852_v60, %v1245_v41 }
 0x6e2   : > { %v1267_v63 = vmul.f32 %v1265_v53, %v1261_v62  ;;  %v1274_v1 = vmul.f32 %v1272_v61, %v3152_v57  ;;  %v1307_v57 = vrot.slane %v3186_v22, %v3113_v51 }
 0x6e4   : > { %v1273_v2 = vadd.f32 %v1271_v56, %v1267_v63  ;;  %v1276_v7 = vrot.slane %v1274_v1, 6  ;;  %v1290_v9 = vrot.slane %v1274_v1, 7  ;;  %v1312_v16 = vrot.slane %v1274_v1, 1 }
 0x6e5   : > { %v1326_v36 = vrot.slane %v1274_v1, 2  ;;  %v1308_v42 = vmul.f32 %v1307_v57, %v1274_v1 }
 0x6e6   : > { %v1275_v4 = vmul.f32 %v1273_v2, %v3181_v21  ;;  %v1335_v21 = vrot.slane %v3186_v22, %v3118_v11 }
 0x6e8   : > { %v1277_v8 = vrot.slane %v1275_v4, 6  ;;  %v1291_v12 = vrot.slane %v1275_v4, 7  ;;  %v1313_v13 = vrot.slane %v1275_v4, 1  ;;  %v1327_v18 = vrot.slane %v1275_v4, 2 }
 0x6e9   : > { %v1309_v35 = vmul.f32 %v1307_v57, %v1275_v4 }
 0x6ea   : > { %v1278_v19 = vsel %vm1081_vm8, %v1276_v7, %v1277_v8  ;;  %v1279_v27 = vsel %vm1081_vm8, %v1277_v8, %v1276_v7  ;;  %v1292_v20 = vsel %vm1102_vm10, %v1290_v9, %v1291_v12  ;;  %v1293_v23 = vsel %vm1102_vm10, %v1291_v12, %v1290_v9 }
 0x6eb   : > { %v1280_v51 = vsel %vm1084_vm9, %v1279_v27, 0.0  ;;  %v1287_v26 = vmul.f32 %v1285_v0, %v1278_v19  ;;  %v1294_v29 = vsel %vm1105_vm11, %v1293_v23, 0.0  ;;  %v1301_v30 = vmul.f32 %v1299_v5, %v1292_v20  ;;  %v3319_v19 = vld [vmem:[%s3518_s9 + $0x10] sm:$0xff] }
 0x6ec   : > { %v1286_v31 = vmul.f32 %v1285_v0, %v1280_v51  ;;  %v1300_v33 = vmul.f32 %v1299_v5, %v1294_v29  ;;  %v1315_v34 = vsel %vm1131_vm12, %v1313_v13, %v1312_v16  ;;  %v1314_v38 = vsel %vm1131_vm12, %v1312_v16, %v1313_v13 }
 0x6ed   : > { %v1303_v37 = vadd.f32 %v1301_v30, %v1287_v26  ;;  %v1317_v40 = vsel %vm1135_vm13, %v1315_v34, 0.0  ;;  %v1329_v43 = vsel %vm1152_vm14, %v1327_v18, %v1326_v36  ;;  %v1328_v45 = vsel %vm1152_vm14, %v1326_v36, %v1327_v18  ;;  %v2823_v18 = vld [vmem:[%s3519_s10 + $0x8] sm:$0xff]  }
 0x6ee   : > { %v1302_v41 = vadd.f32 %v1300_v33, %v1286_v31  ;;  %v1323_v44 = vmul.f32 %v1321_v6, %v1317_v40  ;;  %v1331_v46 = vsel %vm1156_vm15, %v1329_v43, 0.0  ;;  %v1322_v48 = vmul.f32 %v1321_v6, %v1314_v38  ;;  %2681 = vmatpush3.bf16.msra.mxu0 %v2823_v18 }
 0x6ef   : > { %v1311_v39 = vadd.f32 %v1309_v35, %v1303_v37  ;;  %v1337_v50 = vmul.f32 %v1335_v21, %v1331_v46  ;;  %v1336_v53 = vmul.f32 %v1335_v21, %v1328_v45  ;;  %v2824_v21 = vld [vmem:[%s3519_s10] sm:$0xff]   ;;  %2682 = vmatprep.subr.bf16.mxu0 %v2902_v17  ;;  %v1444_v27 = vrot.slane %v3319_v19, 1 }
 0x6f0   : > { %v1310_v47 = vadd.f32 %v1308_v42, %v1302_v41  ;;  %v1448_v20 = vrot.slane %v3319_v19, 2  ;;  %v1434_v36 = vrot.slane %v3319_v19, %v3039_v28  ;;  %v1440_v40 = vrot.slane %v3319_v19, %v3066_v54 }
 0x6f1   : > { %v1325_v49 = vadd.f32 %v1323_v44, %v1311_v39 }
 0x6f2   : > { %v1324_v52 = vadd.f32 %v1322_v48, %v1310_v47  ;;  %2683 = vmatpush3.bf16.msra.mxu0 %v2824_v21  ;;  %1449 = vrot.lane.b32.xlu1 %v1448_v20, %s2905_s27 }
 0x6f3   : > { %v1339_v55 = vadd.f32 %v1337_v50, %v1325_v49  ;;  %2694 = vmatprep.subr.bf16.mxu0 %v2902_v17 }
 0x6f4   : > { %v1338_v56 = vadd.f32 %v1336_v53, %v1324_v52 }
 0x6f6   : > { %v1340_v58 = vpack.c.bf16 %v1339_v55, %v1338_v56 }
 0x6f8   : > { %2677 = vmatmul.mubr.msk.bf16.vlgmr.msra.gmra.mxu1 %vm592_vm2, %v1340_v58 }
 0x6f9   : > { %2690 = vmatprep.mubr.msk.bf16.mxu1 %vm2903_vm1, %v2902_v17 }
 0x764   : > { %v1450_v46 = vpop.permute.xlu1 %1449 }
 0x7b8   : > { %v1394_v59 = vpop.f32.mrf.mxu1 }
 0x7b9   : > { %v1395_v14 = vadd.f32 %v1394_v59, %v1344_v25 }
 0x7ba   : > { %v2678_v60 = vpop.f32.mrf.mxu1 }
 0x7bb   : > { %v1401_v61 = vmax.f32 %v1395_v14, 0.0 }
 0x7bc   : > { %v1397_v62 = vpop.f32.mrf.mxu1 }
 0x7bd   : > { %v3296_v63 = vadd.f32 %v1401_v61, %v3229_v24  ;;  %v1398_v1 = vadd.f32 %v1397_v62, %v1344_v25  ;;  %v989_v61 = vld [vmem:[%s457_s16] sm:$0x1] }
 0x7be   : > { %v2679_v2 = vpop.f32.mrf.mxu1  ;;  %v990_v62 = vmul.f32 1e+30, %v989_v61 }
 0x7bf   : > { %v1402_v4 = vmax.f32 %v1398_v1, 0.0  ;;  %v1405_v5 = vsel %vm592_vm2, %v3296_v63, 0.0 }
 0x7c0   : > { %1406 = vadd.xlane.f32.xlu0 %v1405_v5  ;;  %v3358_v1 = vrot.slane %v990_v62, %v3039_v28 }
 0x7c1   : > { %v3301_v6 = vadd.f32 %v1402_v4, %v3234_v32 }
 0x7c3   : > { %v1408_v22 = vsel %vm592_vm2, %v3301_v6, 0.0 }
 0x7c4   : > { %1409 = vadd.xlane.f32.xlu0 %v1408_v22 }
 0x849   : > { %v1407_v7 = vpop.xlane.xlu0 %1406 }
 0x84a   : > { %v1411_v0 = vmul.f32 0.03125, %v1407_v7 }
 0x84c   : > { %v1413_v8 = vsub.f32 %v3296_v63, %v1411_v0 }
 0x84d   : > { %v1410_v24 = vpop.xlane.xlu0 %1409 }
 0x84e   : > { %v1412_v9 = vmul.f32 0.03125, %v1410_v24  ;;  %v1415_v12 = vmul.f32 %v1413_v8, %v1413_v8 }
 0x850   : > { %v1414_v13 = vsub.f32 %v3301_v6, %v1412_v9  ;;  %v1417_v57 = vsel %vm592_vm2, %v1415_v12, 0.0 }
 0x851   : > { %1418 = vadd.xlane.f32.xlu0 %v1417_v57 }
 0x852   : > { %v1416_v16 = vmul.f32 %v1414_v13, %v1414_v13 }
 0x854   : > { %v1420_v32 = vsel %vm592_vm2, %v1416_v16, 0.0 }
 0x855   : > { %1421 = vadd.xlane.f32.xlu0 %v1420_v32 }
 0x86b   : > { %1445 = vrot.lane.b32.xlu0 %v1444_v27, %s2901_s15  ;;  %s2906_s15 = smov 88  }
 0x8da   : > { %v1419_v23 = vpop.xlane.xlu0 %1418 }
 0x8db   : > { %v1423_v51 = vmul.f32 0.03125, %v1419_v23 }
 0x8dd   : > { %v1425_v26 = vadd.f32 1e-05, %v1423_v51 }
 0x8de   : > { %v1422_v29 = vpop.xlane.xlu0 %1421 }
 0x8df   : > { %2853 = vrsqrt.f32 %v1425_v26  ;;  %v1424_v30 = vmul.f32 0.03125, %v1422_v29 }
 0x8e1   : > { %v1426_v31 = vadd.f32 1e-05, %v1424_v30 }
 0x8e2   : > { %v1446_v44 = vpop.permute.xlu0 %1445 }
 0x8e3   : > { %2855 = vrsqrt.f32 %v1426_v31  ;;  %v1452_v45 = vsel %vm592_vm2, %v3319_v19, %v1446_v44 }
 0x8e4   : > { %v1453_v47 = vsel %vm632_vm3, %v1452_v45, %v1450_v46  ;;  %vm1519_vm3 = vcmask 64512  }
 0x8e5   : > { %v1458_v49 = vrot.slane %v1453_v47, %v3096_v3 }
 0x8ec   : > { %v2854_v33 = vpop.eup %2853 }
 0x8ed   : > { %v1429_v34 = vmul.f32 %v2854_v33, %v1413_v8 }
 0x8ef   : > { %v1435_v38 = vmul.f32 %v1434_v36, %v1429_v34 }
 0x8f0   : > { %v2856_v37 = vpop.eup %2855 }
 0x8f1   : > { %v1430_v35 = vmul.f32 %v2856_v37, %v1414_v13  ;;  %v1441_v42 = vadd.f32 %v1440_v40, %v1435_v38 }
 0x8f3   : > { %v1436_v41 = vmul.f32 %v1434_v36, %v1430_v35 }
 0x8f5   : > { %v1442_v43 = vadd.f32 %v1440_v40, %v1436_v41 }
 0x8f7   : > { %v1454_v39 = vpack.c.bf16 %v1442_v43, %v1441_v42 }
 0x8f9   : > { %2685 = vmatmul.mubr.msk.bf16.vlgmr.msra.gmra.mxu0 %vm592_vm2, %v1454_v39 }
 0x8fa   : > { %2696 = vmatprep.mubr.msk.bf16.mxu0 %vm2903_vm1, %v2902_v17 }
 0x9b9   : > { %v1508_v48 = vpop.f32.mrf.mxu0 }
 0x9ba   : > { %v1509_v53 = vadd.f32 %v1508_v48, %v1458_v49 }
 0x9bb   : > { %v2686_v50 = vpop.f32.mrf.mxu0 }
 0x9bd   : > { %v1511_v52 = vpop.f32.mrf.mxu0 }
 0x9be   : > { %v1512_v55 = vadd.f32 %v1511_v52, %v1458_v49 }
 0x9bf   : > { %v2687_v56 = vpop.f32.mrf.mxu0 }
 0x9c0   : > { %v3337_v58 = vpack.c.bf16 %v1512_v55, %v1509_v53 }
 0x9c2   : > { %1650 = vrot.lane.b32.xlu1 %v3337_v58, %s2906_s15  ;;  %1517 = vrot.lane.b32.xlu0 %v3337_v58, %s2907_s28  ;;  %s467_s28 = scalar_lea.vmem %s3521_s12, %s2999_s29 }
 0x9c6   : > { %1648 = vrot.lane.b32.xlu0 %v3337_v58, %s2908_s30  ;;  %s2915_s30 = smov 40  }
 0xa34   : > { %v1518_v25 = vpop.permute.xlu0 %1517  ;;  %v1651_v59 = vpop.permute.xlu1 %1650 }
 0xa35   : > { %v1524_v3 = vsel %vm1519_vm3, %v1518_v25, 0  ;;  %v1656_v14 = vsel %vm1519_vm3, %v1651_v59, 0 }
 0xa36   : > { %2689 = vmatpush3.bf16.xpose.msra.mxu1 %v1524_v3 }
 0xa37   : > { %2700 = vmatprep.subr.bf16.mxu1 %v2902_v17 }
 0xa38   : > { %v1649_v60 = vpop.permute.xlu0 %1648 }
 0xa3d   : > { %2691 = vmatmul.mubr.msk.bf16.vlgmr.msra.gmra.mxu1 %vm1519_vm3, %v3337_v58 }
 0xa3e   : > { %2701 = vmatpush3.bf16.xpose.msra.mxu1 %v1656_v14  ;;  %2702 = vmatprep.mubr.msk.bf16.mxu1 %vm2903_vm1, %v2902_v17 }
 0xa3f   : > { %2712 = vmatprep.subr.bf16.mxu1 %v2902_v17 }
 0xa45   : > { %2703 = vmatmul.mubr.msk.bf16.vlgmr.msra.gmra.mxu1 %vm1519_vm3, %v1649_v60 }
 0xa46   : > { %2714 = vmatprep.mubr.msk.bf16.mxu1 %vm2903_vm1, %v2902_v17 }
 0xafd   : > { %v1560_v2 = vpop.f32.mrf.mxu1 }
 0xafe   : > { %v1567_v4 = vmul.f32 0.35355338, %v1560_v2 }
 0xaff   : > { %v2692_v5 = vpop.f32.mrf.mxu1 }
 0xb00   : > { %v1575_v22 = vsub.f32 %v1567_v4, %v3358_v1 }
 0xb01   : > { %v1563_v7 = vpop.f32.mrf.mxu1 }
 0xb02   : > { %v1568_v0 = vmul.f32 0.35355338, %v1563_v7  ;;  %v1577_v8 = vsel %vm490_vm0, %v1575_v22, -inf }
 0xb03   : > { %1578 = vmax.xlane.f32.xlu1 %v1577_v8  ;;  %v2693_v24 = vpop.f32.mrf.mxu1 }
 0xb04   : > { %v1576_v9 = vsub.f32 %v1568_v0, %v3358_v1  ;;  %v1012_v0 = vld [vmem:[%s3520_s11 + $0x24] sm:$0xf] }
 0xb05   : > { %v1692_v12 = vpop.f32.mrf.mxu1  ;;  %v1779_v8 = vsel %vm1777_vm4, %v1012_v0, 0 }
 0xb06   : > { %v1699_v13 = vmul.f32 0.35355338, %v1692_v12  ;;  %v1580_v57 = vsel %vm490_vm0, %v1576_v9, -inf  ;;  %2713 = vmatpush3.bf16.msra.mxu1 %v1779_v8 }
 0xb07   : > { %1581 = vmax.xlane.f32.xlu0 %v1580_v57  ;;  %v2704_v16 = vpop.f32.mrf.mxu1  ;;  %2724 = vmatprep.subr.bf16.mxu1 %v2902_v17 }
 0xb08   : > { %v1701_v32 = vsub.f32 %v1699_v13, %v3358_v1 }
 0xb09   : > { %v1695_v18 = vpop.f32.mrf.mxu1 }
 0xb0a   : > { %v1700_v21 = vmul.f32 0.35355338, %v1695_v18  ;;  %v1703_v27 = vsel %vm490_vm0, %v1701_v32, -inf }
 0xb0b   : > { %1704 = vmax.xlane.f32.xlu0 %v1703_v27  ;;  %v2705_v20 = vpop.f32.mrf.mxu1 }
 0xb0c   : > { %v1702_v23 = vsub.f32 %v1700_v21, %v3358_v1 }
 0xb0e   : > { %v1706_v51 = vsel %vm490_vm0, %v1702_v23, -inf }
 0xb0f   : > { %1707 = vmax.xlane.f32.xlu1 %v1706_v51 }
 0xb8c   : > { %v1579_v26 = vpop.xlane.xlu1 %1578 }
 0xb8d   : > { %v1583_v29 = vsub.f32 %v1575_v22, %v1579_v26  ;;  %v1011_v22 = vld [vmem:[%s3520_s11 + $0x20] sm:$0xf] }
 0xb8e   : > { %v1826_v7 = vsel %vm1777_vm4, %v1011_v22, 0 }
 0xb8f   : > { %v1585_v30 = vmul.f32 1.442695, %v1583_v29 }
 0xb90   : > { %v1582_v31 = vpop.xlane.xlu0 %1581 }
 0xb91   : > { %2857 = vpow2.f32 %v1585_v30  ;;  %v1584_v33 = vsub.f32 %v1576_v9, %v1582_v31 }
 0xb93   : > { %v1587_v34 = vmul.f32 1.442695, %v1584_v33 }
 0xb94   : > { %v1705_v36 = vpop.xlane.xlu0 %1704 }
 0xb95   : > { %2859 = vpow2.f32 %v1587_v34  ;;  %v1709_v37 = vsub.f32 %v1701_v32, %v1705_v36 }
 0xb97   : > { %v1711_v35 = vmul.f32 1.442695, %v1709_v37 }
 0xb98   : > { %v1708_v38 = vpop.xlane.xlu1 %1707 }
 0xb99   : > { %2861 = vpow2.f32 %v1711_v35  ;;  %v1710_v40 = vsub.f32 %v1702_v23, %v1708_v38 }
 0xb9b   : > { %v1713_v41 = vmul.f32 1.442695, %v1710_v40 }
 0xb9d   : > { %2863 = vpow2.f32 %v1713_v41 }
 0xb9e   : > { %v2858_v42 = vpop.eup %2857 }
 0xb9f   : > { %v1589_v43 = vsel %vm490_vm0, %v2858_v42, 0.0 }
 0xba0   : > { %1590 = vadd.xlane.f32.xlu0 %v1589_v43 }
 0xba2   : > { %v2860_v39 = vpop.eup %2859 }
 0xba3   : > { %v1592_v44 = vsel %vm490_vm0, %v2860_v39, 0.0 }
 0xba4   : > { %1593 = vadd.xlane.f32.xlu1 %v1592_v44 }
 0xba6   : > { %v2862_v45 = vpop.eup %2861 }
 0xba7   : > { %v1715_v46 = vsel %vm490_vm0, %v2862_v45, 0.0 }
 0xba8   : > { %1716 = vadd.xlane.f32.xlu0 %v1715_v46 }
 0xbaa   : > { %v2864_v47 = vpop.eup %2863 }
 0xbab   : > { %v1718_v48 = vsel %vm490_vm0, %v2864_v47, 0.0 }
 0xbac   : > { %1719 = vadd.xlane.f32.xlu1 %v1718_v48 }
 0xbbd   : > { %1726 = vrot.lane.b32.xlu1 %v3337_v58, %s2909_s22 }
 0xbbe   : > { %1600 = vrot.lane.b32.xlu0 %v3337_v58, %s2905_s27  ;;  %s2914_s27 = smov 104  }
 0xbc1   : > { %1871 = vrot.lane.b32.xlu1 %v3337_v58, %s2910_s17 }
 0xbc2   : > { %1869 = vrot.lane.b32.xlu0 %v3337_v58, %s2911_s18 }
 0xc29   : > { %v1591_v49 = vpop.xlane.xlu0 %1590 }
 0xc2a   : > { %2865 = vrcp.f32 %v1591_v49 }
 0xc2d   : > { %v1594_v50 = vpop.xlane.xlu1 %1593 }
 0xc2e   : > { %2867 = vrcp.f32 %v1594_v50 }
 0xc31   : > { %v1717_v52 = vpop.xlane.xlu0 %1716 }
 0xc32   : > { %2869 = vrcp.f32 %v1717_v52 }
 0xc35   : > { %v1601_v53 = vpop.permute.xlu0 %1600  ;;  %v1720_v55 = vpop.xlane.xlu1 %1719 }
 0xc36   : > { %2871 = vrcp.f32 %v1720_v55  ;;  %2695 = vmatpush3.bf16.msra.mxu0 %v1601_v53 }
 0xc37   : > { %2706 = vmatprep.subr.bf16.mxu0 %v2902_v17  ;;  %v2866_v56 = vpop.eup %2865 }
 0xc38   : > { %v1597_v3 = vmul.f32 %v2866_v56, %v2858_v42 }
 0xc39   : > { %v1727_v60 = vpop.permute.xlu1 %1726  ;;  %v1870_v51 = vpop.permute.xlu0 %1869 }
 0xc3b   : > { %v2868_v25 = vpop.eup %2867 }
 0xc3c   : > { %v1598_v59 = vmul.f32 %v2868_v25, %v2860_v39 }
 0xc3d   : > { %v1872_v18 = vpop.permute.xlu1 %1871 }
 0xc3e   : > { %v1599_v14 = vpack.c.bf16 %v1598_v59, %v1597_v3  ;;  %v1877_v23 = vsel %vm1519_vm3, %v1872_v18, 0 }
 0xc3f   : > { %v2870_v61 = vpop.eup %2869 }
 0xc40   : > { %2697 = vmatmul.mubr.msk.bf16.vlgmr.msra.gmra.mxu0 %vm490_vm0, %v1599_v14  ;;  %v1723_v2 = vmul.f32 %v2870_v61, %v2862_v45 }
 0xc41   : > { %2707 = vmatpush3.bf16.msra.mxu0 %v1727_v60  ;;  %2708 = vmatprep.mubr.msk.bf16.mxu0 %vm2903_vm1, %v2902_v17 }
 0xc42   : > { %2718 = vmatprep.subr.bf16.mxu0 %v2902_v17 }
 0xc43   : > { %v2872_v62 = vpop.eup %2871 }
 0xc44   : > { %v1724_v4 = vmul.f32 %v2872_v62, %v2864_v47 }
 0xc46   : > { %v1725_v5 = vpack.c.bf16 %v1724_v4, %v1723_v2 }
 0xc48   : > { %2709 = vmatmul.mubr.msk.bf16.vlgmr.msra.gmra.mxu0 %vm490_vm0, %v1725_v5 }
 0xc49   : > { %2720 = vmatprep.mubr.msk.bf16.mxu0 %vm2903_vm1, %v2902_v17  ;;  %2719 = vmatpush3.bf16.msra.mxu0 %v1826_v7 }
 0xc4a   : > { %2730 = vmatprep.subr.bf16.mxu0 %v2902_v17 }
 0xd00   : > { %v1640_v24 = vpop.f32.mrf.mxu0 }
 0xd02   : > { %v2698_v9 = vpop.f32.mrf.mxu0 }
 0xd03   : > { %v1013_v9 = vld [vmem:[%s3520_s11 + $0x28] sm:$0xf] }
 0xd04   : > { %v1643_v12 = vpop.f32.mrf.mxu0 }
 0xd05   : > { %v1647_v13 = vpack.c.bf16 %v1643_v12, %v1640_v24  ;;  %v1999_v12 = vsel %vm1777_vm4, %v1013_v9, 0 }
 0xd06   : > { %v2699_v57 = vpop.f32.mrf.mxu0 }
 0xd07   : > { %2721 = vmatmul.mubr.msk.bf16.vlgmr.msra.gmra.mxu0 %vm1519_vm3, %v1647_v13 }
 0xd08   : > { %v1766_v16 = vpop.f32.mrf.mxu0  ;;  %2732 = vmatprep.mubr.msk.bf16.mxu0 %vm2903_vm1, %v2902_v17 }
 0xd0a   : > { %v2710_v32 = vpop.f32.mrf.mxu0 }
 0xd0c   : > { %v1769_v21 = vpop.f32.mrf.mxu0 }
 0xd0d   : > { %v1773_v27 = vpack.c.bf16 %v1769_v21, %v1766_v16 }
 0xd0e   : > { %v2711_v20 = vpop.f32.mrf.mxu0 }
 0xd0f   : > { %2715 = vmatmul.mubr.msk.bf16.vlgmr.msra.gmra.mxu1 %vm1519_vm3, %v1773_v27 }
 0xd10   : > { %2725 = vmatpush3.bf16.xpose.msra.mxu1 %v1877_v23  ;;  %2726 = vmatprep.mubr.msk.bf16.mxu1 %vm2903_vm1, %v2902_v17 }
 0xd11   : > { %2736 = vmatprep.subr.bf16.mxu1 %v2902_v17 }
 0xd17   : > { %2727 = vmatmul.mubr.msk.bf16.vlgmr.msra.gmra.mxu1 %vm1519_vm3, %v1870_v51 }
 0xd18   : > { %2738 = vmatprep.mubr.msk.bf16.mxu1 %vm2903_vm1, %v2902_v17  ;;  %2737 = vmatpush3.bf16.msra.mxu1 %v1999_v12 }
 0xd19   : > { %2748 = vmatprep.subr.bf16.mxu1 %v2902_v17 }
 0xdc7   : > { %v1862_v26 = vpop.f32.mrf.mxu0 }
 0xdc9   : > { %v2722_v29 = vpop.f32.mrf.mxu0 }
 0xdcb   : > { %v1865_v30 = vpop.f32.mrf.mxu0 }
 0xdcd   : > { %v2723_v31 = vpop.f32.mrf.mxu0 }
 0xdcf   : > { %v1815_v33 = vpop.f32.mrf.mxu1 }
 0xdd0   : > { %v3406_v34 = vadd.f32 %v1862_v26, %v1815_v33 }
 0xdd1   : > { %v2716_v36 = vpop.f32.mrf.mxu1 }
 0xdd3   : > { %v1818_v37 = vpop.f32.mrf.mxu1 }
 0xdd4   : > { %v3408_v35 = vadd.f32 %v1865_v30, %v1818_v37 }
 0xdd5   : > { %v2717_v38 = vpop.f32.mrf.mxu1 }
 0xdd7   : > { %v1913_v40 = vpop.f32.mrf.mxu1 }
 0xdd8   : > { %v1920_v41 = vmul.f32 0.35355338, %v1913_v40 }
 0xdd9   : > { %v2728_v42 = vpop.f32.mrf.mxu1 }
 0xdda   : > { %v1922_v43 = vsub.f32 %v1920_v41, %v3358_v1 }
 0xddb   : > { %v1916_v39 = vpop.f32.mrf.mxu1 }
 0xddc   : > { %v1921_v44 = vmul.f32 0.35355338, %v1916_v39  ;;  %v1924_v45 = vsel %vm490_vm0, %v1922_v43, -inf }
 0xddd   : > { %1925 = vmax.xlane.f32.xlu1 %v1924_v45  ;;  %v2729_v46 = vpop.f32.mrf.mxu1 }
 0xdde   : > { %v1923_v47 = vsub.f32 %v1921_v44, %v3358_v1 }
 0xde0   : > { %v1927_v48 = vsel %vm490_vm0, %v1923_v47, -inf }
 0xde1   : > { %1928 = vmax.xlane.f32.xlu0 %v1927_v48 }
 0xe66   : > { %v1926_v49 = vpop.xlane.xlu1 %1925 }
 0xe67   : > { %v1930_v50 = vsub.f32 %v1922_v43, %v1926_v49 }
 0xe69   : > { %v1932_v52 = vmul.f32 1.442695, %v1930_v50 }
 0xe6a   : > { %v1929_v53 = vpop.xlane.xlu0 %1928 }
 0xe6b   : > { %2873 = vpow2.f32 %v1932_v52  ;;  %v1931_v55 = vsub.f32 %v1923_v47, %v1929_v53 }
 0xe6d   : > { %v1934_v56 = vmul.f32 1.442695, %v1931_v55 }
 0xe6f   : > { %2875 = vpow2.f32 %v1934_v56 }
 0xe78   : > { %v2874_v25 = vpop.eup %2873 }
 0xe79   : > { %v1936_v3 = vsel %vm490_vm0, %v2874_v25, 0.0 }
 0xe7a   : > { %1937 = vadd.xlane.f32.xlu0 %v1936_v3 }
 0xe7c   : > { %v2876_v59 = vpop.eup %2875 }
 0xe7d   : > { %v1939_v14 = vsel %vm490_vm0, %v2876_v59, 0.0 }
 0xe7e   : > { %1940 = vadd.xlane.f32.xlu1 %v1939_v14 }
 0xe8f   : > { %2046 = vrot.lane.b32.xlu1 %v3337_v58, %s2912_s25 }
 0xe90   : > { %1947 = vrot.lane.b32.xlu0 %v3337_v58, %s2913_s26 }
 0xe93   : > { %2044 = vrot.lane.b32.xlu1 %v3337_v58, %s2914_s27 }
 0xf03   : > { %v1938_v60 = vpop.xlane.xlu0 %1937 }
 0xf04   : > { %2877 = vrcp.f32 %v1938_v60 }
 0xf07   : > { %v1941_v61 = vpop.xlane.xlu1 %1940  ;;  %v1948_v62 = vpop.permute.xlu0 %1947 }
 0xf08   : > { %2879 = vrcp.f32 %v1941_v61  ;;  %2731 = vmatpush3.bf16.msra.mxu0 %v1948_v62 }
 0xf09   : > { %2742 = vmatprep.subr.bf16.mxu0 %v2902_v17 }
 0xf0b   : > { %v2047_v7 = vpop.permute.xlu1 %2046 }
 0xf0c   : > { %v2052_v8 = vsel %vm1519_vm3, %v2047_v7, 0 }
 0xf0f   : > { %v2045_v24 = vpop.permute.xlu1 %2044 }
 0xf11   : > { %v2878_v2 = vpop.eup %2877 }
 0xf12   : > { %v1944_v5 = vmul.f32 %v2878_v2, %v2874_v25 }
 0xf15   : > { %v2880_v4 = vpop.eup %2879 }
 0xf16   : > { %v1945_v22 = vmul.f32 %v2880_v4, %v2876_v59  ;;  %v2222_v4 = vrot.slane %v3319_v19, %v3118_v11 }
 0xf18   : > { %v1946_v0 = vpack.c.bf16 %v1945_v22, %v1944_v5 }
 0xf1a   : > { %2733 = vmatmul.mubr.msk.bf16.vlgmr.msra.gmra.mxu0 %vm490_vm0, %v1946_v0 }
 0xf1b   : > { %2743 = vmatpush3.bf16.xpose.msra.mxu0 %v2052_v8  ;;  %2744 = vmatprep.mubr.msk.bf16.mxu0 %vm2903_vm1, %v2902_v17 }
 0xf1c   : > { %2754 = vmatprep.subr.bf16.mxu0 %v2902_v17 }
 0xf22   : > { %2745 = vmatmul.mubr.msk.bf16.vlgmr.msra.gmra.mxu0 %vm1519_vm3, %v2045_v24 }
 0xf23   : > { %2756 = vmatprep.mubr.msk.bf16.mxu0 %vm2903_vm1, %v2902_v17 }
 0xfda   : > { %v1987_v13 = vpop.f32.mrf.mxu0 }
 0xfdc   : > { %v2734_v57 = vpop.f32.mrf.mxu0 }
 0xfde   : > { %v1990_v16 = vpop.f32.mrf.mxu0 }
 0xfdf   : > { %v1994_v32 = vpack.c.bf16 %v1990_v16, %v1987_v13 }
 0xfe0   : > { %v2735_v18 = vpop.f32.mrf.mxu0 }
 0xfe1   : > { %2739 = vmatmul.mubr.msk.bf16.vlgmr.msra.gmra.mxu1 %vm1519_vm3, %v1994_v32 }
 0xfe2   : > { %v2088_v21 = vpop.f32.mrf.mxu0  ;;  %2750 = vmatprep.mubr.msk.bf16.mxu1 %vm2903_vm1, %v2902_v17 }
 0xfe3   : > { %v2095_v27 = vmul.f32 0.35355338, %v2088_v21 }
 0xfe4   : > { %v2746_v20 = vpop.f32.mrf.mxu0 }
 0xfe5   : > { %v2097_v23 = vsub.f32 %v2095_v27, %v3358_v1 }
 0xfe6   : > { %v2091_v51 = vpop.f32.mrf.mxu0 }
 0xfe7   : > { %v2096_v26 = vmul.f32 0.35355338, %v2091_v51  ;;  %v2099_v29 = vsel %vm490_vm0, %v2097_v23, -inf }
 0xfe8   : > { %2100 = vmax.xlane.f32.xlu0 %v2099_v29  ;;  %v2747_v30 = vpop.f32.mrf.mxu0  ;;  %v2825_v29 = vld [vmem:[%s3520_s11 + $0x38] sm:$0xff]  }
 0xfe9   : > { %v2098_v31 = vsub.f32 %v2096_v26, %v3358_v1  ;;  %v2826_v30 = vld [vmem:[%s3520_s11 + $0x30] sm:$0xff]  }
 0xfeb   : > { %v2102_v33 = vsel %vm490_vm0, %v2098_v31, -inf }
 0xfec   : > { %2103 = vmax.xlane.f32.xlu1 %v2102_v33 }
 0xffd   : > { %2122 = vrot.lane.b32.xlu1 %v3337_v58, %s2915_s30 }
0x1071   : > { %v2101_v36 = vpop.xlane.xlu0 %2100 }
0x1072   : > { %v2105_v37 = vsub.f32 %v2097_v23, %v2101_v36 }
0x1074   : > { %v2107_v38 = vmul.f32 1.442695, %v2105_v37 }
0x1075   : > { %v2104_v40 = vpop.xlane.xlu1 %2103 }
0x1076   : > { %2881 = vpow2.f32 %v2107_v38  ;;  %v2106_v41 = vsub.f32 %v2098_v31, %v2104_v40 }
0x1078   : > { %v2109_v42 = vmul.f32 1.442695, %v2106_v41 }
0x1079   : > { %v2123_v43 = vpop.permute.xlu1 %2122 }
0x107a   : > { %2883 = vpow2.f32 %v2109_v42  ;;  %2749 = vmatpush3.bf16.msra.mxu1 %v2123_v43  ;;  %v2256_v43 = vrot.slane %v3319_v19, %v3164_v10  ;;  %v2828_v10 = vld [vmem:[%s3520_s11 + $0x40] sm:$0xff]  }
0x107b   : > { %2760 = vmatprep.subr.bf16.mxu1 %v2902_v17 }
0x1083   : > { %v2882_v39 = vpop.eup %2881 }
0x1084   : > { %v2111_v1 = vsel %vm490_vm0, %v2882_v39, 0.0 }
0x1085   : > { %2112 = vadd.xlane.f32.xlu0 %v2111_v1 }
0x1087   : > { %v2884_v44 = vpop.eup %2883 }
0x1088   : > { %v2114_v45 = vsel %vm490_vm0, %v2884_v44, 0.0 }
0x1089   : > { %2115 = vadd.xlane.f32.xlu0 %v2114_v45  ;;  %v2262_v45 = vrot.slane %v3319_v19, %v3171_v15  ;;  %v998_v15 = vld [vmem:[%s3518_s9 + $0x18] sm:$0x3] }
0x108a   : > { %v2269_v19 = vrot.slane %v998_v15, %v3039_v28 }
0x10a1   : > { %v2035_v58 = vpop.f32.mrf.mxu1 }
0x10a2   : > { %v2042_v46 = vadd.f32 %v2035_v58, %v3406_v34  ;;  %v1014_v34 = vld [vmem:[%s3520_s11 + $0x2c] sm:$0xf] }
0x10a3   : > { %v2740_v47 = vpop.f32.mrf.mxu1 }
0x10a5   : > { %v2038_v48 = vpop.f32.mrf.mxu1 }
0x10a6   : > { %v2043_v49 = vadd.f32 %v2038_v48, %v3408_v35  ;;  %v2174_v35 = vsel %vm1777_vm4, %v1014_v34, 0  ;;  %v2332_v34 = vrot.slane %v998_v15, %v3066_v54 }
0x10a7   : > { %v2741_v50 = vpop.f32.mrf.mxu1  ;;  %2755 = vmatpush3.bf16.msra.mxu0 %v2174_v35 }
0x10a8   : > { %2768 = vmatprep.subr.bf16.mxu0 %v2902_v17 }
0x110e   : > { %v2113_v52 = vpop.xlane.xlu0 %2112 }
0x110f   : > { %2885 = vrcp.f32 %v2113_v52 }
0x1112   : > { %v2116_v53 = vpop.xlane.xlu0 %2115 }
0x1113   : > { %2887 = vrcp.f32 %v2116_v53 }
0x111c   : > { %v2886_v55 = vpop.eup %2885 }
0x111d   : > { %v2119_v25 = vmul.f32 %v2886_v55, %v2882_v39 }
0x1120   : > { %v2888_v56 = vpop.eup %2887 }
0x1121   : > { %v2120_v3 = vmul.f32 %v2888_v56, %v2884_v44 }
0x1123   : > { %v2121_v59 = vpack.c.bf16 %v2120_v3, %v2119_v25 }
0x1125   : > { %2751 = vmatmul.mubr.msk.bf16.vlgmr.msra.gmra.mxu1 %vm490_vm0, %v2121_v59 }
0x1126   : > { %2764 = vmatprep.mubr.msk.bf16.mxu1 %vm2903_vm1, %v2902_v17  ;;  %2761 = vmatpush3.bf16.msra.mxu1 %v2825_v29 }
0x1127   : > { %2762 = vmatprep.subr.bf16.mxu1 %v2902_v17 }
0x112a   : > { %2763 = vmatpush3.bf16.msra.mxu1 %v2826_v30 }
0x11e5   : > { %v2162_v14 = vpop.f32.mrf.mxu1 }
0x11e7   : > { %v2752_v60 = vpop.f32.mrf.mxu1 }
0x11e9   : > { %v2165_v61 = vpop.f32.mrf.mxu1 }
0x11ea   : > { %v2169_v62 = vpack.c.bf16 %v2165_v61, %v2162_v14 }
0x11eb   : > { %v2753_v2 = vpop.f32.mrf.mxu1 }
0x11ec   : > { %2757 = vmatmul.mubr.msk.bf16.vlgmr.msra.gmra.mxu0 %vm1519_vm3, %v2169_v62 }
0x11ed   : > { %2772 = vmatprep.mubr.msk.bf16.mxu0 %vm2903_vm1, %v2902_v17 }
0x12ac   : > { %v2210_v5 = vpop.f32.mrf.mxu0 }
0x12ad   : > { %v2217_v22 = vadd.f32 %v2210_v5, %v2042_v46 }
0x12ae   : > { %v2758_v7 = vpop.f32.mrf.mxu0 }
0x12af   : > { %v2223_v0 = vadd.f32 %v2222_v4, %v2217_v22 }
0x12b0   : > { %v2213_v8 = vpop.f32.mrf.mxu0 }
0x12b1   : > { %v3460_v24 = vadd.f32 %v2223_v0, %v3296_v63  ;;  %v2218_v9 = vadd.f32 %v2213_v8, %v2043_v49  ;;  %v2827_v49 = vld [vmem:[%s3520_s11 + $0x48] sm:$0xff]  }
0x12b2   : > { %v2759_v12 = vpop.f32.mrf.mxu0  ;;  %2769 = vmatpush3.bf16.msra.mxu0 %v2827_v49 }
0x12b3   : > { %v2224_v13 = vadd.f32 %v2222_v4, %v2218_v9  ;;  %v2227_v57 = vsel %vm592_vm2, %v3460_v24, 0.0  ;;  %2770 = vmatprep.subr.bf16.mxu0 %v2902_v17 }
0x12b4   : > { %2228 = vadd.xlane.f32.xlu0 %v2227_v57 }
0x12b5   : > { %v3465_v16 = vadd.f32 %v2224_v13, %v3301_v6 }
0x12b6   : > { %2771 = vmatpush3.bf16.msra.mxu0 %v2828_v10 }
0x12b7   : > { %v2230_v11 = vsel %vm592_vm2, %v3465_v16, 0.0 }
0x12b8   : > { %2231 = vadd.xlane.f32.xlu0 %v2230_v11 }
0x133d   : > { %v2229_v32 = vpop.xlane.xlu0 %2228 }
0x133e   : > { %v2233_v18 = vmul.f32 0.03125, %v2229_v32 }
0x1340   : > { %v2235_v21 = vsub.f32 %v3460_v24, %v2233_v18 }
0x1341   : > { %v2232_v63 = vpop.xlane.xlu0 %2231 }
0x1342   : > { %v2234_v27 = vmul.f32 0.03125, %v2232_v63  ;;  %v2237_v20 = vmul.f32 %v2235_v21, %v2235_v21 }
0x1344   : > { %v2236_v23 = vsub.f32 %v3465_v16, %v2234_v27  ;;  %v2239_v51 = vsel %vm592_vm2, %v2237_v20, 0.0 }
0x1345   : > { %2240 = vadd.xlane.f32.xlu0 %v2239_v51 }
0x1346   : > { %v2238_v26 = vmul.f32 %v2236_v23, %v2236_v23 }
0x1348   : > { %v2242_v6 = vsel %vm592_vm2, %v2238_v26, 0.0 }
0x1349   : > { %2243 = vadd.xlane.f32.xlu0 %v2242_v6 }
0x13ce   : > { %v2241_v31 = vpop.xlane.xlu0 %2240 }
0x13cf   : > { %v2245_v33 = vmul.f32 0.03125, %v2241_v31 }
0x13d1   : > { %v2247_v36 = vadd.f32 1e-05, %v2245_v33 }
0x13d2   : > { %v2244_v37 = vpop.xlane.xlu0 %2243 }
0x13d3   : > { %2889 = vrsqrt.f32 %v2247_v36  ;;  %v2246_v38 = vmul.f32 0.03125, %v2244_v37 }
0x13d5   : > { %v2248_v40 = vadd.f32 1e-05, %v2246_v38 }
0x13d7   : > { %2891 = vrsqrt.f32 %v2248_v40 }
0x13e0   : > { %v2890_v41 = vpop.eup %2889 }
0x13e1   : > { %v2251_v42 = vmul.f32 %v2890_v41, %v2235_v21 }
0x13e3   : > { %v2257_v44 = vmul.f32 %v2256_v43, %v2251_v42 }
0x13e4   : > { %v2892_v39 = vpop.eup %2891 }
0x13e5   : > { %v2252_v1 = vmul.f32 %v2892_v39, %v2236_v23  ;;  %v2263_v46 = vadd.f32 %v2262_v45, %v2257_v44 }
0x13e7   : > { %v2258_v58 = vmul.f32 %v2256_v43, %v2252_v1 }
0x13e9   : > { %v2264_v47 = vadd.f32 %v2262_v45, %v2258_v58 }
0x13eb   : > { %v2265_v48 = vpack.c.bf16 %v2264_v47, %v2263_v46 }
0x13ed   : > { %2765 = vmatmul.mubr.msk.bf16.vlgmr.msra.gmra.mxu1 %vm592_vm2, %v2265_v48 }
0x14ad   : > { %v2319_v50 = vpop.f32.mrf.mxu1 }
0x14ae   : > { %v2320_v53 = vadd.f32 %v2319_v50, %v2269_v19 }
0x14af   : > { %v2766_v52 = vpop.f32.mrf.mxu1 }
0x14b0   : > { %v2326_v3 = vmax.f32 %v2320_v53, 0.0 }
0x14b1   : > { %v2322_v55 = vpop.f32.mrf.mxu1 }
0x14b2   : > { %v2323_v56 = vadd.f32 %v2322_v55, %v2269_v19 }
0x14b3   : > { %v2767_v25 = vpop.f32.mrf.mxu1 }
0x14b4   : > { %v2327_v17 = vmax.f32 %v2323_v56, 0.0 }
0x14b6   : > { %v2328_v59 = vpack.c.bf16 %v2327_v17, %v2326_v3 }
0x14b8   : > { %2773 = vmatmul.mubr.msk.bf16.vlgmr.msra.gmra.mxu0 %vm592_vm2, %v2328_v59 }
0x1578   : > { %v2382_v35 = vpop.f32.mrf.mxu0 }
0x1579   : > { %v2383_v14 = vadd.f32 %v2382_v35, %v2332_v34 }
0x157a   : > { %v2774_v28 = vpop.f32.mrf.mxu0 }
0x157b   : > { %v2389_v60 = vadd.f32 %v2383_v14, %v3460_v24 }
0x157c   : > { %v2385_v61 = vpop.f32.mrf.mxu0 }
0x157d   : > { %2391 = vst.msk [vmem:[%s467_s28] sm:$0xff] %vm592_vm2, %v2389_v60  ;;  %v2386_v62 = vadd.f32 %v2385_v61, %v2332_v34 }
0x157e   : > { %v2775_v2 = vpop.f32.mrf.mxu0 }
0x157f   : > { %v2390_v4 = vadd.f32 %v2386_v62, %v3465_v16 }
0x1581   : > { %2392 = vst.msk [vmem:[%s467_s28 + $0x8] sm:$0xff] %vm592_vm2, %v2390_v4 }
0x1582 PF: > { %s22_s21 = sadd.s32 1, %s2899_s21  }
0x1583   : > { %p19_p4 = scmp.ge.s32.totalorder %s22_s21, 6  }
0x1585   :  { %21 = sbr.rel (!%p19_p4) target bundleno = 1 (0x1), region = 107 }

// kernel: _lambda_.5
= control target key start
LH: loop header
LB: loop body
LE: loop exit
PB: predicated region body
PF: predicated region fallthrough
CT: control target
= control target key end

     0   :  { %s4989_s27 = smov 0   ;;  %s6230_s0 = inlined_call_operand.vmem [shape: f32[2,16,32], index: 0, kind: input, shape index: {}]   ;;  %s6231_s1 = inlined_call_operand.vmem [shape: f32[2,1,16], index: 1, kind: input, shape index: {}]   ;;  %s6232_s2 = inlined_call_operand.vmem [shape: f32[2,16,1], index: 2, kind: input, shape index: {}]   ;;  %s6233_s3 = inlined_call_operand.vmem [shape: f32[16,32], index: 3, kind: input, shape index: {}]   ;;  %s6234_s4 = inlined_call_operand.vmem [shape: f32[1,26,32], index: 4, kind: input, shape index: {}]   ;;  %s6235_s5 = inlined_call_operand.vmem [shape: bf16[1,32,96], index: 5, kind: input, shape index: {}]   ;;  %s6236_s6 = inlined_call_operand.vmem [shape: bf16[5,32,32], index: 6, kind: input, shape index: {}]   ;;  %s6237_s7 = inlined_call_operand.vmem [shape: f32[5,32], index: 7, kind: input, shape index: {}]   ;;  %s6238_s8 = inlined_call_operand.vmem [shape: f32[2,16,2], index: 8, kind: output, shape index: {}]  }
   0x1 LB: > { %s4189_s28 = sadd.s32 4294967295, %s4927_s27   ;;  %p4193_p0 = scmp.ge.s32.totalorder %s4927_s27, 1  ;;  %s4927_s27 = sphi %s4989_s27, %s18_s27  }
   0x2   : > { %p280_p1 = scmp.lt.s32.totalorder %s4927_s27, 3 }
   0x4   : > { %p281_p2 = pnand %p4193_p0, %p280_p1 }
   0x6   : > { %284 = sbr.rel (%p281_p2) target bundleno = 13959 (0x3687), region = 52 }
   0xb   : > { %p322_p3 = scmp.lt.s32.totalorder %s4189_s28, 1  ;;  %v369_v0 = vld [vmem:[%s6233_s3] sm:$0xff]  ;;  %v370_v1 = vld [vmem:[%s6233_s3 + $0x8] sm:$0xff]  ;;  %vm380_vm0 = vcmask 261120   ;;  %v6239_v19 = vmov 0.0   ;;  %vm4930_vm1 = vmmov 0   ;;  %v375_v25 = vlaneseq }
   0xc   : > { %v4742_v18 = vld [vmem:[%s6236_s6 + $0x8] sm:$0xff]   ;;  %4383 = vmatprep.subr.bf16.mxu0 %v6239_v19  ;;  %4387 = vmatprep.mubr.msk.bf16.mxu0 %vm4930_vm1, %v6239_v19  ;;  %v4743_v20 = vld [vmem:[%s6236_s6] sm:$0xff]   ;;  %s4932_s15 = smov 64   ;;  %vm792_vm10 = vcmask 523264   ;;  %s4933_s16 = smov 120   ;;  %vm859_vm11 = vcmask 64512  }
   0xd   : > { %s6246_s28 = smov (!%p322_p3, %s4189_s28), 1  ;;  %4384 = vmatpush3.bf16.msra.mxu0 %v4742_v18  ;;  %4391 = vmatprep.subr.bf16.mxu1 %v6239_v19  ;;  %v5038_v28 = vshrl.u32 %v375_v25, 7  ;;  %v5046_v30 = vld [vmem:[%s6234_s4] sm:$0xff]  ;;  %v5095_v50 = vld [vmem:[%s6234_s4 + $0x8] sm:$0xff]  ;;  %s4934_s17 = smov 96   ;;  %vm917_vm12 = vcmask 130048  }
   0xe   : > { %s5003_s9 = sshll.u32 %s6246_s28, 4  ;;  %4385 = vmatprep.subr.bf16.mxu0 %v6239_v19  ;;  %4395 = vmatprep.mubr.msk.bf16.mxu1 %vm4930_vm1, %v6239_v19  ;;  %s4935_s18 = smov 88   ;;  %vm1118_vm13 = vcmask 1043456   ;;  %vm4079_vm14 = vcmask 7168   ;;  %vm4082_vm15 = vcmask 15360  }
   0xf   : > { %s326_s14 = scalar_lea.vmem %s6230_s0, %s5003_s9  ;;  %v5041_v29 = vsub.s32 0, %v5038_v28  ;;  %v5049_v31 = vsub.s32 2, %v5038_v28  ;;  %v5061_v37 = vsub.s32 6, %v5038_v28  ;;  %v5064_v39 = vsub.s32 4, %v5038_v28  ;;  %s329_s21 = scalar_lea.vmem %s6231_s1, %s6246_s28 }
  0x10   : > { %v373_v2 = vld [vmem:[%s326_s14] sm:$0xff]  ;;  %v374_v3 = vld [vmem:[%s326_s14 + $0x8] sm:$0xff]  ;;  %v5067_v40 = vsub.s32 5, %v5038_v28  ;;  %v5071_v43 = vadd.s32 8, %v5038_v28  ;;  %v5074_v44 = vsub.s32 7, %v5038_v28  ;;  %vm422_vm2 = vcmp.lt.s32.totalorder %v5038_v28, 2 }
  0x11   : > { %v5012_v4 = vadd.f32 %v373_v2, %v369_v0  ;;  %v5014_v5 = vadd.f32 %v374_v3, %v370_v1  ;;  %4386 = vmatpush3.bf16.msra.mxu0 %v4743_v20  ;;  %v5053_v32 = vrot.slane %v5046_v30, %v5041_v29  ;;  %v5057_v35 = vrot.slane %v5046_v30, %v5049_v31  ;;  %s4931_s14 = smov 32   ;;  %s4936_s28 = smov 80  }
  0x12   : > { %4399 = vmatprep.subr.bf16.mxu0 %v6239_v19  ;;  %6242 = vst [vmem:[#allocation2_spill] sm:$0xff] %v5064_v39  ;;  %v5079_v46 = vrot.slane %v5046_v30, %v5061_v37  ;;  %v5084_v47 = vrot.slane %v5046_v30, %v5064_v39  ;;  %vm443_vm3 = vcmp.lt.s32.totalorder %v5038_v28, 1  ;;  %v5089_v48 = vrot.slane %v5046_v30, %v5067_v40  ;;  %s4937_s22 = smov 112   ;;  %s4938_s23 = smov 56  }
  0x13   : > { %v381_v6 = vsel %vm380_vm0, %v5012_v4, 0.0  ;;  %v384_v7 = vsel %vm380_vm0, %v5014_v5, 0.0  ;;  %vm425_vm4 = vcmp.ge.s32.totalorder %v5038_v28, 2  ;;  %vm446_vm5 = vcmp.ge.s32.totalorder %v5038_v28, 1  ;;  %s4939_s30 = smov 48   ;;  %s4940_s10 = smov 104  }
  0x14   : > { %382 = vadd.xlane.f32.xlu0 %v381_v6  ;;  %vm472_vm6 = vcmp.lt.s32.totalorder %v5038_v28, 7  ;;  %vm476_vm7 = vcmp.lt.s32.totalorder %v5071_v43, 15  ;;  %v5103_v52 = vrot.slane %v5046_v30, %v5074_v44  ;;  %vm493_vm8 = vcmp.lt.s32.totalorder %v5038_v28, 6  ;;  %s4941_s11 = smov 72   ;;  %s4943_s29 = smov 1  }
  0x15   : > { %vm497_vm9 = vcmp.lt.s32.totalorder %v5071_v43, 14  ;;  %v5109_v59 = vrot.slane %v5095_v50, %v5041_v29 }
  0x18   : > { %385 = vadd.xlane.f32.xlu0 %v384_v7 }
  0x9d   : > { %v383_v8 = vpop.xlane.xlu0 %382 }
  0x9e   : > { %v388_v9 = vmul.f32 0.03125, %v383_v8 }
  0xa0   : > { %v390_v10 = vsub.f32 %v5012_v4, %v388_v9 }
  0xa1   : > { %v386_v11 = vpop.xlane.xlu0 %385 }
  0xa2   : > { %v389_v12 = vmul.f32 0.03125, %v386_v11  ;;  %v392_v13 = vmul.f32 %v390_v10, %v390_v10 }
  0xa4   : > { %v391_v14 = vsub.f32 %v5014_v5, %v389_v12  ;;  %v394_v15 = vsel %vm380_vm0, %v392_v13, 0.0 }
  0xa5   : > { %395 = vadd.xlane.f32.xlu1 %v394_v15 }
  0xa6   : > { %v393_v16 = vmul.f32 %v391_v14, %v391_v14 }
  0xa8   : > { %v397_v17 = vsel %vm380_vm0, %v393_v16, 0.0 }
  0xa9   : > { %398 = vadd.xlane.f32.xlu1 %v397_v17 }
 0x12e   : > { %v396_v21 = vpop.xlane.xlu1 %395 }
 0x12f   : > { %v400_v22 = vmul.f32 0.03125, %v396_v21 }
 0x131   : > { %v402_v23 = vadd.f32 1e-05, %v400_v22 }
 0x132   : > { %v399_v24 = vpop.xlane.xlu1 %398 }
 0x133   : > { %4752 = vrsqrt.f32 %v402_v23  ;;  %v401_v26 = vmul.f32 0.03125, %v399_v24 }
 0x135   : > { %v403_v27 = vadd.f32 1e-05, %v401_v26 }
 0x137   : > { %4754 = vrsqrt.f32 %v403_v27 }
 0x140   : > { %v4753_v33 = vpop.eup %4752 }
 0x141   : > { %v406_v34 = vmul.f32 %v4753_v33, %v390_v10 }
 0x143   : > { %v412_v36 = vmul.f32 %v5053_v32, %v406_v34 }
 0x144   : > { %v4755_v38 = vpop.eup %4754 }
 0x145   : > { %v407_v41 = vmul.f32 %v4755_v38, %v391_v14  ;;  %v418_v42 = vadd.f32 %v5057_v35, %v412_v36  ;;  %v5150_v38 = vrot.slane %v5095_v50, %v5061_v37 }
 0x147   : > { %v413_v45 = vmul.f32 %v5053_v32, %v407_v41  ;;  %v420_v51 = vrot.slane %v418_v42, 6  ;;  %v441_v54 = vrot.slane %v418_v42, 7  ;;  %v470_v57 = vrot.slane %v418_v42, 1 }
 0x148   : > { %v491_v9 = vrot.slane %v418_v42, 2  ;;  %v466_v15 = vmul.f32 %v5079_v46, %v418_v42 }
 0x149   : > { %v419_v49 = vadd.f32 %v5057_v35, %v413_v45 }
 0x14b   : > { %v421_v53 = vrot.slane %v419_v49, 6  ;;  %v442_v55 = vrot.slane %v419_v49, 7  ;;  %v471_v56 = vrot.slane %v419_v49, 1  ;;  %v492_v58 = vrot.slane %v419_v49, 2 }
 0x14c   : > { %v467_v11 = vmul.f32 %v5079_v46, %v419_v49 }
 0x14d   : > { %v423_v60 = vsel %vm422_vm2, %v420_v51, %v421_v53  ;;  %v424_v61 = vsel %vm422_vm2, %v421_v53, %v420_v51  ;;  %v444_v62 = vsel %vm443_vm3, %v441_v54, %v442_v55  ;;  %v445_v63 = vsel %vm443_vm3, %v442_v55, %v441_v54 }
 0x14e   : > { %v431_v0 = vsel %vm425_vm4, %v424_v61, 0.0  ;;  %v438_v1 = vmul.f32 %v5084_v47, %v423_v60  ;;  %v452_v2 = vsel %vm446_vm5, %v445_v63, 0.0  ;;  %v459_v3 = vmul.f32 %v5089_v48, %v444_v62 }
 0x14f   : > { %v437_v6 = vmul.f32 %v5084_v47, %v431_v0  ;;  %v458_v7 = vmul.f32 %v5089_v48, %v452_v2  ;;  %v474_v8 = vsel %vm472_vm6, %v471_v56, %v470_v57  ;;  %v473_v12 = vsel %vm472_vm6, %v470_v57, %v471_v56 }
 0x150   : > { %v461_v10 = vadd.f32 %v459_v3, %v438_v1  ;;  %v482_v13 = vsel %vm476_vm7, %v474_v8, 0.0  ;;  %v495_v16 = vsel %vm493_vm8, %v492_v58, %v491_v9  ;;  %v494_v20 = vsel %vm493_vm8, %v491_v9, %v492_v58  ;;  %v5177_v8 = vld [vmem:[%s6236_s6 + $0x10] sm:$0xff]  }
 0x151   : > { %v460_v14 = vadd.f32 %v458_v7, %v437_v6  ;;  %v488_v18 = vmul.f32 %v5103_v52, %v482_v13  ;;  %v503_v21 = vsel %vm497_vm9, %v495_v16, 0.0  ;;  %v487_v23 = vmul.f32 %v5103_v52, %v473_v12  ;;  %v5171_v7 = vld [vmem:[%s6236_s6 + $0x18] sm:$0xff]  }
 0x152   : > { %v469_v17 = vadd.f32 %v467_v11, %v461_v10  ;;  %v509_v25 = vmul.f32 %v5109_v59, %v503_v21  ;;  %v508_v27 = vmul.f32 %v5109_v59, %v494_v20  ;;  %4392 = vmatpush3.bf16.msra.mxu1 %v5171_v7  ;;  %v5186_v16 = vsub.s32 3, %v5038_v28 }
 0x153   : > { %v468_v22 = vadd.f32 %v466_v15, %v460_v14  ;;  %4393 = vmatprep.subr.bf16.mxu1 %v6239_v19  ;;  %v5183_v15 = vsub.s32 1, %v5038_v28 }
 0x154   : > { %v490_v24 = vadd.f32 %v488_v18, %v469_v17  ;;  %v5194_v21 = vrot.slane %v5046_v30, %v5186_v16 }
 0x155   : > { %v489_v26 = vadd.f32 %v487_v23, %v468_v22  ;;  %v5190_v17 = vrot.slane %v5046_v30, %v5183_v15  ;;  %v5210_v30 = vrot.slane %v5095_v50, %v5186_v16 }
 0x156   : > { %v511_v33 = vadd.f32 %v509_v25, %v490_v24  ;;  %4394 = vmatpush3.bf16.msra.mxu1 %v5177_v8 }
 0x157   : > { %v510_v34 = vadd.f32 %v508_v27, %v489_v26  ;;  %4407 = vmatprep.subr.bf16.mxu1 %v6239_v19 }
 0x159   : > { %v512_v36 = vpack.c.bf16 %v511_v33, %v510_v34  ;;  %v5202_v34 = vrot.slane %v5095_v50, %v5183_v15 }
 0x15b   : > { %4388 = vmatmul.mubr.msk.bf16.vlgmr.msra.gmra.mxu0 %vm380_vm0, %v512_v36  ;;  %v5206_v36 = vrot.slane %v5095_v50, %v5049_v31 }
 0x15c   : > { %4403 = vmatprep.mubr.msk.bf16.mxu0 %vm4930_vm1, %v6239_v19 }
 0x21b   : > { %v566_v41 = vpop.f32.mrf.mxu0 }
 0x21c   : > { %v567_v42 = vadd.f32 %v566_v41, %v5150_v38 }
 0x21d   : > { %v4389_v45 = vpop.f32.mrf.mxu0 }
 0x21e   : > { %v573_v49 = vmax.f32 %v567_v42, 0.0 }
 0x21f   : > { %v569_v51 = vpop.f32.mrf.mxu0 }
 0x220   : > { %v5154_v53 = vadd.f32 %v573_v49, %v5012_v4  ;;  %v570_v54 = vadd.f32 %v569_v51, %v5150_v38 }
 0x221   : > { %v4390_v55 = vpop.f32.mrf.mxu0 }
 0x222   : > { %v574_v56 = vmax.f32 %v570_v54, 0.0  ;;  %v577_v57 = vsel %vm380_vm0, %v5154_v53, 0.0  ;;  %v5214_v54 = vrot.slane %v5095_v50, %v5064_v39 }
 0x223   : > { %578 = vadd.xlane.f32.xlu0 %v577_v57 }
 0x224   : > { %v5160_v58 = vadd.f32 %v574_v56, %v5014_v5  ;;  %v5218_v56 = vrot.slane %v5095_v50, %v5067_v40 }
 0x226   : > { %v580_v60 = vsel %vm380_vm0, %v5160_v58, 0.0 }
 0x227   : > { %581 = vadd.xlane.f32.xlu1 %v580_v60 }
 0x2ac   : > { %v579_v61 = vpop.xlane.xlu0 %578 }
 0x2ad   : > { %v583_v62 = vmul.f32 0.03125, %v579_v61 }
 0x2af   : > { %v585_v4 = vsub.f32 %v5154_v53, %v583_v62 }
 0x2b0   : > { %v582_v63 = vpop.xlane.xlu1 %581 }
 0x2b1   : > { %v584_v0 = vmul.f32 0.03125, %v582_v63  ;;  %v587_v1 = vmul.f32 %v585_v4, %v585_v4 }
 0x2b3   : > { %v586_v2 = vsub.f32 %v5160_v58, %v584_v0  ;;  %v589_v3 = vsel %vm380_vm0, %v587_v1, 0.0 }
 0x2b4   : > { %590 = vadd.xlane.f32.xlu0 %v589_v3 }
 0x2b5   : > { %v588_v6 = vmul.f32 %v586_v2, %v586_v2 }
 0x2b7   : > { %v592_v5 = vsel %vm380_vm0, %v588_v6, 0.0 }
 0x2b8   : > { %593 = vadd.xlane.f32.xlu1 %v592_v5 }
 0x33d   : > { %v591_v9 = vpop.xlane.xlu0 %590 }
 0x33e   : > { %v595_v10 = vmul.f32 0.03125, %v591_v9 }
 0x340   : > { %v597_v11 = vadd.f32 1e-05, %v595_v10 }
 0x341   : > { %v594_v12 = vpop.xlane.xlu1 %593 }
 0x342   : > { %4756 = vrsqrt.f32 %v597_v11  ;;  %v596_v13 = vmul.f32 0.03125, %v594_v12 }
 0x344   : > { %v598_v14 = vadd.f32 1e-05, %v596_v13 }
 0x346   : > { %4758 = vrsqrt.f32 %v598_v14 }
 0x34f   : > { %v4757_v18 = vpop.eup %4756 }
 0x350   : > { %v601_v20 = vmul.f32 %v4757_v18, %v585_v4 }
 0x352   : > { %v607_v22 = vmul.f32 %v5190_v17, %v601_v20 }
 0x353   : > { %v4759_v23 = vpop.eup %4758 }
 0x354   : > { %v602_v24 = vmul.f32 %v4759_v23, %v586_v2  ;;  %v613_v25 = vadd.f32 %v5194_v21, %v607_v22 }
 0x356   : > { %v608_v26 = vmul.f32 %v5190_v17, %v602_v24  ;;  %v615_v33 = vrot.slane %v613_v25, 6  ;;  %v629_v42 = vrot.slane %v613_v25, 7  ;;  %v651_v51 = vrot.slane %v613_v25, 1 }
 0x357   : > { %v665_v5 = vrot.slane %v613_v25, 2  ;;  %v647_v14 = vmul.f32 %v5210_v30, %v613_v25 }
 0x358   : > { %v614_v27 = vadd.f32 %v5194_v21, %v608_v26 }
 0x35a   : > { %v616_v41 = vrot.slane %v614_v27, 6  ;;  %v630_v45 = vrot.slane %v614_v27, 7  ;;  %v652_v49 = vrot.slane %v614_v27, 1  ;;  %v666_v55 = vrot.slane %v614_v27, 2 }
 0x35b   : > { %v648_v10 = vmul.f32 %v5210_v30, %v614_v27 }
 0x35c   : > { %v617_v57 = vsel %vm422_vm2, %v615_v33, %v616_v41  ;;  %v618_v60 = vsel %vm422_vm2, %v616_v41, %v615_v33  ;;  %v631_v61 = vsel %vm443_vm3, %v629_v42, %v630_v45  ;;  %v632_v62 = vsel %vm443_vm3, %v630_v45, %v629_v42 }
 0x35d   : > { %v619_v4 = vsel %vm425_vm4, %v618_v60, 0.0  ;;  %v626_v63 = vmul.f32 %v5202_v34, %v617_v57  ;;  %v633_v0 = vsel %vm446_vm5, %v632_v62, 0.0  ;;  %v640_v1 = vmul.f32 %v5206_v36, %v631_v61 }
 0x35e   : > { %v625_v2 = vmul.f32 %v5202_v34, %v619_v4  ;;  %v639_v3 = vmul.f32 %v5206_v36, %v633_v0  ;;  %v654_v6 = vsel %vm472_vm6, %v652_v49, %v651_v51  ;;  %v653_v11 = vsel %vm472_vm6, %v651_v51, %v652_v49 }
 0x35f   : > { %v642_v9 = vadd.f32 %v640_v1, %v626_v63  ;;  %v656_v12 = vsel %vm476_vm7, %v654_v6, 0.0  ;;  %v668_v18 = vsel %vm493_vm8, %v666_v55, %v665_v5  ;;  %v667_v23 = vsel %vm493_vm8, %v665_v5, %v666_v55 }
 0x360   : > { %v641_v13 = vadd.f32 %v639_v3, %v625_v2  ;;  %v662_v22 = vmul.f32 %v5214_v54, %v656_v12  ;;  %v670_v24 = vsel %vm497_vm9, %v668_v18, 0.0  ;;  %v661_v27 = vmul.f32 %v5214_v54, %v653_v11 }
 0x361   : > { %v650_v20 = vadd.f32 %v648_v10, %v642_v9  ;;  %v676_v41 = vmul.f32 %v5218_v56, %v670_v24  ;;  %v675_v25 = vmul.f32 %v5218_v56, %v667_v23  ;;  %v5259_v55 = vrot.slane %v5095_v50, %v5074_v44  ;;  %v5293_v23 = vld [vmem:[%s6234_s4 + $0x10] sm:$0xff] }
 0x362   : > { %v649_v26 = vadd.f32 %v647_v14, %v641_v13  ;;  %v783_v24 = vrot.slane %v5293_v23, 1 }
 0x363   : > { %v664_v33 = vadd.f32 %v662_v22, %v650_v20  ;;  %v5280_v20 = vld [vmem:[%s6235_s5 + $0x8] sm:$0xff]   ;;  %v5286_v22 = vld [vmem:[%s6235_s5] sm:$0xff]  }
 0x364   : > { %v663_v42 = vadd.f32 %v661_v27, %v649_v26  ;;  %4400 = vmatpush3.bf16.msra.mxu0 %v5280_v20  ;;  %v787_v26 = vrot.slane %v5293_v23, 2 }
 0x365   : > { %v678_v45 = vadd.f32 %v676_v41, %v664_v33  ;;  %4401 = vmatprep.subr.bf16.mxu0 %v6239_v19 }
 0x366   : > { %v677_v49 = vadd.f32 %v675_v25, %v663_v42 }
 0x368   : > { %v679_v51 = vpack.c.bf16 %v678_v45, %v677_v49  ;;  %4402 = vmatpush3.bf16.msra.mxu0 %v5286_v22 }
 0x369   : > { %4413 = vmatprep.subr.bf16.mxu0 %v6239_v19 }
 0x36a   : > { %4396 = vmatmul.mubr.msk.bf16.vlgmr.msra.gmra.mxu1 %vm380_vm0, %v679_v51 }
 0x36b   : > { %4409 = vmatprep.mubr.msk.bf16.mxu1 %vm4930_vm1, %v6239_v19 }
 0x42a   : > { %v733_v57 = vpop.f32.mrf.mxu1 }
 0x42b   : > { %v734_v60 = vadd.f32 %v733_v57, %v5259_v55  ;;  %v5301_v57 = vrot.slane %v5293_v23, %v5041_v29 }
 0x42c   : > { %v4397_v61 = vpop.f32.mrf.mxu1 }
 0x42d   : > { %v740_v62 = vmax.f32 %v734_v60, 0.0 }
 0x42e   : > { %v736_v4 = vpop.f32.mrf.mxu1 }
 0x42f   : > { %v5263_v63 = vadd.f32 %v740_v62, %v5154_v53  ;;  %v737_v0 = vadd.f32 %v736_v4, %v5259_v55  ;;  %v5306_v4 = vrot.slane %v5293_v23, %v5183_v15 }
 0x430   : > { %v4398_v1 = vpop.f32.mrf.mxu1 }
 0x431   : > { %v741_v2 = vmax.f32 %v737_v0, 0.0  ;;  %v744_v3 = vsel %vm380_vm0, %v5263_v63, 0.0 }
 0x432   : > { %745 = vadd.xlane.f32.xlu0 %v744_v3 }
 0x433   : > { %v5269_v50 = vadd.f32 %v741_v2, %v5160_v58 }
 0x435   : > { %v747_v6 = vsel %vm380_vm0, %v5269_v50, 0.0 }
 0x436   : > { %748 = vadd.xlane.f32.xlu1 %v747_v6 }
 0x4bb   : > { %v746_v5 = vpop.xlane.xlu0 %745 }
 0x4bc   : > { %v750_v9 = vmul.f32 0.03125, %v746_v5 }
 0x4be   : > { %v752_v53 = vsub.f32 %v5263_v63, %v750_v9 }
 0x4bf   : > { %v749_v10 = vpop.xlane.xlu1 %748 }
 0x4c0   : > { %v751_v11 = vmul.f32 0.03125, %v749_v10  ;;  %v754_v12 = vmul.f32 %v752_v53, %v752_v53 }
 0x4c2   : > { %v753_v13 = vsub.f32 %v5269_v50, %v751_v11  ;;  %v756_v14 = vsel %vm380_vm0, %v754_v12, 0.0 }
 0x4c3   : > { %757 = vadd.xlane.f32.xlu0 %v756_v14 }
 0x4c4   : > { %v755_v18 = vmul.f32 %v753_v13, %v753_v13 }
 0x4c6   : > { %v759_v58 = vsel %vm380_vm0, %v755_v18, 0.0 }
 0x4c7   : > { %760 = vadd.xlane.f32.xlu1 %v759_v58 }
 0x4d8   : > { %788 = vrot.lane.b32.xlu1 %v787_v26, %s4932_s15 }
 0x4d9   : > { %784 = vrot.lane.b32.xlu0 %v783_v24, %s4931_s14  ;;  %s4942_s14 = smov 40  }
 0x54c   : > { %v758_v27 = vpop.xlane.xlu0 %757 }
 0x54d   : > { %v762_v33 = vmul.f32 0.03125, %v758_v27 }
 0x54f   : > { %v764_v41 = vadd.f32 1e-05, %v762_v33 }
 0x550   : > { %v761_v42 = vpop.xlane.xlu1 %760  ;;  %v785_v6 = vpop.permute.xlu0 %784 }
 0x551   : > { %4760 = vrsqrt.f32 %v764_v41  ;;  %v763_v25 = vmul.f32 0.03125, %v761_v42  ;;  %v791_v5 = vsel %vm380_vm0, %v5293_v23, %v785_v6 }
 0x553   : > { %v765_v45 = vadd.f32 1e-05, %v763_v25  ;;  %v371_v25 = vld [vmem:[%s329_s21] sm:$0x1]  ;;  %s339_s21 = scalar_lea.vmem %s6238_s8, %s5003_s9 }
 0x554   : > { %v789_v9 = vpop.permute.xlu1 %788 }
 0x555   : > { %4762 = vrsqrt.f32 %v765_v45  ;;  %v372_v45 = vmul.f32 1e+30, %v371_v25 }
 0x55e   : > { %v4761_v49 = vpop.eup %4760 }
 0x55f   : > { %v768_v51 = vmul.f32 %v4761_v49, %v752_v53  ;;  %v793_v53 = vsel %vm792_vm10, %v791_v5, %v789_v9  ;;  %v5345_v49 = vrot.slane %v372_v45, %v5041_v29 }
 0x560   : > { %v5317_v11 = vrot.slane %v793_v53, %v5049_v31 }
 0x561   : > { %v774_v62 = vmul.f32 %v5301_v57, %v768_v51 }
 0x562   : > { %v4763_v60 = vpop.eup %4762 }
 0x563   : > { %v769_v61 = vmul.f32 %v4763_v60, %v753_v13  ;;  %v780_v1 = vadd.f32 %v5306_v4, %v774_v62 }
 0x565   : > { %v775_v0 = vmul.f32 %v5301_v57, %v769_v61 }
 0x567   : > { %v781_v2 = vadd.f32 %v5306_v4, %v775_v0 }
 0x569   : > { %v794_v3 = vpack.c.bf16 %v781_v2, %v780_v1 }
 0x56b   : > { %4404 = vmatmul.mubr.msk.bf16.vlgmr.msra.gmra.mxu0 %vm380_vm0, %v794_v3 }
 0x56c   : > { %4415 = vmatprep.mubr.msk.bf16.mxu0 %vm4930_vm1, %v6239_v19 }
 0x62b   : > { %v848_v10 = vpop.f32.mrf.mxu0 }
 0x62c   : > { %v849_v14 = vadd.f32 %v848_v10, %v5317_v11 }
 0x62d   : > { %v4405_v12 = vpop.f32.mrf.mxu0 }
 0x62f   : > { %v851_v13 = vpop.f32.mrf.mxu0 }
 0x630   : > { %v852_v18 = vadd.f32 %v851_v13, %v5317_v11 }
 0x631   : > { %v4406_v58 = vpop.f32.mrf.mxu0 }
 0x632   : > { %v5321_v24 = vpack.c.bf16 %v852_v18, %v849_v14 }
 0x634   : > { %989 = vrot.lane.b32.xlu0 %v5321_v24, %s4933_s16  ;;  %857 = vrot.lane.b32.xlu1 %v5321_v24, %s4934_s17 }
 0x638   : > { %991 = vrot.lane.b32.xlu1 %v5321_v24, %s4935_s18 }
 0x6a6   : > { %v858_v26 = vpop.permute.xlu1 %857  ;;  %v990_v42 = vpop.permute.xlu0 %989 }
 0x6a7   : > { %v864_v27 = vsel %vm859_vm11, %v858_v26, 0 }
 0x6a8   : > { %4408 = vmatpush3.bf16.xpose.msra.mxu1 %v864_v27 }
 0x6a9   : > { %4419 = vmatprep.subr.bf16.mxu1 %v6239_v19 }
 0x6aa   : > { %v992_v33 = vpop.permute.xlu1 %991 }
 0x6ab   : > { %v997_v41 = vsel %vm859_vm11, %v992_v33, 0 }
 0x6af   : > { %4410 = vmatmul.mubr.msk.bf16.vlgmr.msra.gmra.mxu1 %vm859_vm11, %v5321_v24 }
 0x6b0   : > { %4420 = vmatpush3.bf16.xpose.msra.mxu1 %v997_v41  ;;  %4421 = vmatprep.mubr.msk.bf16.mxu1 %vm4930_vm1, %v6239_v19 }
 0x6b1   : > { %4431 = vmatprep.subr.bf16.mxu1 %v6239_v19 }
 0x6b7   : > { %4422 = vmatmul.mubr.msk.bf16.vlgmr.msra.gmra.mxu1 %vm859_vm11, %v990_v42 }
 0x6b8   : > { %4433 = vmatprep.mubr.msk.bf16.mxu1 %vm4930_vm1, %v6239_v19 }
 0x76f   : > { %v900_v51 = vpop.f32.mrf.mxu1 }
 0x770   : > { %v907_v60 = vmul.f32 0.35355338, %v900_v51 }
 0x771   : > { %v4411_v61 = vpop.f32.mrf.mxu1 }
 0x772   : > { %v915_v62 = vsub.f32 %v907_v60, %v5345_v49 }
 0x773   : > { %v903_v0 = vpop.f32.mrf.mxu1 }
 0x774   : > { %v908_v1 = vmul.f32 0.35355338, %v903_v0  ;;  %v918_v2 = vsel %vm917_vm12, %v915_v62, -inf }
 0x775   : > { %919 = vmax.xlane.f32.xlu1 %v918_v2  ;;  %v4412_v3 = vpop.f32.mrf.mxu1 }
 0x776   : > { %v916_v6 = vsub.f32 %v908_v1, %v5345_v49 }
 0x777   : > { %v1033_v5 = vpop.f32.mrf.mxu1 }
 0x778   : > { %v1040_v9 = vmul.f32 0.35355338, %v1033_v5  ;;  %v921_v53 = vsel %vm917_vm12, %v916_v6, -inf }
 0x779   : > { %922 = vmax.xlane.f32.xlu0 %v921_v53  ;;  %v4423_v10 = vpop.f32.mrf.mxu1 }
 0x77a   : > { %v1042_v12 = vsub.f32 %v1040_v9, %v5345_v49 }
 0x77b   : > { %v1036_v13 = vpop.f32.mrf.mxu1 }
 0x77c   : > { %v1041_v14 = vmul.f32 0.35355338, %v1036_v13  ;;  %v1044_v18 = vsel %vm917_vm12, %v1042_v12, -inf }
 0x77d   : > { %1045 = vmax.xlane.f32.xlu0 %v1044_v18  ;;  %v4424_v58 = vpop.f32.mrf.mxu1 }
 0x77e   : > { %v1043_v26 = vsub.f32 %v1041_v14, %v5345_v49 }
 0x780   : > { %v1047_v27 = vsel %vm917_vm12, %v1043_v26, -inf }
 0x781   : > { %1048 = vmax.xlane.f32.xlu0 %v1047_v27 }
 0x7fe   : > { %v920_v33 = vpop.xlane.xlu1 %919 }
 0x7ff   : > { %v924_v41 = vsub.f32 %v915_v62, %v920_v33 }
 0x801   : > { %v926_v42 = vmul.f32 1.442695, %v924_v41 }
 0x802   : > { %v923_v25 = vpop.xlane.xlu0 %922 }
 0x803   : > { %4764 = vpow2.f32 %v926_v42  ;;  %v925_v45 = vsub.f32 %v916_v6, %v923_v25 }
 0x805   : > { %v928_v51 = vmul.f32 1.442695, %v925_v45 }
 0x806   : > { %v1046_v60 = vpop.xlane.xlu0 %1045 }
 0x807   : > { %4766 = vpow2.f32 %v928_v51  ;;  %v1050_v61 = vsub.f32 %v1042_v12, %v1046_v60 }
 0x809   : > { %v1052_v0 = vmul.f32 1.442695, %v1050_v61 }
 0x80a   : > { %v1049_v1 = vpop.xlane.xlu0 %1048 }
 0x80b   : > { %4768 = vpow2.f32 %v1052_v0  ;;  %v1051_v2 = vsub.f32 %v1043_v26, %v1049_v1 }
 0x80d   : > { %v1054_v3 = vmul.f32 1.442695, %v1051_v2 }
 0x80f   : > { %4770 = vpow2.f32 %v1054_v3  ;;  %v357_v3 = vld [vmem:[%s6236_s6 + $0x20] sm:$0xf] }
 0x810   : > { %v4765_v5 = vpop.eup %4764 }
 0x811   : > { %v930_v9 = vsel %vm917_vm12, %v4765_v5, 0.0 }
 0x812   : > { %931 = vadd.xlane.f32.xlu1 %v930_v9  ;;  %v358_v9 = vld [vmem:[%s6236_s6 + $0x24] sm:$0xf] }
 0x814   : > { %v4767_v53 = vpop.eup %4766 }
 0x815   : > { %v933_v62 = vsel %vm917_vm12, %v4767_v53, 0.0 }
 0x816   : > { %934 = vadd.xlane.f32.xlu0 %v933_v62 }
 0x818   : > { %v4769_v10 = vpop.eup %4768 }
 0x819   : > { %v1056_v6 = vsel %vm917_vm12, %v4769_v10, 0.0 }
 0x81a   : > { %1057 = vadd.xlane.f32.xlu1 %v1056_v6 }
 0x81c   : > { %v4771_v13 = vpop.eup %4770 }
 0x81d   : > { %v1059_v12 = vsel %vm917_vm12, %v4771_v13, 0.0 }
 0x81e   : > { %1060 = vadd.xlane.f32.xlu0 %v1059_v12 }
 0x82b   : > { %941 = vrot.lane.b32.xlu1 %v5321_v24, %s4932_s15 }
 0x82f   : > { %1212 = vrot.lane.b32.xlu1 %v5321_v24, %s4936_s28 }
 0x833   : > { %1210 = vrot.lane.b32.xlu1 %v5321_v24, %s4937_s22 }
 0x834   : > { %1067 = vrot.lane.b32.xlu0 %v5321_v24, %s4938_s23 }
 0x89b   : > { %v932_v14 = vpop.xlane.xlu1 %931 }
 0x89c   : > { %4772 = vrcp.f32 %v932_v14 }
 0x89f   : > { %v935_v18 = vpop.xlane.xlu0 %934 }
 0x8a0   : > { %4774 = vrcp.f32 %v935_v18 }
 0x8a3   : > { %v1058_v58 = vpop.xlane.xlu1 %1057 }
 0x8a4   : > { %4776 = vrcp.f32 %v1058_v58 }
 0x8a7   : > { %v1061_v26 = vpop.xlane.xlu0 %1060  ;;  %v942_v27 = vpop.permute.xlu1 %941 }
 0x8a8   : > { %4778 = vrcp.f32 %v1061_v26  ;;  %4414 = vmatpush3.bf16.msra.mxu0 %v942_v27 }
 0x8a9   : > { %4425 = vmatprep.subr.bf16.mxu0 %v6239_v19  ;;  %v4773_v33 = vpop.eup %4772 }
 0x8aa   : > { %v938_v42 = vmul.f32 %v4773_v33, %v4765_v5  ;;  %v5379_v5 = vsel %vm1118_vm13, %v357_v3, 0 }
 0x8ab   : > { %v1068_v51 = vpop.permute.xlu0 %1067  ;;  %v1213_v58 = vpop.permute.xlu1 %1212 }
 0x8ad   : > { %v4775_v41 = vpop.eup %4774 }
 0x8ae   : > { %v939_v25 = vmul.f32 %v4775_v41, %v4767_v53  ;;  %v5387_v53 = vsel %vm1118_vm13, %v358_v9, 0  ;;  %v1218_v41 = vsel %vm859_vm11, %v1213_v58, 0 }
 0x8af   : > { %4432 = vmatpush3.bf16.msra.mxu1 %v5387_v53 }
 0x8b0   : > { %v940_v45 = vpack.c.bf16 %v939_v25, %v938_v42  ;;  %4443 = vmatprep.subr.bf16.mxu1 %v6239_v19  ;;  %v1211_v42 = vpop.permute.xlu1 %1210 }
 0x8b1   : > { %v4777_v60 = vpop.eup %4776 }
 0x8b2   : > { %4416 = vmatmul.mubr.msk.bf16.vlgmr.msra.gmra.mxu0 %vm917_vm12, %v940_v45  ;;  %v1064_v0 = vmul.f32 %v4777_v60, %v4769_v10 }
 0x8b3   : > { %4426 = vmatpush3.bf16.msra.mxu0 %v1068_v51  ;;  %4427 = vmatprep.mubr.msk.bf16.mxu0 %vm4930_vm1, %v6239_v19 }
 0x8b4   : > { %4437 = vmatprep.subr.bf16.mxu0 %v6239_v19 }
 0x8b5   : > { %v4779_v61 = vpop.eup %4778 }
 0x8b6   : > { %v1065_v1 = vmul.f32 %v4779_v61, %v4771_v13 }
 0x8b8   : > { %v1066_v2 = vpack.c.bf16 %v1065_v1, %v1064_v0 }
 0x8ba   : > { %4428 = vmatmul.mubr.msk.bf16.vlgmr.msra.gmra.mxu0 %vm917_vm12, %v1066_v2 }
 0x8bb   : > { %4439 = vmatprep.mubr.msk.bf16.mxu0 %vm4930_vm1, %v6239_v19  ;;  %4438 = vmatpush3.bf16.msra.mxu0 %v5379_v5 }
 0x8bc   : > { %4449 = vmatprep.subr.bf16.mxu0 %v6239_v19 }
 0x972   : > { %v981_v62 = vpop.f32.mrf.mxu0 }
 0x974   : > { %v4417_v10 = vpop.f32.mrf.mxu0 }
 0x976   : > { %v984_v6 = vpop.f32.mrf.mxu0 }
 0x977   : > { %v988_v13 = vpack.c.bf16 %v984_v6, %v981_v62 }
 0x978   : > { %v4418_v12 = vpop.f32.mrf.mxu0 }
 0x979   : > { %4440 = vmatmul.mubr.msk.bf16.vlgmr.msra.gmra.mxu0 %vm859_vm11, %v988_v13 }
 0x97a   : > { %v1107_v14 = vpop.f32.mrf.mxu0  ;;  %4451 = vmatprep.mubr.msk.bf16.mxu0 %vm4930_vm1, %v6239_v19 }
 0x97c   : > { %v4429_v18 = vpop.f32.mrf.mxu0 }
 0x97e   : > { %v1110_v26 = vpop.f32.mrf.mxu0 }
 0x97f   : > { %v1114_v27 = vpack.c.bf16 %v1110_v26, %v1107_v14 }
 0x980   : > { %v4430_v33 = vpop.f32.mrf.mxu0 }
 0x981   : > { %4434 = vmatmul.mubr.msk.bf16.vlgmr.msra.gmra.mxu1 %vm859_vm11, %v1114_v27 }
 0x982   : > { %4444 = vmatpush3.bf16.xpose.msra.mxu1 %v1218_v41  ;;  %4445 = vmatprep.mubr.msk.bf16.mxu1 %vm4930_vm1, %v6239_v19 }
 0x983   : > { %4455 = vmatprep.subr.bf16.mxu1 %v6239_v19 }
 0x989   : > { %4446 = vmatmul.mubr.msk.bf16.vlgmr.msra.gmra.mxu1 %vm859_vm11, %v1211_v42 }
 0x98a   : > { %4457 = vmatprep.mubr.msk.bf16.mxu1 %vm4930_vm1, %v6239_v19 }
 0xa39   : > { %v1203_v25 = vpop.f32.mrf.mxu0 }
 0xa3b   : > { %v4441_v45 = vpop.f32.mrf.mxu0 }
 0xa3d   : > { %v1206_v51 = vpop.f32.mrf.mxu0 }
 0xa3f   : > { %v4442_v60 = vpop.f32.mrf.mxu0 }
 0xa41   : > { %v1156_v61 = vpop.f32.mrf.mxu1 }
 0xa42   : > { %v5402_v0 = vadd.f32 %v1203_v25, %v1156_v61 }
 0xa43   : > { %v4435_v1 = vpop.f32.mrf.mxu1 }
 0xa45   : > { %v1159_v2 = vpop.f32.mrf.mxu1 }
 0xa46   : > { %v5404_v3 = vadd.f32 %v1206_v51, %v1159_v2 }
 0xa47   : > { %v4436_v9 = vpop.f32.mrf.mxu1 }
 0xa49   : > { %v1254_v62 = vpop.f32.mrf.mxu1 }
 0xa4a   : > { %v1261_v10 = vmul.f32 0.35355338, %v1254_v62 }
 0xa4b   : > { %v4447_v6 = vpop.f32.mrf.mxu1 }
 0xa4c   : > { %v1263_v13 = vsub.f32 %v1261_v10, %v5345_v49 }
 0xa4d   : > { %v1257_v12 = vpop.f32.mrf.mxu1 }
 0xa4e   : > { %v1262_v14 = vmul.f32 0.35355338, %v1257_v12  ;;  %v1265_v18 = vsel %vm917_vm12, %v1263_v13, -inf }
 0xa4f   : > { %1266 = vmax.xlane.f32.xlu1 %v1265_v18  ;;  %v4448_v58 = vpop.f32.mrf.mxu1 }
 0xa50   : > { %v1264_v26 = vsub.f32 %v1262_v14, %v5345_v49 }
 0xa52   : > { %v1268_v27 = vsel %vm917_vm12, %v1264_v26, -inf }
 0xa53   : > { %1269 = vmax.xlane.f32.xlu0 %v1268_v27 }
 0xa60   : > { %1288 = vrot.lane.b32.xlu1 %v5321_v24, %s4939_s30 }
 0xa64   : > { %1385 = vrot.lane.b32.xlu1 %v5321_v24, %s4940_s10 }
 0xad8   : > { %v1267_v33 = vpop.xlane.xlu1 %1266 }
 0xad9   : > { %v1271_v41 = vsub.f32 %v1263_v13, %v1267_v33  ;;  %v359_v33 = vld [vmem:[%s6236_s6 + $0x28] sm:$0xf] }
 0xadb   : > { %v1273_v42 = vmul.f32 1.442695, %v1271_v41  ;;  %v5431_v41 = vsel %vm1118_vm13, %v359_v33, 0 }
 0xadc   : > { %v1289_v25 = vpop.permute.xlu1 %1288  ;;  %v1270_v45 = vpop.xlane.xlu0 %1269  ;;  %4456 = vmatpush3.bf16.msra.mxu1 %v5431_v41 }
 0xadd   : > { %4780 = vpow2.f32 %v1273_v42  ;;  %v1272_v51 = vsub.f32 %v1264_v26, %v1270_v45  ;;  %4450 = vmatpush3.bf16.msra.mxu0 %v1289_v25  ;;  %4467 = vmatprep.subr.bf16.mxu1 %v6239_v19 }
 0xade   : > { %4461 = vmatprep.subr.bf16.mxu0 %v6239_v19 }
 0xadf   : > { %v1275_v60 = vmul.f32 1.442695, %v1272_v51 }
 0xae0   : > { %v1386_v27 = vpop.permute.xlu1 %1385 }
 0xae1   : > { %4782 = vpow2.f32 %v1275_v60 }
 0xaea   : > { %v4781_v61 = vpop.eup %4780 }
 0xaeb   : > { %v1277_v1 = vsel %vm917_vm12, %v4781_v61, 0.0 }
 0xaec   : > { %1278 = vadd.xlane.f32.xlu0 %v1277_v1 }
 0xaee   : > { %v4783_v2 = vpop.eup %4782 }
 0xaef   : > { %v1280_v9 = vsel %vm917_vm12, %v4783_v2, 0.0 }
 0xaf0   : > { %1281 = vadd.xlane.f32.xlu0 %v1280_v9 }
 0xb06   : > { %1387 = vrot.lane.b32.xlu0 %v5321_v24, %s4941_s11 }
 0xb75   : > { %v1279_v62 = vpop.xlane.xlu0 %1278 }
 0xb76   : > { %4784 = vrcp.f32 %v1279_v62 }
 0xb79   : > { %v1282_v10 = vpop.xlane.xlu0 %1281 }
 0xb7a   : > { %4786 = vrcp.f32 %v1282_v10 }
 0xb7d   : > { %v1388_v18 = vpop.permute.xlu0 %1387 }
 0xb7e   : > { %v1393_v26 = vsel %vm859_vm11, %v1388_v18, 0 }
 0xb83   : > { %v4785_v6 = vpop.eup %4784 }
 0xb84   : > { %v1285_v12 = vmul.f32 %v4785_v6, %v4781_v61 }
 0xb87   : > { %v4787_v13 = vpop.eup %4786 }
 0xb88   : > { %v1286_v14 = vmul.f32 %v4787_v13, %v4783_v2 }
 0xb8a   : > { %v1287_v58 = vpack.c.bf16 %v1286_v14, %v1285_v12 }
 0xb8c   : > { %4452 = vmatmul.mubr.msk.bf16.vlgmr.msra.gmra.mxu0 %vm917_vm12, %v1287_v58 }
 0xb8d   : > { %4462 = vmatpush3.bf16.xpose.msra.mxu0 %v1393_v26  ;;  %4463 = vmatprep.mubr.msk.bf16.mxu0 %vm4930_vm1, %v6239_v19 }
 0xb8e   : > { %4473 = vmatprep.subr.bf16.mxu0 %v6239_v19 }
 0xb94   : > { %4464 = vmatmul.mubr.msk.bf16.vlgmr.msra.gmra.mxu0 %vm859_vm11, %v1386_v27 }
 0xb95   : > { %4475 = vmatprep.mubr.msk.bf16.mxu0 %vm4930_vm1, %v6239_v19 }
 0xc4c   : > { %v1328_v42 = vpop.f32.mrf.mxu0 }
 0xc4e   : > { %v4453_v25 = vpop.f32.mrf.mxu0 }
 0xc50   : > { %v1331_v45 = vpop.f32.mrf.mxu0 }
 0xc51   : > { %v1335_v51 = vpack.c.bf16 %v1331_v45, %v1328_v42 }
 0xc52   : > { %v4454_v60 = vpop.f32.mrf.mxu0 }
 0xc53   : > { %4458 = vmatmul.mubr.msk.bf16.vlgmr.msra.gmra.mxu1 %vm859_vm11, %v1335_v51 }
 0xc54   : > { %v1429_v61 = vpop.f32.mrf.mxu0  ;;  %4469 = vmatprep.mubr.msk.bf16.mxu1 %vm4930_vm1, %v6239_v19 }
 0xc55   : > { %v1436_v1 = vmul.f32 0.35355338, %v1429_v61 }
 0xc56   : > { %v4465_v2 = vpop.f32.mrf.mxu0 }
 0xc57   : > { %v1438_v9 = vsub.f32 %v1436_v1, %v5345_v49 }
 0xc58   : > { %v1432_v62 = vpop.f32.mrf.mxu0 }
 0xc59   : > { %v1437_v10 = vmul.f32 0.35355338, %v1432_v62  ;;  %v1440_v6 = vsel %vm917_vm12, %v1438_v9, -inf }
 0xc5a   : > { %1441 = vmax.xlane.f32.xlu1 %v1440_v6  ;;  %v4466_v13 = vpop.f32.mrf.mxu0 }
 0xc5b   : > { %v1439_v12 = vsub.f32 %v1437_v10, %v5345_v49 }
 0xc5d   : > { %v1443_v14 = vsel %vm917_vm12, %v1439_v12, -inf }
 0xc5e   : > { %1444 = vmax.xlane.f32.xlu0 %v1443_v14 }
 0xce3   : > { %v1442_v18 = vpop.xlane.xlu1 %1441 }
 0xce4   : > { %v1446_v58 = vsub.f32 %v1438_v9, %v1442_v18 }
 0xce6   : > { %v1448_v26 = vmul.f32 1.442695, %v1446_v58 }
 0xce7   : > { %v1445_v27 = vpop.xlane.xlu0 %1444 }
 0xce8   : > { %4788 = vpow2.f32 %v1448_v26  ;;  %v1447_v33 = vsub.f32 %v1439_v12, %v1445_v27 }
 0xcea   : > { %v1450_v42 = vmul.f32 1.442695, %v1447_v33 }
 0xcec   : > { %4790 = vpow2.f32 %v1450_v42 }
 0xcf5   : > { %v4789_v25 = vpop.eup %4788 }
 0xcf6   : > { %v1452_v45 = vsel %vm917_vm12, %v4789_v25, 0.0 }
 0xcf7   : > { %1453 = vadd.xlane.f32.xlu0 %v1452_v45 }
 0xcf9   : > { %v4791_v51 = vpop.eup %4790 }
 0xcfa   : > { %v1455_v60 = vsel %vm917_vm12, %v4791_v51, 0.0 }
 0xcfb   : > { %1456 = vadd.xlane.f32.xlu1 %v1455_v60 }
 0xd0d   : > { %1463 = vrot.lane.b32.xlu0 %v5321_v24, %s4942_s14 }
 0xd13   : > { %v1376_v61 = vpop.f32.mrf.mxu1 }
 0xd14   : > { %v1383_v1 = vadd.f32 %v1376_v61, %v5402_v0  ;;  %v360_v0 = vld [vmem:[%s6236_s6 + $0x2c] sm:$0xf] }
 0xd15   : > { %v4459_v2 = vpop.f32.mrf.mxu1 }
 0xd17   : > { %v1379_v9 = vpop.f32.mrf.mxu1 }
 0xd18   : > { %v1384_v62 = vadd.f32 %v1379_v9, %v5404_v3  ;;  %v5456_v3 = vsel %vm1118_vm13, %v360_v0, 0 }
 0xd19   : > { %v4460_v10 = vpop.f32.mrf.mxu1  ;;  %4474 = vmatpush3.bf16.msra.mxu0 %v5456_v3 }
 0xd1a   : > { %4487 = vmatprep.subr.bf16.mxu0 %v6239_v19 }
 0xd80   : > { %v1454_v6 = vpop.xlane.xlu0 %1453 }
 0xd81   : > { %4792 = vrcp.f32 %v1454_v6 }
 0xd84   : > { %v1457_v13 = vpop.xlane.xlu1 %1456  ;;  %v1464_v12 = vpop.permute.xlu0 %1463 }
 0xd85   : > { %4794 = vrcp.f32 %v1457_v13  ;;  %4468 = vmatpush3.bf16.msra.mxu1 %v1464_v12 }
 0xd86   : > { %4479 = vmatprep.subr.bf16.mxu1 %v6239_v19 }
 0xd8e   : > { %v4793_v14 = vpop.eup %4792 }
 0xd8f   : > { %v1460_v58 = vmul.f32 %v4793_v14, %v4789_v25 }
 0xd92   : > { %v4795_v18 = vpop.eup %4794 }
 0xd93   : > { %v1461_v24 = vmul.f32 %v4795_v18, %v4791_v51  ;;  %v5465_v51 = vrot.slane %v5293_v23, %v5067_v40 }
 0xd95   : > { %v1462_v26 = vpack.c.bf16 %v1461_v24, %v1460_v58 }
 0xd97   : > { %4470 = vmatmul.mubr.msk.bf16.vlgmr.msra.gmra.mxu1 %vm917_vm12, %v1462_v26 }
 0xd98   : > { %4483 = vmatprep.mubr.msk.bf16.mxu1 %vm4930_vm1, %v6239_v19 }
 0xe57   : > { %v1503_v27 = vpop.f32.mrf.mxu1 }
 0xe59   : > { %v4471_v33 = vpop.f32.mrf.mxu1 }
 0xe5b   : > { %v1506_v42 = vpop.f32.mrf.mxu1 }
 0xe5c   : > { %v1510_v25 = vpack.c.bf16 %v1506_v42, %v1503_v27 }
 0xe5d   : > { %v4472_v45 = vpop.f32.mrf.mxu1 }
 0xe5e   : > { %4476 = vmatmul.mubr.msk.bf16.vlgmr.msra.gmra.mxu0 %vm859_vm11, %v1510_v25  ;;  %v4748_v25 = vld [vmem:[%s6236_s6 + $0x38] sm:$0xff]   ;;  %v4749_v45 = vld [vmem:[%s6236_s6 + $0x30] sm:$0xff]  }
 0xe5f   : > { %4491 = vmatprep.mubr.msk.bf16.mxu0 %vm4930_vm1, %v6239_v19  ;;  %4480 = vmatpush3.bf16.msra.mxu1 %v4748_v25 }
 0xe60   : > { %4481 = vmatprep.subr.bf16.mxu1 %v6239_v19 }
 0xe63   : > { %4482 = vmatpush3.bf16.msra.mxu1 %v4749_v45 }
 0xe64   : > { %4495 = vmatprep.subr.bf16.mxu1 %v6239_v19 }
 0xf1e   : > { %v1551_v60 = vpop.f32.mrf.mxu0 }
 0xf1f   : > { %v1558_v61 = vadd.f32 %v1551_v60, %v1383_v1 }
 0xf20   : > { %v4477_v2 = vpop.f32.mrf.mxu0 }
 0xf21   : > { %v1564_v9 = vadd.f32 %v5465_v51, %v1558_v61 }
 0xf22   : > { %v1554_v10 = vpop.f32.mrf.mxu0 }
 0xf23   : > { %v5469_v6 = vadd.f32 %v1564_v9, %v5263_v63  ;;  %v1559_v13 = vadd.f32 %v1554_v10, %v1384_v62 }
 0xf24   : > { %v4478_v12 = vpop.f32.mrf.mxu0 }
 0xf25   : > { %v1565_v14 = vadd.f32 %v5465_v51, %v1559_v13  ;;  %v1568_v18 = vsel %vm380_vm0, %v5469_v6, 0.0 }
 0xf26   : > { %1569 = vadd.xlane.f32.xlu1 %v1568_v18  ;;  %v5493_v18 = vrot.slane %v5293_v23, %v5061_v37  ;;  %v4902_v37 = vld [vmem:[%s6236_s6 + $0x8] sm:$0xff]  }
 0xf27   : > { %v5475_v40 = vadd.f32 %v1565_v14, %v5269_v50 }
 0xf29   : > { %v1571_v1 = vsel %vm380_vm0, %v5475_v40, 0.0 }
 0xf2a   : > { %1572 = vadd.xlane.f32.xlu1 %v1571_v1 }
 0xfaf   : > { %v1570_v58 = vpop.xlane.xlu1 %1569 }
 0xfb0   : > { %v1574_v24 = vmul.f32 0.03125, %v1570_v58 }
 0xfb2   : > { %v1576_v63 = vsub.f32 %v5469_v6, %v1574_v24 }
 0xfb3   : > { %v1573_v26 = vpop.xlane.xlu1 %1572 }
 0xfb4   : > { %v1575_v62 = vmul.f32 0.03125, %v1573_v26  ;;  %v1578_v0 = vmul.f32 %v1576_v63, %v1576_v63  ;;  %v5498_v26 = vrot.slane %v5293_v23, %v5074_v44  ;;  %v4903_v44 = vld [vmem:[%s6236_s6] sm:$0xff]   ;;  %v5517_v23 = vld [vmem:[%s6236_s6 + $0x48] sm:$0xff]  }
 0xfb5   : > { %4488 = vmatpush3.bf16.msra.mxu0 %v5517_v23 }
 0xfb6   : > { %v1577_v27 = vsub.f32 %v5475_v40, %v1575_v62  ;;  %v1580_v33 = vsel %vm380_vm0, %v1578_v0, 0.0  ;;  %4489 = vmatprep.subr.bf16.mxu0 %v6239_v19 }
 0xfb7   : > { %1581 = vadd.xlane.f32.xlu1 %v1580_v33 }
 0xfb8   : > { %v1579_v42 = vmul.f32 %v1577_v27, %v1577_v27 }
 0xfba   : > { %v1583_v50 = vsel %vm380_vm0, %v1579_v42, 0.0 }
 0xfbb   : > { %1584 = vadd.xlane.f32.xlu1 %v1583_v50 }
0x1040   : > { %v1582_v60 = vpop.xlane.xlu1 %1581 }
0x1041   : > { %v1586_v61 = vmul.f32 0.03125, %v1582_v60 }
0x1043   : > { %v1588_v2 = vadd.f32 1e-05, %v1586_v61 }
0x1044   : > { %v1585_v9 = vpop.xlane.xlu1 %1584 }
0x1045   : > { %4796 = vrsqrt.f32 %v1588_v2  ;;  %v1587_v10 = vmul.f32 0.03125, %v1585_v9 }
0x1047   : > { %v1589_v13 = vadd.f32 1e-05, %v1587_v10 }
0x1049   : > { %4798 = vrsqrt.f32 %v1589_v13 }
0x1052   : > { %v4797_v12 = vpop.eup %4796 }
0x1053   : > { %v1592_v14 = vmul.f32 %v4797_v12, %v1576_v63  ;;  %v5524_v63 = vld [vmem:[%s6236_s6 + $0x40] sm:$0xff]  }
0x1054   : > { %4490 = vmatpush3.bf16.msra.mxu0 %v5524_v63 }
0x1055   : > { %v1598_v24 = vmul.f32 %v5493_v18, %v1592_v14  ;;  %4503 = vmatprep.subr.bf16.mxu0 %v6239_v19 }
0x1056   : > { %v4799_v1 = vpop.eup %4798 }
0x1057   : > { %v1593_v58 = vmul.f32 %v4799_v1, %v1577_v27  ;;  %v1604_v0 = vadd.f32 %v5498_v26, %v1598_v24  ;;  %v344_v27 = vld [vmem:[%s6234_s4 + $0x18] sm:$0x3] }
0x1058   : > { %v5532_v50 = vrot.slane %v344_v27, %v5041_v29  ;;  %v5544_v14 = vrot.slane %v344_v27, %v5183_v15 }
0x1059   : > { %v1599_v62 = vmul.f32 %v5493_v18, %v1593_v58 }
0x105b   : > { %v1605_v33 = vadd.f32 %v5498_v26, %v1599_v62 }
0x105d   : > { %v1606_v42 = vpack.c.bf16 %v1605_v33, %v1604_v0  ;;  %v4904_v33 = vld [vmem:[%s6233_s3] sm:$0xff] }
0x105f   : > { %4484 = vmatmul.mubr.msk.bf16.vlgmr.msra.gmra.mxu1 %vm380_vm0, %v1606_v42 }
0x1060   : > { %4496 = vmatpush3.bf16.msra.mxu1 %v4902_v37  ;;  %4499 = vmatprep.mubr.msk.bf16.mxu1 %vm4930_vm1, %v6239_v19 }
0x1061   : > { %4497 = vmatprep.subr.bf16.mxu1 %v6239_v19 }
0x1064   : > { %4498 = vmatpush3.bf16.msra.mxu1 %v4903_v44 }
0x1065   : > { %4511 = vmatprep.subr.bf16.mxu1 %v6239_v19 }
0x111f   : > { %v1660_v25 = vpop.f32.mrf.mxu1 }
0x1120   : > { %v1661_v60 = vadd.f32 %v1660_v25, %v5532_v50 }
0x1121   : > { %v4485_v45 = vpop.f32.mrf.mxu1 }
0x1122   : > { %v1667_v10 = vmax.f32 %v1661_v60, 0.0 }
0x1123   : > { %v1663_v61 = vpop.f32.mrf.mxu1 }
0x1124   : > { %v1664_v2 = vadd.f32 %v1663_v61, %v5532_v50 }
0x1125   : > { %v4486_v9 = vpop.f32.mrf.mxu1 }
0x1126   : > { %v1668_v13 = vmax.f32 %v1664_v2, 0.0 }
0x1128   : > { %v1669_v12 = vpack.c.bf16 %v1668_v13, %v1667_v10 }
0x112a   : > { %4492 = vmatmul.mubr.msk.bf16.vlgmr.msra.gmra.mxu0 %vm380_vm0, %v1669_v12 }
0x112b   : > { %4504 = vmatpush3.bf16.msra.mxu0 %v5171_v7  ;;  %4507 = vmatprep.mubr.msk.bf16.mxu0 %vm4930_vm1, %v6239_v19 }
0x112c   : > { %4505 = vmatprep.subr.bf16.mxu0 %v6239_v19 }
0x112f   : > { %4506 = vmatpush3.bf16.msra.mxu0 %v5177_v8 }
0x1130   : > { %4519 = vmatprep.subr.bf16.mxu0 %v6239_v19 }
0x11ea   : > { %v1723_v1 = vpop.f32.mrf.mxu0 }
0x11eb   : > { %v1724_v58 = vadd.f32 %v1723_v1, %v5544_v14 }
0x11ec   : > { %v4493_v24 = vpop.f32.mrf.mxu0 }
0x11ed   : > { %v5548_v62 = vadd.f32 %v1724_v58, %v5469_v6  ;;  %v4905_v6 = vld [vmem:[%s6233_s3 + $0x8] sm:$0xff] }
0x11ee   : > { %v1726_v7 = vpop.f32.mrf.mxu0 }
0x11ef   : > { %v1727_v0 = vadd.f32 %v1726_v7, %v5544_v14  ;;  %v5555_v8 = vadd.f32 %v4904_v33, %v5548_v62 }
0x11f0   : > { %v4494_v42 = vpop.f32.mrf.mxu0 }
0x11f1   : > { %v5558_v37 = vadd.f32 %v1727_v0, %v5475_v40  ;;  %v1734_v44 = vsel %vm380_vm0, %v5555_v8, 0.0 }
0x11f2   : > { %1735 = vadd.xlane.f32.xlu1 %v1734_v44 }
0x11f3   : > { %v5566_v27 = vadd.f32 %v4905_v6, %v5558_v37 }
0x11f5   : > { %v1737_v25 = vsel %vm380_vm0, %v5566_v27, 0.0 }
0x11f6   : > { %1738 = vadd.xlane.f32.xlu1 %v1737_v25 }
0x127b   : > { %v1736_v45 = vpop.xlane.xlu1 %1735 }
0x127c   : > { %v1740_v60 = vmul.f32 0.03125, %v1736_v45 }
0x127e   : > { %v1742_v40 = vsub.f32 %v5555_v8, %v1740_v60 }
0x127f   : > { %v1739_v61 = vpop.xlane.xlu1 %1738 }
0x1280   : > { %v1741_v2 = vmul.f32 0.03125, %v1739_v61  ;;  %v1744_v9 = vmul.f32 %v1742_v40, %v1742_v40 }
0x1282   : > { %v1743_v10 = vsub.f32 %v5566_v27, %v1741_v2  ;;  %v1746_v13 = vsel %vm380_vm0, %v1744_v9, 0.0 }
0x1283   : > { %1747 = vadd.xlane.f32.xlu0 %v1746_v13 }
0x1284   : > { %v1745_v12 = vmul.f32 %v1743_v10, %v1743_v10 }
0x1286   : > { %v1749_v1 = vsel %vm380_vm0, %v1745_v12, 0.0 }
0x1287   : > { %1750 = vadd.xlane.f32.xlu1 %v1749_v1 }
0x130c   : > { %v1748_v58 = vpop.xlane.xlu0 %1747 }
0x130d   : > { %v1752_v24 = vmul.f32 0.03125, %v1748_v58 }
0x130f   : > { %v1754_v7 = vadd.f32 1e-05, %v1752_v24 }
0x1310   : > { %v1751_v0 = vpop.xlane.xlu1 %1750 }
0x1311   : > { %4800 = vrsqrt.f32 %v1754_v7  ;;  %v1753_v33 = vmul.f32 0.03125, %v1751_v0 }
0x1313   : > { %v1755_v42 = vadd.f32 1e-05, %v1753_v33 }
0x1315   : > { %4802 = vrsqrt.f32 %v1755_v42 }
0x131e   : > { %v4801_v44 = vpop.eup %4800 }
0x131f   : > { %v1758_v6 = vmul.f32 %v4801_v44, %v1742_v40 }
0x1321   : > { %v1760_v25 = vmul.f32 %v1758_v6, %v5053_v32 }
0x1322   : > { %v4803_v45 = vpop.eup %4802 }
0x1323   : > { %v1759_v60 = vmul.f32 %v4803_v45, %v1743_v10  ;;  %v1762_v61 = vadd.f32 %v1760_v25, %v5057_v35 }
0x1325   : > { %v1761_v2 = vmul.f32 %v1759_v60, %v5053_v32  ;;  %v1764_v13 = vrot.slane %v1762_v61, 6  ;;  %v1774_v1 = vrot.slane %v1762_v61, 7  ;;  %v1788_v7 = vrot.slane %v1762_v61, 1 }
0x1327   : > { %v1763_v9 = vadd.f32 %v1761_v2, %v5057_v35 }
0x1329   : > { %v1765_v12 = vrot.slane %v1763_v9, 6  ;;  %v1775_v58 = vrot.slane %v1763_v9, 7  ;;  %v1789_v24 = vrot.slane %v1763_v9, 1  ;;  %v1799_v0 = vrot.slane %v1763_v9, 2 }
0x132b   : > { %v1766_v40 = vsel %vm422_vm2, %v1764_v13, %v1765_v12  ;;  %v1767_v33 = vsel %vm422_vm2, %v1765_v12, %v1764_v13  ;;  %v1776_v10 = vsel %vm443_vm3, %v1774_v1, %v1775_v58  ;;  %v1777_v42 = vsel %vm443_vm3, %v1775_v58, %v1774_v1 }
0x132c   : > { %v1768_v44 = vsel %vm425_vm4, %v1767_v33, 0.0  ;;  %v1771_v6 = vmul.f32 %v1766_v40, %v5084_v47  ;;  %v1778_v25 = vsel %vm446_vm5, %v1777_v42, 0.0  ;;  %v1781_v45 = vmul.f32 %v1776_v10, %v5089_v48 }
0x132d   : > { %v1770_v60 = vmul.f32 %v1768_v44, %v5084_v47  ;;  %v1780_v2 = vmul.f32 %v1778_v25, %v5089_v48  ;;  %v1791_v13 = vsel %vm472_vm6, %v1789_v24, %v1788_v7  ;;  %v1798_v12 = vrot.slane %v1762_v61, 2 }
0x132e   : > { %v1783_v19 = vadd.f32 %v1781_v45, %v1771_v6  ;;  %v1785_v1 = vmul.f32 %v1763_v9, %v5079_v46  ;;  %v1790_v58 = vsel %vm472_vm6, %v1788_v7, %v1789_v24  ;;  %v1793_v40 = vsel %vm476_vm7, %v1791_v13, 0.0 }
0x132f   : > { %v1782_v33 = vadd.f32 %v1780_v2, %v1770_v60  ;;  %v1784_v10 = vmul.f32 %v1762_v61, %v5079_v46  ;;  %v1801_v42 = vsel %vm493_vm8, %v1799_v0, %v1798_v12  ;;  %v1795_v25 = vmul.f32 %v1793_v40, %v5103_v52 }
0x1330   : > { %v1787_v44 = vadd.f32 %v1785_v1, %v1783_v19  ;;  %v1800_v6 = vsel %vm493_vm8, %v1798_v12, %v1799_v0  ;;  %v1803_v9 = vsel %vm497_vm9, %v1801_v42, 0.0  ;;  %v1794_v24 = vmul.f32 %v1790_v58, %v5103_v52 }
0x1331   : > { %v1786_v45 = vadd.f32 %v1784_v10, %v1782_v33  ;;  %v1805_v60 = vmul.f32 %v1803_v9, %v5109_v59  ;;  %v1804_v61 = vmul.f32 %v1800_v6, %v5109_v59  ;;  %v6243_v0 = vmov 0.0  }
0x1332   : > { %v1797_v7 = vadd.f32 %v1795_v25, %v1787_v44 }
0x1333   : > { %v1796_v2 = vadd.f32 %v1794_v24, %v1786_v45 }
0x1334   : > { %v1807_v13 = vadd.f32 %v1805_v60, %v1797_v7 }
0x1335   : > { %v1806_v39 = vadd.f32 %v1804_v61, %v1796_v2 }
0x1337   : > { %v1808_v19 = vpack.c.bf16 %v1807_v13, %v1806_v39 }
0x1339   : > { %4500 = vmatmul.mubr.msk.bf16.vlgmr.msra.gmra.mxu1 %vm380_vm0, %v1808_v19 }
0x133a   : > { %4512 = vmatpush3.bf16.msra.mxu1 %v5280_v20  ;;  %4515 = vmatprep.mubr.msk.bf16.mxu1 %vm4930_vm1, %v6243_v0 }
0x133b   : > { %4513 = vmatprep.subr.bf16.mxu1 %v6243_v0 }
0x133e   : > { %4514 = vmatpush3.bf16.msra.mxu1 %v5286_v22 }
0x133f   : > { %4525 = vmatprep.subr.bf16.mxu1 %v6243_v0 }
0x13f9   : > { %v1846_v12 = vpop.f32.mrf.mxu1 }
0x13fa   : > { %v1847_v1 = vadd.f32 %v1846_v12, %v5150_v38 }
0x13fb   : > { %v4501_v58 = vpop.f32.mrf.mxu1 }
0x13fc   : > { %v1853_v40 = vmax.f32 %v1847_v1, 0.0 }
0x13fd   : > { %v1849_v33 = vpop.f32.mrf.mxu1 }
0x13fe   : > { %v5621_v39 = vadd.f32 %v1853_v40, %v5555_v8  ;;  %v1850_v20 = vadd.f32 %v1849_v33, %v5150_v38 }
0x13ff   : > { %v4502_v10 = vpop.f32.mrf.mxu1 }
0x1400   : > { %v1854_v42 = vmax.f32 %v1850_v20, 0.0  ;;  %v1857_v44 = vsel %vm380_vm0, %v5621_v39, 0.0 }
0x1401   : > { %1858 = vadd.xlane.f32.xlu1 %v1857_v44 }
0x1402   : > { %v5627_v22 = vadd.f32 %v1854_v42, %v5566_v27 }
0x1404   : > { %v1860_v25 = vsel %vm380_vm0, %v5627_v22, 0.0 }
0x1405   : > { %1861 = vadd.xlane.f32.xlu1 %v1860_v25 }
0x148a   : > { %v1859_v6 = vpop.xlane.xlu1 %1858 }
0x148b   : > { %v1863_v9 = vmul.f32 0.03125, %v1859_v6 }
0x148d   : > { %v1865_v8 = vsub.f32 %v5621_v39, %v1863_v9 }
0x148e   : > { %v1862_v45 = vpop.xlane.xlu1 %1861 }
0x148f   : > { %v1864_v24 = vmul.f32 0.03125, %v1862_v45  ;;  %v1867_v7 = vmul.f32 %v1865_v8, %v1865_v8 }
0x1491   : > { %v1866_v60 = vsub.f32 %v5627_v22, %v1864_v24  ;;  %v1869_v2 = vsel %vm380_vm0, %v1867_v7, 0.0 }
0x1492   : > { %1870 = vadd.xlane.f32.xlu1 %v1869_v2 }
0x1493   : > { %v1868_v61 = vmul.f32 %v1866_v60, %v1866_v60 }
0x1495   : > { %v1872_v27 = vsel %vm380_vm0, %v1868_v61, 0.0 }
0x1496   : > { %1873 = vadd.xlane.f32.xlu1 %v1872_v27 }
0x151b   : > { %v1871_v13 = vpop.xlane.xlu1 %1870 }
0x151c   : > { %v1875_v19 = vmul.f32 0.03125, %v1871_v13 }
0x151e   : > { %v1877_v12 = vadd.f32 1e-05, %v1875_v19 }
0x151f   : > { %v1874_v1 = vpop.xlane.xlu1 %1873 }
0x1520   : > { %4804 = vrsqrt.f32 %v1877_v12  ;;  %v1876_v58 = vmul.f32 0.03125, %v1874_v1 }
0x1522   : > { %v1878_v40 = vadd.f32 1e-05, %v1876_v58 }
0x1524   : > { %4806 = vrsqrt.f32 %v1878_v40 }
0x152d   : > { %v4805_v33 = vpop.eup %4804 }
0x152e   : > { %v1881_v20 = vmul.f32 %v4805_v33, %v1865_v8 }
0x1530   : > { %v1883_v10 = vmul.f32 %v1881_v20, %v5190_v17 }
0x1531   : > { %v4807_v42 = vpop.eup %4806 }
0x1532   : > { %v1882_v44 = vmul.f32 %v4807_v42, %v1866_v60  ;;  %v1885_v25 = vadd.f32 %v1883_v10, %v5194_v21 }
0x1534   : > { %v1884_v6 = vmul.f32 %v1882_v44, %v5190_v17  ;;  %v1887_v45 = vrot.slane %v1885_v25, 6  ;;  %v1897_v7 = vrot.slane %v1885_v25, 7  ;;  %v1911_v27 = vrot.slane %v1885_v25, 1 }
0x1535   : > { %v1921_v44 = vrot.slane %v1885_v25, 2 }
0x1536   : > { %v1886_v9 = vadd.f32 %v1884_v6, %v5194_v21 }
0x1538   : > { %v1888_v24 = vrot.slane %v1886_v9, 6  ;;  %v1898_v2 = vrot.slane %v1886_v9, 7  ;;  %v1912_v61 = vrot.slane %v1886_v9, 1  ;;  %v1922_v13 = vrot.slane %v1886_v9, 2 }
0x153a   : > { %v1889_v8 = vsel %vm422_vm2, %v1887_v45, %v1888_v24  ;;  %v1890_v19 = vsel %vm422_vm2, %v1888_v24, %v1887_v45  ;;  %v1899_v60 = vsel %vm443_vm3, %v1897_v7, %v1898_v2  ;;  %v1900_v12 = vsel %vm443_vm3, %v1898_v2, %v1897_v7 }
0x153b   : > { %v1891_v1 = vsel %vm425_vm4, %v1890_v19, 0.0  ;;  %v1894_v58 = vmul.f32 %v1889_v8, %v5202_v34  ;;  %v1901_v40 = vsel %vm446_vm5, %v1900_v12, 0.0  ;;  %v1904_v33 = vmul.f32 %v1899_v60, %v5206_v36 }
0x153c   : > { %v1893_v20 = vmul.f32 %v1891_v1, %v5202_v34  ;;  %v1903_v10 = vmul.f32 %v1901_v40, %v5206_v36  ;;  %v1914_v42 = vsel %vm472_vm6, %v1912_v61, %v1911_v27  ;;  %v1908_v45 = vmul.f32 %v1886_v9, %v5210_v30 }
0x153d   : > { %v1906_v6 = vadd.f32 %v1904_v33, %v1894_v58  ;;  %v1913_v24 = vsel %vm472_vm6, %v1911_v27, %v1912_v61  ;;  %v1916_v7 = vsel %vm476_vm7, %v1914_v42, 0.0  ;;  %v1907_v8 = vmul.f32 %v1885_v25, %v5210_v30 }
0x153e   : > { %v1905_v2 = vadd.f32 %v1903_v10, %v1893_v20  ;;  %v1924_v19 = vsel %vm493_vm8, %v1922_v13, %v1921_v44  ;;  %v1918_v12 = vmul.f32 %v1916_v7, %v5214_v54  ;;  %v1923_v1 = vsel %vm493_vm8, %v1921_v44, %v1922_v13 }
0x153f   : > { %v1910_v60 = vadd.f32 %v1908_v45, %v1906_v6  ;;  %v1926_v9 = vsel %vm497_vm9, %v1924_v19, 0.0  ;;  %v1917_v61 = vmul.f32 %v1913_v24, %v5214_v54  ;;  %v1927_v25 = vmul.f32 %v1923_v1, %v5218_v56 }
0x1540   : > { %v1909_v58 = vadd.f32 %v1907_v8, %v1905_v2  ;;  %v1928_v40 = vmul.f32 %v1926_v9, %v5218_v56 }
0x1541   : > { %v1920_v27 = vadd.f32 %v1918_v12, %v1910_v60 }
0x1542   : > { %v1919_v33 = vadd.f32 %v1917_v61, %v1909_v58 }
0x1543   : > { %v1930_v20 = vadd.f32 %v1928_v40, %v1920_v27 }
0x1544   : > { %v1929_v10 = vadd.f32 %v1927_v25, %v1919_v33 }
0x1546   : > { %v1931_v42 = vpack.c.bf16 %v1930_v20, %v1929_v10 }
0x1548   : > { %4508 = vmatmul.mubr.msk.bf16.vlgmr.msra.gmra.mxu0 %vm380_vm0, %v1931_v42 }
0x1549   : > { %4521 = vmatprep.mubr.msk.bf16.mxu0 %vm4930_vm1, %v6243_v0 }
0x1608   : > { %v1969_v13 = vpop.f32.mrf.mxu0 }
0x1609   : > { %v1970_v44 = vadd.f32 %v1969_v13, %v5259_v55 }
0x160a   : > { %v4509_v6 = vpop.f32.mrf.mxu0 }
0x160b   : > { %v1976_v45 = vmax.f32 %v1970_v44, 0.0 }
0x160c   : > { %v1972_v24 = vpop.f32.mrf.mxu0 }
0x160d   : > { %v5678_v7 = vadd.f32 %v1976_v45, %v5621_v39  ;;  %v1973_v2 = vadd.f32 %v1972_v24, %v5259_v55 }
0x160e   : > { %v4510_v8 = vpop.f32.mrf.mxu0 }
0x160f   : > { %v1977_v19 = vmax.f32 %v1973_v2, 0.0  ;;  %v1980_v60 = vsel %vm380_vm0, %v5678_v7, 0.0 }
0x1610   : > { %1981 = vadd.xlane.f32.xlu1 %v1980_v60 }
0x1611   : > { %v5684_v12 = vadd.f32 %v1977_v19, %v5627_v22 }
0x1613   : > { %v1983_v1 = vsel %vm380_vm0, %v5684_v12, 0.0 }
0x1614   : > { %1984 = vadd.xlane.f32.xlu1 %v1983_v1 }
0x1699   : > { %v1982_v9 = vpop.xlane.xlu1 %1981 }
0x169a   : > { %v1986_v58 = vmul.f32 0.03125, %v1982_v9 }
0x169c   : > { %v1988_v39 = vsub.f32 %v5678_v7, %v1986_v58 }
0x169d   : > { %v1985_v61 = vpop.xlane.xlu1 %1984 }
0x169e   : > { %v1987_v27 = vmul.f32 0.03125, %v1985_v61  ;;  %v1990_v40 = vmul.f32 %v1988_v39, %v1988_v39 }
0x16a0   : > { %v1989_v33 = vsub.f32 %v5684_v12, %v1987_v27  ;;  %v1992_v25 = vsel %vm380_vm0, %v1990_v40, 0.0 }
0x16a1   : > { %1993 = vadd.xlane.f32.xlu1 %v1992_v25 }
0x16a2   : > { %v1991_v20 = vmul.f32 %v1989_v33, %v1989_v33 }
0x16a4   : > { %v1995_v22 = vsel %vm380_vm0, %v1991_v20, 0.0 }
0x16a5   : > { %1996 = vadd.xlane.f32.xlu0 %v1995_v22 }
0x172a   : > { %v1994_v10 = vpop.xlane.xlu1 %1993 }
0x172b   : > { %v1998_v42 = vmul.f32 0.03125, %v1994_v10 }
0x172d   : > { %v2000_v13 = vadd.f32 1e-05, %v1998_v42 }
0x172e   : > { %v1997_v44 = vpop.xlane.xlu0 %1996 }
0x172f   : > { %4808 = vrsqrt.f32 %v2000_v13  ;;  %v1999_v6 = vmul.f32 0.03125, %v1997_v44 }
0x1731   : > { %v2001_v45 = vadd.f32 1e-05, %v1999_v6 }
0x1733   : > { %4810 = vrsqrt.f32 %v2001_v45 }
0x173c   : > { %v4809_v24 = vpop.eup %4808 }
0x173d   : > { %v2004_v2 = vmul.f32 %v4809_v24, %v1988_v39 }
0x173f   : > { %v2006_v60 = vmul.f32 %v2004_v2, %v5301_v57 }
0x1740   : > { %v4811_v8 = vpop.eup %4810 }
0x1741   : > { %v2005_v19 = vmul.f32 %v4811_v8, %v1989_v33  ;;  %v2008_v9 = vadd.f32 %v2006_v60, %v5306_v4 }
0x1743   : > { %v2007_v1 = vmul.f32 %v2005_v19, %v5301_v57 }
0x1745   : > { %v2009_v58 = vadd.f32 %v2007_v1, %v5306_v4 }
0x1747   : > { %v2010_v61 = vpack.c.bf16 %v2009_v58, %v2008_v9 }
0x1749   : > { %4516 = vmatmul.mubr.msk.bf16.vlgmr.msra.gmra.mxu1 %vm380_vm0, %v2010_v61 }
0x174a   : > { %4527 = vmatprep.mubr.msk.bf16.mxu1 %vm4930_vm1, %v6243_v0 }
0x1809   : > { %v2048_v27 = vpop.f32.mrf.mxu1 }
0x180a   : > { %v2049_v39 = vadd.f32 %v2048_v27, %v5317_v11 }
0x180b   : > { %v4517_v40 = vpop.f32.mrf.mxu1 }
0x180d   : > { %v2051_v25 = vpop.f32.mrf.mxu1 }
0x180e   : > { %v2052_v33 = vadd.f32 %v2051_v25, %v5317_v11 }
0x180f   : > { %v4518_v20 = vpop.f32.mrf.mxu1 }
0x1810   : > { %v5701_v22 = vpack.c.bf16 %v2052_v33, %v2049_v39 }
0x1812   : > { %2183 = vrot.lane.b32.xlu0 %v5701_v22, %s4935_s18  ;;  %2057 = vrot.lane.b32.xlu1 %v5701_v22, %s4934_s17 }
0x1816   : > { %2181 = vrot.lane.b32.xlu1 %v5701_v22, %s4933_s16 }
0x1884   : > { %v2058_v10 = vpop.permute.xlu1 %2057  ;;  %v2184_v13 = vpop.permute.xlu0 %2183 }
0x1885   : > { %v2063_v42 = vsel %vm859_vm11, %v2058_v10, 0  ;;  %v2189_v44 = vsel %vm859_vm11, %v2184_v13, 0 }
0x1886   : > { %4520 = vmatpush3.bf16.xpose.msra.mxu0 %v2063_v42 }
0x1887   : > { %4531 = vmatprep.subr.bf16.mxu0 %v6243_v0 }
0x1888   : > { %v2182_v6 = vpop.permute.xlu1 %2181 }
0x188d   : > { %4522 = vmatmul.mubr.msk.bf16.vlgmr.msra.gmra.mxu0 %vm859_vm11, %v5701_v22 }
0x188e   : > { %4532 = vmatpush3.bf16.xpose.msra.mxu0 %v2189_v44  ;;  %4533 = vmatprep.mubr.msk.bf16.mxu0 %vm4930_vm1, %v6243_v0 }
0x188f   : > { %4543 = vmatprep.subr.bf16.mxu0 %v6243_v0 }
0x1895   : > { %4534 = vmatmul.mubr.msk.bf16.vlgmr.msra.gmra.mxu0 %vm859_vm11, %v2182_v6 }
0x1896   : > { %4544 = vmatpush3.bf16.msra.mxu0 %v5387_v53  ;;  %4545 = vmatprep.mubr.msk.bf16.mxu0 %vm4930_vm1, %v6243_v0 }
0x1897   : > { %4555 = vmatprep.subr.bf16.mxu0 %v6243_v0 }
0x194d   : > { %v2099_v45 = vpop.f32.mrf.mxu0 }
0x194e   : > { %v2106_v24 = vmul.f32 0.35355338, %v2099_v45 }
0x194f   : > { %v4523_v2 = vpop.f32.mrf.mxu0 }
0x1950   : > { %v2108_v8 = vsub.f32 %v2106_v24, %v5345_v49 }
0x1951   : > { %v2102_v19 = vpop.f32.mrf.mxu0 }
0x1952   : > { %v2107_v60 = vmul.f32 0.35355338, %v2102_v19  ;;  %v2110_v1 = vsel %vm917_vm12, %v2108_v8, -inf }
0x1953   : > { %2111 = vmax.xlane.f32.xlu1 %v2110_v1  ;;  %v4524_v9 = vpop.f32.mrf.mxu0 }
0x1954   : > { %v2109_v58 = vsub.f32 %v2107_v60, %v5345_v49 }
0x1955   : > { %v2225_v61 = vpop.f32.mrf.mxu0 }
0x1956   : > { %v2232_v27 = vmul.f32 0.35355338, %v2225_v61  ;;  %v2113_v40 = vsel %vm917_vm12, %v2109_v58, -inf }
0x1957   : > { %2114 = vmax.xlane.f32.xlu0 %v2113_v40  ;;  %v4535_v25 = vpop.f32.mrf.mxu0 }
0x1958   : > { %v2234_v39 = vsub.f32 %v2232_v27, %v5345_v49 }
0x1959   : > { %v2228_v33 = vpop.f32.mrf.mxu0 }
0x195a   : > { %v2233_v20 = vmul.f32 0.35355338, %v2228_v33  ;;  %v2236_v10 = vsel %vm917_vm12, %v2234_v39, -inf }
0x195b   : > { %2237 = vmax.xlane.f32.xlu0 %v2236_v10  ;;  %v4536_v42 = vpop.f32.mrf.mxu0 }
0x195c   : > { %v2235_v13 = vsub.f32 %v2233_v20, %v5345_v49 }
0x195e   : > { %v2239_v44 = vsel %vm917_vm12, %v2235_v13, -inf }
0x195f   : > { %2240 = vmax.xlane.f32.xlu1 %v2239_v44 }
0x19dc   : > { %v2112_v6 = vpop.xlane.xlu1 %2111 }
0x19dd   : > { %v2116_v45 = vsub.f32 %v2108_v8, %v2112_v6 }
0x19df   : > { %v2118_v24 = vmul.f32 1.442695, %v2116_v45 }
0x19e0   : > { %v2115_v2 = vpop.xlane.xlu0 %2114 }
0x19e1   : > { %4812 = vpow2.f32 %v2118_v24  ;;  %v2117_v19 = vsub.f32 %v2109_v58, %v2115_v2 }
0x19e3   : > { %v2120_v60 = vmul.f32 1.442695, %v2117_v19 }
0x19e4   : > { %v2238_v1 = vpop.xlane.xlu0 %2237 }
0x19e5   : > { %4814 = vpow2.f32 %v2120_v60  ;;  %v2242_v9 = vsub.f32 %v2234_v39, %v2238_v1 }
0x19e7   : > { %v2244_v61 = vmul.f32 1.442695, %v2242_v9 }
0x19e8   : > { %v2241_v27 = vpop.xlane.xlu1 %2240 }
0x19e9   : > { %4816 = vpow2.f32 %v2244_v61  ;;  %v2243_v40 = vsub.f32 %v2235_v13, %v2241_v27 }
0x19eb   : > { %v2246_v25 = vmul.f32 1.442695, %v2243_v40 }
0x19ed   : > { %4818 = vpow2.f32 %v2246_v25 }
0x19ee   : > { %v4813_v33 = vpop.eup %4812 }
0x19ef   : > { %v2122_v20 = vsel %vm917_vm12, %v4813_v33, 0.0 }
0x19f0   : > { %2123 = vadd.xlane.f32.xlu0 %v2122_v20 }
0x19f2   : > { %v4815_v10 = vpop.eup %4814 }
0x19f3   : > { %v2125_v8 = vsel %vm917_vm12, %v4815_v10, 0.0 }
0x19f4   : > { %2126 = vadd.xlane.f32.xlu1 %v2125_v8 }
0x19f6   : > { %v4817_v42 = vpop.eup %4816 }
0x19f7   : > { %v2248_v58 = vsel %vm917_vm12, %v4817_v42, 0.0 }
0x19f8   : > { %2249 = vadd.xlane.f32.xlu0 %v2248_v58 }
0x19fa   : > { %v4819_v44 = vpop.eup %4818 }
0x19fb   : > { %v2251_v39 = vsel %vm917_vm12, %v4819_v44, 0.0 }
0x19fc   : > { %2252 = vadd.xlane.f32.xlu1 %v2251_v39 }
0x1a0d   : > { %2259 = vrot.lane.b32.xlu1 %v5701_v22, %s4938_s23 }
0x1a0e   : > { %2133 = vrot.lane.b32.xlu0 %v5701_v22, %s4932_s15 }
0x1a11   : > { %2397 = vrot.lane.b32.xlu1 %v5701_v22, %s4936_s28 }
0x1a12   : > { %2395 = vrot.lane.b32.xlu0 %v5701_v22, %s4937_s22 }
0x1a79   : > { %v2124_v13 = vpop.xlane.xlu0 %2123 }
0x1a7a   : > { %4820 = vrcp.f32 %v2124_v13 }
0x1a7d   : > { %v2127_v6 = vpop.xlane.xlu1 %2126 }
0x1a7e   : > { %4822 = vrcp.f32 %v2127_v6 }
0x1a81   : > { %v2250_v45 = vpop.xlane.xlu0 %2249 }
0x1a82   : > { %4824 = vrcp.f32 %v2250_v45 }
0x1a85   : > { %v2134_v24 = vpop.permute.xlu0 %2133  ;;  %v2253_v2 = vpop.xlane.xlu1 %2252 }
0x1a86   : > { %4826 = vrcp.f32 %v2253_v2  ;;  %4526 = vmatpush3.bf16.msra.mxu1 %v2134_v24 }
0x1a87   : > { %4537 = vmatprep.subr.bf16.mxu1 %v6243_v0  ;;  %v4821_v19 = vpop.eup %4820 }
0x1a88   : > { %v2130_v1 = vmul.f32 %v4821_v19, %v4813_v33 }
0x1a89   : > { %v2260_v27 = vpop.permute.xlu1 %2259 }
0x1a8b   : > { %v4823_v60 = vpop.eup %4822 }
0x1a8c   : > { %v2131_v9 = vmul.f32 %v4823_v60, %v4815_v10 }
0x1a8e   : > { %v2132_v61 = vpack.c.bf16 %v2131_v9, %v2130_v1  ;;  %v2396_v1 = vpop.permute.xlu0 %2395 }
0x1a8f   : > { %v4825_v40 = vpop.eup %4824 }
0x1a90   : > { %4528 = vmatmul.mubr.msk.bf16.vlgmr.msra.gmra.mxu1 %vm917_vm12, %v2132_v61  ;;  %v2256_v20 = vmul.f32 %v4825_v40, %v4817_v42 }
0x1a91   : > { %4538 = vmatpush3.bf16.msra.mxu1 %v2260_v27  ;;  %4539 = vmatprep.mubr.msk.bf16.mxu1 %vm4930_vm1, %v6243_v0 }
0x1a92   : > { %4549 = vmatprep.subr.bf16.mxu1 %v6243_v0 }
0x1a93   : > { %v4827_v25 = vpop.eup %4826 }
0x1a94   : > { %v2257_v8 = vmul.f32 %v4827_v25, %v4819_v44  ;;  %v2398_v44 = vpop.permute.xlu1 %2397 }
0x1a95   : > { %v2403_v60 = vsel %vm859_vm11, %v2398_v44, 0 }
0x1a96   : > { %v2258_v58 = vpack.c.bf16 %v2257_v8, %v2256_v20 }
0x1a98   : > { %4540 = vmatmul.mubr.msk.bf16.vlgmr.msra.gmra.mxu1 %vm917_vm12, %v2258_v58 }
0x1a99   : > { %4550 = vmatpush3.bf16.msra.mxu1 %v5379_v5  ;;  %4551 = vmatprep.mubr.msk.bf16.mxu1 %vm4930_vm1, %v6243_v0 }
0x1a9a   : > { %4561 = vmatprep.subr.bf16.mxu1 %v6243_v0 }
0x1b50   : > { %v2173_v33 = vpop.f32.mrf.mxu1 }
0x1b52   : > { %v4529_v10 = vpop.f32.mrf.mxu1 }
0x1b54   : > { %v2176_v39 = vpop.f32.mrf.mxu1 }
0x1b55   : > { %v2180_v13 = vpack.c.bf16 %v2176_v39, %v2173_v33 }
0x1b56   : > { %v4530_v6 = vpop.f32.mrf.mxu1 }
0x1b57   : > { %4552 = vmatmul.mubr.msk.bf16.vlgmr.msra.gmra.mxu1 %vm859_vm11, %v2180_v13 }
0x1b58   : > { %v2299_v45 = vpop.f32.mrf.mxu1  ;;  %4563 = vmatprep.mubr.msk.bf16.mxu1 %vm4930_vm1, %v6243_v0 }
0x1b5a   : > { %v4541_v42 = vpop.f32.mrf.mxu1 }
0x1b5c   : > { %v2302_v24 = vpop.f32.mrf.mxu1 }
0x1b5d   : > { %v2306_v2 = vpack.c.bf16 %v2302_v24, %v2299_v45 }
0x1b5e   : > { %v4542_v19 = vpop.f32.mrf.mxu1 }
0x1b5f   : > { %4546 = vmatmul.mubr.msk.bf16.vlgmr.msra.gmra.mxu0 %vm859_vm11, %v2306_v2 }
0x1b60   : > { %4556 = vmatpush3.bf16.xpose.msra.mxu0 %v2403_v60  ;;  %4557 = vmatprep.mubr.msk.bf16.mxu0 %vm4930_vm1, %v6243_v0 }
0x1b61   : > { %4567 = vmatprep.subr.bf16.mxu0 %v6243_v0 }
0x1b67   : > { %4558 = vmatmul.mubr.msk.bf16.vlgmr.msra.gmra.mxu0 %vm859_vm11, %v2396_v1 }
0x1b68   : > { %4568 = vmatpush3.bf16.msra.mxu0 %v5431_v41  ;;  %4569 = vmatprep.mubr.msk.bf16.mxu0 %vm4930_vm1, %v6243_v0 }
0x1b69   : > { %4579 = vmatprep.subr.bf16.mxu0 %v6243_v0 }
0x1c17   : > { %v2388_v9 = vpop.f32.mrf.mxu1 }
0x1c19   : > { %v4553_v61 = vpop.f32.mrf.mxu1 }
0x1c1b   : > { %v2391_v27 = vpop.f32.mrf.mxu1 }
0x1c1d   : > { %v4554_v40 = vpop.f32.mrf.mxu1 }
0x1c1f   : > { %v2344_v25 = vpop.f32.mrf.mxu0 }
0x1c20   : > { %v5765_v20 = vadd.f32 %v2388_v9, %v2344_v25 }
0x1c21   : > { %v4547_v8 = vpop.f32.mrf.mxu0 }
0x1c23   : > { %v2347_v58 = vpop.f32.mrf.mxu0 }
0x1c24   : > { %v5767_v33 = vadd.f32 %v2391_v27, %v2347_v58 }
0x1c25   : > { %v4548_v10 = vpop.f32.mrf.mxu0 }
0x1c27   : > { %v2439_v39 = vpop.f32.mrf.mxu0 }
0x1c28   : > { %v2446_v13 = vmul.f32 0.35355338, %v2439_v39 }
0x1c29   : > { %v4559_v6 = vpop.f32.mrf.mxu0 }
0x1c2a   : > { %v2448_v45 = vsub.f32 %v2446_v13, %v5345_v49 }
0x1c2b   : > { %v2442_v42 = vpop.f32.mrf.mxu0 }
0x1c2c   : > { %v2447_v44 = vmul.f32 0.35355338, %v2442_v42  ;;  %v2450_v24 = vsel %vm917_vm12, %v2448_v45, -inf }
0x1c2d   : > { %2451 = vmax.xlane.f32.xlu1 %v2450_v24  ;;  %v4560_v2 = vpop.f32.mrf.mxu0 }
0x1c2e   : > { %v2449_v19 = vsub.f32 %v2447_v44, %v5345_v49 }
0x1c30   : > { %v2453_v60 = vsel %vm917_vm12, %v2449_v19, -inf }
0x1c31   : > { %2454 = vmax.xlane.f32.xlu0 %v2453_v60 }
0x1cb6   : > { %v2452_v1 = vpop.xlane.xlu1 %2451 }
0x1cb7   : > { %v2456_v9 = vsub.f32 %v2448_v45, %v2452_v1 }
0x1cb9   : > { %v2458_v61 = vmul.f32 1.442695, %v2456_v9 }
0x1cba   : > { %v2455_v27 = vpop.xlane.xlu0 %2454 }
0x1cbb   : > { %4828 = vpow2.f32 %v2458_v61  ;;  %v2457_v40 = vsub.f32 %v2449_v19, %v2455_v27 }
0x1cbd   : > { %v2460_v25 = vmul.f32 1.442695, %v2457_v40 }
0x1cbf   : > { %4830 = vpow2.f32 %v2460_v25 }
0x1cc8   : > { %v4829_v8 = vpop.eup %4828 }
0x1cc9   : > { %v2462_v58 = vsel %vm917_vm12, %v4829_v8, 0.0 }
0x1cca   : > { %2463 = vadd.xlane.f32.xlu0 %v2462_v58 }
0x1ccc   : > { %v4831_v10 = vpop.eup %4830 }
0x1ccd   : > { %v2465_v39 = vsel %vm917_vm12, %v4831_v10, 0.0 }
0x1cce   : > { %2466 = vadd.xlane.f32.xlu1 %v2465_v39 }
0x1cdf   : > { %2569 = vrot.lane.b32.xlu1 %v5701_v22, %s4941_s11 }
0x1ce0   : > { %2473 = vrot.lane.b32.xlu0 %v5701_v22, %s4939_s30 }
0x1ce3   : > { %2567 = vrot.lane.b32.xlu1 %v5701_v22, %s4940_s10 }
0x1d53   : > { %v2464_v13 = vpop.xlane.xlu0 %2463 }
0x1d54   : > { %4832 = vrcp.f32 %v2464_v13 }
0x1d57   : > { %v2467_v6 = vpop.xlane.xlu1 %2466  ;;  %v2474_v45 = vpop.permute.xlu0 %2473 }
0x1d58   : > { %4834 = vrcp.f32 %v2467_v6  ;;  %4562 = vmatpush3.bf16.msra.mxu1 %v2474_v45 }
0x1d59   : > { %4573 = vmatprep.subr.bf16.mxu1 %v6243_v0 }
0x1d5b   : > { %v2570_v19 = vpop.permute.xlu1 %2569 }
0x1d5c   : > { %v2575_v1 = vsel %vm859_vm11, %v2570_v19, 0 }
0x1d5f   : > { %v2568_v9 = vpop.permute.xlu1 %2567 }
0x1d61   : > { %v4833_v42 = vpop.eup %4832 }
0x1d62   : > { %v2470_v24 = vmul.f32 %v4833_v42, %v4829_v8 }
0x1d65   : > { %v4835_v44 = vpop.eup %4834 }
0x1d66   : > { %v2471_v2 = vmul.f32 %v4835_v44, %v4831_v10 }
0x1d68   : > { %v2472_v60 = vpack.c.bf16 %v2471_v2, %v2470_v24 }
0x1d6a   : > { %4564 = vmatmul.mubr.msk.bf16.vlgmr.msra.gmra.mxu1 %vm917_vm12, %v2472_v60 }
0x1d6b   : > { %4574 = vmatpush3.bf16.xpose.msra.mxu1 %v2575_v1  ;;  %4575 = vmatprep.mubr.msk.bf16.mxu1 %vm4930_vm1, %v6243_v0 }
0x1d6c   : > { %4585 = vmatprep.subr.bf16.mxu1 %v6243_v0 }
0x1d72   : > { %4576 = vmatmul.mubr.msk.bf16.vlgmr.msra.gmra.mxu1 %vm859_vm11, %v2568_v9 }
0x1d73   : > { %4586 = vmatpush3.bf16.msra.mxu1 %v5456_v3  ;;  %4587 = vmatprep.mubr.msk.bf16.mxu1 %vm4930_vm1, %v6243_v0 }
0x1d74   : > { %4599 = vmatprep.subr.bf16.mxu1 %v6243_v0 }
0x1e2a   : > { %v2513_v61 = vpop.f32.mrf.mxu1 }
0x1e2c   : > { %v4565_v27 = vpop.f32.mrf.mxu1 }
0x1e2e   : > { %v2516_v40 = vpop.f32.mrf.mxu1 }
0x1e2f   : > { %v2520_v25 = vpack.c.bf16 %v2516_v40, %v2513_v61 }
0x1e30   : > { %v4566_v8 = vpop.f32.mrf.mxu1 }
0x1e31   : > { %4570 = vmatmul.mubr.msk.bf16.vlgmr.msra.gmra.mxu0 %vm859_vm11, %v2520_v25 }
0x1e32   : > { %v2611_v58 = vpop.f32.mrf.mxu1  ;;  %4581 = vmatprep.mubr.msk.bf16.mxu0 %vm4930_vm1, %v6243_v0 }
0x1e33   : > { %v2618_v10 = vmul.f32 0.35355338, %v2611_v58 }
0x1e34   : > { %v4577_v39 = vpop.f32.mrf.mxu1 }
0x1e35   : > { %v2620_v13 = vsub.f32 %v2618_v10, %v5345_v49 }
0x1e36   : > { %v2614_v6 = vpop.f32.mrf.mxu1 }
0x1e37   : > { %v2619_v45 = vmul.f32 0.35355338, %v2614_v6  ;;  %v2622_v42 = vsel %vm917_vm12, %v2620_v13, -inf }
0x1e38   : > { %2623 = vmax.xlane.f32.xlu0 %v2622_v42  ;;  %v4578_v44 = vpop.f32.mrf.mxu1 }
0x1e39   : > { %v2621_v24 = vsub.f32 %v2619_v45, %v5345_v49 }
0x1e3b   : > { %v2625_v2 = vsel %vm917_vm12, %v2621_v24, -inf }
0x1e3c   : > { %2626 = vmax.xlane.f32.xlu1 %v2625_v2 }
0x1e4d   : > { %2645 = vrot.lane.b32.xlu1 %v5701_v22, %s4942_s14 }
0x1ec1   : > { %v2624_v19 = vpop.xlane.xlu0 %2623 }
0x1ec2   : > { %v2628_v60 = vsub.f32 %v2620_v13, %v2624_v19 }
0x1ec4   : > { %v2630_v1 = vmul.f32 1.442695, %v2628_v60 }
0x1ec5   : > { %v2627_v9 = vpop.xlane.xlu1 %2626 }
0x1ec6   : > { %4836 = vpow2.f32 %v2630_v1  ;;  %v2629_v61 = vsub.f32 %v2621_v24, %v2627_v9 }
0x1ec8   : > { %v2632_v27 = vmul.f32 1.442695, %v2629_v61 }
0x1ec9   : > { %v2646_v40 = vpop.permute.xlu1 %2645 }
0x1eca   : > { %4838 = vpow2.f32 %v2632_v27  ;;  %4580 = vmatpush3.bf16.msra.mxu0 %v2646_v40 }
0x1ecb   : > { %4591 = vmatprep.subr.bf16.mxu0 %v6243_v0 }
0x1ed3   : > { %v4837_v25 = vpop.eup %4836 }
0x1ed4   : > { %v2634_v8 = vsel %vm917_vm12, %v4837_v25, 0.0 }
0x1ed5   : > { %2635 = vadd.xlane.f32.xlu0 %v2634_v8 }
0x1ed7   : > { %v4839_v58 = vpop.eup %4838 }
0x1ed8   : > { %v2637_v10 = vsel %vm917_vm12, %v4839_v58, 0.0 }
0x1ed9   : > { %2638 = vadd.xlane.f32.xlu0 %v2637_v10 }
0x1ef1   : > { %v2558_v22 = vpop.f32.mrf.mxu0 }
0x1ef2   : > { %v2565_v39 = vadd.f32 %v2558_v22, %v5765_v20  ;;  %v4906_v20 = vld [vmem:[%s6236_s6 + $0x38] sm:$0xff]  }
0x1ef3   : > { %v4571_v13 = vpop.f32.mrf.mxu0 }
0x1ef5   : > { %v2561_v6 = vpop.f32.mrf.mxu0 }
0x1ef6   : > { %v2566_v45 = vadd.f32 %v2561_v6, %v5767_v33  ;;  %v4907_v33 = vld [vmem:[%s6236_s6 + $0x30] sm:$0xff]  }
0x1ef7   : > { %v4572_v42 = vpop.f32.mrf.mxu0 }
0x1f5e   : > { %v2636_v44 = vpop.xlane.xlu0 %2635 }
0x1f5f   : > { %4840 = vrcp.f32 %v2636_v44 }
0x1f62   : > { %v2639_v24 = vpop.xlane.xlu0 %2638 }
0x1f63   : > { %4842 = vrcp.f32 %v2639_v24 }
0x1f6c   : > { %v4841_v2 = vpop.eup %4840 }
0x1f6d   : > { %v2642_v60 = vmul.f32 %v4841_v2, %v4837_v25 }
0x1f70   : > { %v4843_v19 = vpop.eup %4842 }
0x1f71   : > { %v2643_v1 = vmul.f32 %v4843_v19, %v4839_v58 }
0x1f73   : > { %v2644_v9 = vpack.c.bf16 %v2643_v1, %v2642_v60 }
0x1f75   : > { %4582 = vmatmul.mubr.msk.bf16.vlgmr.msra.gmra.mxu0 %vm917_vm12, %v2644_v9 }
0x1f76   : > { %4592 = vmatpush3.bf16.msra.mxu0 %v4906_v20  ;;  %4595 = vmatprep.mubr.msk.bf16.mxu0 %vm4930_vm1, %v6243_v0 }
0x1f77   : > { %4593 = vmatprep.subr.bf16.mxu0 %v6243_v0 }
0x1f7a   : > { %4594 = vmatpush3.bf16.msra.mxu0 %v4907_v33 }
0x1f7b   : > { %4607 = vmatprep.subr.bf16.mxu0 %v6243_v0 }
0x2035   : > { %v2685_v61 = vpop.f32.mrf.mxu0 }
0x2037   : > { %v4583_v27 = vpop.f32.mrf.mxu0 }
0x2039   : > { %v2688_v40 = vpop.f32.mrf.mxu0 }
0x203a   : > { %v2692_v25 = vpack.c.bf16 %v2688_v40, %v2685_v61 }
0x203b   : > { %v4584_v8 = vpop.f32.mrf.mxu0 }
0x203c   : > { %4588 = vmatmul.mubr.msk.bf16.vlgmr.msra.gmra.mxu1 %vm859_vm11, %v2692_v25 }
0x203d   : > { %4600 = vmatpush3.bf16.msra.mxu1 %v5517_v23  ;;  %4603 = vmatprep.mubr.msk.bf16.mxu1 %vm4930_vm1, %v6243_v0 }
0x203e   : > { %4601 = vmatprep.subr.bf16.mxu1 %v6243_v0 }
0x2041   : > { %4602 = vmatpush3.bf16.msra.mxu1 %v5524_v63 }
0x2042   : > { %4615 = vmatprep.subr.bf16.mxu1 %v6243_v0 }
0x20fc   : > { %v2730_v58 = vpop.f32.mrf.mxu1 }
0x20fd   : > { %v2737_v10 = vadd.f32 %v2730_v58, %v2565_v39 }
0x20fe   : > { %v4589_v22 = vpop.f32.mrf.mxu1 }
0x20ff   : > { %v2739_v13 = vadd.f32 %v2737_v10, %v5465_v51 }
0x2100   : > { %v2733_v6 = vpop.f32.mrf.mxu1 }
0x2101   : > { %v5826_v42 = vadd.f32 %v2739_v13, %v5678_v7  ;;  %v2738_v44 = vadd.f32 %v2733_v6, %v2566_v45 }
0x2102   : > { %v4590_v23 = vpop.f32.mrf.mxu1 }
0x2103   : > { %v2740_v24 = vadd.f32 %v2738_v44, %v5465_v51  ;;  %v2743_v2 = vsel %vm380_vm0, %v5826_v42, 0.0 }
0x2104   : > { %2744 = vadd.xlane.f32.xlu0 %v2743_v2 }
0x2105   : > { %v5832_v63 = vadd.f32 %v2740_v24, %v5684_v12 }
0x2107   : > { %v2746_v39 = vsel %vm380_vm0, %v5832_v63, 0.0 }
0x2108   : > { %2747 = vadd.xlane.f32.xlu0 %v2746_v39 }
0x218d   : > { %v2745_v19 = vpop.xlane.xlu0 %2744 }
0x218e   : > { %v2749_v60 = vmul.f32 0.03125, %v2745_v19 }
0x2190   : > { %v2751_v7 = vsub.f32 %v5826_v42, %v2749_v60  ;;  %v4908_v60 = vld [vmem:[%s6236_s6 + $0x8] sm:$0xff]  }
0x2191   : > { %v2748_v1 = vpop.xlane.xlu0 %2747 }
0x2192   : > { %v2750_v45 = vmul.f32 0.03125, %v2748_v1  ;;  %v2753_v9 = vmul.f32 %v2751_v7, %v2751_v7 }
0x2194   : > { %v2752_v20 = vsub.f32 %v5832_v63, %v2750_v45  ;;  %v2755_v33 = vsel %vm380_vm0, %v2753_v9, 0.0 }
0x2195   : > { %2756 = vadd.xlane.f32.xlu0 %v2755_v33 }
0x2196   : > { %v2754_v61 = vmul.f32 %v2752_v20, %v2752_v20 }
0x2198   : > { %v2758_v12 = vsel %vm380_vm0, %v2754_v61, 0.0 }
0x2199   : > { %2759 = vadd.xlane.f32.xlu0 %v2758_v12 }
0x221e   : > { %v2757_v27 = vpop.xlane.xlu0 %2756 }
0x221f   : > { %v2761_v40 = vmul.f32 0.03125, %v2757_v27 }
0x2221   : > { %v2763_v25 = vadd.f32 1e-05, %v2761_v40 }
0x2222   : > { %v2760_v8 = vpop.xlane.xlu0 %2759 }
0x2223   : > { %4844 = vrsqrt.f32 %v2763_v25  ;;  %v2762_v58 = vmul.f32 0.03125, %v2760_v8  ;;  %v4910_v25 = vld [vmem:[%s6236_s6 + $0x18] sm:$0xff]   ;;  %v4911_v8 = vld [vmem:[%s6236_s6 + $0x10] sm:$0xff]  }
0x2225   : > { %v2764_v10 = vadd.f32 1e-05, %v2762_v58 }
0x2227   : > { %4846 = vrsqrt.f32 %v2764_v10 }
0x2230   : > { %v4845_v22 = vpop.eup %4844 }
0x2231   : > { %v2767_v13 = vmul.f32 %v4845_v22, %v2751_v7  ;;  %v4909_v7 = vld [vmem:[%s6236_s6] sm:$0xff]  }
0x2233   : > { %v2769_v23 = vmul.f32 %v2767_v13, %v5493_v18 }
0x2234   : > { %v4847_v6 = vpop.eup %4846 }
0x2235   : > { %v2768_v44 = vmul.f32 %v4847_v6, %v2752_v20  ;;  %v2771_v2 = vadd.f32 %v2769_v23, %v5498_v26 }
0x2237   : > { %v2770_v24 = vmul.f32 %v2768_v44, %v5493_v18  ;;  %v4912_v44 = vld [vmem:[%s6233_s3] sm:$0xff] }
0x2239   : > { %v2772_v39 = vadd.f32 %v2770_v24, %v5498_v26 }
0x223b   : > { %v2773_v19 = vpack.c.bf16 %v2772_v39, %v2771_v2  ;;  %v5882_v39 = vld [vmem:[%s6237_s7] sm:$0x1f] }
0x223d   : > { %4596 = vmatmul.mubr.msk.bf16.vlgmr.msra.gmra.mxu0 %vm380_vm0, %v2773_v19 }
0x223e   : > { %4608 = vmatpush3.bf16.msra.mxu0 %v4908_v60  ;;  %4611 = vmatprep.mubr.msk.bf16.mxu0 %vm4930_vm1, %v6243_v0  ;;  %v5889_v60 = vrot.slane %v5882_v39, %v5183_v15 }
0x223f   : > { %4609 = vmatprep.subr.bf16.mxu0 %v6243_v0 }
0x2242   : > { %4610 = vmatpush3.bf16.msra.mxu0 %v4909_v7  ;;  %v4913_v7 = vld [vmem:[%s6233_s3 + $0x8] sm:$0xff] }
0x2243   : > { %4623 = vmatprep.subr.bf16.mxu0 %v6243_v0 }
0x22fd   : > { %v2811_v1 = vpop.f32.mrf.mxu0 }
0x22fe   : > { %v2812_v9 = vadd.f32 %v2811_v1, %v5532_v50 }
0x22ff   : > { %v4597_v45 = vpop.f32.mrf.mxu0 }
0x2300   : > { %v2818_v12 = vmax.f32 %v2812_v9, 0.0 }
0x2301   : > { %v2814_v20 = vpop.f32.mrf.mxu0 }
0x2302   : > { %v2815_v33 = vadd.f32 %v2814_v20, %v5532_v50 }
0x2303   : > { %v4598_v61 = vpop.f32.mrf.mxu0 }
0x2304   : > { %v2819_v27 = vmax.f32 %v2815_v33, 0.0 }
0x2306   : > { %v2820_v40 = vpack.c.bf16 %v2819_v27, %v2818_v12 }
0x2308   : > { %4604 = vmatmul.mubr.msk.bf16.vlgmr.msra.gmra.mxu1 %vm380_vm0, %v2820_v40 }
0x2309   : > { %4616 = vmatpush3.bf16.msra.mxu1 %v4910_v25  ;;  %4619 = vmatprep.mubr.msk.bf16.mxu1 %vm4930_vm1, %v6243_v0 }
0x230a   : > { %4617 = vmatprep.subr.bf16.mxu1 %v6243_v0 }
0x230d   : > { %4618 = vmatpush3.bf16.msra.mxu1 %v4911_v8 }
0x230e   : > { %4631 = vmatprep.subr.bf16.mxu1 %v6243_v0 }
0x23c8   : > { %v2858_v58 = vpop.f32.mrf.mxu1 }
0x23c9   : > { %v2859_v10 = vadd.f32 %v2858_v58, %v5544_v14 }
0x23ca   : > { %v4605_v22 = vpop.f32.mrf.mxu1 }
0x23cb   : > { %v5870_v13 = vadd.f32 %v2859_v10, %v5826_v42 }
0x23cc   : > { %v2861_v6 = vpop.f32.mrf.mxu1 }
0x23cd   : > { %v5876_v23 = vadd.f32 %v4912_v44, %v5870_v13  ;;  %v2862_v24 = vadd.f32 %v2861_v6, %v5544_v14 }
0x23ce   : > { %v4606_v2 = vpop.f32.mrf.mxu1 }
0x23cf   : > { %v2866_v19 = vadd.f32 %v2862_v24, %v5832_v63  ;;  %v2869_v42 = vsel %vm380_vm0, %v5876_v23, 0.0 }
0x23d0   : > { %2870 = vadd.xlane.f32.xlu0 %v2869_v42 }
0x23d1   : > { %v5894_v1 = vadd.f32 %v4913_v7, %v2866_v19  ;;  %v5897_v45 = vmul.f32 %v5889_v60, %v2866_v19 }
0x23d3   : > { %v2872_v63 = vsel %vm380_vm0, %v5894_v1, 0.0 }
0x23d4   : > { %2873 = vadd.xlane.f32.xlu1 %v2872_v63 }
0x2459   : > { %v2871_v9 = vpop.xlane.xlu0 %2870 }
0x245a   : > { %v2875_v20 = vmul.f32 0.03125, %v2871_v9 }
0x245c   : > { %v2877_v33 = vsub.f32 %v5876_v23, %v2875_v20 }
0x245d   : > { %v2874_v15 = vpop.xlane.xlu1 %2873 }
0x245e   : > { %v2876_v61 = vmul.f32 0.03125, %v2874_v15  ;;  %v2879_v12 = vmul.f32 %v2877_v33, %v2877_v33 }
0x2460   : > { %v2878_v27 = vsub.f32 %v5894_v1, %v2876_v61  ;;  %v2881_v40 = vsel %vm380_vm0, %v2879_v12, 0.0 }
0x2461   : > { %2882 = vadd.xlane.f32.xlu0 %v2881_v40 }
0x2462   : > { %v2880_v25 = vmul.f32 %v2878_v27, %v2878_v27 }
0x2464   : > { %v2884_v8 = vsel %vm380_vm0, %v2880_v25, 0.0 }
0x2465   : > { %2885 = vadd.xlane.f32.xlu0 %v2884_v8 }
0x24ea   : > { %v2883_v58 = vpop.xlane.xlu0 %2882 }
0x24eb   : > { %v2887_v10 = vmul.f32 0.03125, %v2883_v58 }
0x24ed   : > { %v2889_v22 = vadd.f32 1e-05, %v2887_v10 }
0x24ee   : > { %v2886_v6 = vpop.xlane.xlu0 %2885 }
0x24ef   : > { %4848 = vrsqrt.f32 %v2889_v22  ;;  %v2888_v44 = vmul.f32 0.03125, %v2886_v6 }
0x24f1   : > { %v2890_v24 = vadd.f32 1e-05, %v2888_v44 }
0x24f3   : > { %4850 = vrsqrt.f32 %v2890_v24 }
0x24fc   : > { %v4849_v2 = vpop.eup %4848 }
0x24fd   : > { %v2893_v19 = vmul.f32 %v4849_v2, %v2877_v33 }
0x24ff   : > { %v2895_v42 = vmul.f32 %v2893_v19, %v5053_v32 }
0x2500   : > { %v4851_v7 = vpop.eup %4850 }
0x2501   : > { %v2894_v63 = vmul.f32 %v4851_v7, %v2878_v27  ;;  %v2897_v9 = vadd.f32 %v2895_v42, %v5057_v35 }
0x2503   : > { %v2896_v20 = vmul.f32 %v2894_v63, %v5053_v32  ;;  %v2899_v61 = vrot.slane %v2897_v9, 6  ;;  %v2909_v40 = vrot.slane %v2897_v9, 7  ;;  %v2923_v58 = vrot.slane %v2897_v9, 1 }
0x2504   : > { %v2933_v7 = vrot.slane %v2897_v9, 2 }
0x2505   : > { %v2898_v15 = vadd.f32 %v2896_v20, %v5057_v35 }
0x2507   : > { %v2900_v12 = vrot.slane %v2898_v15, 6  ;;  %v2910_v25 = vrot.slane %v2898_v15, 7  ;;  %v2924_v8 = vrot.slane %v2898_v15, 1  ;;  %v2934_v10 = vrot.slane %v2898_v15, 2 }
0x2508   : > { %v2920_v20 = vmul.f32 %v2898_v15, %v5079_v46 }
0x2509   : > { %v2901_v33 = vsel %vm422_vm2, %v2899_v61, %v2900_v12  ;;  %v2902_v22 = vsel %vm422_vm2, %v2900_v12, %v2899_v61  ;;  %v2911_v27 = vsel %vm443_vm3, %v2909_v40, %v2910_v25  ;;  %v2912_v32 = vsel %vm443_vm3, %v2910_v25, %v2909_v40 }
0x250a   : > { %v2903_v35 = vsel %vm425_vm4, %v2902_v22, 0.0  ;;  %v2906_v6 = vmul.f32 %v2901_v33, %v5084_v47  ;;  %v2913_v44 = vsel %vm446_vm5, %v2912_v32, 0.0  ;;  %v2916_v24 = vmul.f32 %v2911_v27, %v5089_v48 }
0x250b   : > { %v2905_v2 = vmul.f32 %v2903_v35, %v5084_v47  ;;  %v2915_v19 = vmul.f32 %v2913_v44, %v5089_v48  ;;  %v2926_v42 = vsel %vm472_vm6, %v2924_v8, %v2923_v58  ;;  %v2925_v61 = vsel %vm472_vm6, %v2923_v58, %v2924_v8 }
0x250c   : > { %v2918_v63 = vadd.f32 %v2916_v24, %v2906_v6  ;;  %v2928_v12 = vsel %vm476_vm7, %v2926_v42, 0.0  ;;  %v2919_v25 = vmul.f32 %v2897_v9, %v5079_v46  ;;  %v2936_v47 = vsel %vm493_vm8, %v2934_v10, %v2933_v7 }
0x250d   : > { %v2917_v40 = vadd.f32 %v2915_v19, %v2905_v2  ;;  %v2930_v33 = vmul.f32 %v2928_v12, %v5103_v52  ;;  %v2935_v22 = vsel %vm493_vm8, %v2933_v7, %v2934_v10  ;;  %v2938_v15 = vsel %vm497_vm9, %v2936_v47, 0.0  ;;  %v4914_v10 = vld [vmem:[%s6235_s5 + $0x8] sm:$0xff]  }
0x250e   : > { %v2922_v48 = vadd.f32 %v2920_v20, %v2918_v63  ;;  %v2929_v8 = vmul.f32 %v2925_v61, %v5103_v52  ;;  %v2940_v32 = vmul.f32 %v2938_v15, %v5109_v59  ;;  %v2939_v46 = vmul.f32 %v2935_v22, %v5109_v59  ;;  %v4915_v52 = vld [vmem:[%s6235_s5] sm:$0xff]  }
0x250f   : > { %v2921_v27 = vadd.f32 %v2919_v25, %v2917_v40 }
0x2510   : > { %v2932_v58 = vadd.f32 %v2930_v33, %v2922_v48 }
0x2511   : > { %v2931_v35 = vadd.f32 %v2929_v8, %v2921_v27 }
0x2512   : > { %v2942_v9 = vadd.f32 %v2940_v32, %v2932_v58 }
0x2513   : > { %v2941_v6 = vadd.f32 %v2939_v46, %v2931_v35 }
0x2515   : > { %v2943_v44 = vpack.c.bf16 %v2942_v9, %v2941_v6 }
0x2517   : > { %4612 = vmatmul.mubr.msk.bf16.vlgmr.msra.gmra.mxu0 %vm380_vm0, %v2943_v44 }
0x2518   : > { %4624 = vmatpush3.bf16.msra.mxu0 %v4914_v10  ;;  %4627 = vmatprep.mubr.msk.bf16.mxu0 %vm4930_vm1, %v6243_v0 }
0x2519   : > { %4625 = vmatprep.subr.bf16.mxu0 %v6243_v0 }
0x251c   : > { %4626 = vmatpush3.bf16.msra.mxu0 %v4915_v52 }
0x251d   : > { %4637 = vmatprep.subr.bf16.mxu0 %v6243_v0 }
0x25d7   : > { %v2981_v59 = vpop.f32.mrf.mxu0 }
0x25d8   : > { %v2982_v24 = vadd.f32 %v2981_v59, %v5150_v38 }
0x25d9   : > { %v4613_v2 = vpop.f32.mrf.mxu0 }
0x25da   : > { %v2988_v19 = vmax.f32 %v2982_v24, 0.0 }
0x25db   : > { %v2984_v42 = vpop.f32.mrf.mxu0 }
0x25dc   : > { %v5956_v7 = vadd.f32 %v2988_v19, %v5876_v23  ;;  %v2985_v63 = vadd.f32 %v2984_v42, %v5150_v38 }
0x25dd   : > { %v4614_v20 = vpop.f32.mrf.mxu0 }
0x25de   : > { %v2989_v61 = vmax.f32 %v2985_v63, 0.0  ;;  %v2992_v12 = vsel %vm380_vm0, %v5956_v7, 0.0 }
0x25df   : > { %2993 = vadd.xlane.f32.xlu0 %v2992_v12 }
0x25e0   : > { %v5962_v40 = vadd.f32 %v2989_v61, %v5894_v1 }
0x25e2   : > { %v2995_v25 = vsel %vm380_vm0, %v5962_v40, 0.0 }
0x25e3   : > { %2996 = vadd.xlane.f32.xlu0 %v2995_v25 }
0x2668   : > { %v2994_v47 = vpop.xlane.xlu0 %2993 }
0x2669   : > { %v2998_v48 = vmul.f32 0.03125, %v2994_v47 }
0x266b   : > { %v3000_v23 = vsub.f32 %v5956_v7, %v2998_v48 }
0x266c   : > { %v2997_v33 = vpop.xlane.xlu0 %2996 }
0x266d   : > { %v2999_v22 = vmul.f32 0.03125, %v2997_v33  ;;  %v3002_v38 = vmul.f32 %v3000_v23, %v3000_v23 }
0x266f   : > { %v3001_v15 = vsub.f32 %v5962_v40, %v2999_v22  ;;  %v3004_v27 = vsel %vm380_vm0, %v3002_v38, 0.0 }
0x2670   : > { %3005 = vadd.xlane.f32.xlu0 %v3004_v27 }
0x2671   : > { %v3003_v8 = vmul.f32 %v3001_v15, %v3001_v15 }
0x2673   : > { %v3007_v1 = vsel %vm380_vm0, %v3003_v8, 0.0 }
0x2674   : > { %3008 = vadd.xlane.f32.xlu0 %v3007_v1 }
0x26f9   : > { %v3006_v58 = vpop.xlane.xlu0 %3005 }
0x26fa   : > { %v3010_v32 = vmul.f32 0.03125, %v3006_v58 }
0x26fc   : > { %v3012_v35 = vadd.f32 1e-05, %v3010_v32 }
0x26fd   : > { %v3009_v46 = vpop.xlane.xlu0 %3008 }
0x26fe   : > { %4852 = vrsqrt.f32 %v3012_v35  ;;  %v3011_v9 = vmul.f32 0.03125, %v3009_v46 }
0x2700   : > { %v3013_v6 = vadd.f32 1e-05, %v3011_v9 }
0x2702   : > { %4854 = vrsqrt.f32 %v3013_v6 }
0x270b   : > { %v4853_v44 = vpop.eup %4852 }
0x270c   : > { %v3016_v10 = vmul.f32 %v4853_v44, %v3000_v23 }
0x270e   : > { %v3018_v52 = vmul.f32 %v3016_v10, %v5190_v17 }
0x270f   : > { %v4855_v59 = vpop.eup %4854 }
0x2710   : > { %v3017_v24 = vmul.f32 %v4855_v59, %v3001_v15  ;;  %v3020_v2 = vadd.f32 %v3018_v52, %v5194_v21 }
0x2712   : > { %v3019_v19 = vmul.f32 %v3017_v24, %v5190_v17  ;;  %v3022_v63 = vrot.slane %v3020_v2, 6  ;;  %v3032_v61 = vrot.slane %v3020_v2, 7  ;;  %v3046_v47 = vrot.slane %v3020_v2, 1 }
0x2713   : > { %v3056_v32 = vrot.slane %v3020_v2, 2  ;;  %v3042_v10 = vmul.f32 %v3020_v2, %v5210_v30 }
0x2714   : > { %v3021_v42 = vadd.f32 %v3019_v19, %v5194_v21 }
0x2716   : > { %v3023_v20 = vrot.slane %v3021_v42, 6  ;;  %v3033_v12 = vrot.slane %v3021_v42, 7  ;;  %v3047_v25 = vrot.slane %v3021_v42, 1  ;;  %v3057_v48 = vrot.slane %v3021_v42, 2 }
0x2717   : > { %v3043_v46 = vmul.f32 %v3021_v42, %v5210_v30 }
0x2718   : > { %v3024_v23 = vsel %vm422_vm2, %v3022_v63, %v3023_v20  ;;  %v3025_v33 = vsel %vm422_vm2, %v3023_v20, %v3022_v63  ;;  %v3034_v22 = vsel %vm443_vm3, %v3032_v61, %v3033_v12  ;;  %v3035_v17 = vsel %vm443_vm3, %v3033_v12, %v3032_v61 }
0x2719   : > { %v3026_v21 = vsel %vm425_vm4, %v3025_v33, 0.0  ;;  %v3029_v38 = vmul.f32 %v3024_v23, %v5202_v34  ;;  %v3036_v15 = vsel %vm446_vm5, %v3035_v17, 0.0  ;;  %v3039_v27 = vmul.f32 %v3034_v22, %v5206_v36 }
0x271a   : > { %v3028_v8 = vmul.f32 %v3026_v21, %v5202_v34  ;;  %v3038_v1 = vmul.f32 %v3036_v15, %v5206_v36  ;;  %v3049_v58 = vsel %vm472_vm6, %v3047_v25, %v3046_v47  ;;  %v3048_v9 = vsel %vm472_vm6, %v3046_v47, %v3047_v25 }
0x271b   : > { %v3041_v35 = vadd.f32 %v3039_v27, %v3029_v38  ;;  %v3051_v6 = vsel %vm476_vm7, %v3049_v58, 0.0  ;;  %v3059_v34 = vsel %vm493_vm8, %v3057_v48, %v3056_v32  ;;  %v3058_v59 = vsel %vm493_vm8, %v3056_v32, %v3057_v48 }
0x271c   : > { %v3040_v44 = vadd.f32 %v3038_v1, %v3028_v8  ;;  %v3053_v52 = vmul.f32 %v3051_v6, %v5214_v54  ;;  %v3061_v24 = vsel %vm497_vm9, %v3059_v34, 0.0  ;;  %v3052_v42 = vmul.f32 %v3048_v9, %v5214_v54 }
0x271d   : > { %v3045_v36 = vadd.f32 %v3043_v46, %v3041_v35  ;;  %v3063_v20 = vmul.f32 %v3061_v24, %v5218_v56  ;;  %v3062_v30 = vmul.f32 %v3058_v59, %v5218_v56 }
0x271e   : > { %v3044_v19 = vadd.f32 %v3042_v10, %v3040_v44 }
0x271f   : > { %v3055_v63 = vadd.f32 %v3053_v52, %v3045_v36 }
0x2720   : > { %v3054_v61 = vadd.f32 %v3052_v42, %v3044_v19 }
0x2721   : > { %v3065_v2 = vadd.f32 %v3063_v20, %v3055_v63 }
0x2722   : > { %v3064_v12 = vadd.f32 %v3062_v30, %v3054_v61 }
0x2724   : > { %v3066_v25 = vpack.c.bf16 %v3065_v2, %v3064_v12 }
0x2726   : > { %4620 = vmatmul.mubr.msk.bf16.vlgmr.msra.gmra.mxu1 %vm380_vm0, %v3066_v25 }
0x2727   : > { %4633 = vmatprep.mubr.msk.bf16.mxu1 %vm4930_vm1, %v6243_v0 }
0x27e6   : > { %v3104_v28 = vpop.f32.mrf.mxu1 }
0x27e7   : > { %v3105_v43 = vadd.f32 %v3104_v28, %v5259_v55 }
0x27e8   : > { %v4621_v47 = vpop.f32.mrf.mxu1 }
0x27e9   : > { %v3111_v48 = vmax.f32 %v3105_v43, 0.0 }
0x27ea   : > { %v3107_v54 = vpop.f32.mrf.mxu1 }
0x27eb   : > { %v6013_v23 = vadd.f32 %v3111_v48, %v5956_v7  ;;  %v3108_v33 = vadd.f32 %v3107_v54, %v5259_v55 }
0x27ec   : > { %v4622_v56 = vpop.f32.mrf.mxu1 }
0x27ed   : > { %v3112_v22 = vmax.f32 %v3108_v33, 0.0  ;;  %v3115_v17 = vsel %vm380_vm0, %v6013_v23, 0.0 }
0x27ee   : > { %3116 = vadd.xlane.f32.xlu0 %v3115_v17 }
0x27ef   : > { %v6019_v21 = vadd.f32 %v3112_v22, %v5962_v40 }
0x27f1   : > { %v3118_v38 = vsel %vm380_vm0, %v6019_v21, 0.0 }
0x27f2   : > { %3119 = vadd.xlane.f32.xlu0 %v3118_v38 }
0x2877   : > { %v3117_v15 = vpop.xlane.xlu0 %3116 }
0x2878   : > { %v3121_v27 = vmul.f32 0.03125, %v3117_v15 }
0x287a   : > { %v3123_v7 = vsub.f32 %v6013_v23, %v3121_v27 }
0x287b   : > { %v3120_v8 = vpop.xlane.xlu0 %3119 }
0x287c   : > { %v3122_v1 = vmul.f32 0.03125, %v3120_v8  ;;  %v3125_v55 = vmul.f32 %v3123_v7, %v3123_v7 }
0x287e   : > { %v3124_v58 = vsub.f32 %v6019_v21, %v3122_v1  ;;  %v3127_v32 = vsel %vm380_vm0, %v3125_v55, 0.0 }
0x287f   : > { %3128 = vadd.xlane.f32.xlu0 %v3127_v32 }
0x2880   : > { %v3126_v35 = vmul.f32 %v3124_v58, %v3124_v58 }
0x2882   : > { %v3130_v40 = vsel %vm380_vm0, %v3126_v35, 0.0 }
0x2883   : > { %3131 = vadd.xlane.f32.xlu1 %v3130_v40 }
0x2908   : > { %v3129_v46 = vpop.xlane.xlu0 %3128 }
0x2909   : > { %v3133_v9 = vmul.f32 0.03125, %v3129_v46 }
0x290b   : > { %v3135_v6 = vadd.f32 1e-05, %v3133_v9 }
0x290c   : > { %v3132_v44 = vpop.xlane.xlu1 %3131 }
0x290d   : > { %4856 = vrsqrt.f32 %v3135_v6  ;;  %v3134_v10 = vmul.f32 0.03125, %v3132_v44 }
0x290f   : > { %v3136_v34 = vadd.f32 1e-05, %v3134_v10 }
0x2911   : > { %4858 = vrsqrt.f32 %v3136_v34 }
0x291a   : > { %v4857_v36 = vpop.eup %4856 }
0x291b   : > { %v3139_v52 = vmul.f32 %v4857_v36, %v3123_v7 }
0x291d   : > { %v3141_v19 = vmul.f32 %v3139_v52, %v5301_v57 }
0x291e   : > { %v4859_v59 = vpop.eup %4858 }
0x291f   : > { %v3140_v24 = vmul.f32 %v4859_v59, %v3124_v58  ;;  %v3143_v63 = vadd.f32 %v3141_v19, %v5306_v4 }
0x2921   : > { %v3142_v42 = vmul.f32 %v3140_v24, %v5301_v57 }
0x2923   : > { %v3144_v20 = vadd.f32 %v3142_v42, %v5306_v4 }
0x2925   : > { %v3145_v61 = vpack.c.bf16 %v3144_v20, %v3143_v63 }
0x2927   : > { %4628 = vmatmul.mubr.msk.bf16.vlgmr.msra.gmra.mxu0 %vm380_vm0, %v3145_v61 }
0x2928   : > { %4639 = vmatprep.mubr.msk.bf16.mxu0 %vm4930_vm1, %v6243_v0 }
0x29e7   : > { %v3183_v30 = vpop.f32.mrf.mxu0 }
0x29e8   : > { %v3184_v25 = vadd.f32 %v3183_v30, %v5317_v11 }
0x29e9   : > { %v4629_v2 = vpop.f32.mrf.mxu0 }
0x29eb   : > { %v3186_v12 = vpop.f32.mrf.mxu0 }
0x29ec   : > { %v3187_v28 = vadd.f32 %v3186_v12, %v5317_v11 }
0x29ed   : > { %v4630_v43 = vpop.f32.mrf.mxu0 }
0x29ee   : > { %v6036_v47 = vpack.c.bf16 %v3187_v28, %v3184_v25 }
0x29f0   : > { %3318 = vrot.lane.b32.xlu1 %v6036_v47, %s4935_s18  ;;  %3192 = vrot.lane.b32.xlu0 %v6036_v47, %s4934_s17 }
0x29f4   : > { %3316 = vrot.lane.b32.xlu1 %v6036_v47, %s4933_s16 }
0x2a62   : > { %v3193_v57 = vpop.permute.xlu0 %3192  ;;  %v3319_v48 = vpop.permute.xlu1 %3318 }
0x2a63   : > { %v3198_v4 = vsel %vm859_vm11, %v3193_v57, 0  ;;  %v3324_v11 = vsel %vm859_vm11, %v3319_v48, 0 }
0x2a64   : > { %4632 = vmatpush3.bf16.xpose.msra.mxu1 %v3198_v4 }
0x2a65   : > { %4643 = vmatprep.subr.bf16.mxu1 %v6243_v0 }
0x2a66   : > { %v3317_v54 = vpop.permute.xlu1 %3316 }
0x2a6b   : > { %4634 = vmatmul.mubr.msk.bf16.vlgmr.msra.gmra.mxu1 %vm859_vm11, %v6036_v47 }
0x2a6c   : > { %4644 = vmatpush3.bf16.xpose.msra.mxu1 %v3324_v11  ;;  %4645 = vmatprep.mubr.msk.bf16.mxu1 %vm4930_vm1, %v6243_v0 }
0x2a6d   : > { %4655 = vmatprep.subr.bf16.mxu1 %v6243_v0 }
0x2a73   : > { %4646 = vmatmul.mubr.msk.bf16.vlgmr.msra.gmra.mxu1 %vm859_vm11, %v3317_v54 }
0x2a74   : > { %4656 = vmatpush3.bf16.msra.mxu1 %v5387_v53  ;;  %4657 = vmatprep.mubr.msk.bf16.mxu1 %vm4930_vm1, %v6243_v0 }
0x2a75   : > { %4667 = vmatprep.subr.bf16.mxu1 %v6243_v0 }
0x2b2b   : > { %v3234_v33 = vpop.f32.mrf.mxu1 }
0x2b2c   : > { %v3241_v56 = vmul.f32 0.35355338, %v3234_v33 }
0x2b2d   : > { %v4635_v22 = vpop.f32.mrf.mxu1 }
0x2b2e   : > { %v3243_v17 = vsub.f32 %v3241_v56, %v5345_v49 }
0x2b2f   : > { %v3237_v38 = vpop.f32.mrf.mxu1 }
0x2b30   : > { %v3242_v15 = vmul.f32 0.35355338, %v3237_v38  ;;  %v3245_v27 = vsel %vm917_vm12, %v3243_v17, -inf }
0x2b31   : > { %3246 = vmax.xlane.f32.xlu1 %v3245_v27  ;;  %v4636_v7 = vpop.f32.mrf.mxu1 }
0x2b32   : > { %v3244_v8 = vsub.f32 %v3242_v15, %v5345_v49 }
0x2b33   : > { %v3360_v1 = vpop.f32.mrf.mxu1 }
0x2b34   : > { %v3367_v53 = vmul.f32 0.35355338, %v3360_v1  ;;  %v3248_v55 = vsel %vm917_vm12, %v3244_v8, -inf }
0x2b35   : > { %3249 = vmax.xlane.f32.xlu0 %v3248_v55  ;;  %v4647_v58 = vpop.f32.mrf.mxu1 }
0x2b36   : > { %v3369_v32 = vsub.f32 %v3367_v53, %v5345_v49 }
0x2b37   : > { %v3363_v35 = vpop.f32.mrf.mxu1 }
0x2b38   : > { %v3368_v40 = vmul.f32 0.35355338, %v3363_v35  ;;  %v3371_v46 = vsel %vm917_vm12, %v3369_v32, -inf }
0x2b39   : > { %3372 = vmax.xlane.f32.xlu0 %v3371_v46  ;;  %v4648_v9 = vpop.f32.mrf.mxu1 }
0x2b3a   : > { %v3370_v6 = vsub.f32 %v3368_v40, %v5345_v49 }
0x2b3c   : > { %v3374_v44 = vsel %vm917_vm12, %v3370_v6, -inf }
0x2b3d   : > { %3375 = vmax.xlane.f32.xlu0 %v3374_v44 }
0x2bba   : > { %v3247_v10 = vpop.xlane.xlu1 %3246 }
0x2bbb   : > { %v3251_v34 = vsub.f32 %v3243_v17, %v3247_v10 }
0x2bbd   : > { %v3253_v36 = vmul.f32 1.442695, %v3251_v34 }
0x2bbe   : > { %v3250_v52 = vpop.xlane.xlu0 %3249 }
0x2bbf   : > { %4860 = vpow2.f32 %v3253_v36  ;;  %v3252_v59 = vsub.f32 %v3244_v8, %v3250_v52 }
0x2bc1   : > { %v3255_v24 = vmul.f32 1.442695, %v3252_v59 }
0x2bc2   : > { %v3373_v19 = vpop.xlane.xlu0 %3372 }
0x2bc3   : > { %4862 = vpow2.f32 %v3255_v24  ;;  %v3377_v42 = vsub.f32 %v3369_v32, %v3373_v19 }
0x2bc5   : > { %v3379_v63 = vmul.f32 1.442695, %v3377_v42 }
0x2bc6   : > { %v3376_v20 = vpop.xlane.xlu0 %3375 }
0x2bc7   : > { %4864 = vpow2.f32 %v3379_v63  ;;  %v3378_v61 = vsub.f32 %v3370_v6, %v3376_v20 }
0x2bc9   : > { %v3381_v30 = vmul.f32 1.442695, %v3378_v61 }
0x2bcb   : > { %4866 = vpow2.f32 %v3381_v30 }
0x2bcc   : > { %v4861_v2 = vpop.eup %4860 }
0x2bcd   : > { %v3257_v12 = vsel %vm917_vm12, %v4861_v2, 0.0 }
0x2bce   : > { %3258 = vadd.xlane.f32.xlu1 %v3257_v12 }
0x2bd0   : > { %v4863_v25 = vpop.eup %4862 }
0x2bd1   : > { %v3260_v28 = vsel %vm917_vm12, %v4863_v25, 0.0 }
0x2bd2   : > { %3261 = vadd.xlane.f32.xlu0 %v3260_v28 }
0x2bd4   : > { %v4865_v43 = vpop.eup %4864 }
0x2bd5   : > { %v3383_v57 = vsel %vm917_vm12, %v4865_v43, 0.0 }
0x2bd6   : > { %3384 = vadd.xlane.f32.xlu1 %v3383_v57 }
0x2bd8   : > { %v4867_v4 = vpop.eup %4866 }
0x2bd9   : > { %v3386_v48 = vsel %vm917_vm12, %v4867_v4, 0.0 }
0x2bda   : > { %3387 = vadd.xlane.f32.xlu0 %v3386_v48 }
0x2be7   : > { %3268 = vrot.lane.b32.xlu1 %v6036_v47, %s4932_s15 }
0x2beb   : > { %3532 = vrot.lane.b32.xlu1 %v6036_v47, %s4936_s28 }
0x2bef   : > { %3530 = vrot.lane.b32.xlu1 %v6036_v47, %s4937_s22 }
0x2bf0   : > { %3394 = vrot.lane.b32.xlu0 %v6036_v47, %s4938_s23 }
0x2c57   : > { %v3259_v11 = vpop.xlane.xlu1 %3258 }
0x2c58   : > { %4868 = vrcp.f32 %v3259_v11 }
0x2c5b   : > { %v3262_v54 = vpop.xlane.xlu0 %3261 }
0x2c5c   : > { %4870 = vrcp.f32 %v3262_v54 }
0x2c5f   : > { %v3385_v33 = vpop.xlane.xlu1 %3384 }
0x2c60   : > { %4872 = vrcp.f32 %v3385_v33 }
0x2c63   : > { %v3269_v56 = vpop.permute.xlu1 %3268  ;;  %v3388_v22 = vpop.xlane.xlu0 %3387 }
0x2c64   : > { %4874 = vrcp.f32 %v3388_v22  ;;  %4638 = vmatpush3.bf16.msra.mxu0 %v3269_v56 }
0x2c65   : > { %4649 = vmatprep.subr.bf16.mxu0 %v6243_v0  ;;  %v4869_v17 = vpop.eup %4868 }
0x2c66   : > { %v3265_v15 = vmul.f32 %v4869_v17, %v4861_v2 }
0x2c67   : > { %v3395_v8 = vpop.permute.xlu0 %3394  ;;  %v3533_v34 = vpop.permute.xlu1 %3532 }
0x2c68   : > { %v3538_v59 = vsel %vm859_vm11, %v3533_v34, 0 }
0x2c69   : > { %v4871_v38 = vpop.eup %4870 }
0x2c6a   : > { %v3266_v27 = vmul.f32 %v4871_v38, %v4863_v25 }
0x2c6b   : > { %v3531_v24 = vpop.permute.xlu1 %3530 }
0x2c6c   : > { %v3267_v7 = vpack.c.bf16 %v3266_v27, %v3265_v15 }
0x2c6d   : > { %v4873_v1 = vpop.eup %4872 }
0x2c6e   : > { %4640 = vmatmul.mubr.msk.bf16.vlgmr.msra.gmra.mxu0 %vm917_vm12, %v3267_v7  ;;  %v3391_v55 = vmul.f32 %v4873_v1, %v4865_v43 }
0x2c6f   : > { %4650 = vmatpush3.bf16.msra.mxu0 %v3395_v8  ;;  %4651 = vmatprep.mubr.msk.bf16.mxu0 %vm4930_vm1, %v6243_v0 }
0x2c70   : > { %4661 = vmatprep.subr.bf16.mxu0 %v6243_v0 }
0x2c71   : > { %v4875_v53 = vpop.eup %4874 }
0x2c72   : > { %v3392_v58 = vmul.f32 %v4875_v53, %v4867_v4 }
0x2c74   : > { %v3393_v32 = vpack.c.bf16 %v3392_v58, %v3391_v55 }
0x2c76   : > { %4652 = vmatmul.mubr.msk.bf16.vlgmr.msra.gmra.mxu0 %vm917_vm12, %v3393_v32 }
0x2c77   : > { %4662 = vmatpush3.bf16.msra.mxu0 %v5379_v5  ;;  %4663 = vmatprep.mubr.msk.bf16.mxu0 %vm4930_vm1, %v6243_v0 }
0x2c78   : > { %4673 = vmatprep.subr.bf16.mxu0 %v6243_v0 }
0x2d2e   : > { %v3308_v35 = vpop.f32.mrf.mxu0 }
0x2d30   : > { %v4641_v40 = vpop.f32.mrf.mxu0 }
0x2d32   : > { %v3311_v46 = vpop.f32.mrf.mxu0 }
0x2d33   : > { %v3315_v9 = vpack.c.bf16 %v3311_v46, %v3308_v35 }
0x2d34   : > { %v4642_v6 = vpop.f32.mrf.mxu0 }
0x2d35   : > { %4664 = vmatmul.mubr.msk.bf16.vlgmr.msra.gmra.mxu0 %vm859_vm11, %v3315_v9 }
0x2d36   : > { %v3434_v44 = vpop.f32.mrf.mxu0  ;;  %4675 = vmatprep.mubr.msk.bf16.mxu0 %vm4930_vm1, %v6243_v0 }
0x2d38   : > { %v4653_v10 = vpop.f32.mrf.mxu0 }
0x2d3a   : > { %v3437_v36 = vpop.f32.mrf.mxu0 }
0x2d3b   : > { %v3441_v5 = vpack.c.bf16 %v3437_v36, %v3434_v44 }
0x2d3c   : > { %v4654_v52 = vpop.f32.mrf.mxu0 }
0x2d3d   : > { %4658 = vmatmul.mubr.msk.bf16.vlgmr.msra.gmra.mxu1 %vm859_vm11, %v3441_v5 }
0x2d3e   : > { %4668 = vmatpush3.bf16.xpose.msra.mxu1 %v3538_v59  ;;  %4669 = vmatprep.mubr.msk.bf16.mxu1 %vm4930_vm1, %v6243_v0 }
0x2d3f   : > { %4679 = vmatprep.subr.bf16.mxu1 %v6243_v0 }
0x2d45   : > { %4670 = vmatmul.mubr.msk.bf16.vlgmr.msra.gmra.mxu1 %vm859_vm11, %v3531_v24 }
0x2d46   : > { %4680 = vmatpush3.bf16.msra.mxu1 %v5431_v41  ;;  %4681 = vmatprep.mubr.msk.bf16.mxu1 %vm4930_vm1, %v6243_v0 }
0x2d47   : > { %4691 = vmatprep.subr.bf16.mxu1 %v6243_v0 }
0x2df5   : > { %v3523_v19 = vpop.f32.mrf.mxu0 }
0x2df7   : > { %v4665_v42 = vpop.f32.mrf.mxu0 }
0x2df9   : > { %v3526_v63 = vpop.f32.mrf.mxu0 }
0x2dfb   : > { %v4666_v20 = vpop.f32.mrf.mxu0 }
0x2dfd   : > { %v3479_v61 = vpop.f32.mrf.mxu1 }
0x2dfe   : > { %v6100_v30 = vadd.f32 %v3523_v19, %v3479_v61 }
0x2dff   : > { %v4659_v2 = vpop.f32.mrf.mxu1 }
0x2e01   : > { %v3482_v12 = vpop.f32.mrf.mxu1 }
0x2e02   : > { %v6102_v25 = vadd.f32 %v3526_v63, %v3482_v12 }
0x2e03   : > { %v4660_v28 = vpop.f32.mrf.mxu1 }
0x2e05   : > { %v3574_v43 = vpop.f32.mrf.mxu1 }
0x2e06   : > { %v3581_v57 = vmul.f32 0.35355338, %v3574_v43 }
0x2e07   : > { %v4671_v41 = vpop.f32.mrf.mxu1 }
0x2e08   : > { %v3583_v4 = vsub.f32 %v3581_v57, %v5345_v49 }
0x2e09   : > { %v3577_v48 = vpop.f32.mrf.mxu1 }
0x2e0a   : > { %v3582_v11 = vmul.f32 0.35355338, %v3577_v48  ;;  %v3585_v54 = vsel %vm917_vm12, %v3583_v4, -inf }
0x2e0b   : > { %3586 = vmax.xlane.f32.xlu1 %v3585_v54  ;;  %v4672_v33 = vpop.f32.mrf.mxu1 }
0x2e0c   : > { %v3584_v56 = vsub.f32 %v3582_v11, %v5345_v49 }
0x2e0e   : > { %v3588_v22 = vsel %vm917_vm12, %v3584_v56, -inf }
0x2e0f   : > { %3589 = vmax.xlane.f32.xlu0 %v3588_v22 }
0x2e1c   : > { %3608 = vrot.lane.b32.xlu1 %v6036_v47, %s4939_s30 }
0x2e20   : > { %3702 = vrot.lane.b32.xlu1 %v6036_v47, %s4940_s10 }
0x2e94   : > { %v3587_v17 = vpop.xlane.xlu1 %3586 }
0x2e95   : > { %v3591_v38 = vsub.f32 %v3583_v4, %v3587_v17 }
0x2e97   : > { %v3593_v15 = vmul.f32 1.442695, %v3591_v38 }
0x2e98   : > { %v3609_v27 = vpop.permute.xlu1 %3608  ;;  %v3590_v7 = vpop.xlane.xlu0 %3589 }
0x2e99   : > { %4876 = vpow2.f32 %v3593_v15  ;;  %v3592_v8 = vsub.f32 %v3584_v56, %v3590_v7  ;;  %4674 = vmatpush3.bf16.msra.mxu0 %v3609_v27 }
0x2e9a   : > { %4685 = vmatprep.subr.bf16.mxu0 %v6243_v0 }
0x2e9b   : > { %v3595_v1 = vmul.f32 1.442695, %v3592_v8 }
0x2e9c   : > { %v3703_v5 = vpop.permute.xlu1 %3702 }
0x2e9d   : > { %4878 = vpow2.f32 %v3595_v1 }
0x2ea6   : > { %v4877_v53 = vpop.eup %4876 }
0x2ea7   : > { %v3597_v55 = vsel %vm917_vm12, %v4877_v53, 0.0 }
0x2ea8   : > { %3598 = vadd.xlane.f32.xlu0 %v3597_v55  ;;  %v4023_v55 = vmul.f32 %v5889_v60, %v5870_v13  ;;  %v4916_v13 = vld [vmem:[%s6236_s6 + $0x38] sm:$0xff]   ;;  %v4917_v60 = vld [vmem:[%s6236_s6 + $0x30] sm:$0xff]  }
0x2eaa   : > { %v4879_v58 = vpop.eup %4878 }
0x2eab   : > { %v3600_v32 = vsel %vm917_vm12, %v4879_v58, 0.0 }
0x2eac   : > { %3601 = vadd.xlane.f32.xlu0 %v3600_v32 }
0x2ec2   : > { %3704 = vrot.lane.b32.xlu0 %v6036_v47, %s4941_s11 }
0x2f31   : > { %v3599_v35 = vpop.xlane.xlu0 %3598 }
0x2f32   : > { %4880 = vrcp.f32 %v3599_v35 }
0x2f35   : > { %v3602_v40 = vpop.xlane.xlu0 %3601 }
0x2f36   : > { %4882 = vrcp.f32 %v3602_v40 }
0x2f39   : > { %v3705_v10 = vpop.permute.xlu0 %3704 }
0x2f3a   : > { %v3710_v36 = vsel %vm859_vm11, %v3705_v10, 0 }
0x2f3f   : > { %v4881_v46 = vpop.eup %4880 }
0x2f40   : > { %v3605_v6 = vmul.f32 %v4881_v46, %v4877_v53 }
0x2f43   : > { %v4883_v9 = vpop.eup %4882 }
0x2f44   : > { %v3606_v44 = vmul.f32 %v4883_v9, %v4879_v58  ;;  %v4025_v58 = vsel %vm380_vm0, %v4023_v55, 0.0 }
0x2f46   : > { %v3607_v34 = vpack.c.bf16 %v3606_v44, %v3605_v6 }
0x2f48   : > { %4676 = vmatmul.mubr.msk.bf16.vlgmr.msra.gmra.mxu0 %vm917_vm12, %v3607_v34 }
0x2f49   : > { %4686 = vmatpush3.bf16.xpose.msra.mxu0 %v3710_v36  ;;  %4687 = vmatprep.mubr.msk.bf16.mxu0 %vm4930_vm1, %v6243_v0 }
0x2f4a   : > { %4697 = vmatprep.subr.bf16.mxu0 %v6243_v0 }
0x2f50   : > { %4688 = vmatmul.mubr.msk.bf16.vlgmr.msra.gmra.mxu0 %vm859_vm11, %v3703_v5  ;;  %v4918_v5 = vld [vmem:[%s6236_s6 + $0x48] sm:$0xff]  }
0x2f51   : > { %4698 = vmatpush3.bf16.msra.mxu0 %v5456_v3  ;;  %4699 = vmatprep.mubr.msk.bf16.mxu0 %vm4930_vm1, %v6243_v0 }
0x2f52   : > { %4711 = vmatprep.subr.bf16.mxu0 %v6243_v0 }
0x3008   : > { %v3648_v52 = vpop.f32.mrf.mxu0 }
0x300a   : > { %v4677_v59 = vpop.f32.mrf.mxu0 }
0x300c   : > { %v3651_v24 = vpop.f32.mrf.mxu0 }
0x300d   : > { %v3655_v19 = vpack.c.bf16 %v3651_v24, %v3648_v52  ;;  %v4919_v52 = vld [vmem:[%s6236_s6 + $0x40] sm:$0xff]  }
0x300e   : > { %v4678_v42 = vpop.f32.mrf.mxu0 }
0x300f   : > { %4682 = vmatmul.mubr.msk.bf16.vlgmr.msra.gmra.mxu1 %vm859_vm11, %v3655_v19 }
0x3010   : > { %v3746_v63 = vpop.f32.mrf.mxu0  ;;  %4693 = vmatprep.mubr.msk.bf16.mxu1 %vm4930_vm1, %v6243_v0 }
0x3011   : > { %v3753_v20 = vmul.f32 0.35355338, %v3746_v63 }
0x3012   : > { %v4689_v61 = vpop.f32.mrf.mxu0 }
0x3013   : > { %v3755_v3 = vsub.f32 %v3753_v20, %v5345_v49 }
0x3014   : > { %v3749_v2 = vpop.f32.mrf.mxu0 }
0x3015   : > { %v3754_v12 = vmul.f32 0.35355338, %v3749_v2  ;;  %v3757_v28 = vsel %vm917_vm12, %v3755_v3, -inf }
0x3016   : > { %3758 = vmax.xlane.f32.xlu1 %v3757_v28  ;;  %v4690_v43 = vpop.f32.mrf.mxu0 }
0x3017   : > { %v3756_v57 = vsub.f32 %v3754_v12, %v5345_v49 }
0x3019   : > { %v3760_v41 = vsel %vm917_vm12, %v3756_v57, -inf }
0x301a   : > { %3761 = vmax.xlane.f32.xlu0 %v3760_v41 }
0x309f   : > { %v3759_v4 = vpop.xlane.xlu1 %3758 }
0x30a0   : > { %v3763_v48 = vsub.f32 %v3755_v3, %v3759_v4 }
0x30a2   : > { %v3765_v11 = vmul.f32 1.442695, %v3763_v48 }
0x30a3   : > { %v3762_v54 = vpop.xlane.xlu0 %3761 }
0x30a4   : > { %4884 = vpow2.f32 %v3765_v11  ;;  %v3764_v33 = vsub.f32 %v3756_v57, %v3762_v54  ;;  %v4010_v54 = vrot.slane %v5882_v39, %v5041_v29  ;;  %v4028_v29 = vsel %vm380_vm0, %v5897_v45, 0.0 }
0x30a6   : > { %v3767_v56 = vmul.f32 1.442695, %v3764_v33 }
0x30a8   : > { %4886 = vpow2.f32 %v3767_v56  ;;  %v4011_v56 = vmul.f32 %v4010_v54, %v5548_v62 }
0x30b1   : > { %v4885_v22 = vpop.eup %4884 }
0x30b2   : > { %v3769_v17 = vsel %vm917_vm12, %v4885_v22, 0.0 }
0x30b3   : > { %3770 = vadd.xlane.f32.xlu0 %v3769_v17  ;;  %v4012_v17 = vmul.f32 %v4010_v54, %v5558_v37 }
0x30b5   : > { %v4887_v38 = vpop.eup %4886 }
0x30b6   : > { %v3772_v15 = vsel %vm917_vm12, %v4887_v38, 0.0 }
0x30b7   : > { %3773 = vadd.xlane.f32.xlu1 %v3772_v15  ;;  %v4044_v15 = vrot.slane %v5882_v39, %v5049_v31 }
0x30c9   : > { %3780 = vrot.lane.b32.xlu0 %v6036_v47, %s4942_s14  ;;  %s334_s14 = scalar_lea.vmem %s6232_s2, %s5003_s9 }
0x30cf   : > { %v3693_v49 = vpop.f32.mrf.mxu1 }
0x30d0   : > { %v3700_v27 = vadd.f32 %v3693_v49, %v6100_v30  ;;  %v4045_v49 = vmul.f32 %v4044_v15, %v5548_v62 }
0x30d1   : > { %v4683_v7 = vpop.f32.mrf.mxu1 }
0x30d2   : > { %v4046_v7 = vmul.f32 %v4044_v15, %v5558_v37 }
0x30d3   : > { %v3696_v8 = vpop.f32.mrf.mxu1 }
0x30d4   : > { %v3701_v1 = vadd.f32 %v3696_v8, %v6102_v25  ;;  %v4050_v8 = vsel %vm380_vm0, %v4046_v7, 0.0 }
0x30d5   : > { %v4684_v53 = vpop.f32.mrf.mxu1 }
0x30e8   : > { %4026 = vadd.xlane.f32.xlu0 %v4025_v58 }
0x313c   : > { %v3771_v32 = vpop.xlane.xlu0 %3770 }
0x313d   : > { %4888 = vrcp.f32 %v3771_v32 }
0x3140   : > { %v3774_v35 = vpop.xlane.xlu1 %3773  ;;  %v3781_v40 = vpop.permute.xlu0 %3780 }
0x3141   : > { %4890 = vrcp.f32 %v3774_v35  ;;  %4692 = vmatpush3.bf16.msra.mxu1 %v3781_v40 }
0x3142   : > { %4703 = vmatprep.subr.bf16.mxu1 %v6243_v0 }
0x314a   : > { %v4889_v47 = vpop.eup %4888 }
0x314b   : > { %v3777_v46 = vmul.f32 %v4889_v47, %v4885_v22  ;;  %v4013_v22 = vsel %vm380_vm0, %v4011_v56, 0.0 }
0x314e   : > { %v4891_v30 = vpop.eup %4890 }
0x314f   : > { %v3778_v9 = vmul.f32 %v4891_v30, %v4887_v38  ;;  %v4016_v38 = vsel %vm380_vm0, %v4012_v17, 0.0 }
0x3151   : > { %v3779_v25 = vpack.c.bf16 %v3778_v9, %v3777_v46 }
0x3153   : > { %4694 = vmatmul.mubr.msk.bf16.vlgmr.msra.gmra.mxu1 %vm917_vm12, %v3779_v25 }
0x3154   : > { %4704 = vmatpush3.bf16.msra.mxu1 %v4916_v13  ;;  %4707 = vmatprep.mubr.msk.bf16.mxu1 %vm4930_vm1, %v6243_v0 }
0x3155   : > { %4705 = vmatprep.subr.bf16.mxu1 %v6243_v0 }
0x3158   : > { %4706 = vmatpush3.bf16.msra.mxu1 %v4917_v60 }
0x3213   : > { %v3820_v6 = vpop.f32.mrf.mxu1 }
0x3215   : > { %v4695_v44 = vpop.f32.mrf.mxu1 }
0x3217   : > { %v3823_v10 = vpop.f32.mrf.mxu1 }
0x3218   : > { %v3827_v34 = vpack.c.bf16 %v3823_v10, %v3820_v6 }
0x3219   : > { %v4696_v36 = vpop.f32.mrf.mxu1 }
0x321a   : > { %4700 = vmatmul.mubr.msk.bf16.vlgmr.msra.gmra.mxu0 %vm859_vm11, %v3827_v34 }
0x321b   : > { %4712 = vmatpush3.bf16.msra.mxu0 %v4918_v5  ;;  %4715 = vmatprep.mubr.msk.bf16.mxu0 %vm4930_vm1, %v6243_v0 }
0x321c   : > { %4713 = vmatprep.subr.bf16.mxu0 %v6243_v0 }
0x321f   : > { %4714 = vmatpush3.bf16.msra.mxu0 %v4919_v52 }
0x32da   : > { %v3865_v59 = vpop.f32.mrf.mxu0 }
0x32db   : > { %v3872_v24 = vadd.f32 %v3865_v59, %v3700_v27  ;;  %v4047_v27 = vsel %vm380_vm0, %v4045_v49, 0.0 }
0x32dc   : > { %v4701_v19 = vpop.f32.mrf.mxu0 }
0x32dd   : > { %v3874_v42 = vadd.f32 %v3872_v24, %v5465_v51 }
0x32de   : > { %v3868_v63 = vpop.f32.mrf.mxu0 }
0x32df   : > { %v6166_v20 = vadd.f32 %v3874_v42, %v6013_v23  ;;  %v3873_v61 = vadd.f32 %v3868_v63, %v3701_v1 }
0x32e0   : > { %v4702_v3 = vpop.f32.mrf.mxu0 }
0x32e1   : > { %v3875_v2 = vadd.f32 %v3873_v61, %v5465_v51  ;;  %v3878_v0 = vsel %vm380_vm0, %v6166_v20, 0.0 }
0x32e2   : > { %3879 = vadd.xlane.f32.xlu1 %v3878_v0 }
0x32e3   : > { %v6172_v12 = vadd.f32 %v3875_v2, %v6019_v21 }
0x32e5   : > { %v3881_v28 = vsel %vm380_vm0, %v6172_v12, 0.0 }
0x32e6   : > { %3882 = vadd.xlane.f32.xlu1 %v3881_v28 }
0x336b   : > { %v3880_v43 = vpop.xlane.xlu1 %3879 }
0x336c   : > { %v3884_v57 = vmul.f32 0.03125, %v3880_v43 }
0x336e   : > { %v3886_v23 = vsub.f32 %v6166_v20, %v3884_v57  ;;  %v4003_v57 = vld [vmem:[%s334_s14] sm:$0xff] }
0x336f   : > { %v3883_v41 = vpop.xlane.xlu1 %3882 }
0x3370   : > { %v3885_v4 = vmul.f32 0.03125, %v3883_v41  ;;  %v3888_v48 = vmul.f32 %v3886_v23, %v3886_v23 }
0x3372   : > { %v3887_v51 = vsub.f32 %v6172_v12, %v3885_v4  ;;  %v3890_v11 = vsel %vm380_vm0, %v3888_v48, 0.0 }
0x3373   : > { %3891 = vadd.xlane.f32.xlu1 %v3890_v11 }
0x3374   : > { %v3889_v21 = vmul.f32 %v3887_v51, %v3887_v51 }
0x3376   : > { %v3893_v33 = vsel %vm380_vm0, %v3889_v21, 0.0 }
0x3377   : > { %3894 = vadd.xlane.f32.xlu1 %v3893_v33 }
0x337b   : > { %4014 = vadd.xlane.f32.xlu1 %v4013_v22 }
0x337f   : > { %4017 = vadd.xlane.f32.xlu1 %v4016_v38 }
0x3383   : > { %4029 = vadd.xlane.f32.xlu1 %v4028_v29 }
0x3387   : > { %4048 = vadd.xlane.f32.xlu1 %v4047_v27 }
0x338b   : > { %4051 = vadd.xlane.f32.xlu1 %v4050_v8 }
0x33fc   : > { %v3892_v1 = vpop.xlane.xlu1 %3891 }
0x33fd   : > { %v3896_v53 = vmul.f32 0.03125, %v3892_v1 }
0x33ff   : > { %v3898_v55 = vadd.f32 1e-05, %v3896_v53 }
0x3400   : > { %v3895_v58 = vpop.xlane.xlu1 %3894 }
0x3401   : > { %4892 = vrsqrt.f32 %v3898_v55  ;;  %v3897_v31 = vmul.f32 0.03125, %v3895_v58 }
0x3403   : > { %v3899_v39 = vadd.f32 1e-05, %v3897_v31 }
0x3405   : > { %4894 = vrsqrt.f32 %v3899_v39 }
0x340e   : > { %v4893_v45 = vpop.eup %4892 }
0x340f   : > { %v3902_v32 = vmul.f32 %v4893_v45, %v3886_v23  ;;  %v4005_v23 = vmul.f32 1e+30, %v4003_v57 }
0x3411   : > { %v3904_v40 = vmul.f32 %v3902_v32, %v5493_v18 }
0x3412   : > { %v4895_v62 = vpop.eup %4894 }
0x3413   : > { %v3903_v35 = vmul.f32 %v4895_v62, %v3887_v51  ;;  %v3906_v47 = vadd.f32 %v3904_v40, %v5498_v26  ;;  %v6244_v51 = vld [vmem:[#allocation2_spill] sm:$0xff] }
0x3415   : > { %v3905_v37 = vmul.f32 %v3903_v35, %v5493_v18  ;;  %v4004_v18 = vld [vmem:[%s334_s14 + $0x8] sm:$0xff] }
0x3417   : > { %v3907_v30 = vadd.f32 %v3905_v37, %v5498_v26  ;;  %v4006_v26 = vmul.f32 1e+30, %v4004_v18 }
0x3419   : > { %v3908_v46 = vpack.c.bf16 %v3907_v30, %v3906_v47  ;;  %4073 = vrot.lane.b32.xlu0 %v4006_v26, %s4943_s29 }
0x341b   : > { %4708 = vmatmul.mubr.msk.bf16.vlgmr.msra.gmra.mxu1 %vm380_vm0, %v3908_v46 }
0x34db   : > { %v3946_v9 = vpop.f32.mrf.mxu1 }
0x34dc   : > { %v3947_v13 = vadd.f32 %v3946_v9, %v5532_v50 }
0x34dd   : > { %v4709_v25 = vpop.f32.mrf.mxu1 }
0x34de   : > { %v3953_v10 = vmax.f32 %v3947_v13, 0.0 }
0x34df   : > { %v3949_v60 = vpop.f32.mrf.mxu1 }
0x34e0   : > { %v3950_v6 = vadd.f32 %v3949_v60, %v5532_v50  ;;  %v4920_v50 = vld [vmem:[%s6237_s7] sm:$0x1f] }
0x34e1   : > { %v4710_v44 = vpop.f32.mrf.mxu1  ;;  %v4056_v59 = vrot.slane %v4920_v50, %v5186_v16  ;;  %v4015_v16 = vpop.xlane.xlu1 %4014  ;;  %v4036_v11 = vrot.slane %v4920_v50, %v6244_v51 }
0x34e2   : > { %v3954_v34 = vmax.f32 %v3950_v6, 0.0 }
0x34e4   : > { %v3955_v36 = vpack.c.bf16 %v3954_v34, %v3953_v10 }
0x34e5   : > { %v4018_v41 = vpop.xlane.xlu1 %4017 }
0x34e6   : > { %4716 = vmatmul.mubr.msk.bf16.vlgmr.msra.gmra.mxu0 %vm380_vm0, %v3955_v36 }
0x35a6   : > { %v3993_v5 = vpop.f32.mrf.mxu0 }
0x35a7   : > { %v3994_v52 = vadd.f32 %v3993_v5, %v5544_v14 }
0x35a8   : > { %v4717_v24 = vpop.f32.mrf.mxu0 }
0x35a9   : > { %v4000_v19 = vadd.f32 %v3994_v52, %v6166_v20  ;;  %v4030_v20 = vpop.xlane.xlu1 %4029 }
0x35aa   : > { %v3996_v42 = vpop.f32.mrf.mxu0  ;;  %v4032_v21 = vadd.f32 %v4030_v20, %v4018_v41 }
0x35ab   : > { %v3997_v63 = vadd.f32 %v3996_v42, %v5544_v14  ;;  %v4057_v61 = vmul.f32 %v4056_v59, %v4000_v19  ;;  %v4027_v14 = vpop.xlane.xlu0 %4026 }
0x35ac   : > { %v4718_v3 = vpop.f32.mrf.mxu0  ;;  %v4031_v54 = vadd.f32 %v4027_v14, %v4015_v16  ;;  %v4038_v17 = vadd.f32 %v4036_v11, %v4032_v21 }
0x35ad   : > { %v4001_v2 = vadd.f32 %v3997_v63, %v6172_v12  ;;  %v4059_v0 = vsel %vm380_vm0, %v4057_v61, 0.0  ;;  %v4049_v4 = vpop.xlane.xlu1 %4048 }
0x35ae   : > { %4060 = vadd.xlane.f32.xlu1 %v4059_v0  ;;  %v4037_v56 = vadd.f32 %v4036_v11, %v4031_v54  ;;  %v4040_v8 = vsub.f32 %v4038_v17, %v4006_v26 }
0x35af   : > { %v4058_v28 = vmul.f32 %v4056_v59, %v4001_v2  ;;  %v4074_v15 = vpop.permute.xlu0 %4073 }
0x35b0   : > { %v4039_v27 = vsub.f32 %v4037_v56, %v4005_v23 }
0x35b1   : > { %v4062_v43 = vsel %vm380_vm0, %v4058_v28, 0.0  ;;  %v4052_v48 = vpop.xlane.xlu1 %4051 }
0x35b2   : > { %4063 = vadd.xlane.f32.xlu1 %v4062_v43 }
0x35c3   : > { %4071 = vrot.lane.b32.xlu1 %v4005_v23, %s4943_s29 }
0x3637   : > { %v4061_v12 = vpop.xlane.xlu1 %4060 }
0x3638   : > { %v4065_v33 = vadd.f32 %v4061_v12, %v4049_v4 }
0x363a   : > { %v4067_v49 = vadd.f32 %v4065_v33, %v4036_v11 }
0x363b   : > { %v4064_v22 = vpop.xlane.xlu1 %4063 }
0x363c   : > { %v4066_v38 = vadd.f32 %v4064_v22, %v4052_v48 }
0x363e   : > { %v4068_v29 = vadd.f32 %v4066_v38, %v4036_v11 }
0x363f   : > { %v4072_v7 = vpop.permute.xlu1 %4071 }
0x3640   : > { %v4078_v1 = vsub.f32 %v4068_v29, %v4074_v15  ;;  %v4077_v53 = vsub.f32 %v4067_v49, %v4072_v7 }
0x3642   : > { %v4081_v55 = vsel %vm4079_vm14, %v4040_v8, %v4078_v1  ;;  %v4080_v58 = vsel %vm4079_vm14, %v4039_v27, %v4077_v53 }
0x3643   : > { %v4084_v31 = vsel %vm4082_vm15, %v4081_v55, -inf  ;;  %v4083_v39 = vsel %vm4082_vm15, %v4080_v58, -inf }
0x3644   : > { %v4085_v45 = vmax.f32 %v4083_v39, %v4084_v31 }
0x3646   : > { %v4086_v32 = vrot.slane %v4085_v45, 4 }
0x3648   : > { %v4087_v62 = vmax.f32 %v4085_v45, %v4086_v32 }
0x364a   : > { %v4088_v35 = vrot.slane %v4087_v62, 2 }
0x364c   : > { %v4089_v40 = vmax.f32 %v4087_v62, %v4088_v35 }
0x364e   : > { %v4090_v37 = vrot.slane %v4089_v40, 1 }
0x3650   : > { %v4091_v47 = vmax.f32 %v4089_v40, %v4090_v37 }
0x3652   : > { %v4092_v30 = vsub.f32 %v4080_v58, %v4091_v47  ;;  %v4093_v46 = vsub.f32 %v4081_v55, %v4091_v47 }
0x3654   : > { %v4094_v9 = vmul.f32 1.442695, %v4092_v30  ;;  %v4096_v25 = vmul.f32 1.442695, %v4093_v46 }
0x3656   : > { %4896 = vpow2.f32 %v4094_v9 }
0x3657   : > { %4898 = vpow2.f32 %v4096_v25 }
0x3663   : > { %v4897_v13 = vpop.eup %4896 }
0x3664   : > { %v4899_v60 = vpop.eup %4898  ;;  %v4098_v6 = vsel %vm4082_vm15, %v4897_v13, 0.0 }
0x3665   : > { %v4099_v44 = vsel %vm4082_vm15, %v4899_v60, 0.0 }
0x3666   : > { %v4100_v10 = vadd.f32 %v4099_v44, %v4098_v6 }
0x3668   : > { %v4101_v34 = vrot.slane %v4100_v10, 4 }
0x366a   : > { %v4102_v36 = vadd.f32 %v4101_v34, %v4100_v10 }
0x366c   : > { %v4103_v18 = vrot.slane %v4102_v36, 2 }
0x366e   : > { %v4104_v26 = vadd.f32 %v4103_v18, %v4102_v36 }
0x3670   : > { %v4105_v5 = vrot.slane %v4104_v26, 1 }
0x3672   : > { %v4106_v52 = vadd.f32 %v4105_v5, %v4104_v26 }
0x3674   : > { %4900 = vlog2.f32 %v4106_v52 }
0x3681   : > { %v4901_v50 = vpop.eup %4900 }
0x3682   : > { %v4108_v59 = vmul.f32 0.6931472, %v4901_v50 }
0x3684   : > { %v4109_v24 = vsub.f32 %v4092_v30, %v4108_v59  ;;  %v4110_v19 = vsub.f32 %v4093_v46, %v4108_v59 }
0x3686   : > { %4111 = vst.msk [vmem:[%s339_s21] sm:$0xff] %vm4082_vm15, %v4109_v24  ;;  %4112 = vst.msk [vmem:[%s339_s21 + $0x8] sm:$0xff] %vm4082_vm15, %v4110_v19 }
0x3687 PF: > { %s18_s27 = sadd.s32 1, %s4927_s27  }
0x3688   : > { %p15_p4 = scmp.ge.s32.totalorder %s18_s27, 4  }
0x368a   :  { %17 = sbr.rel (!%p15_p4) target bundleno = 1 (0x1), region = 88 }

</bundles_post_ra>
